<compile_context>
chip_gen: v7x
topology: tpu7x:2x2x1
jax: 0.10.0
libtpu: 0.0.40
codegen_flags: <defaults>
</compile_context>

<pallas_src>
import jax
import jax.numpy as jnp
from jax.experimental import pallas as pl
from jax.experimental.pallas import tpu as pltpu

NUM_NEURONS = 512
LAT_SIZE = 128
NUM_EMB = 7
SKIP_LINK_AT = 4
AUX_W = 128            # lane-dense packed operand: [px, py, one_hot(id,7), zero-pad]
IN_W = 8               # narrow HBM input row: [id, px, py, 0, 0, 0, 0, 0]
DEFAULT_TILE_N = 2048  # rows per grid step (multiple of 256 fills the MXU M dim)


def _mlp_kernel(x_ref,
                w0_ref, b0_ref, w1_ref, b1_ref, w2_ref, b2_ref, w3_ref, b3_ref,
                w4c_ref, w4h_ref, b4_ref, w5_ref, b5_ref, w6_ref, b6_ref,
                w7_ref, b7_ref, out_ref):
    f32, bf16 = jnp.float32, jnp.bfloat16
    T = x_ref.shape[0]

    # ---- build the lane-dense aux operand in-register (no HBM materialisation) ----
    xin = x_ref[...]                                   # (T, 8) f32
    ids = xin[:, 0:1].astype(jnp.int32)                # (T, 1) integer-valued
    px, py = xin[:, 1:2], xin[:, 2:3]                  # (T, 1) each
    lane = jax.lax.broadcasted_iota(jnp.int32, (T, AUX_W), 1)
    # one_hot occupies lanes 2..8; out-of-range ids give all-zeros (embedding dropped,
    # same as jax.nn.one_hot - unlike nn.Embedding which would raise).
    aux = (lane == ids + 2).astype(f32)
    aux = jnp.where(lane == 0, px, aux)
    aux = jnp.where(lane == 1, py, aux)
    aux = aux.astype(bf16)                             # (T, 128) bf16

    mm = lambda a, w_ref: jnp.dot(a, w_ref[...], preferred_element_type=f32)
    # bias-add + ReLU in bf16 (single f32->bf16 cast per layer, half the VALU work).
    act = lambda acc, b_ref: jax.nn.relu(acc.astype(bf16) + b_ref[...])

    # layer 0: relu(cat([lat, pt]) @ W0^T + b0); gather + pt fused into aux @ w0c
    h = act(mm(aux, w0_ref), b0_ref)
    # layers 1..3 (Dropout == identity in eval mode)
    h = act(mm(h, w1_ref), b1_ref)
    h = act(mm(h, w2_ref), b2_ref)
    h = act(mm(h, w3_ref), b3_ref)
    # layer 4 skip link: relu(cat([lat, h, pt]) @ W4^T + b4)
    h = act(mm(aux, w4c_ref) + mm(h, w4h_ref), b4_ref)
    # layers 5..6
    h = act(mm(h, w5_ref), b5_ref)
    h = act(mm(h, w6_ref), b6_ref)
    # layer 7: tanh -> (T, 1), f32. The narrow (T, 1) writeback is ~4 B/row vs
    # ~3.4 MFLOP/row of MXU work, so the masked store is negligible here.
    out_ref[...] = jnp.tanh(mm(h, w7_ref) + b7_ref[...])


def _weight_norm_linear(key, in_f, out_f):
    """Synthesize weight_norm(Linear) params; return effective (W, b)."""
    kv, kg, kb = jax.random.split(key, 3)
    v = jax.random.normal(kv, (out_f, in_f), jnp.float32) * 0.05
    g = jax.random.uniform(kg, (out_f, 1), jnp.float32, minval=0.5, maxval=1.5)
    b = jax.random.normal(kb, (out_f,), jnp.float32) * 0.01
    # weight_norm (dim=0 for Linear): w = g * v / ||v|| per output row
    w = g * v / jnp.linalg.norm(v, axis=1, keepdims=True)
    return w, b  # w: (out_f, in_f)


def init_params(key):
    dims = [(2 + LAT_SIZE, NUM_NEURONS)]
    for i in range(1, 7):
        if i == SKIP_LINK_AT:
            dims.append((NUM_NEURONS + 2 + LAT_SIZE, NUM_NEURONS))
        else:
            dims.append((NUM_NEURONS, NUM_NEURONS))
    dims.append((NUM_NEURONS, 1))
    keys = jax.random.split(key, len(dims))
    return [_weight_norm_linear(k, i, o) for k, (i, o) in zip(keys, dims)]


def prepare_params(weights, emb_table):
    """One-time prep: transpose to (in,out), split the concat weights, fuse the
    embedding table into the layer-0/4 'aux' weights, cast matmul operands and the
    hidden-layer biases to bf16. Happens once, outside the per-call path."""
    f32, bf16 = jnp.float32, jnp.bfloat16
    (w0, b0), (w1, b1), (w2, b2), (w3, b3), \
        (w4, b4), (w5, b5), (w6, b6), (w7, b7) = weights
    E = emb_table.astype(f32)                                # (7, 128)

    # Layer 0: input order is [lat(128), pt(2)].
    w0t = w0.T.astype(f32)                                   # (130, 512)
    w0c = jnp.zeros((AUX_W, NUM_NEURONS), f32)
    w0c = w0c.at[0:2].set(w0t[LAT_SIZE:LAT_SIZE + 2])        # pt rows
    w0c = w0c.at[2:2 + NUM_EMB].set(E @ w0t[:LAT_SIZE])      # one_hot @ (E @ W_lat)

    # Layer 4: input order is [lat(128), h(512), pt(2)].
    w4t = w4.T.astype(f32)                                   # (642, 512)
    w4h = w4t[LAT_SIZE:LAT_SIZE + NUM_NEURONS]               # (512, 512)
    w4c = jnp.zeros((AUX_W, NUM_NEURONS), f32)
    w4c = w4c.at[0:2].set(w4t[LAT_SIZE + NUM_NEURONS:])
    w4c = w4c.at[2:2 + NUM_EMB].set(E @ w4t[:LAT_SIZE])

    hb = lambda b: b.astype(bf16)[None, :]                   # hidden-layer biases: bf16
    return (w0c.astype(bf16), hb(b0),
            w1.T.astype(bf16), hb(b1),
            w2.T.astype(bf16), hb(b2),
            w3.T.astype(bf16), hb(b3),
            w4c.astype(bf16), w4h.astype(bf16), hb(b4),
            w5.T.astype(bf16), hb(b5),
            w6.T.astype(bf16), hb(b6),
            w7.T.astype(bf16), b7.astype(f32)[None, :])      # final bias stays f32


def _round_up(a, b):
    return (a + b - 1) // b * b


def _vmem_limit_bytes():
    """Generation-aware scoped-VMEM budget with headroom (v7x has only 64 MiB/TC)."""
    try:
        cap = int(pltpu.get_tpu_info().vmem_capacity_bytes)
    except Exception:
        cap = 128 * 1024 * 1024
    return int(min(100 * 1024 * 1024, max(32 * 1024 * 1024, cap - 16 * 1024 * 1024)))


def net_forward(x, params, *, tile_n=DEFAULT_TILE_N):
    """x: (..., 3) float32; x[..., 0] = integer-valued id in [0,7), x[..., 1:] = 2D point."""
    lead_shape = x.shape[:-1]
    x2 = x.reshape(-1, 3).astype(jnp.float32)
    n = x2.shape[0]

    # Narrow packed input [id, px, py, 0...]: ~32 B/row of HBM traffic. The lane-dense
    # (T, 128) aux operand is constructed inside the kernel.
    xin = jnp.pad(x2, ((0, 0), (0, IN_W - 3)))

    n_pad128 = _round_up(n, 128)
    tile_n = _round_up(max(128, min(tile_n, n_pad128)), 128)
    # Guarantee >= 2 grid steps whenever possible so dimension_semantics=("parallel",)
    # can shard the batch across both v7x TensorCores.
    if n_pad128 >= 2 * 128 and n_pad128 // tile_n < 2:
        tile_n = _round_up(pl.cdiv(n_pad128, 2), 128)
    n_pad = _round_up(n, tile_n)
    # Padded rows compute tanh(bias-only) garbage that is sliced off below; the
    # padding must never be consumed downstream.
    xin = jnp.pad(xin, ((0, n_pad - n), (0, 0)))

    # Weights/biases: full-array blocks with constant index_maps -> VMEM-resident,
    # not re-DMA'd per grid step.
    resident = lambda a: pl.BlockSpec(a.shape, lambda i: (0, 0))

    flops_per_row = 2 * (2 * AUX_W * NUM_NEURONS + 6 * NUM_NEURONS * NUM_NEURONS
                         + NUM_NEURONS)
    weight_bytes = sum(int(p.size) * p.dtype.itemsize for p in params)
    cost = pl.CostEstimate(
        flops=flops_per_row * n_pad,
        bytes_accessed=n_pad * (IN_W * 4 + 4) + weight_bytes,
        transcendentals=n_pad)

    out = pl.pallas_call(
        _mlp_kernel,
        out_shape=jax.ShapeDtypeStruct((n_pad, 1), jnp.float32),
        grid=(n_pad // tile_n,),
        in_specs=[pl.BlockSpec((tile_n, IN_W), lambda i: (i, 0))]
                 + [resident(p) for p in params],
        out_specs=pl.BlockSpec((tile_n, 1), lambda i: (i, 0)),
        compiler_params=pltpu.CompilerParams(
            dimension_semantics=("parallel",),        # megacore split on v7x
            vmem_limit_bytes=_vmem_limit_bytes()),
        cost_estimate=cost,
    )(xin, *params)

    return out[:n].reshape(*lead_shape, 1)


def net_forward_ref(x, emb_table, weights):
    """Pure-JAX f32 reference mirroring the PyTorch forward (eval mode)."""
    ids = x[:, 0].astype(jnp.int32)
    pt = x[:, 1:]
    lat = jnp.take(emb_table, ids, axis=0)
    h = x[:, 1:]
    for idx, (w, b) in enumerate(weights):
        if idx == 0 or idx == SKIP_LINK_AT:
            h = jnp.concatenate([lat, h], axis=-1)
        if idx == SKIP_LINK_AT:
            h = jnp.concatenate([h, pt], axis=-1)
        y = h @ w.T + b
        h = jnp.tanh(y) if idx == len(weights) - 1 else jax.nn.relu(y)
    return h


if __name__ == "__main__":
    key = jax.random.PRNGKey(0)
    k_emb, k_ids, k_pts, k_w = jax.random.split(key, 4)

    N = 8
    emb_table = jax.random.normal(k_emb, (NUM_EMB, LAT_SIZE), jnp.float32)
    ids = jax.random.randint(k_ids, (N, 1), 0, NUM_EMB).astype(jnp.float32)
    pts = jax.random.uniform(k_pts, (N, 2), jnp.float32, minval=-1.0, maxval=1.0)
    x = jnp.concatenate([ids, pts], axis=-1)          # (N, 3): [id, px, py]

    weights = init_params(k_w)
    params = prepare_params(weights, emb_table)

    fwd = jax.jit(net_forward)                        # fuse the small wrapper ops
    out = fwd(x, params)
    jax.block_until_ready(out)
    assert out.shape == (N, 1) and out.dtype == jnp.float32

    ref = net_forward_ref(x, emb_table, weights)
    # bf16 MXU matmuls with f32 accumulation + bf16 bias/ReLU chain: allow a few %
    # drift vs the f32 reference.
    assert jnp.max(jnp.abs(out - ref)) < 5e-2, (out, ref)

    print("KERNEL_OK")
</pallas_src>

<mosaic_0001>
module attributes {stable_mosaic.version = 11 : i64} {
  func.func @_mlp_kernel(%arg0: i32, %arg1: memref<128x8xf32, #tpu.memory_space<vmem>>, %arg2: memref<128x512xbf16, #tpu.memory_space<vmem>>, %arg3: memref<1x512xbf16, #tpu.memory_space<vmem>>, %arg4: memref<512x512xbf16, #tpu.memory_space<vmem>>, %arg5: memref<1x512xbf16, #tpu.memory_space<vmem>>, %arg6: memref<512x512xbf16, #tpu.memory_space<vmem>>, %arg7: memref<1x512xbf16, #tpu.memory_space<vmem>>, %arg8: memref<512x512xbf16, #tpu.memory_space<vmem>>, %arg9: memref<1x512xbf16, #tpu.memory_space<vmem>>, %arg10: memref<128x512xbf16, #tpu.memory_space<vmem>>, %arg11: memref<512x512xbf16, #tpu.memory_space<vmem>>, %arg12: memref<1x512xbf16, #tpu.memory_space<vmem>>, %arg13: memref<512x512xbf16, #tpu.memory_space<vmem>>, %arg14: memref<1x512xbf16, #tpu.memory_space<vmem>>, %arg15: memref<512x512xbf16, #tpu.memory_space<vmem>>, %arg16: memref<1x512xbf16, #tpu.memory_space<vmem>>, %arg17: memref<512x1xbf16, #tpu.memory_space<vmem>>, %arg18: memref<1x1xf32, #tpu.memory_space<vmem>>, %arg19: memref<128x1xf32, #tpu.memory_space<vmem>>) attributes {dimension_semantics = [#tpu.dimension_semantics<parallel>], iteration_bounds = array<i64: 1>, scalar_prefetch = 0 : i64, scratch_operands = 0 : i64, tpu.core_type = #tpu.core_type<tc>, window_params = [{transform_indices = @transform_0, window_bounds = array<i64: 128, 8>}, {pipeline_mode = #tpu.pipeline_mode<synchronous>, transform_indices = @transform_1, window_bounds = array<i64: 128, 512>}, {pipeline_mode = #tpu.pipeline_mode<synchronous>, transform_indices = @transform_2, window_bounds = array<i64: 1, 512>}, {pipeline_mode = #tpu.pipeline_mode<synchronous>, transform_indices = @transform_3, window_bounds = array<i64: 512, 512>}, {pipeline_mode = #tpu.pipeline_mode<synchronous>, transform_indices = @transform_4, window_bounds = array<i64: 1, 512>}, {pipeline_mode = #tpu.pipeline_mode<synchronous>, transform_indices = @transform_5, window_bounds = array<i64: 512, 512>}, {pipeline_mode = #tpu.pipeline_mode<synchronous>, transform_indices = @transform_6, window_bounds = array<i64: 1, 512>}, {pipeline_mode = #tpu.pipeline_mode<synchronous>, transform_indices = @transform_7, window_bounds = array<i64: 512, 512>}, {pipeline_mode = #tpu.pipeline_mode<synchronous>, transform_indices = @transform_8, window_bounds = array<i64: 1, 512>}, {pipeline_mode = #tpu.pipeline_mode<synchronous>, transform_indices = @transform_9, window_bounds = array<i64: 128, 512>}, {pipeline_mode = #tpu.pipeline_mode<synchronous>, transform_indices = @transform_10, window_bounds = array<i64: 512, 512>}, {pipeline_mode = #tpu.pipeline_mode<synchronous>, transform_indices = @transform_11, window_bounds = array<i64: 1, 512>}, {pipeline_mode = #tpu.pipeline_mode<synchronous>, transform_indices = @transform_12, window_bounds = array<i64: 512, 512>}, {pipeline_mode = #tpu.pipeline_mode<synchronous>, transform_indices = @transform_13, window_bounds = array<i64: 1, 512>}, {pipeline_mode = #tpu.pipeline_mode<synchronous>, transform_indices = @transform_14, window_bounds = array<i64: 512, 512>}, {pipeline_mode = #tpu.pipeline_mode<synchronous>, transform_indices = @transform_15, window_bounds = array<i64: 1, 512>}, {pipeline_mode = #tpu.pipeline_mode<synchronous>, transform_indices = @transform_16, window_bounds = array<i64: 512, 1>}, {pipeline_mode = #tpu.pipeline_mode<synchronous>, transform_indices = @transform_17, window_bounds = array<i64: 1, 1>}, {transform_indices = @transform_18, window_bounds = array<i64: 128, 1>}]} {
    %c0 = arith.constant 0 : index
    %c0_0 = arith.constant 0 : index
    %0 = vector.load %arg1[%c0, %c0_0] : memref<128x8xf32, #tpu.memory_space<vmem>>, vector<128x8xf32>
    %1 = vector.extract_strided_slice %0 {offsets = [0, 0], sizes = [128, 1], strides = [1, 1]} : vector<128x8xf32> to vector<128x1xf32>
    %2 = arith.fptosi %1 : vector<128x1xf32> to vector<128x1xi32>
    %3 = vector.extract_strided_slice %0 {offsets = [0, 1], sizes = [128, 1], strides = [1, 1]} : vector<128x8xf32> to vector<128x1xf32>
    %4 = vector.extract_strided_slice %0 {offsets = [0, 2], sizes = [128, 1], strides = [1, 1]} : vector<128x8xf32> to vector<128x1xf32>
    %5 = tpu.iota {dimensions = array<i32: 1>} : vector<128x128xi32>
    %c2_i32 = arith.constant 2 : i32
    %6 = vector.broadcast %c2_i32 : i32 to vector<128x1xi32>
    %7 = arith.addi %2, %6 : vector<128x1xi32>
    %8 = vector.broadcast %7 : vector<128x1xi32> to vector<128x128xi32>
    %9 = arith.cmpi eq, %5, %8 : vector<128x128xi32>
    %10 = arith.extui %9 : vector<128x128xi1> to vector<128x128xi32>
    %11 = arith.sitofp %10 : vector<128x128xi32> to vector<128x128xf32>
    %c0_i32 = arith.constant 0 : i32
    %12 = vector.broadcast %c0_i32 : i32 to vector<128x128xi32>
    %13 = arith.cmpi eq, %5, %12 : vector<128x128xi32>
    %14 = vector.shape_cast %3 : vector<128x1xf32> to vector<128x1xf32>
    %15 = vector.broadcast %14 : vector<128x1xf32> to vector<128x128xf32>
    %16 = arith.select %13, %15, %11 : vector<128x128xi1>, vector<128x128xf32>
    %c1_i32 = arith.constant 1 : i32
    %17 = vector.broadcast %c1_i32 : i32 to vector<128x128xi32>
    %18 = arith.cmpi eq, %5, %17 : vector<128x128xi32>
    %19 = vector.shape_cast %4 : vector<128x1xf32> to vector<128x1xf32>
    %20 = vector.broadcast %19 : vector<128x1xf32> to vector<128x128xf32>
    %21 = arith.select %18, %20, %16 : vector<128x128xi1>, vector<128x128xf32>
    %22 = arith.truncf %21 : vector<128x128xf32> to vector<128x128xbf16>
    %c0_1 = arith.constant 0 : index
    %c0_2 = arith.constant 0 : index
    %23 = vector.load %arg2[%c0_1, %c0_2] : memref<128x512xbf16, #tpu.memory_space<vmem>>, vector<128x512xbf16>
    %cst = arith.constant dense<0.000000e+00> : vector<128x512xf32>
    %24 = tpu.matmul %22, %23, %cst {dimension_numbers = #tpu.dot_dimension_numbers<[1], [0], [0], [1], [0, 0, 1, 1], [], []>} : vector<128x128xbf16>, vector<128x512xbf16>, vector<128x512xf32> -> vector<128x512xf32>
    %25 = arith.truncf %24 : vector<128x512xf32> to vector<128x512xbf16>
    %c0_3 = arith.constant 0 : index
    %c0_4 = arith.constant 0 : index
    %26 = vector.load %arg3[%c0_3, %c0_4] : memref<1x512xbf16, #tpu.memory_space<vmem>>, vector<1x512xbf16>
    %27 = vector.broadcast %26 : vector<1x512xbf16> to vector<128x512xbf16>
    %28 = arith.addf %25, %27 : vector<128x512xbf16>
    %cst_5 = arith.constant 0.000000e+00 : bf16
    %29 = vector.broadcast %cst_5 : bf16 to vector<128x512xbf16>
    %30 = arith.maximumf %28, %29 : vector<128x512xbf16>
    %c0_6 = arith.constant 0 : index
    %c0_7 = arith.constant 0 : index
    %31 = vector.load %arg4[%c0_6, %c0_7] : memref<512x512xbf16, #tpu.memory_space<vmem>>, vector<512x512xbf16>
    %cst_8 = arith.constant dense<0.000000e+00> : vector<128x512xf32>
    %32 = tpu.matmul %30, %31, %cst_8 {dimension_numbers = #tpu.dot_dimension_numbers<[1], [0], [0], [1], [0, 0, 1, 1], [], []>} : vector<128x512xbf16>, vector<512x512xbf16>, vector<128x512xf32> -> vector<128x512xf32>
    %33 = arith.truncf %32 : vector<128x512xf32> to vector<128x512xbf16>
    %c0_9 = arith.constant 0 : index
    %c0_10 = arith.constant 0 : index
    %34 = vector.load %arg5[%c0_9, %c0_10] : memref<1x512xbf16, #tpu.memory_space<vmem>>, vector<1x512xbf16>
    %35 = vector.broadcast %34 : vector<1x512xbf16> to vector<128x512xbf16>
    %36 = arith.addf %33, %35 : vector<128x512xbf16>
    %cst_11 = arith.constant 0.000000e+00 : bf16
    %37 = vector.broadcast %cst_11 : bf16 to vector<128x512xbf16>
    %38 = arith.maximumf %36, %37 : vector<128x512xbf16>
    %c0_12 = arith.constant 0 : index
    %c0_13 = arith.constant 0 : index
    %39 = vector.load %arg6[%c0_12, %c0_13] : memref<512x512xbf16, #tpu.memory_space<vmem>>, vector<512x512xbf16>
    %cst_14 = arith.constant dense<0.000000e+00> : vector<128x512xf32>
    %40 = tpu.matmul %38, %39, %cst_14 {dimension_numbers = #tpu.dot_dimension_numbers<[1], [0], [0], [1], [0, 0, 1, 1], [], []>} : vector<128x512xbf16>, vector<512x512xbf16>, vector<128x512xf32> -> vector<128x512xf32>
    %41 = arith.truncf %40 : vector<128x512xf32> to vector<128x512xbf16>
    %c0_15 = arith.constant 0 : index
    %c0_16 = arith.constant 0 : index
    %42 = vector.load %arg7[%c0_15, %c0_16] : memref<1x512xbf16, #tpu.memory_space<vmem>>, vector<1x512xbf16>
    %43 = vector.broadcast %42 : vector<1x512xbf16> to vector<128x512xbf16>
    %44 = arith.addf %41, %43 : vector<128x512xbf16>
    %cst_17 = arith.constant 0.000000e+00 : bf16
    %45 = vector.broadcast %cst_17 : bf16 to vector<128x512xbf16>
    %46 = arith.maximumf %44, %45 : vector<128x512xbf16>
    %c0_18 = arith.constant 0 : index
    %c0_19 = arith.constant 0 : index
    %47 = vector.load %arg8[%c0_18, %c0_19] : memref<512x512xbf16, #tpu.memory_space<vmem>>, vector<512x512xbf16>
    %cst_20 = arith.constant dense<0.000000e+00> : vector<128x512xf32>
    %48 = tpu.matmul %46, %47, %cst_20 {dimension_numbers = #tpu.dot_dimension_numbers<[1], [0], [0], [1], [0, 0, 1, 1], [], []>} : vector<128x512xbf16>, vector<512x512xbf16>, vector<128x512xf32> -> vector<128x512xf32>
    %49 = arith.truncf %48 : vector<128x512xf32> to vector<128x512xbf16>
    %c0_21 = arith.constant 0 : index
    %c0_22 = arith.constant 0 : index
    %50 = vector.load %arg9[%c0_21, %c0_22] : memref<1x512xbf16, #tpu.memory_space<vmem>>, vector<1x512xbf16>
    %51 = vector.broadcast %50 : vector<1x512xbf16> to vector<128x512xbf16>
    %52 = arith.addf %49, %51 : vector<128x512xbf16>
    %cst_23 = arith.constant 0.000000e+00 : bf16
    %53 = vector.broadcast %cst_23 : bf16 to vector<128x512xbf16>
    %54 = arith.maximumf %52, %53 : vector<128x512xbf16>
    %c0_24 = arith.constant 0 : index
    %c0_25 = arith.constant 0 : index
    %55 = vector.load %arg10[%c0_24, %c0_25] : memref<128x512xbf16, #tpu.memory_space<vmem>>, vector<128x512xbf16>
    %cst_26 = arith.constant dense<0.000000e+00> : vector<128x512xf32>
    %56 = tpu.matmul %22, %55, %cst_26 {dimension_numbers = #tpu.dot_dimension_numbers<[1], [0], [0], [1], [0, 0, 1, 1], [], []>} : vector<128x128xbf16>, vector<128x512xbf16>, vector<128x512xf32> -> vector<128x512xf32>
    %c0_27 = arith.constant 0 : index
    %c0_28 = arith.constant 0 : index
    %57 = vector.load %arg11[%c0_27, %c0_28] : memref<512x512xbf16, #tpu.memory_space<vmem>>, vector<512x512xbf16>
    %cst_29 = arith.constant dense<0.000000e+00> : vector<128x512xf32>
    %58 = tpu.matmul %54, %57, %cst_29 {dimension_numbers = #tpu.dot_dimension_numbers<[1], [0], [0], [1], [0, 0, 1, 1], [], []>} : vector<128x512xbf16>, vector<512x512xbf16>, vector<128x512xf32> -> vector<128x512xf32>
    %59 = arith.addf %56, %58 : vector<128x512xf32>
    %60 = arith.truncf %59 : vector<128x512xf32> to vector<128x512xbf16>
    %c0_30 = arith.constant 0 : index
    %c0_31 = arith.constant 0 : index
    %61 = vector.load %arg12[%c0_30, %c0_31] : memref<1x512xbf16, #tpu.memory_space<vmem>>, vector<1x512xbf16>
    %62 = vector.broadcast %61 : vector<1x512xbf16> to vector<128x512xbf16>
    %63 = arith.addf %60, %62 : vector<128x512xbf16>
    %cst_32 = arith.constant 0.000000e+00 : bf16
    %64 = vector.broadcast %cst_32 : bf16 to vector<128x512xbf16>
    %65 = arith.maximumf %63, %64 : vector<128x512xbf16>
    %c0_33 = arith.constant 0 : index
    %c0_34 = arith.constant 0 : index
    %66 = vector.load %arg13[%c0_33, %c0_34] : memref<512x512xbf16, #tpu.memory_space<vmem>>, vector<512x512xbf16>
    %cst_35 = arith.constant dense<0.000000e+00> : vector<128x512xf32>
    %67 = tpu.matmul %65, %66, %cst_35 {dimension_numbers = #tpu.dot_dimension_numbers<[1], [0], [0], [1], [0, 0, 1, 1], [], []>} : vector<128x512xbf16>, vector<512x512xbf16>, vector<128x512xf32> -> vector<128x512xf32>
    %68 = arith.truncf %67 : vector<128x512xf32> to vector<128x512xbf16>
    %c0_36 = arith.constant 0 : index
    %c0_37 = arith.constant 0 : index
    %69 = vector.load %arg14[%c0_36, %c0_37] : memref<1x512xbf16, #tpu.memory_space<vmem>>, vector<1x512xbf16>
    %70 = vector.broadcast %69 : vector<1x512xbf16> to vector<128x512xbf16>
    %71 = arith.addf %68, %70 : vector<128x512xbf16>
    %cst_38 = arith.constant 0.000000e+00 : bf16
    %72 = vector.broadcast %cst_38 : bf16 to vector<128x512xbf16>
    %73 = arith.maximumf %71, %72 : vector<128x512xbf16>
    %c0_39 = arith.constant 0 : index
    %c0_40 = arith.constant 0 : index
    %74 = vector.load %arg15[%c0_39, %c0_40] : memref<512x512xbf16, #tpu.memory_space<vmem>>, vector<512x512xbf16>
    %cst_41 = arith.constant dense<0.000000e+00> : vector<128x512xf32>
    %75 = tpu.matmul %73, %74, %cst_41 {dimension_numbers = #tpu.dot_dimension_numbers<[1], [0], [0], [1], [0, 0, 1, 1], [], []>} : vector<128x512xbf16>, vector<512x512xbf16>, vector<128x512xf32> -> vector<128x512xf32>
    %76 = arith.truncf %75 : vector<128x512xf32> to vector<128x512xbf16>
    %c0_42 = arith.constant 0 : index
    %c0_43 = arith.constant 0 : index
    %77 = vector.load %arg16[%c0_42, %c0_43] : memref<1x512xbf16, #tpu.memory_space<vmem>>, vector<1x512xbf16>
    %78 = vector.broadcast %77 : vector<1x512xbf16> to vector<128x512xbf16>
    %79 = arith.addf %76, %78 : vector<128x512xbf16>
    %cst_44 = arith.constant 0.000000e+00 : bf16
    %80 = vector.broadcast %cst_44 : bf16 to vector<128x512xbf16>
    %81 = arith.maximumf %79, %80 : vector<128x512xbf16>
    %c0_45 = arith.constant 0 : index
    %c0_46 = arith.constant 0 : index
    %82 = vector.load %arg17[%c0_45, %c0_46] : memref<512x1xbf16, #tpu.memory_space<vmem>>, vector<512x1xbf16>
    %cst_47 = arith.constant dense<0.000000e+00> : vector<128x1xf32>
    %83 = tpu.matmul %81, %82, %cst_47 {dimension_numbers = #tpu.dot_dimension_numbers<[1], [0], [0], [1], [0, 0, 1, 1], [], []>} : vector<128x512xbf16>, vector<512x1xbf16>, vector<128x1xf32> -> vector<128x1xf32>
    %c0_48 = arith.constant 0 : index
    %c0_49 = arith.constant 0 : index
    %84 = vector.load %arg18[%c0_48, %c0_49] : memref<1x1xf32, #tpu.memory_space<vmem>>, vector<1x1xf32>
    %85 = vector.broadcast %84 : vector<1x1xf32> to vector<128x1xf32>
    %86 = arith.addf %83, %85 : vector<128x1xf32>
    %87 = math.tanh %86 : vector<128x1xf32>
    %c0_50 = arith.constant 0 : index
    %c0_51 = arith.constant 0 : index
    %88 = vector.load %arg19[%c0_50, %c0_51] : memref<128x1xf32, #tpu.memory_space<vmem>>, vector<128x1xf32>
    tpu.vector_store %arg19[%c0_50, %c0_51], %87 {strides = array<i32>} : memref<128x1xf32, #tpu.memory_space<vmem>>, vector<128x1xf32>,
    return
  }
  func.func @transform_0(%arg0: i32) -> (i32, i32) {
    %c0_i32 = arith.constant 0 : i32
    %c0_i32_0 = arith.constant 0 : i32
    return %arg0, %c0_i32 : i32, i32
  }
  func.func @transform_1(%arg0: i32) -> (i32, i32) {
    %c0_i32 = arith.constant 0 : i32
    %c0_i32_0 = arith.constant 0 : i32
    %c0_i32_1 = arith.constant 0 : i32
    return %c0_i32, %c0_i32_0 : i32, i32
  }
  func.func @transform_2(%arg0: i32) -> (i32, i32) {
    %c0_i32 = arith.constant 0 : i32
    %c0_i32_0 = arith.constant 0 : i32
    %c0_i32_1 = arith.constant 0 : i32
    return %c0_i32, %c0_i32_0 : i32, i32
  }
  func.func @transform_3(%arg0: i32) -> (i32, i32) {
    %c0_i32 = arith.constant 0 : i32
    %c0_i32_0 = arith.constant 0 : i32
    %c0_i32_1 = arith.constant 0 : i32
    return %c0_i32, %c0_i32_0 : i32, i32
  }
  func.func @transform_4(%arg0: i32) -> (i32, i32) {
    %c0_i32 = arith.constant 0 : i32
    %c0_i32_0 = arith.constant 0 : i32
    %c0_i32_1 = arith.constant 0 : i32
    return %c0_i32, %c0_i32_0 : i32, i32
  }
  func.func @transform_5(%arg0: i32) -> (i32, i32) {
    %c0_i32 = arith.constant 0 : i32
    %c0_i32_0 = arith.constant 0 : i32
    %c0_i32_1 = arith.constant 0 : i32
    return %c0_i32, %c0_i32_0 : i32, i32
  }
  func.func @transform_6(%arg0: i32) -> (i32, i32) {
    %c0_i32 = arith.constant 0 : i32
    %c0_i32_0 = arith.constant 0 : i32
    %c0_i32_1 = arith.constant 0 : i32
    return %c0_i32, %c0_i32_0 : i32, i32
  }
  func.func @transform_7(%arg0: i32) -> (i32, i32) {
    %c0_i32 = arith.constant 0 : i32
    %c0_i32_0 = arith.constant 0 : i32
    %c0_i32_1 = arith.constant 0 : i32
    return %c0_i32, %c0_i32_0 : i32, i32
  }
  func.func @transform_8(%arg0: i32) -> (i32, i32) {
    %c0_i32 = arith.constant 0 : i32
    %c0_i32_0 = arith.constant 0 : i32
    %c0_i32_1 = arith.constant 0 : i32
    return %c0_i32, %c0_i32_0 : i32, i32
  }
  func.func @transform_9(%arg0: i32) -> (i32, i32) {
    %c0_i32 = arith.constant 0 : i32
    %c0_i32_0 = arith.constant 0 : i32
    %c0_i32_1 = arith.constant 0 : i32
    return %c0_i32, %c0_i32_0 : i32, i32
  }
  func.func @transform_10(%arg0: i32) -> (i32, i32) {
    %c0_i32 = arith.constant 0 : i32
    %c0_i32_0 = arith.constant 0 : i32
    %c0_i32_1 = arith.constant 0 : i32
    return %c0_i32, %c0_i32_0 : i32, i32
  }
  func.func @transform_11(%arg0: i32) -> (i32, i32) {
    %c0_i32 = arith.constant 0 : i32
    %c0_i32_0 = arith.constant 0 : i32
    %c0_i32_1 = arith.constant 0 : i32
    return %c0_i32, %c0_i32_0 : i32, i32
  }
  func.func @transform_12(%arg0: i32) -> (i32, i32) {
    %c0_i32 = arith.constant 0 : i32
    %c0_i32_0 = arith.constant 0 : i32
    %c0_i32_1 = arith.constant 0 : i32
    return %c0_i32, %c0_i32_0 : i32, i32
  }
  func.func @transform_13(%arg0: i32) -> (i32, i32) {
    %c0_i32 = arith.constant 0 : i32
    %c0_i32_0 = arith.constant 0 : i32
    %c0_i32_1 = arith.constant 0 : i32
    return %c0_i32, %c0_i32_0 : i32, i32
  }
  func.func @transform_14(%arg0: i32) -> (i32, i32) {
    %c0_i32 = arith.constant 0 : i32
    %c0_i32_0 = arith.constant 0 : i32
    %c0_i32_1 = arith.constant 0 : i32
    return %c0_i32, %c0_i32_0 : i32, i32
  }
  func.func @transform_15(%arg0: i32) -> (i32, i32) {
    %c0_i32 = arith.constant 0 : i32
    %c0_i32_0 = arith.constant 0 : i32
    %c0_i32_1 = arith.constant 0 : i32
    return %c0_i32, %c0_i32_0 : i32, i32
  }
  func.func @transform_16(%arg0: i32) -> (i32, i32) {
    %c0_i32 = arith.constant 0 : i32
    %c0_i32_0 = arith.constant 0 : i32
    %c0_i32_1 = arith.constant 0 : i32
    return %c0_i32, %c0_i32_0 : i32, i32
  }
  func.func @transform_17(%arg0: i32) -> (i32, i32) {
    %c0_i32 = arith.constant 0 : i32
    %c0_i32_0 = arith.constant 0 : i32
    %c0_i32_1 = arith.constant 0 : i32
    return %c0_i32, %c0_i32_0 : i32, i32
  }
  func.func @transform_18(%arg0: i32) -> (i32, i32) {
    %c0_i32 = arith.constant 0 : i32
    %c0_i32_0 = arith.constant 0 : i32
    return %arg0, %c0_i32 : i32, i32
  }
}

</mosaic_0001>

<bundles_post_ra>
// kernel: net_forward.1
= control target key start
LH: loop header
LB: loop body
LE: loop exit
PB: predicated region body
PF: predicated region fallthrough
CT: control target
= control target key end

     0   :  { %s15698_s0 = inlined_call_operand.hbm [shape: f32[128,8], index: 0, kind: input, shape index: {}]   ;;  %s15699_s1 = inlined_call_operand.hbm [shape: bf16[128,512], index: 1, kind: input, shape index: {}]   ;;  %s15700_s2 = inlined_call_operand.hbm [shape: bf16[1,512], index: 2, kind: input, shape index: {}]   ;;  %s15701_s3 = inlined_call_operand.hbm [shape: bf16[512,512], index: 3, kind: input, shape index: {}]   ;;  %s15702_s4 = inlined_call_operand.hbm [shape: bf16[1,512], index: 4, kind: input, shape index: {}]   ;;  %s15703_s5 = inlined_call_operand.hbm [shape: bf16[512,512], index: 5, kind: input, shape index: {}]   ;;  %s15704_s6 = inlined_call_operand.hbm [shape: bf16[1,512], index: 6, kind: input, shape index: {}]   ;;  %s15705_s7 = inlined_call_operand.hbm [shape: bf16[512,512], index: 7, kind: input, shape index: {}]   ;;  %s15706_s8 = inlined_call_operand.hbm [shape: bf16[1,512], index: 8, kind: input, shape index: {}]   ;;  %s15707_s9 = inlined_call_operand.hbm [shape: bf16[128,512], index: 9, kind: input, shape index: {}]   ;;  %s15708_s10 = inlined_call_operand.hbm [shape: bf16[512,512], index: 10, kind: input, shape index: {}]   ;;  %s15709_s11 = inlined_call_operand.hbm [shape: bf16[1,512], index: 11, kind: input, shape index: {}]   ;;  %s15710_s12 = inlined_call_operand.hbm [shape: bf16[512,512], index: 12, kind: input, shape index: {}]   ;;  %s15711_s13 = inlined_call_operand.hbm [shape: bf16[1,512], index: 13, kind: input, shape index: {}]   ;;  %s15712_s14 = inlined_call_operand.hbm [shape: bf16[512,512], index: 14, kind: input, shape index: {}]   ;;  %s15713_s15 = inlined_call_operand.hbm [shape: bf16[1,512], index: 15, kind: input, shape index: {}]   ;;  %s15714_s16 = inlined_call_operand.hbm [shape: bf16[512,1], index: 16, kind: input, shape index: {}]   ;;  %s15715_s17 = inlined_call_operand.<no memory space> [shape: f32[1,1], index: 17, kind: input, shape index: {}]   ;;  %s15716_s18 = inlined_call_operand.hbm [shape: f32[128,1], index: 18, kind: output, shape index: {}]  }
   0x1   :  { %15723 = sst [smem:[#allocation41_spill]] %s15698_s0  ;;  %v23_v0 = vstv %s15715_s17 }
   0x2   :  { %15724 = sst [smem:[#allocation42_spill]] %s15699_s1  ;;  %24 = vst [vmem:[#allocation2] sm:$0x1] %v23_v0 }
   0x3   :  { %15725 = sst [smem:[#allocation43_spill]] %s15700_s2 }
   0x4   :  { %15726 = sst [smem:[#allocation44_spill]] %s15716_s18 }
   0x5   :  { %25 = vsyncpa [#allocation4], 0 }
   0x6   :  { %26 = vsyncpa [#allocation7], 0 }
   0x7   :  { %27 = vsyncpa [#allocation10], 0 }
   0x8   :  { %28 = vsyncpa [#allocation13], 0 }
   0x9   :  { %29 = vsyncpa [#allocation16], 0 }
   0xa   :  { %30 = vsyncpa [#allocation19], 0 }
   0xb   :  { %31 = vsyncpa [#allocation22], 0 }
   0xc   :  { %32 = vsyncpa [#allocation25], 0 }
   0xd   :  { %33 = vsyncpa [#allocation28], 0 }
   0xe   :  { %34 = vsyncpa [#allocation5], 0  ;;  %s13689_s29 = smov [#allocation6]   ;;  %s15727_s1 = sld [smem:[#allocation42_spill]] }
   0xf   :  { %s52_s30 = sshll.u32 %s13689_s29, 4  ;;  %s53_s30 = int_to_ptr.vmem [resolvable:$true] %s52_s30 }
  0x14   :  { %s13273_s20 = scalar_lea.hbm %s15727_s1, 4096 }
  0x15   :  { %p13274_p0 = scmp.ne.s32.totalorder %s15727_s1, %s13273_s20  ;;  %p13277_p1 = scmp.lt.u32.totalorder %s13273_s20, %s15727_s1 }
  0x17   :  { %p13279_p2 = pnand %p13277_p1, %p13274_p0 }
  0x19   :  { %13282 = shalt.err (!%p13279_p2)
}
  0x1a   :  { %s13283_s23 = scalar_lea.vmem %s53_s30, 4096  ;;  %p13288_p4 = scmp.lt.s32.totalorder %s53_s30, %s53_s30 }
  0x1b   :  { %p13284_p3 = scmp.ne.s32.totalorder %s53_s30, %s13283_s23  ;;  %p13289_p5 = scmp.lt.s32.totalorder %s13283_s23, %s13283_s23 }
  0x1d   :  { %p13290_p6 = por %p13289_p5, %p13288_p4 }
  0x1f   :  { %p13291_p7 = pnand %p13290_p6, %p13284_p3 }
  0x21   :  { %13294 = shalt.err (!%p13291_p7)
}
  0x22   :  { %s13690_s24 = smov 256   ;;  %s13691_s25 = smov 16  }
  0x23   :  { %58 = dma.hbm_to_vmem [thread:$0]  %s15727_s1, 4096, %s53_s30, [#allocation7], %s13690_s24, %s13690_s24, %s13691_s25  }
  0x24   :  { %s13692_s28 = smov [#allocation9]   ;;  %s13693_s0 = smov [#allocation12]  }
  0x25   :  { %s74_s29 = sshll.u32 %s13692_s28, 4  ;;  %s96_s19 = sshll.u32 %s13693_s0, 4  ;;  %s75_s29 = int_to_ptr.vmem [resolvable:$true] %s74_s29  ;;  %s97_s19 = int_to_ptr.vmem [resolvable:$true] %s96_s19 }
  0x26   :  { %s13295_s17 = scalar_lea.hbm %s15701_s3, 16384 }
  0x27   :  { %p13296_p8 = scmp.ne.s32.totalorder %s15701_s3, %s13295_s17  ;;  %p13299_p9 = scmp.lt.u32.totalorder %s13295_s17, %s15701_s3 }
  0x29   :  { %p13301_p10 = pnand %p13299_p9, %p13296_p8 }
  0x2b   :  { %13304 = shalt.err (!%p13301_p10)
}
  0x2c   :  { %s13305_s30 = scalar_lea.vmem %s75_s29, 16384  ;;  %p13310_p12 = scmp.lt.s32.totalorder %s75_s29, %s75_s29 }
  0x2d   :  { %p13306_p11 = scmp.ne.s32.totalorder %s75_s29, %s13305_s30  ;;  %p13311_p13 = scmp.lt.s32.totalorder %s13305_s30, %s13305_s30 }
  0x2f   :  { %p13312_p0 = por %p13311_p13, %p13310_p12 }
  0x31   :  { %p13313_p1 = pnand %p13312_p0, %p13306_p11 }
  0x33   :  { %13316 = shalt.err (!%p13313_p1)
}
  0x34   :  { %80 = dma.hbm_to_vmem [thread:$0]  %s15701_s3, 16384, %s75_s29, [#allocation10], %s13690_s24, %s13690_s24, %s13691_s25  }
  0x35   :  { %s13317_s28 = scalar_lea.hbm %s15703_s5, 16384 }
  0x36   :  { %p13318_p2 = scmp.ne.s32.totalorder %s15703_s5, %s13317_s28  ;;  %p13321_p3 = scmp.lt.u32.totalorder %s13317_s28, %s15703_s5 }
  0x38   :  { %p13323_p4 = pnand %p13321_p3, %p13318_p2 }
  0x3a   :  { %13326 = shalt.err (!%p13323_p4)
}
  0x3b   :  { %s13327_s22 = scalar_lea.vmem %s97_s19, 16384  ;;  %p13332_p6 = scmp.lt.s32.totalorder %s97_s19, %s97_s19 }
  0x3c   :  { %p13328_p5 = scmp.ne.s32.totalorder %s97_s19, %s13327_s22  ;;  %p13333_p7 = scmp.lt.s32.totalorder %s13327_s22, %s13327_s22 }
  0x3e   :  { %p13334_p8 = por %p13333_p7, %p13332_p6 }
  0x40   :  { %p13335_p9 = pnand %p13334_p8, %p13328_p5 }
  0x42   :  { %13338 = shalt.err (!%p13335_p9)
}
  0x43   :  { %102 = dma.hbm_to_vmem [thread:$0]  %s15703_s5, 16384, %s97_s19, [#allocation13], %s13690_s24, %s13690_s24, %s13691_s25  }
  0x44   :  { %s13694_s2 = smov [#allocation15]   ;;  %s13695_s30 = smov [#allocation18]  }
  0x45   :  { %s118_s23 = sshll.u32 %s13694_s2, 4  ;;  %s140_s1 = sshll.u32 %s13695_s30, 4  ;;  %s119_s23 = int_to_ptr.vmem [resolvable:$true] %s118_s23  ;;  %s141_s1 = int_to_ptr.vmem [resolvable:$true] %s140_s1 }
  0x46   :  { %s13339_s18 = scalar_lea.hbm %s15705_s7, 16384 }
  0x47   :  { %p13340_p10 = scmp.ne.s32.totalorder %s15705_s7, %s13339_s18  ;;  %p13343_p11 = scmp.lt.u32.totalorder %s13339_s18, %s15705_s7 }
  0x49   :  { %p13345_p12 = pnand %p13343_p11, %p13340_p10 }
  0x4b   :  { %13348 = shalt.err (!%p13345_p12)
}
  0x4c   :  { %s13349_s5 = scalar_lea.vmem %s119_s23, 16384  ;;  %p13354_p0 = scmp.lt.s32.totalorder %s119_s23, %s119_s23 }
  0x4d   :  { %p13350_p13 = scmp.ne.s32.totalorder %s119_s23, %s13349_s5  ;;  %p13355_p1 = scmp.lt.s32.totalorder %s13349_s5, %s13349_s5 }
  0x4f   :  { %p13356_p2 = por %p13355_p1, %p13354_p0 }
  0x51   :  { %p13357_p3 = pnand %p13356_p2, %p13350_p13 }
  0x53   :  { %13360 = shalt.err (!%p13357_p3)
}
  0x54   :  { %124 = dma.hbm_to_vmem [thread:$0]  %s15705_s7, 16384, %s119_s23, [#allocation16], %s13690_s24, %s13690_s24, %s13691_s25  }
  0x55   :  { %s13361_s29 = scalar_lea.hbm %s15707_s9, 4096 }
  0x56   :  { %p13362_p4 = scmp.ne.s32.totalorder %s15707_s9, %s13361_s29  ;;  %p13365_p5 = scmp.lt.u32.totalorder %s13361_s29, %s15707_s9 }
  0x58   :  { %p13367_p6 = pnand %p13365_p5, %p13362_p4 }
  0x5a   :  { %13370 = shalt.err (!%p13367_p6)
}
  0x5b   :  { %s13371_s18 = scalar_lea.vmem %s141_s1, 4096  ;;  %p13376_p8 = scmp.lt.s32.totalorder %s141_s1, %s141_s1 }
  0x5c   :  { %p13372_p7 = scmp.ne.s32.totalorder %s141_s1, %s13371_s18  ;;  %p13377_p9 = scmp.lt.s32.totalorder %s13371_s18, %s13371_s18 }
  0x5e   :  { %p13378_p10 = por %p13377_p9, %p13376_p8 }
  0x60   :  { %p13379_p11 = pnand %p13378_p10, %p13372_p7 }
  0x62   :  { %13382 = shalt.err (!%p13379_p11)
}
  0x63   :  { %146 = dma.hbm_to_vmem [thread:$0]  %s15707_s9, 4096, %s141_s1, [#allocation19], %s13690_s24, %s13690_s24, %s13691_s25  }
  0x64   :  { %s13696_s28 = smov [#allocation21]   ;;  %s13697_s20 = smov [#allocation24]  }
  0x65   :  { %s165_s0 = sshll.u32 %s13696_s28, 4  ;;  %s187_s21 = sshll.u32 %s13697_s20, 4  ;;  %s166_s0 = int_to_ptr.vmem [resolvable:$true] %s165_s0  ;;  %s188_s21 = int_to_ptr.vmem [resolvable:$true] %s187_s21 }
  0x66   :  { %s13383_s17 = scalar_lea.hbm %s15709_s11, 64 }
  0x67   :  { %p13384_p12 = scmp.ne.s32.totalorder %s15709_s11, %s13383_s17  ;;  %p13387_p13 = scmp.lt.u32.totalorder %s13383_s17, %s15709_s11 }
  0x69   :  { %p13389_p0 = pnand %p13387_p13, %p13384_p12 }
  0x6b   :  { %13392 = shalt.err (!%p13389_p0)
}
  0x6c   :  { %s13393_s9 = scalar_lea.vmem %s166_s0, 64  ;;  %p13398_p2 = scmp.lt.s32.totalorder %s166_s0, %s166_s0 }
  0x6d   :  { %p13394_p1 = scmp.ne.s32.totalorder %s166_s0, %s13393_s9  ;;  %p13399_p3 = scmp.lt.s32.totalorder %s13393_s9, %s13393_s9 }
  0x6f   :  { %p13400_p4 = por %p13399_p3, %p13398_p2 }
  0x71   :  { %p13401_p5 = pnand %p13400_p4, %p13394_p1 }
  0x73   :  { %13404 = shalt.err (!%p13401_p5)
}
  0x74   :  { %168 = dma.hbm_to_vmem [thread:$0]  %s15709_s11, 64, %s166_s0, [#allocation22]  }
  0x75   :  { %s13405_s18 = scalar_lea.hbm %s15711_s13, 64 }
  0x76   :  { %p13406_p6 = scmp.ne.s32.totalorder %s15711_s13, %s13405_s18  ;;  %p13409_p7 = scmp.lt.u32.totalorder %s13405_s18, %s15711_s13 }
  0x78   :  { %p13411_p8 = pnand %p13409_p7, %p13406_p6 }
  0x7a   :  { %13414 = shalt.err (!%p13411_p8)
}
  0x7b   :  { %s13415_s5 = scalar_lea.vmem %s188_s21, 64  ;;  %p13420_p10 = scmp.lt.s32.totalorder %s188_s21, %s188_s21 }
  0x7c   :  { %p13416_p9 = scmp.ne.s32.totalorder %s188_s21, %s13415_s5  ;;  %p13421_p11 = scmp.lt.s32.totalorder %s13415_s5, %s13415_s5 }
  0x7e   :  { %p13422_p12 = por %p13421_p11, %p13420_p10 }
  0x80   :  { %p13423_p13 = pnand %p13422_p12, %p13416_p9 }
  0x82   :  { %13426 = shalt.err (!%p13423_p13)
}
  0x83   :  { %190 = dma.hbm_to_vmem [thread:$0]  %s15711_s13, 64, %s188_s21, [#allocation25]  }
  0x84   :  { %s13698_s19 = smov [#allocation27]   ;;  %s13699_s22 = smov [#allocation3]  }
  0x85   :  { %s209_s17 = sshll.u32 %s13698_s19, 4  ;;  %s40_s3 = sshll.u32 %s13699_s22, 4  ;;  %s210_s17 = int_to_ptr.vmem [resolvable:$true] %s209_s17  ;;  %s41_s3 = int_to_ptr.vmem [resolvable:$true] %s40_s3 }
  0x86   :  { %s13427_s9 = scalar_lea.hbm %s15713_s15, 64 }
  0x87   :  { %p13428_p0 = scmp.ne.s32.totalorder %s15713_s15, %s13427_s9  ;;  %p13431_p1 = scmp.lt.u32.totalorder %s13427_s9, %s15713_s15 }
  0x89   :  { %p13433_p2 = pnand %p13431_p1, %p13428_p0 }
  0x8b   :  { %13436 = shalt.err (!%p13433_p2)
}
  0x8c   :  { %s13437_s13 = scalar_lea.vmem %s210_s17, 64  ;;  %p13442_p4 = scmp.lt.s32.totalorder %s210_s17, %s210_s17 }
  0x8d   :  { %p13438_p3 = scmp.ne.s32.totalorder %s210_s17, %s13437_s13  ;;  %p13443_p5 = scmp.lt.s32.totalorder %s13437_s13, %s13437_s13 }
  0x8f   :  { %p13444_p6 = por %p13443_p5, %p13442_p4 }
  0x91   :  { %p13445_p7 = pnand %p13444_p6, %p13438_p3 }
  0x93   :  { %13448 = shalt.err (!%p13445_p7)
}
  0x94   :  { %212 = dma.hbm_to_vmem [thread:$0]  %s15713_s15, 64, %s210_s17, [#allocation28]  }
  0x95   :  { %s15728_s28 = sld [smem:[#allocation41_spill]] }
  0x9b   :  { %s13449_s20 = scalar_lea.hbm %s15728_s28, 2048 }
  0x9c   :  { %p13450_p8 = scmp.ne.s32.totalorder %s15728_s28, %s13449_s20  ;;  %p13453_p9 = scmp.lt.u32.totalorder %s13449_s20, %s15728_s28 }
  0x9e   :  { %p13455_p10 = pnand %p13453_p9, %p13450_p8 }
  0xa0   :  { %13458 = shalt.err (!%p13455_p10)
}
  0xa1   :  { %s13459_s22 = scalar_lea.vmem %s41_s3, 2048  ;;  %p13464_p12 = scmp.lt.s32.totalorder %s41_s3, %s41_s3 }
  0xa2   :  { %p13460_p11 = scmp.ne.s32.totalorder %s41_s3, %s13459_s22  ;;  %p13465_p13 = scmp.lt.s32.totalorder %s13459_s22, %s13459_s22 }
  0xa4   :  { %p13466_p0 = por %p13465_p13, %p13464_p12 }
  0xa6   :  { %p13467_p1 = pnand %p13466_p0, %p13460_p11 }
  0xa8   :  { %13470 = shalt.err (!%p13467_p1)
}
  0xa9   :  { %s13700_s15 = smov 128   ;;  %s13701_s17 = smov 8  }
  0xaa   :  { %46 = dma.hbm_to_vmem [thread:$0]  %s15728_s28, 2048, %s41_s3, [#allocation4], %s13700_s15, %s13700_s15, %s13701_s17  }
  0xab   :  { %s13702_s9 = smov [#allocation8]   ;;  %s13703_s30 = smov [#allocation11]  }
  0xac   :  { %s65_s1 = sshll.u32 %s13702_s9, 4  ;;  %s87_s26 = sshll.u32 %s13703_s30, 4  ;;  %s66_s1 = int_to_ptr.vmem [resolvable:$true] %s65_s1  ;;  %s88_s26 = int_to_ptr.vmem [resolvable:$true] %s87_s26 }
  0xad   :  { %s15729_s21 = sld [smem:[#allocation43_spill]] }
  0xb3   :  { %s13471_s18 = scalar_lea.hbm %s15729_s21, 64 }
  0xb4   :  { %p13472_p2 = scmp.ne.s32.totalorder %s15729_s21, %s13471_s18  ;;  %p13475_p3 = scmp.lt.u32.totalorder %s13471_s18, %s15729_s21 }
  0xb6   :  { %p13477_p4 = pnand %p13475_p3, %p13472_p2 }
  0xb8   :  { %13480 = shalt.err (!%p13477_p4)
}
  0xb9   :  { %s13481_s3 = scalar_lea.vmem %s66_s1, 64  ;;  %p13486_p6 = scmp.lt.s32.totalorder %s66_s1, %s66_s1 }
  0xba   :  { %p13482_p5 = scmp.ne.s32.totalorder %s66_s1, %s13481_s3  ;;  %p13487_p7 = scmp.lt.s32.totalorder %s13481_s3, %s13481_s3 }
  0xbc   :  { %p13488_p8 = por %p13487_p7, %p13486_p6 }
  0xbe   :  { %p13489_p9 = pnand %p13488_p8, %p13482_p5 }
  0xc0   :  { %13492 = shalt.err (!%p13489_p9)
}
  0xc1   :  { %68 = dma.hbm_to_vmem [thread:$0]  %s15729_s21, 64, %s66_s1, [#allocation7]  }
  0xc2   :  { %s13493_s22 = scalar_lea.hbm %s15702_s4, 64 }
  0xc3   :  { %p13494_p10 = scmp.ne.s32.totalorder %s15702_s4, %s13493_s22  ;;  %p13497_p11 = scmp.lt.u32.totalorder %s13493_s22, %s15702_s4 }
  0xc5   :  { %p13499_p12 = pnand %p13497_p11, %p13494_p10 }
  0xc7   :  { %13502 = shalt.err (!%p13499_p12)
}
  0xc8   :  { %s13503_s27 = scalar_lea.vmem %s88_s26, 64  ;;  %p13508_p0 = scmp.lt.s32.totalorder %s88_s26, %s88_s26 }
  0xc9   :  { %p13504_p13 = scmp.ne.s32.totalorder %s88_s26, %s13503_s27  ;;  %p13509_p1 = scmp.lt.s32.totalorder %s13503_s27, %s13503_s27 }
  0xcb   :  { %p13510_p2 = por %p13509_p1, %p13508_p0 }
  0xcd   :  { %p13511_p3 = pnand %p13510_p2, %p13504_p13 }
  0xcf   :  { %13514 = shalt.err (!%p13511_p3)
}
  0xd0   :  { %90 = dma.hbm_to_vmem [thread:$0]  %s15702_s4, 64, %s88_s26, [#allocation10]  }
  0xd1   :  { %s13704_s21 = smov [#allocation14]   ;;  %s13705_s7 = smov [#allocation17]  }
  0xd2   :  { %s109_s18 = sshll.u32 %s13704_s21, 4  ;;  %s131_s23 = sshll.u32 %s13705_s7, 4  ;;  %s110_s18 = int_to_ptr.vmem [resolvable:$true] %s109_s18  ;;  %s132_s23 = int_to_ptr.vmem [resolvable:$true] %s131_s23 }
  0xd3   :  { %s13515_s3 = scalar_lea.hbm %s15704_s6, 64 }
  0xd4   :  { %p13516_p4 = scmp.ne.s32.totalorder %s15704_s6, %s13515_s3  ;;  %p13519_p5 = scmp.lt.u32.totalorder %s13515_s3, %s15704_s6 }
  0xd6   :  { %p13521_p6 = pnand %p13519_p5, %p13516_p4 }
  0xd8   :  { %13524 = shalt.err (!%p13521_p6)
}
  0xd9   :  { %s13525_s4 = scalar_lea.vmem %s110_s18, 64  ;;  %p13530_p8 = scmp.lt.s32.totalorder %s110_s18, %s110_s18 }
  0xda   :  { %p13526_p7 = scmp.ne.s32.totalorder %s110_s18, %s13525_s4  ;;  %p13531_p9 = scmp.lt.s32.totalorder %s13525_s4, %s13525_s4 }
  0xdc   :  { %p13532_p10 = por %p13531_p9, %p13530_p8 }
  0xde   :  { %p13533_p11 = pnand %p13532_p10, %p13526_p7 }
  0xe0   :  { %13536 = shalt.err (!%p13533_p11)
}
  0xe1   :  { %112 = dma.hbm_to_vmem [thread:$0]  %s15704_s6, 64, %s110_s18, [#allocation13]  }
  0xe2   :  { %s13537_s9 = scalar_lea.hbm %s15706_s8, 64 }
  0xe3   :  { %p13538_p12 = scmp.ne.s32.totalorder %s15706_s8, %s13537_s9  ;;  %p13541_p13 = scmp.lt.u32.totalorder %s13537_s9, %s15706_s8 }
  0xe5   :  { %p13543_p0 = pnand %p13541_p13, %p13538_p12 }
  0xe7   :  { %13546 = shalt.err (!%p13543_p0)
}
  0xe8   :  { %s13547_s21 = scalar_lea.vmem %s132_s23, 64  ;;  %p13552_p2 = scmp.lt.s32.totalorder %s132_s23, %s132_s23 }
  0xe9   :  { %p13548_p1 = scmp.ne.s32.totalorder %s132_s23, %s13547_s21  ;;  %p13553_p3 = scmp.lt.s32.totalorder %s13547_s21, %s13547_s21 }
  0xeb   :  { %p13554_p4 = por %p13553_p3, %p13552_p2 }
  0xed   :  { %p13555_p5 = pnand %p13554_p4, %p13548_p1 }
  0xef   :  { %13558 = shalt.err (!%p13555_p5)
}
  0xf0   :  { %134 = dma.hbm_to_vmem [thread:$0]  %s15706_s8, 64, %s132_s23, [#allocation16]  }
  0xf1   :  { %s13706_s7 = smov [#allocation20]   ;;  %s13707_s5 = smov [#allocation23]  }
  0xf2   :  { %s152_s20 = sshll.u32 %s13706_s7, 4  ;;  %s174_s3 = sshll.u32 %s13707_s5, 4  ;;  %s153_s20 = int_to_ptr.vmem [resolvable:$true] %s152_s20  ;;  %s175_s3 = int_to_ptr.vmem [resolvable:$true] %s174_s3 }
  0xf3   :  { %s13559_s0 = scalar_lea.hbm %s15708_s10, 16384 }
  0xf4   :  { %p13560_p6 = scmp.ne.s32.totalorder %s15708_s10, %s13559_s0  ;;  %p13563_p7 = scmp.lt.u32.totalorder %s13559_s0, %s15708_s10 }
  0xf6   :  { %p13565_p8 = pnand %p13563_p7, %p13560_p6 }
  0xf8   :  { %13568 = shalt.err (!%p13565_p8)
}
  0xf9   :  { %s13569_s8 = scalar_lea.vmem %s153_s20, 16384  ;;  %p13574_p10 = scmp.lt.s32.totalorder %s153_s20, %s153_s20 }
  0xfa   :  { %p13570_p9 = scmp.ne.s32.totalorder %s153_s20, %s13569_s8  ;;  %p13575_p11 = scmp.lt.s32.totalorder %s13569_s8, %s13569_s8 }
  0xfc   :  { %p13576_p12 = por %p13575_p11, %p13574_p10 }
  0xfe   :  { %p13577_p13 = pnand %p13576_p12, %p13570_p9 }
 0x100   :  { %13580 = shalt.err (!%p13577_p13)
}
 0x101   :  { %158 = dma.hbm_to_vmem [thread:$0]  %s15708_s10, 16384, %s153_s20, [#allocation19], %s13690_s24, %s13690_s24, %s13691_s25  }
 0x102   :  { %s13581_s30 = scalar_lea.hbm %s15710_s12, 16384 }
 0x103   :  { %p13582_p0 = scmp.ne.s32.totalorder %s15710_s12, %s13581_s30  ;;  %p13585_p1 = scmp.lt.u32.totalorder %s13581_s30, %s15710_s12 }
 0x105   :  { %p13587_p2 = pnand %p13585_p1, %p13582_p0 }
 0x107   :  { %13590 = shalt.err (!%p13587_p2)
}
 0x108   :  { %s13591_s6 = scalar_lea.vmem %s175_s3, 16384  ;;  %p13596_p4 = scmp.lt.s32.totalorder %s175_s3, %s175_s3 }
 0x109   :  { %p13592_p3 = scmp.ne.s32.totalorder %s175_s3, %s13591_s6  ;;  %p13597_p5 = scmp.lt.s32.totalorder %s13591_s6, %s13591_s6 }
 0x10b   :  { %p13598_p6 = por %p13597_p5, %p13596_p4 }
 0x10d   :  { %p13599_p7 = pnand %p13598_p6, %p13592_p3 }
 0x10f   :  { %13602 = shalt.err (!%p13599_p7)
}
 0x110   :  { %180 = dma.hbm_to_vmem [thread:$0]  %s15710_s12, 16384, %s175_s3, [#allocation22], %s13690_s24, %s13690_s24, %s13691_s25  }
 0x111   :  { %s13708_s7 = smov [#allocation26]   ;;  %s13709_s5 = smov [#allocation29]  }
 0x112   :  { %s196_s20 = sshll.u32 %s13708_s7, 4  ;;  %s218_s28 = sshll.u32 %s13709_s5, 4  ;;  %s197_s20 = int_to_ptr.vmem [resolvable:$true] %s196_s20  ;;  %s219_s28 = int_to_ptr.vmem [resolvable:$true] %s218_s28 }
 0x113   :  { %s13603_s19 = scalar_lea.hbm %s15712_s14, 16384 }
 0x114   :  { %p13604_p8 = scmp.ne.s32.totalorder %s15712_s14, %s13603_s19  ;;  %p13607_p9 = scmp.lt.u32.totalorder %s13603_s19, %s15712_s14 }
 0x116   :  { %p13609_p10 = pnand %p13607_p9, %p13604_p8 }
 0x118   :  { %13612 = shalt.err (!%p13609_p10)
}
 0x119   :  { %s13613_s12 = scalar_lea.vmem %s197_s20, 16384  ;;  %p13618_p12 = scmp.lt.s32.totalorder %s197_s20, %s197_s20 }
 0x11a   :  { %p13614_p11 = scmp.ne.s32.totalorder %s197_s20, %s13613_s12  ;;  %p13619_p13 = scmp.lt.s32.totalorder %s13613_s12, %s13613_s12 }
 0x11c   :  { %p13620_p0 = por %p13619_p13, %p13618_p12 }
 0x11e   :  { %p13621_p1 = pnand %p13620_p0, %p13614_p11 }
 0x120   :  { %13624 = shalt.err (!%p13621_p1)
}
 0x121   :  { %202 = dma.hbm_to_vmem [thread:$0]  %s15712_s14, 16384, %s197_s20, [#allocation25], %s13690_s24, %s13690_s24, %s13691_s25  }
 0x122   :  { %s13625_s9 = scalar_lea.hbm %s15714_s16, 4096 }
 0x123   :  { %p13626_p2 = scmp.ne.s32.totalorder %s15714_s16, %s13625_s9  ;;  %p13629_p3 = scmp.lt.u32.totalorder %s13625_s9, %s15714_s16 }
 0x125   :  { %p13631_p4 = pnand %p13629_p3, %p13626_p2 }
 0x127   :  { %13634 = shalt.err (!%p13631_p4)
}
 0x128   :  { %s13635_s21 = scalar_lea.vmem %s219_s28, 4096  ;;  %p13640_p6 = scmp.lt.s32.totalorder %s219_s28, %s219_s28 }
 0x129   :  { %p13636_p5 = scmp.ne.s32.totalorder %s219_s28, %s13635_s21  ;;  %p13641_p7 = scmp.lt.s32.totalorder %s13635_s21, %s13635_s21 }
 0x12b   :  { %p13642_p8 = por %p13641_p7, %p13640_p6 }
 0x12d   :  { %p13643_p9 = pnand %p13642_p8, %p13636_p5 }
 0x12f   :  { %13646 = shalt.err (!%p13643_p9)
}
 0x130   :  { %s13710_s14 = smov 64   ;;  %s13711_s24 = smov 4  }
 0x131   :  { %224 = dma.hbm_to_vmem [thread:$0]  %s15714_s16, 4096, %s219_s28, [#allocation28], %s13710_s14, %s13710_s14, %s13711_s24  }
 0x132   :  { %13669 = dma.done.wait [#allocation4], 2048  }
 0x133   :  { %13670 = vsyncadd [#allocation4], 4294965248 }
 0x134   :  { %13671 = dma.done.wait [#allocation7], 4160  }
 0x135   :  { %13672 = vsyncadd [#allocation7], 4294963136 }
 0x136   :  { %13673 = dma.done.wait [#allocation10], 16448  }
 0x137   :  { %13674 = vsyncadd [#allocation10], 4294950848 }
 0x138   :  { %13675 = dma.done.wait [#allocation13], 16448  }
 0x139   :  { %13676 = vsyncadd [#allocation13], 4294950848 }
 0x13a   :  { %13677 = dma.done.wait [#allocation16], 16448  }
 0x13b   :  { %13678 = vsyncadd [#allocation16], 4294950848 }
 0x13c   :  { %13679 = dma.done.wait [#allocation19], 20480  }
 0x13d   :  { %13680 = vsyncadd [#allocation19], 4294946816 }
 0x13e   :  { %13681 = dma.done.wait [#allocation22], 16448  }
 0x13f   :  { %13682 = vsyncadd [#allocation22], 4294950848 }
 0x140   :  { %13683 = dma.done.wait [#allocation25], 16448  }
 0x141   :  { %13684 = vsyncadd [#allocation25], 4294950848 }
 0x142   :  { %13685 = dma.done.wait [#allocation28], 4160  }
 0x143   :  { %13686 = vsyncadd [#allocation28], 4294963136  ;;  %v13712_v1 = vmov 1   ;;  %v15721_v2 = vmov 0   ;;  %v279_v3 = vld [vmem:[#allocation3] sm:$0xff]  ;;  %v280_v4 = vld [vmem:[#allocation3 + $0x8] sm:$0xff] }
 0x144   :  { %11857 = vset.pattern.permute.xlu1 %v13712_v1  ;;  %11874 = vset.pattern.permute.xlu0 %v15721_v2  ;;  %v281_v5 = vld [vmem:[#allocation3 + $0x10] sm:$0xff]  ;;  %v11858_v6 = vpack.i.bf16 %v280_v4, %v279_v3  ;;  %v11796_v7 = vtrunc.f32 %v279_v3  ;;  %v11798_v8 = vtrunc.f32 %v280_v4  ;;  %v282_v9 = vld [vmem:[#allocation3 + $0x18] sm:$0xff]  ;;  %v14051_v14 = vld [vmem:[#allocation3 + $0x28] sm:$0xff]  ;;  %v13714_v18 = vmov 2   ;;  %s13717_s16 = smov [#allocation30]  }
 0x145   :  { %835 = vmatprep.mubr.bf16.mxu0 %v15721_v2  ;;  %948 = vmatprep.mubr.bf16.mxu1 %v15721_v2  ;;  %v11800_v12 = vtrunc.f32 %v281_v5  ;;  %v11802_v13 = vtrunc.f32 %v282_v9  ;;  %v14053_v16 = vld [vmem:[#allocation3 + $0x20] sm:$0xff]  ;;  %v11806_v21 = vtrunc.f32 %v14051_v14  ;;  %v11963_v22 = vld [vmem:[#allocation6 + $0xc] ss:$16 sps:$4 sm:$0xff]   ;;  %v11869_v24 = vpack.i.bf16 %v282_v9, %v281_v5  ;;  %v11966_v26 = vld [vmem:[#allocation6 + $0x8] ss:$16 sps:$4 sm:$0xff]   ;;  %s10312_s10 = sshll.u32 %s13717_s16, 4  ;;  %s10313_s10 = int_to_ptr.vmem [resolvable:$true] %s10312_s10 }
 0x146   :  { %11859 = vperm.xlu1 %11857, %v11858_v6   ;;  %v11797_v10 = vcvt.f32.s32 %v11796_v7  ;;  %v11799_v11 = vcvt.f32.s32 %v11798_v8  ;;  %v11961_v17 = vld [vmem:[#allocation6 + $0x4] ss:$16 sps:$4 sm:$0xff]   ;;  %v11965_v23 = vld [vmem:[#allocation6] ss:$16 sps:$4 sm:$0xff]   ;;  %v11804_v27 = vtrunc.f32 %v14053_v16  ;;  %916 = vmatprep.subr.bf16.mxu1 %v11963_v22  ;;  %v11969_v29 = vld [vmem:[#allocation6 + $0x2c] ss:$16 sps:$4 sm:$0xff]   ;;  %v11883_v54 = vpack.i.bf16 %v14051_v14, %v14053_v16  ;;  %p13652_p11 = scmp.lt.s32.totalorder %s10313_s10, %s10313_s10 }
 0x147   :  { %v11801_v20 = vcvt.f32.s32 %v11800_v12  ;;  %v11803_v25 = vcvt.f32.s32 %v11802_v13  ;;  %803 = vmatprep.subr.bf16.mxu0 %v11961_v17  ;;  %v11967_v28 = vld [vmem:[#allocation6 + $0x24] ss:$16 sps:$4 sm:$0xff]   ;;  %917 = vmatpush1.bf16.msra.mxu1 %v11966_v26  ;;  %v11971_v30 = vld [vmem:[#allocation6 + $0x20] ss:$16 sps:$4 sm:$0xff]   ;;  %v11972_v31 = vld [vmem:[#allocation6 + $0x28] ss:$16 sps:$4 sm:$0xff]   ;;  %v11807_v33 = vcvt.f32.s32 %v11806_v21 }
 0x148   :  { %v313_v15 = vadd.s32 2, %v11797_v10  ;;  %v314_v19 = vadd.s32 2, %v11799_v11  ;;  %804 = vmatpush1.bf16.msra.mxu0 %v11965_v23  ;;  %v11973_v34 = vld [vmem:[#allocation6 + $0x44] ss:$16 sps:$4 sm:$0xff]   ;;  %918 = vmatprep.subr.bf16.mxu1 %v11969_v29  ;;  %v11805_v36 = vcvt.f32.s32 %v11804_v27  ;;  %v11975_v37 = vld [vmem:[#allocation6 + $0x4c] ss:$16 sps:$4 sm:$0xff]  }
 0x149   :  { %v315_v32 = vadd.s32 2, %v11801_v20  ;;  %805 = vmatprep.subr.bf16.mxu0 %v11967_v28  ;;  %v316_v35 = vadd.s32 2, %v11803_v25  ;;  %v11977_v38 = vld [vmem:[#allocation6 + $0x40] ss:$16 sps:$4 sm:$0xff]   ;;  %v11978_v39 = vld [vmem:[#allocation6 + $0x48] ss:$16 sps:$4 sm:$0xff]  }
 0x14a   :  { %11863 = vset.pattern.permute.xlu1 %v13714_v18  ;;  %330 = vperm.xlu0 %11874, %v313_v15   ;;  %v11979_v40 = vld [vmem:[#allocation6 + $0x64] ss:$16 sps:$4 sm:$0xff]   ;;  %v318_v41 = vadd.s32 2, %v11807_v33  ;;  %v11981_v42 = vld [vmem:[#allocation6 + $0x6c] ss:$16 sps:$4 sm:$0xff]   ;;  %v317_v44 = vadd.s32 2, %v11805_v36 }
 0x14b   :  { %11865 = vperm.xlu1 %11863, %v11858_v6   ;;  %919 = vmatpush1.bf16.msra.mxu1 %v11972_v31  ;;  %v285_v43 = vld [vmem:[#allocation3 + $0x30] sm:$0xff]  ;;  %v11984_v46 = vld [vmem:[#allocation6 + $0x68] ss:$16 sps:$4 sm:$0xff]   ;;  %v11987_v48 = vld [vmem:[#allocation6 + $0x8c] ss:$16 sps:$4 sm:$0xff]   ;;  %s13647_s18 = scalar_lea.vmem %s10313_s10, 2048 }
 0x14c   :  { %806 = vmatpush1.bf16.msra.mxu0 %v11971_v30  ;;  %920 = vmatprep.subr.bf16.mxu1 %v11975_v37  ;;  %v11983_v45 = vld [vmem:[#allocation6 + $0x60] ss:$16 sps:$4 sm:$0xff]   ;;  %v11985_v47 = vld [vmem:[#allocation6 + $0x84] ss:$16 sps:$4 sm:$0xff]   ;;  %v286_v49 = vld [vmem:[#allocation3 + $0x38] sm:$0xff]  ;;  %v11808_v50 = vtrunc.f32 %v285_v43  ;;  %p13648_p10 = scmp.ne.s32.totalorder %s10313_s10, %s13647_s18  ;;  %p13653_p12 = scmp.lt.s32.totalorder %s13647_s18, %s13647_s18 }
 0x14d   :  { %807 = vmatprep.subr.bf16.mxu0 %v11973_v34  ;;  %v14059_v51 = vld [vmem:[#allocation3 + $0x48] sm:$0xff]  ;;  %v11989_v52 = vld [vmem:[#allocation6 + $0x80] ss:$16 sps:$4 sm:$0xff]   ;;  %v11991_v55 = vld [vmem:[#allocation6 + $0xa4] ss:$16 sps:$4 sm:$0xff]   ;;  %v11895_v57 = vpack.i.bf16 %v286_v49, %v285_v43  ;;  %v11810_v58 = vtrunc.f32 %v286_v49  ;;  %v311_v49 = vlaneseq }
 0x14e   :  { %333 = vperm.xlu0 %11874, %v314_v19   ;;  %v11990_v53 = vld [vmem:[#allocation6 + $0x88] ss:$16 sps:$4 sm:$0xff]   ;;  %v11993_v56 = vld [vmem:[#allocation6 + $0xac] ss:$16 sps:$4 sm:$0xff]   ;;  %v289_v59 = vld [vmem:[#allocation3 + $0x50] sm:$0xff]  ;;  %v11809_v61 = vcvt.f32.s32 %v11808_v50  ;;  %v11814_v62 = vtrunc.f32 %v14059_v51  ;;  %p13654_p13 = por %p13653_p12, %p13652_p11 }
 0x14f   :  { %11870 = vperm.xlu1 %11863, %v11869_v24   ;;  %921 = vmatpush1.bf16.msra.mxu1 %v11978_v39  ;;  %v11995_v60 = vld [vmem:[#allocation6 + $0xa0] ss:$16 sps:$4 sm:$0xff]   ;;  %v11996_v63 = vld [vmem:[#allocation6 + $0xa8] ss:$16 sps:$4 sm:$0xff]   ;;  %v11997_v0 = vld [vmem:[#allocation6 + $0xc4] ss:$16 sps:$4 sm:$0xff]   ;;  %v11811_v5 = vcvt.f32.s32 %v11810_v58  ;;  %v11816_v11 = vtrunc.f32 %v289_v59 }
 0x150   :  { %808 = vmatpush1.bf16.msra.mxu0 %v11977_v38  ;;  %922 = vmatprep.subr.bf16.mxu1 %v11981_v42  ;;  %v11999_v3 = vld [vmem:[#allocation6 + $0xcc] ss:$16 sps:$4 sm:$0xff]   ;;  %v12001_v4 = vld [vmem:[#allocation6 + $0xc0] ss:$16 sps:$4 sm:$0xff]   ;;  %v12002_v6 = vld [vmem:[#allocation6 + $0xc8] ss:$16 sps:$4 sm:$0xff]   ;;  %v11815_v10 = vcvt.f32.s32 %v11814_v62  ;;  %p13655_p0 = pnand %p13654_p13, %p13648_p10 }
 0x151   :  { %809 = vmatprep.subr.bf16.mxu0 %v11979_v40  ;;  %v12003_v7 = vld [vmem:[#allocation6 + $0xe4] ss:$16 sps:$4 sm:$0xff]   ;;  %v319_v8 = vadd.s32 2, %v11809_v61  ;;  %v12005_v12 = vld [vmem:[#allocation6 + $0xec] ss:$16 sps:$4 sm:$0xff]   ;;  %v320_v14 = vadd.s32 2, %v11811_v5  ;;  %v11817_v17 = vcvt.f32.s32 %v11816_v11 }
 0x152   :  { %336 = vperm.xlu0 %11874, %v315_v32   ;;  %v287_v9 = vld [vmem:[#allocation3 + $0x40] sm:$0xff]  ;;  %v12008_v15 = vld [vmem:[#allocation6 + $0xe8] ss:$16 sps:$4 sm:$0xff]   ;;  %v322_v16 = vadd.s32 2, %v11815_v10  ;;  %v12018_v11 = vld [vmem:[#allocation9 + $0x28] ss:$16 sps:$4 sm:$0xff]  }
 0x153   :  { %11875 = vset.pattern.permute.xlu1 %v15721_v2  ;;  %923 = vmatpush1.bf16.msra.mxu1 %v11984_v46  ;;  %v12007_v13 = vld [vmem:[#allocation6 + $0xe0] ss:$16 sps:$4 sm:$0xff]   ;;  %v11812_v19 = vtrunc.f32 %v287_v9  ;;  %v292_v20 = vld [vmem:[#allocation3 + $0x68] sm:$0xff]  ;;  %v323_v21 = vadd.s32 2, %v11817_v17  ;;  %v290_v22 = vld [vmem:[#allocation3 + $0x58] sm:$0xff]  ;;  %v11909_v30 = vpack.i.bf16 %v14059_v51, %v287_v9 }
 0x154   :  { %339 = vperm.xlu1 %11875, %v316_v35   ;;  %810 = vmatpush1.bf16.msra.mxu0 %v11983_v45  ;;  %v11822_v25 = vtrunc.f32 %v292_v20  ;;  %v11922_v27 = vpack.i.bf16 %v290_v22, %v289_v59  ;;  %v11818_v33 = vtrunc.f32 %v290_v22  ;;  %v294_v35 = vld [vmem:[#allocation3 + $0x78] sm:$0xff]  ;;  %v291_v37 = vld [vmem:[#allocation3 + $0x60] sm:$0xff] }
 0x155   :  { %811 = vmatprep.subr.bf16.mxu0 %v11985_v47  ;;  %924 = vmatprep.subr.bf16.mxu1 %v11987_v48  ;;  %v11813_v23 = vcvt.f32.s32 %v11812_v19  ;;  %v11820_v40 = vtrunc.f32 %v291_v37  ;;  %v11936_v43 = vpack.i.bf16 %v292_v20, %v291_v37  ;;  %v12011_v47 = vld [vmem:[#allocation9 + $0x4] ss:$16 sps:$4 sm:$0xff]   ;;  %v12014_v48 = vld [vmem:[#allocation9 + $0xc] ss:$16 sps:$4 sm:$0xff]   ;;  %v12015_v10 = vld [vmem:[#allocation9 + $0x20] ss:$16 sps:$4 sm:$0xff]  }
 0x156   :  { %345 = vperm.xlu0 %11874, %v318_v41   ;;  %v11823_v28 = vcvt.f32.s32 %v11822_v25  ;;  %v11819_v36 = vcvt.f32.s32 %v11818_v33  ;;  %v12024_v17 = vld [vmem:[#allocation9 + $0x48] ss:$16 sps:$4 sm:$0xff]   ;;  %v12029_v19 = vld [vmem:[#allocation9 + $0x64] ss:$16 sps:$4 sm:$0xff]   ;;  %v12032_v20 = vld [vmem:[#allocation9 + $0x6c] ss:$16 sps:$4 sm:$0xff]  }
 0x157   :  { %925 = vmatpush1.bf16.msra.mxu1 %v11990_v53  ;;  %v321_v26 = vadd.s32 2, %v11813_v23  ;;  %v11821_v41 = vcvt.f32.s32 %v11820_v40  ;;  %v13715_v53 = vmov 0.0   ;;  %v12038_v37 = vld [vmem:[#allocation9 + $0x8c] ss:$16 sps:$4 sm:$0xff]  }
 0x158   :  { %342 = vperm.xlu1 %11875, %v317_v44   ;;  %812 = vmatpush1.bf16.msra.mxu0 %v11989_v52  ;;  %v326_v31 = vadd.s32 2, %v11823_v28  ;;  %v324_v39 = vadd.s32 2, %v11819_v36  ;;  %v11826_v44 = vtrunc.f32 %v294_v35  ;;  %v12035_v36 = vld [vmem:[#allocation9 + $0x84] ss:$16 sps:$4 sm:$0xff]  }
 0x159   :  { %813 = vmatprep.subr.bf16.mxu0 %v11991_v55  ;;  %926 = vmatprep.subr.bf16.mxu1 %v11993_v56  ;;  %v325_v42 = vadd.s32 2, %v11821_v41 }
 0x15a   :  { %11876 = vset.pattern.permute.xlu0 %v13712_v1  ;;  %v11827_v45 = vcvt.f32.s32 %v11826_v44  ;;  %v12036_v44 = vld [vmem:[#allocation9 + $0x88] ss:$16 sps:$4 sm:$0xff]  }
 0x15b   :  { %11878 = vperm.xlu0 %11876, %v11869_v24   ;;  %927 = vmatpush1.bf16.msra.mxu1 %v11996_v63  ;;  %v293_v24 = vld [vmem:[#allocation3 + $0x70] sm:$0xff] }
 0x15c   :  { %11882 = vset.pattern.permute.xlu1 %v13712_v1  ;;  %814 = vmatpush1.bf16.msra.mxu0 %v11995_v60  ;;  %v11824_v29 = vtrunc.f32 %v293_v24  ;;  %v11949_v38 = vpack.i.bf16 %v294_v35, %v293_v24  ;;  %v328_v46 = vadd.s32 2, %v11827_v45  ;;  %v12009_v63 = vld [vmem:[#allocation9] ss:$16 sps:$4 sm:$0xff]  }
 0x15d   :  { %11884 = vperm.xlu1 %11882, %v11883_v54   ;;  %815 = vmatprep.subr.bf16.mxu0 %v11997_v0  ;;  %v12012_v0 = vld [vmem:[#allocation9 + $0x8] ss:$16 sps:$4 sm:$0xff]  }
 0x15e   :  { %928 = vmatprep.subr.bf16.mxu1 %v11999_v3  ;;  %v11825_v32 = vcvt.f32.s32 %v11824_v29 }
 0x15f   :  { %11896 = vperm.xlu0 %11876, %v11895_v57   ;;  %929 = vmatpush1.bf16.msra.mxu1 %v12002_v6  ;;  %v12017_v6 = vld [vmem:[#allocation9 + $0x24] ss:$16 sps:$4 sm:$0xff]  }
 0x160   :  { %816 = vmatpush1.bf16.msra.mxu0 %v12001_v4  ;;  %930 = vmatprep.subr.bf16.mxu1 %v12005_v12  ;;  %v327_v34 = vadd.s32 2, %v11825_v32  ;;  %v12030_v32 = vld [vmem:[#allocation9 + $0x68] ss:$16 sps:$4 sm:$0xff]  }
 0x161   :  { %11888 = vset.pattern.permute.xlu1 %v13714_v18  ;;  %817 = vmatprep.subr.bf16.mxu0 %v12003_v7  ;;  %v12020_v7 = vld [vmem:[#allocation9 + $0x2c] ss:$16 sps:$4 sm:$0xff]  }
 0x162   :  { %11890 = vperm.xlu1 %11888, %v11883_v54  }
 0x163   :  { %11900 = vset.pattern.permute.xlu0 %v15721_v2  ;;  %931 = vmatpush1.bf16.msra.mxu1 %v12008_v15 }
 0x164   :  { %348 = vperm.xlu0 %11900, %v319_v8   ;;  %818 = vmatpush1.bf16.msra.mxu0 %v12007_v13  ;;  %v12023_v13 = vld [vmem:[#allocation9 + $0x44] ss:$16 sps:$4 sm:$0xff]  }
 0x165   :  { %1947 = vmatprep.subr.bf16.mxu0 %v12011_v47  ;;  %2173 = vmatprep.subr.bf16.mxu1 %v12014_v48  ;;  %v12041_v48 = vld [vmem:[#allocation9 + $0xa4] ss:$16 sps:$4 sm:$0xff]  }
 0x166   :  { %11894 = vset.pattern.permute.xlu1 %v15721_v2 }
 0x167   :  { %351 = vperm.xlu1 %11894, %v320_v14   ;;  %v12026_v14 = vld [vmem:[#allocation9 + $0x4c] ss:$16 sps:$4 sm:$0xff]  }
 0x168   :  { %357 = vperm.xlu0 %11900, %v322_v16   ;;  %v12021_v16 = vld [vmem:[#allocation9 + $0x40] ss:$16 sps:$4 sm:$0xff]  }
 0x16b   :  { %11901 = vset.pattern.permute.xlu1 %v13714_v18 }
 0x16c   :  { %11903 = vperm.xlu1 %11901, %v11895_v57   ;;  %360 = vperm.xlu0 %11900, %v323_v21  }
 0x170   :  { %11907 = vset.pattern.permute.xlu1 %v15721_v2  ;;  %11921 = vset.pattern.permute.xlu0 %v13712_v1 }
 0x171   :  { %354 = vperm.xlu1 %11907, %v321_v26   ;;  %11923 = vperm.xlu0 %11921, %v11922_v27  }
 0x175   :  { %11908 = vset.pattern.permute.xlu1 %v13712_v1  ;;  %11934 = vset.pattern.permute.xlu0 %v15721_v2 }
 0x176   :  { %11910 = vperm.xlu1 %11908, %v11909_v30   ;;  %369 = vperm.xlu0 %11934, %v326_v31   ;;  %v12027_v31 = vld [vmem:[#allocation9 + $0x60] ss:$16 sps:$4 sm:$0xff]  }
 0x17a   :  { %11914 = vset.pattern.permute.xlu1 %v13714_v18  ;;  %372 = vperm.xlu0 %11934, %v327_v34  }
 0x17b   :  { %11916 = vperm.xlu1 %11914, %v11909_v30  }
 0x17e   :  { %11948 = vset.pattern.permute.xlu0 %v13712_v1 }
 0x17f   :  { %11920 = vset.pattern.permute.xlu1 %v15721_v2  ;;  %11950 = vperm.xlu0 %11948, %v11949_v38  }
 0x180   :  { %363 = vperm.xlu1 %11920, %v324_v39  }
 0x183   :  { %11960 = vset.pattern.permute.xlu0 %v13714_v18 }
 0x184   :  { %11927 = vset.pattern.permute.xlu1 %v13714_v18 }
 0x185   :  { %11929 = vperm.xlu1 %11927, %v11922_v27  }
 0x189   :  { %11933 = vset.pattern.permute.xlu1 %v15721_v2 }
 0x18a   :  { %366 = vperm.xlu1 %11933, %v325_v42  }
 0x18e   :  { %11935 = vset.pattern.permute.xlu1 %v13712_v1  ;;  %v14086_v1 = vand.u32 127, %v311_v49 }
 0x18f   :  { %11937 = vperm.xlu1 %11935, %v11936_v43  }
 0x190   :  { %vm425_vm1 = vcmp.eq.s32.totalorder %v14086_v1, 0  ;;  %vm522_vm2 = vcmp.eq.s32.totalorder %v14086_v1, 1 }
 0x193   :  { %11941 = vset.pattern.permute.xlu1 %v13714_v18 }
 0x194   :  { %11943 = vperm.xlu1 %11941, %v11936_v43   ;;  %v12033_v43 = vld [vmem:[#allocation9 + $0x80] ss:$16 sps:$4 sm:$0xff]  }
 0x198   :  { %11947 = vset.pattern.permute.xlu1 %v15721_v2 }
 0x199   :  { %375 = vperm.xlu1 %11947, %v328_v46  }
 0x19d   :  { %11954 = vset.pattern.permute.xlu1 %v13714_v18 }
 0x19e   :  { %11956 = vperm.xlu1 %11954, %v11949_v38  }
 0x1c5   :  { %v11860_v50 = vpop.permute.xlu1 %11859 }
 0x1c6   :  { %v11861_v18 = vunpack.i.l.bf16 %v11860_v50  ;;  %v11862_v57 = vunpack.i.h.bf16 %v11860_v50  ;;  %v12044_v50 = vld [vmem:[#allocation9 + $0xac] ss:$16 sps:$4 sm:$0xff]  }
 0x1c9   :  { %v331_v51 = vpop.permute.xlu0 %330 }
 0x1ca   :  { %vm377_vm0 = vcmp.eq.s32.totalorder %v14086_v1, %v331_v51  ;;  %v11866_v52 = vpop.permute.xlu1 %11865 }
 0x1cb   :  { %v10332_v54 = vsel %vm377_vm0, 1.0, %v13715_v53  ;;  %v11867_v55 = vunpack.i.l.bf16 %v11866_v52  ;;  %v11868_v60 = vunpack.i.h.bf16 %v11866_v52 }
 0x1cc   :  { %v506_v58 = vsel %vm425_vm1, %v11861_v18, %v10332_v54 }
 0x1cd   :  { %v334_v56 = vpop.permute.xlu0 %333  ;;  %v587_v3 = vsel %vm522_vm2, %v11867_v55, %v506_v58 }
 0x1ce   :  { %vm378_vm3 = vcmp.eq.s32.totalorder %v14086_v1, %v334_v56  ;;  %v11871_v59 = vpop.permute.xlu1 %11870  ;;  %v12039_v56 = vld [vmem:[#allocation9 + $0xa0] ss:$16 sps:$4 sm:$0xff]  }
 0x1cf   :  { %v10333_v61 = vsel %vm378_vm3, 1.0, %v13715_v53  ;;  %v11873_v25 = vunpack.i.h.bf16 %v11871_v59  ;;  %v11872_v26 = vunpack.i.l.bf16 %v11871_v59  ;;  %v12047_v59 = vld [vmem:[#allocation9 + $0xc4] ss:$16 sps:$4 sm:$0xff]  }
 0x1d0   :  { %v507_v62 = vsel %vm425_vm1, %v11862_v57, %v10333_v61  ;;  %v12042_v57 = vld [vmem:[#allocation9 + $0xa8] ss:$16 sps:$4 sm:$0xff]  }
 0x1d1   :  { %v588_v4 = vsel %vm522_vm2, %v11868_v60, %v507_v62  ;;  %v337_v5 = vpop.permute.xlu0 %336  ;;  %v12050_v60 = vld [vmem:[#allocation9 + $0xcc] ss:$16 sps:$4 sm:$0xff]  }
 0x1d2   :  { %v14102_v8 = vpack.c.bf16 %v588_v4, %v587_v3  ;;  %vm379_vm4 = vcmp.eq.s32.totalorder %v14086_v1, %v337_v5  ;;  %v12045_v3 = vld [vmem:[#allocation9 + $0xc0] ss:$16 sps:$4 sm:$0xff]   ;;  %v12048_v4 = vld [vmem:[#allocation9 + $0xc8] ss:$16 sps:$4 sm:$0xff]  }
 0x1d3   :  { %v340_v9 = vpop.permute.xlu1 %339  ;;  %v10334_v21 = vsel %vm379_vm4, 1.0, %v13715_v53 }
 0x1d4   :  { %836 = vmatmul.mubr.bf16.vlgmr.msra.gmra.mrb[0].mxu0 %v14102_v8  ;;  %949 = vmatmul.mubr.bf16.vlgmr.msra.gmra.mrb[0].mxu1 %v14102_v8  ;;  %vm380_vm5 = vcmp.eq.s32.totalorder %v14086_v1, %v340_v9 }
 0x1d5   :  { %v346_v12 = vpop.permute.xlu0 %345  ;;  %845 = vmatprep.mubr.bf16.mxu0 %v15721_v2  ;;  %958 = vmatprep.mubr.bf16.mxu1 %v15721_v2  ;;  %v10335_v27 = vsel %vm380_vm5, 1.0, %v13715_v53 }
 0x1d6   :  { %1948 = vmatpush1.bf16.msra.mxu0 %v12009_v63  ;;  %2174 = vmatpush1.bf16.msra.mxu1 %v12012_v0  ;;  %vm382_vm6 = vcmp.eq.s32.totalorder %v14086_v1, %v346_v12 }
 0x1d7   :  { %v343_v15 = vpop.permute.xlu1 %342  ;;  %1949 = vmatprep.subr.bf16.mxu0 %v12017_v6  ;;  %2175 = vmatprep.subr.bf16.mxu1 %v12020_v7  ;;  %v10337_v41 = vsel %vm382_vm6, 1.0, %v13715_v53  ;;  %v12053_v6 = vld [vmem:[#allocation9 + $0xe4] ss:$16 sps:$4 sm:$0xff]   ;;  %v12056_v7 = vld [vmem:[#allocation9 + $0xec] ss:$16 sps:$4 sm:$0xff]  }
 0x1d8   :  { %vm381_vm7 = vcmp.eq.s32.totalorder %v14086_v1, %v343_v15  ;;  %v12054_v15 = vld [vmem:[#allocation9 + $0xe8] ss:$16 sps:$4 sm:$0xff]  }
 0x1d9   :  { %v10336_v45 = vsel %vm381_vm7, 1.0, %v13715_v53 }
 0x1da   :  { %v11879_v22 = vpop.permute.xlu0 %11878  ;;  %1950 = vmatpush1.bf16.msra.mxu0 %v12015_v10  ;;  %2176 = vmatpush1.bf16.msra.mxu1 %v12018_v11 }
 0x1db   :  { %v11881_v23 = vunpack.i.h.bf16 %v11879_v22  ;;  %v11880_v24 = vunpack.i.l.bf16 %v11879_v22  ;;  %1951 = vmatprep.subr.bf16.mxu0 %v12023_v13  ;;  %2177 = vmatprep.subr.bf16.mxu1 %v12026_v14  ;;  %v12051_v14 = vld [vmem:[#allocation9 + $0xe0] ss:$16 sps:$4 sm:$0xff]  }
 0x1dc   :  { %v11885_v28 = vpop.permute.xlu1 %11884 }
 0x1dd   :  { %v509_v29 = vsel %vm425_vm1, %v11881_v23, %v10335_v27  ;;  %v508_v30 = vsel %vm425_vm1, %v11880_v24, %v10334_v21  ;;  %v11887_v38 = vunpack.i.h.bf16 %v11885_v28  ;;  %v11886_v39 = vunpack.i.l.bf16 %v11885_v28  ;;  %v12057_v23 = vld [vmem:[#allocation9 + $0x100] ss:$16 sps:$4 sm:$0xff]   ;;  %v12060_v24 = vld [vmem:[#allocation9 + $0x108] ss:$16 sps:$4 sm:$0xff]  }
 0x1de   :  { %v589_v33 = vsel %vm522_vm2, %v11872_v26, %v508_v30  ;;  %v590_v34 = vsel %vm522_vm2, %v11873_v25, %v509_v29  ;;  %v14121_v35 = vpop.permute.xlu0 %11896  ;;  %1952 = vmatpush1.bf16.msra.mxu0 %v12021_v16  ;;  %2178 = vmatpush1.bf16.msra.mxu1 %v12024_v17  ;;  %v12065_v25 = vld [vmem:[#allocation9 + $0x124] ss:$16 sps:$4 sm:$0xff]   ;;  %v12068_v26 = vld [vmem:[#allocation9 + $0x12c] ss:$16 sps:$4 sm:$0xff]   ;;  %v12063_v29 = vld [vmem:[#allocation9 + $0x120] ss:$16 sps:$4 sm:$0xff]  }
 0x1df   :  { %v14124_v40 = vpack.c.bf16 %v590_v34, %v589_v33  ;;  %1953 = vmatprep.subr.bf16.mxu0 %v12029_v19  ;;  %2179 = vmatprep.subr.bf16.mxu1 %v12032_v20  ;;  %v510_v51 = vsel %vm425_vm1, %v11886_v39, %v10336_v45  ;;  %v511_v52 = vsel %vm425_vm1, %v11887_v38, %v10337_v41  ;;  %v11898_v62 = vunpack.i.l.bf16 %v14121_v35  ;;  %v12059_v19 = vld [vmem:[#allocation9 + $0x104] ss:$16 sps:$4 sm:$0xff]   ;;  %v12062_v20 = vld [vmem:[#allocation9 + $0x10c] ss:$16 sps:$4 sm:$0xff]   ;;  %v12066_v30 = vld [vmem:[#allocation9 + $0x128] ss:$16 sps:$4 sm:$0xff]  }
 0x1e0   :  { %v11899_v0 = vunpack.i.h.bf16 %v14121_v35  ;;  %v12072_v38 = vld [vmem:[#allocation9 + $0x148] ss:$16 sps:$4 sm:$0xff]  }
 0x1e1   :  { %v11891_v42 = vpop.permute.xlu1 %11890  ;;  %846 = vmatmul.mubr.bf16.gmra.mrb[4].mxu0 %v14124_v40  ;;  %959 = vmatmul.mubr.bf16.gmra.mrb[4].mxu1 %v14124_v40 }
 0x1e2   :  { %v11893_v46 = vunpack.i.h.bf16 %v11891_v42  ;;  %v11892_v47 = vunpack.i.l.bf16 %v11891_v42  ;;  %855 = vmatprep.mubr.bf16.mxu0 %v15721_v2  ;;  %968 = vmatprep.mubr.bf16.mxu1 %v15721_v2 }
 0x1e3   :  { %v349_v54 = vpop.permute.xlu0 %348  ;;  %1954 = vmatpush1.bf16.msra.mxu0 %v12027_v31  ;;  %2180 = vmatpush1.bf16.msra.mxu1 %v12030_v32  ;;  %v12071_v31 = vld [vmem:[#allocation9 + $0x144] ss:$16 sps:$4 sm:$0xff]   ;;  %v12074_v32 = vld [vmem:[#allocation9 + $0x14c] ss:$16 sps:$4 sm:$0xff]  }
 0x1e4   :  { %v591_v18 = vsel %vm522_vm2, %v11892_v47, %v510_v51  ;;  %v592_v55 = vsel %vm522_vm2, %v11893_v46, %v511_v52  ;;  %1955 = vmatprep.subr.bf16.mxu0 %v12035_v36  ;;  %2181 = vmatprep.subr.bf16.mxu1 %v12038_v37  ;;  %vm383_vm8 = vcmp.eq.s32.totalorder %v14086_v1, %v349_v54  ;;  %v12069_v37 = vld [vmem:[#allocation9 + $0x140] ss:$16 sps:$4 sm:$0xff]   ;;  %v12077_v46 = vld [vmem:[#allocation9 + $0x164] ss:$16 sps:$4 sm:$0xff]   ;;  %v12080_v47 = vld [vmem:[#allocation9 + $0x16c] ss:$16 sps:$4 sm:$0xff]  }
 0x1e5   :  { %v14143_v61 = vpack.c.bf16 %v592_v55, %v591_v18  ;;  %v10338_v63 = vsel %vm383_vm8, 1.0, %v13715_v53  ;;  %v12075_v51 = vld [vmem:[#allocation9 + $0x160] ss:$16 sps:$4 sm:$0xff]   ;;  %v12078_v52 = vld [vmem:[#allocation9 + $0x168] ss:$16 sps:$4 sm:$0xff]  }
 0x1e6   :  { %v352_v58 = vpop.permute.xlu1 %351  ;;  %v512_v9 = vsel %vm425_vm1, %v11898_v62, %v10338_v63  ;;  %v12083_v18 = vld [vmem:[#allocation9 + $0x184] ss:$16 sps:$4 sm:$0xff]   ;;  %v12086_v55 = vld [vmem:[#allocation9 + $0x18c] ss:$16 sps:$4 sm:$0xff]  }
 0x1e7   :  { %vm384_vm9 = vcmp.eq.s32.totalorder %v14086_v1, %v352_v58  ;;  %1956 = vmatpush1.bf16.msra.mxu0 %v12033_v43  ;;  %2182 = vmatpush1.bf16.msra.mxu1 %v12036_v44  ;;  %v358_v27 = vpop.permute.xlu0 %357  ;;  %v12081_v58 = vld [vmem:[#allocation9 + $0x180] ss:$16 sps:$4 sm:$0xff]   ;;  %v12089_v63 = vld [vmem:[#allocation9 + $0x1a4] ss:$16 sps:$4 sm:$0xff]  }
 0x1e8   :  { %1957 = vmatprep.subr.bf16.mxu0 %v12041_v48  ;;  %2183 = vmatprep.subr.bf16.mxu1 %v12044_v50  ;;  %v10339_v5 = vsel %vm384_vm9, 1.0, %v13715_v53  ;;  %vm386_vm10 = vcmp.eq.s32.totalorder %v14086_v1, %v358_v27 }
 0x1e9   :  { %856 = vmatmul.mubr.bf16.gmra.mrb[8].mxu0 %v14143_v61  ;;  %969 = vmatmul.mubr.bf16.gmra.mrb[8].mxu1 %v14143_v61  ;;  %v513_v13 = vsel %vm425_vm1, %v11899_v0, %v10339_v5  ;;  %v10341_v35 = vsel %vm386_vm10, 1.0, %v13715_v53  ;;  %v12092_v0 = vld [vmem:[#allocation9 + $0x1ac] ss:$16 sps:$4 sm:$0xff]  }
 0x1ea   :  { %865 = vmatprep.mubr.bf16.mxu0 %v15721_v2  ;;  %978 = vmatprep.mubr.bf16.mxu1 %v15721_v2 }
 0x1eb   :  { %v11904_v10 = vpop.permute.xlu1 %11903  ;;  %1958 = vmatpush1.bf16.msra.mxu0 %v12039_v56  ;;  %2184 = vmatpush1.bf16.msra.mxu1 %v12042_v57  ;;  %v361_v36 = vpop.permute.xlu0 %360 }
 0x1ec   :  { %v11906_v11 = vunpack.i.h.bf16 %v11904_v10  ;;  %v11905_v12 = vunpack.i.l.bf16 %v11904_v10  ;;  %1959 = vmatprep.subr.bf16.mxu0 %v12047_v59  ;;  %2185 = vmatprep.subr.bf16.mxu1 %v12050_v60  ;;  %vm387_vm12 = vcmp.eq.s32.totalorder %v14086_v1, %v361_v36  ;;  %v12084_v59 = vld [vmem:[#allocation9 + $0x188] ss:$16 sps:$4 sm:$0xff]  }
 0x1ee   :  { %v593_v16 = vsel %vm522_vm2, %v11905_v12, %v512_v9  ;;  %v594_v17 = vsel %vm522_vm2, %v11906_v11, %v513_v13  ;;  %v12087_v11 = vld [vmem:[#allocation9 + $0x1a0] ss:$16 sps:$4 sm:$0xff]   ;;  %v12090_v12 = vld [vmem:[#allocation9 + $0x1a8] ss:$16 sps:$4 sm:$0xff]  }
 0x1ef   :  { %v14162_v21 = vpack.c.bf16 %v594_v17, %v593_v16  ;;  %1960 = vmatpush1.bf16.msra.mxu0 %v12045_v3  ;;  %2186 = vmatpush1.bf16.msra.mxu1 %v12048_v4  ;;  %v10342_v3 = vsel %vm387_vm12, 1.0, %v13715_v53 }
 0x1f0   :  { %v355_v22 = vpop.permute.xlu1 %354  ;;  %1961 = vmatprep.subr.bf16.mxu0 %v12053_v6  ;;  %2187 = vmatprep.subr.bf16.mxu1 %v12056_v7  ;;  %v11924_v56 = vpop.permute.xlu0 %11923 }
 0x1f1   :  { %866 = vmatmul.mubr.bf16.gmra.mrb[12].mxu0 %v14162_v21  ;;  %979 = vmatmul.mubr.bf16.gmra.mrb[12].mxu1 %v14162_v21  ;;  %vm385_vm11 = vcmp.eq.s32.totalorder %v14086_v1, %v355_v22  ;;  %v11926_v60 = vunpack.i.h.bf16 %v11924_v56  ;;  %v11925_v62 = vunpack.i.l.bf16 %v11924_v56  ;;  %v12099_v56 = vld [vmem:[#allocation9 + $0x1e0] ss:$16 sps:$4 sm:$0xff]  }
 0x1f2   :  { %875 = vmatprep.mubr.bf16.mxu0 %v15721_v2  ;;  %988 = vmatprep.mubr.bf16.mxu1 %v15721_v2  ;;  %v10340_v41 = vsel %vm385_vm11, 1.0, %v13715_v53 }
 0x1f3   :  { %1962 = vmatpush1.bf16.msra.mxu0 %v12051_v14  ;;  %2188 = vmatpush1.bf16.msra.mxu1 %v12054_v15  ;;  %v516_v9 = vsel %vm425_vm1, %v11925_v62, %v10342_v3  ;;  %v1075_v62 = vshrl.u32 %v311_v49, 7 }
 0x1f4   :  { %1963 = vmatprep.subr.bf16.mxu0 %v12059_v19  ;;  %2189 = vmatprep.subr.bf16.mxu1 %v12062_v20 }
 0x1f5   :  { %v11911_v28 = vpop.permute.xlu1 %11910  ;;  %v370_v17 = vpop.permute.xlu0 %369 }
 0x1f6   :  { %v11913_v33 = vunpack.i.h.bf16 %v11911_v28  ;;  %v11912_v34 = vunpack.i.l.bf16 %v11911_v28  ;;  %vm390_vm14 = vcmp.eq.s32.totalorder %v14086_v1, %v370_v17 }
 0x1f7   :  { %1964 = vmatpush1.bf16.msra.mxu0 %v12057_v23  ;;  %2190 = vmatpush1.bf16.msra.mxu1 %v12060_v24  ;;  %v10345_v23 = vsel %vm390_vm14, 1.0, %v13715_v53 }
 0x1f8   :  { %1965 = vmatprep.subr.bf16.mxu0 %v12065_v25  ;;  %2191 = vmatprep.subr.bf16.mxu1 %v12068_v26  ;;  %v514_v44 = vsel %vm425_vm1, %v11912_v34, %v10340_v41  ;;  %v515_v45 = vsel %vm425_vm1, %v11913_v33, %v10341_v35 }
 0x1f9   :  { %v373_v24 = vpop.permute.xlu0 %372 }
 0x1fa   :  { %v11917_v39 = vpop.permute.xlu1 %11916  ;;  %vm391_vm0 = vcmp.eq.s32.totalorder %v14086_v1, %v373_v24 }
 0x1fb   :  { %v11919_v42 = vunpack.i.h.bf16 %v11917_v39  ;;  %v11918_v43 = vunpack.i.l.bf16 %v11917_v39  ;;  %1966 = vmatpush1.bf16.msra.mxu0 %v12063_v29  ;;  %2192 = vmatpush1.bf16.msra.mxu1 %v12066_v30 }
 0x1fc   :  { %1967 = vmatprep.subr.bf16.mxu0 %v12071_v31  ;;  %2193 = vmatprep.subr.bf16.mxu1 %v12074_v32 }
 0x1fd   :  { %v595_v48 = vsel %vm522_vm2, %v11918_v43, %v514_v44  ;;  %v596_v50 = vsel %vm522_vm2, %v11919_v42, %v515_v45 }
 0x1fe   :  { %v14180_v54 = vpack.c.bf16 %v596_v50, %v595_v48  ;;  %v11951_v34 = vpop.permute.xlu0 %11950  ;;  %v12098_v50 = vld [vmem:[#allocation9 + $0x1cc] ss:$16 sps:$4 sm:$0xff]  }
 0x1ff   :  { %v364_v57 = vpop.permute.xlu1 %363  ;;  %1968 = vmatpush1.bf16.msra.mxu0 %v12069_v37  ;;  %2194 = vmatpush1.bf16.msra.mxu1 %v12072_v38  ;;  %v11953_v36 = vunpack.i.h.bf16 %v11951_v34  ;;  %v11952_v37 = vunpack.i.l.bf16 %v11951_v34  ;;  %v10346_v38 = vsel %vm391_vm0, 1.0, %v13715_v53 }
 0x200   :  { %vm388_vm13 = vcmp.eq.s32.totalorder %v14086_v1, %v364_v57  ;;  %876 = vmatmul.mubr.bf16.gmra.mrb[16].mxu0 %v14180_v54  ;;  %989 = vmatmul.mubr.bf16.gmra.mrb[16].mxu1 %v14180_v54  ;;  %v12102_v57 = vld [vmem:[#allocation9 + $0x1e8] ss:$16 sps:$4 sm:$0xff]  }
 0x201   :  { %885 = vmatprep.mubr.bf16.mxu0 %v15721_v2  ;;  %998 = vmatprep.mubr.bf16.mxu1 %v15721_v2  ;;  %v10343_v4 = vsel %vm388_vm13, 1.0, %v13715_v53  ;;  %v520_v44 = vsel %vm425_vm1, %v11952_v37, %v10346_v38 }
 0x202   :  { %1969 = vmatprep.subr.bf16.mxu0 %v12077_v46  ;;  %2195 = vmatprep.subr.bf16.mxu1 %v12080_v47  ;;  %v517_v10 = vsel %vm425_vm1, %v11926_v60, %v10343_v4 }
 0x203   :  { %1970 = vmatpush1.bf16.msra.mxu0 %v12075_v51  ;;  %2196 = vmatpush1.bf16.msra.mxu1 %v12078_v52  ;;  %v12093_v51 = vld [vmem:[#allocation9 + $0x1c0] ss:$16 sps:$4 sm:$0xff]   ;;  %v12096_v52 = vld [vmem:[#allocation9 + $0x1c8] ss:$16 sps:$4 sm:$0xff]  }
 0x204   :  { %v11930_v5 = vpop.permute.xlu1 %11929  ;;  %1971 = vmatprep.subr.bf16.mxu0 %v12083_v18  ;;  %2197 = vmatprep.subr.bf16.mxu1 %v12086_v55  ;;  %v12101_v18 = vld [vmem:[#allocation9 + $0x1e4] ss:$16 sps:$4 sm:$0xff]   ;;  %v12104_v55 = vld [vmem:[#allocation9 + $0x1ec] ss:$16 sps:$4 sm:$0xff]  }
 0x205   :  { %v11932_v6 = vunpack.i.h.bf16 %v11930_v5  ;;  %v11931_v7 = vunpack.i.l.bf16 %v11930_v5 }
 0x207   :  { %v597_v13 = vsel %vm522_vm2, %v11931_v7, %v516_v9  ;;  %v598_v14 = vsel %vm522_vm2, %v11932_v6, %v517_v10  ;;  %1972 = vmatpush1.bf16.msra.mxu0 %v12081_v58  ;;  %2198 = vmatpush1.bf16.msra.mxu1 %v12084_v59  ;;  %v12110_v58 = vld [vmem:[#allocation9 + $0x20c] ss:$16 sps:$4 sm:$0xff]   ;;  %v13716_v59 = vmov 1966171168  }
 0x208   :  { %v14198_v15 = vpack.c.bf16 %v598_v14, %v597_v13  ;;  %1973 = vmatprep.subr.bf16.mxu0 %v12089_v63  ;;  %2199 = vmatprep.subr.bf16.mxu1 %v12092_v0  ;;  %v1072_v60 = vunpack.c.l.s4 %v13716_v59  ;;  %v14239_v63 = vsub.s32 0, %v1075_v62  ;;  %v10380_v0 = vld.sshfl [vmem:[#allocation8] sm:$0x33 pattern:$0x75316420] }
 0x209   :  { %v367_v16 = vpop.permute.xlu1 %366  ;;  %v1070_v5 = vcombine.high %v10380_v0, %v10380_v0 }
 0x20a   :  { %886 = vmatmul.mubr.bf16.gmra.mrb[20].mxu0 %v14198_v15  ;;  %999 = vmatmul.mubr.bf16.gmra.mrb[20].mxu1 %v14198_v15  ;;  %vm389_vm15 = vcmp.eq.s32.totalorder %v14086_v1, %v367_v16  ;;  %v1073_v3 = vunpack.c.0.s8 %v1072_v60  ;;  %v12117_v60 = vld [vmem:[#allocation9 + $0x240] ss:$16 sps:$4 sm:$0xff]  }
 0x20b   :  { %895 = vmatprep.mubr.bf16.mxu0 %v15721_v2  ;;  %1008 = vmatprep.mubr.bf16.mxu1 %v15721_v2  ;;  %v10344_v26 = vsel %vm389_vm15, 1.0, %v13715_v53 }
 0x20c   :  { %1974 = vmatpush1.bf16.msra.mxu0 %v12087_v11  ;;  %2200 = vmatpush1.bf16.msra.mxu1 %v12090_v12  ;;  %v14241_v4 = vsub.s32 %v1073_v3, %v1075_v62  ;;  %v12120_v62 = vld [vmem:[#allocation9 + $0x248] ss:$16 sps:$4 sm:$0xff]  }
 0x20d   :  { %2201 = vmatprep.subr.bf16.mxu1 %v12098_v50  ;;  %v12119_v50 = vld [vmem:[#allocation9 + $0x244] ss:$16 sps:$4 sm:$0xff]  }
 0x20e   :  { %v11938_v19 = vpop.permute.xlu1 %11937  ;;  %v1077_v6 = vrot.slane %v10380_v0, %v14241_v4  ;;  %v1084_v7 = vrot.slane %v1070_v5, %v14241_v4  ;;  %v12125_v5 = vld [vmem:[#allocation9 + $0x264] ss:$16 sps:$4 sm:$0xff]  }
 0x20f   :  { %v11940_v20 = vunpack.i.h.bf16 %v11938_v19  ;;  %v11939_v22 = vunpack.i.l.bf16 %v11938_v19 }
 0x210   :  { %2202 = vmatpush1.bf16.msra.mxu1 %v12096_v52  ;;  %v1085_v9 = vcombine.high %v1077_v6, %v1077_v6  ;;  %v1086_v10 = vcombine.high %v1084_v7, %v1084_v7  ;;  %v1088_v11 = vpack.i.b16 %v1077_v6, %v1077_v6  ;;  %v1095_v13 = vpack.i.b16 %v1084_v7, %v1084_v7  ;;  %v12128_v6 = vld [vmem:[#allocation9 + $0x26c] ss:$16 sps:$4 sm:$0xff]  }
 0x211   :  { %v518_v29 = vsel %vm425_vm1, %v11939_v22, %v10344_v26  ;;  %v519_v30 = vsel %vm425_vm1, %v11940_v20, %v10345_v23  ;;  %2203 = vmatprep.subr.bf16.mxu1 %v12104_v55 }
 0x212   :  { %v1102_v12 = vpack.i.b16 %v1085_v9, %v1085_v9  ;;  %v1109_v14 = vpack.i.b16 %v1086_v10, %v1086_v10  ;;  %v14246_v20 = vrot.slane %v1088_v11, %v14239_v63 }
 0x213   :  { %v11944_v25 = vpop.permute.xlu1 %11943 }
 0x214   :  { %v11946_v27 = vunpack.i.h.bf16 %v11944_v25  ;;  %v11945_v28 = vunpack.i.l.bf16 %v11944_v25  ;;  %2204 = vmatpush1.bf16.msra.mxu1 %v12102_v57  ;;  %v14249_v22 = vrot.slane %v1102_v12, %v14239_v63  ;;  %v14252_v25 = vrot.slane %v1095_v13, %v14239_v63 }
 0x215   :  { %2286 = vmatprep.subr.bf16.mxu1 %v12110_v58  ;;  %v14255_v26 = vrot.slane %v1109_v14, %v14239_v63 }
 0x216   :  { %v599_v31 = vsel %vm522_vm2, %v11945_v28, %v518_v29  ;;  %v600_v32 = vsel %vm522_vm2, %v11946_v27, %v519_v30 }
 0x217   :  { %v14216_v33 = vpack.c.bf16 %v600_v32, %v599_v31 }
 0x218   :  { %v376_v35 = vpop.permute.xlu1 %375 }
 0x219   :  { %vm392_vm3 = vcmp.eq.s32.totalorder %v14086_v1, %v376_v35  ;;  %896 = vmatmul.mubr.bf16.gmra.mrb[24].mxu0 %v14216_v33  ;;  %1009 = vmatmul.mubr.bf16.gmra.mrb[24].mxu1 %v14216_v33  ;;  %v12107_v1 = vld [vmem:[#allocation9 + $0x204] ss:$16 sps:$4 sm:$0xff]  }
 0x21a   :  { %905 = vmatprep.mubr.bf16.mxu0 %v15721_v2  ;;  %1018 = vmatprep.mubr.bf16.mxu1 %v15721_v2  ;;  %v10347_v39 = vsel %vm392_vm3, 1.0, %v13715_v53  ;;  %v12095_v53 = vld [vmem:[#allocation9 + $0x1c4] ss:$16 sps:$4 sm:$0xff]  }
 0x21b   :  { %v521_v45 = vsel %vm425_vm1, %v11953_v36, %v10347_v39  ;;  %1975 = vmatprep.subr.bf16.mxu0 %v12095_v53  ;;  %v12105_v39 = vld [vmem:[#allocation9 + $0x200] ss:$16 sps:$4 sm:$0xff]   ;;  %vm10290_vm1 = vcmask 7168  }
 0x21c   :  { %1976 = vmatpush1.bf16.msra.mxu0 %v12093_v51  ;;  %v12122_v51 = vld [vmem:[#allocation9 + $0x24c] ss:$16 sps:$4 sm:$0xff]  }
 0x21d   :  { %v11957_v41 = vpop.permute.xlu1 %11956  ;;  %1977 = vmatprep.subr.bf16.mxu0 %v12101_v18 }
 0x21e   :  { %v11959_v42 = vunpack.i.h.bf16 %v11957_v41  ;;  %v11958_v43 = vunpack.i.l.bf16 %v11957_v41  ;;  %v12108_v41 = vld [vmem:[#allocation9 + $0x208] ss:$16 sps:$4 sm:$0xff]  }
 0x220   :  { %v601_v46 = vsel %vm522_vm2, %v11958_v43, %v520_v44  ;;  %v602_v47 = vsel %vm522_vm2, %v11959_v42, %v521_v45  ;;  %1978 = vmatpush1.bf16.msra.mxu0 %v12099_v56  ;;  %v12113_v43 = vld [vmem:[#allocation9 + $0x224] ss:$16 sps:$4 sm:$0xff]   ;;  %v12116_v44 = vld [vmem:[#allocation9 + $0x22c] ss:$16 sps:$4 sm:$0xff]   ;;  %v12111_v45 = vld [vmem:[#allocation9 + $0x220] ss:$16 sps:$4 sm:$0xff]  }
 0x221   :  { %v14234_v48 = vpack.c.bf16 %v602_v47, %v601_v46  ;;  %2060 = vmatprep.subr.bf16.mxu0 %v12107_v1  ;;  %v12114_v46 = vld [vmem:[#allocation9 + $0x228] ss:$16 sps:$4 sm:$0xff]  }
 0x223   :  { %906 = vmatmul.mubr.bf16.gmra.mrb[28].mxu0 %v14234_v48  ;;  %1019 = vmatmul.mubr.bf16.gmra.mrb[28].mxu1 %v14234_v48 }
 0x2a7   :  { %v837_v16 = vpop.f32.mrb[0].mxu0  ;;  %v950_v17 = vpop.f32.mrb[0].mxu1 }
 0x2a8   :  { %v839_v49 = vpop.f32.mrb[1].mxu0  ;;  %v952_v19 = vpop.f32.mrb[1].mxu1 }
 0x2a9   :  { %v841_v23 = vpop.f32.mrb[2].mxu0  ;;  %v954_v24 = vpop.f32.mrb[2].mxu1 }
 0x2aa   :  { %v1029_v27 = vpack.c.bf16 %v841_v23, %v837_v16  ;;  %v1031_v28 = vpack.c.bf16 %v954_v24, %v950_v17  ;;  %v843_v29 = vpop.f32.mrb[3].mxu0  ;;  %v956_v30 = vpop.f32.mrb[3].mxu1  ;;  %v12123_v16 = vld [vmem:[#allocation9 + $0x260] ss:$16 sps:$4 sm:$0xff]   ;;  %v12126_v17 = vld [vmem:[#allocation9 + $0x268] ss:$16 sps:$4 sm:$0xff]  }
 0x2ab   :  { %v1030_v31 = vpack.c.bf16 %v843_v29, %v839_v49  ;;  %v1032_v32 = vpack.c.bf16 %v956_v30, %v952_v19  ;;  %v12131_v24 = vld [vmem:[#allocation9 + $0x284] ss:$16 sps:$4 sm:$0xff]  }
 0x2ac   :  { %v1115_v34 = vadd.bf16 %v14246_v20, %v1029_v27  ;;  %v14259_v35 = vadd.bf16 %v14249_v22, %v1031_v28  ;;  %v12134_v27 = vld [vmem:[#allocation9 + $0x28c] ss:$16 sps:$4 sm:$0xff]  }
 0x2ad   :  { %v1116_v36 = vadd.bf16 %v14252_v25, %v1030_v31  ;;  %v14263_v37 = vadd.bf16 %v14255_v26, %v1032_v32 }
 0x2ae   :  { %v1147_v42 = vmax.bf16 %v15721_v2, %v1115_v34 }
 0x2af   :  { %v1148_v38 = vmax.bf16 %v15721_v2, %v1116_v36 }
 0x2b1   :  { %1979 = vmatprep.mubr.bf16.mxu0 %v1148_v38  ;;  %2205 = vmatprep.mubr.bf16.mxu1 %v1148_v38 }
 0x2b2   :  { %1980 = vmatmul.mubr.bf16.vlgmr.msra.gmra.mrb[32].mxu0 %v1147_v42  ;;  %2206 = vmatmul.mubr.bf16.vlgmr.msra.gmra.mrb[32].mxu1 %v1147_v42 }
 0x2b3   :  { %2061 = vmatpush1.bf16.msra.mxu0 %v12105_v39  ;;  %2287 = vmatpush1.bf16.msra.mxu1 %v12108_v41  ;;  %v12129_v39 = vld [vmem:[#allocation9 + $0x280] ss:$16 sps:$4 sm:$0xff]   ;;  %v12132_v41 = vld [vmem:[#allocation9 + $0x288] ss:$16 sps:$4 sm:$0xff]  }
 0x2b4   :  { %v847_v47 = vpop.f32.mrb[4].mxu0  ;;  %v960_v53 = vpop.f32.mrb[4].mxu1  ;;  %2062 = vmatprep.subr.bf16.mxu0 %v12113_v43  ;;  %2288 = vmatprep.subr.bf16.mxu1 %v12116_v44  ;;  %v12137_v44 = vld [vmem:[#allocation9 + $0x2a4] ss:$16 sps:$4 sm:$0xff]  }
 0x2b5   :  { %v849_v52 = vpop.f32.mrb[5].mxu0  ;;  %v962_v18 = vpop.f32.mrb[5].mxu1 }
 0x2b6   :  { %v851_v55 = vpop.f32.mrb[6].mxu0  ;;  %v964_v56 = vpop.f32.mrb[6].mxu1 }
 0x2b7   :  { %v1033_v57 = vpack.c.bf16 %v851_v55, %v847_v47  ;;  %v1035_v1 = vpack.c.bf16 %v964_v56, %v960_v53  ;;  %v853_v58 = vpop.f32.mrb[7].mxu0  ;;  %v966_v59 = vpop.f32.mrb[7].mxu1  ;;  %2063 = vmatpush1.bf16.msra.mxu0 %v12111_v45  ;;  %2289 = vmatpush1.bf16.msra.mxu1 %v12114_v46  ;;  %v12140_v45 = vld [vmem:[#allocation9 + $0x2ac] ss:$16 sps:$4 sm:$0xff]  }
 0x2b8   :  { %v1034_v0 = vpack.c.bf16 %v853_v58, %v849_v52  ;;  %v1036_v3 = vpack.c.bf16 %v966_v59, %v962_v18  ;;  %2064 = vmatprep.subr.bf16.mxu0 %v12119_v50  ;;  %2290 = vmatprep.subr.bf16.mxu1 %v12122_v51  ;;  %v12135_v52 = vld [vmem:[#allocation9 + $0x2a0] ss:$16 sps:$4 sm:$0xff]   ;;  %v12138_v18 = vld [vmem:[#allocation9 + $0x2a8] ss:$16 sps:$4 sm:$0xff]   ;;  %v12146_v58 = vld [vmem:[#allocation9 + $0x2cc] ss:$16 sps:$4 sm:$0xff]  }
 0x2b9   :  { %v1119_v7 = vadd.bf16 %v14246_v20, %v1033_v57  ;;  %v14269_v9 = vadd.bf16 %v14249_v22, %v1035_v1  ;;  %v12143_v1 = vld [vmem:[#allocation9 + $0x2c4] ss:$16 sps:$4 sm:$0xff]  }
 0x2ba   :  { %v1120_v10 = vadd.bf16 %v14252_v25, %v1034_v0  ;;  %v14273_v11 = vadd.bf16 %v14255_v26, %v1036_v3 }
 0x2bb   :  { %2065 = vmatpush1.bf16.msra.mxu0 %v12117_v60  ;;  %2291 = vmatpush1.bf16.msra.mxu1 %v12120_v62  ;;  %v1151_v23 = vmax.bf16 %v15721_v2, %v1119_v7 }
 0x2bc   :  { %v857_v12 = vpop.f32.mrb[8].mxu0  ;;  %v970_v13 = vpop.f32.mrb[8].mxu1  ;;  %v1152_v14 = vmax.bf16 %v15721_v2, %v1120_v10  ;;  %2066 = vmatprep.subr.bf16.mxu0 %v12125_v5  ;;  %2292 = vmatprep.subr.bf16.mxu1 %v12128_v6  ;;  %v12141_v10 = vld [vmem:[#allocation9 + $0x2c0] ss:$16 sps:$4 sm:$0xff]  }
 0x2bd   :  { %v859_v49 = vpop.f32.mrb[9].mxu0  ;;  %v972_v19 = vpop.f32.mrb[9].mxu1 }
 0x2be   :  { %v861_v28 = vpop.f32.mrb[10].mxu0  ;;  %v974_v29 = vpop.f32.mrb[10].mxu1  ;;  %1989 = vmatprep.mubr.bf16.mxu0 %v1152_v14  ;;  %2215 = vmatprep.mubr.bf16.mxu1 %v1152_v14 }
 0x2bf   :  { %v1037_v30 = vpack.c.bf16 %v861_v28, %v857_v12  ;;  %v1039_v31 = vpack.c.bf16 %v974_v29, %v970_v13  ;;  %v863_v32 = vpop.f32.mrb[11].mxu0  ;;  %v976_v34 = vpop.f32.mrb[11].mxu1  ;;  %1990 = vmatmul.mubr.bf16.gmra.mrb[36].mxu0 %v1151_v23  ;;  %2216 = vmatmul.mubr.bf16.gmra.mrb[36].mxu1 %v1151_v23  ;;  %v12144_v12 = vld [vmem:[#allocation9 + $0x2c8] ss:$16 sps:$4 sm:$0xff]   ;;  %v12155_v29 = vld [vmem:[#allocation9 + $0x304] ss:$16 sps:$4 sm:$0xff]  }
 0x2c0   :  { %v1038_v36 = vpack.c.bf16 %v863_v32, %v859_v49  ;;  %v1040_v38 = vpack.c.bf16 %v976_v34, %v972_v19  ;;  %2067 = vmatpush1.bf16.msra.mxu0 %v12123_v16  ;;  %2293 = vmatpush1.bf16.msra.mxu1 %v12126_v17  ;;  %v12149_v16 = vld [vmem:[#allocation9 + $0x2e4] ss:$16 sps:$4 sm:$0xff]   ;;  %v12152_v17 = vld [vmem:[#allocation9 + $0x2ec] ss:$16 sps:$4 sm:$0xff]   ;;  %v12156_v32 = vld [vmem:[#allocation9 + $0x308] ss:$16 sps:$4 sm:$0xff]  }
 0x2c1   :  { %v1123_v42 = vadd.bf16 %v14246_v20, %v1037_v30  ;;  %v14279_v43 = vadd.bf16 %v14249_v22, %v1039_v31  ;;  %2068 = vmatprep.subr.bf16.mxu0 %v12131_v24  ;;  %2294 = vmatprep.subr.bf16.mxu1 %v12134_v27  ;;  %v12147_v24 = vld [vmem:[#allocation9 + $0x2e0] ss:$16 sps:$4 sm:$0xff]   ;;  %v12150_v27 = vld [vmem:[#allocation9 + $0x2e8] ss:$16 sps:$4 sm:$0xff]   ;;  %v12158_v30 = vld [vmem:[#allocation9 + $0x30c] ss:$16 sps:$4 sm:$0xff]  }
 0x2c2   :  { %v1124_v46 = vadd.bf16 %v14252_v25, %v1038_v36  ;;  %v14283_v47 = vadd.bf16 %v14255_v26, %v1040_v38  ;;  %v12153_v31 = vld [vmem:[#allocation9 + $0x300] ss:$16 sps:$4 sm:$0xff]   ;;  %v12161_v34 = vld [vmem:[#allocation9 + $0x324] ss:$16 sps:$4 sm:$0xff]   ;;  %v12164_v36 = vld [vmem:[#allocation9 + $0x32c] ss:$16 sps:$4 sm:$0xff]  }
 0x2c3   :  { %v1155_v57 = vmax.bf16 %v15721_v2, %v1123_v42 }
 0x2c4   :  { %v867_v53 = vpop.f32.mrb[12].mxu0  ;;  %v980_v50 = vpop.f32.mrb[12].mxu1  ;;  %v1156_v51 = vmax.bf16 %v15721_v2, %v1124_v46  ;;  %2069 = vmatpush1.bf16.msra.mxu0 %v12129_v39  ;;  %2295 = vmatpush1.bf16.msra.mxu1 %v12132_v41 }
 0x2c5   :  { %v869_v55 = vpop.f32.mrb[13].mxu0  ;;  %v982_v56 = vpop.f32.mrb[13].mxu1  ;;  %2070 = vmatprep.subr.bf16.mxu0 %v12137_v44  ;;  %2296 = vmatprep.subr.bf16.mxu1 %v12140_v45  ;;  %v12159_v44 = vld [vmem:[#allocation9 + $0x320] ss:$16 sps:$4 sm:$0xff]   ;;  %v12162_v45 = vld [vmem:[#allocation9 + $0x328] ss:$16 sps:$4 sm:$0xff]  }
 0x2c6   :  { %v871_v59 = vpop.f32.mrb[14].mxu0  ;;  %v984_v60 = vpop.f32.mrb[14].mxu1  ;;  %1999 = vmatprep.mubr.bf16.mxu0 %v1156_v51  ;;  %2225 = vmatprep.mubr.bf16.mxu1 %v1156_v51  ;;  %v12170_v51 = vld [vmem:[#allocation9 + $0x34c] ss:$16 sps:$4 sm:$0xff]  }
 0x2c7   :  { %v1041_v62 = vpack.c.bf16 %v871_v59, %v867_v53  ;;  %v1043_v0 = vpack.c.bf16 %v984_v60, %v980_v50  ;;  %v873_v3 = vpop.f32.mrb[15].mxu0  ;;  %v986_v5 = vpop.f32.mrb[15].mxu1  ;;  %2000 = vmatmul.mubr.bf16.gmra.mrb[40].mxu0 %v1155_v57  ;;  %2226 = vmatmul.mubr.bf16.gmra.mrb[40].mxu1 %v1155_v57  ;;  %v12167_v50 = vld [vmem:[#allocation9 + $0x344] ss:$16 sps:$4 sm:$0xff]   ;;  %v12165_v60 = vld [vmem:[#allocation9 + $0x340] ss:$16 sps:$4 sm:$0xff]  }
 0x2c8   :  { %v1042_v6 = vpack.c.bf16 %v873_v3, %v869_v55  ;;  %v1044_v7 = vpack.c.bf16 %v986_v5, %v982_v56  ;;  %2071 = vmatpush1.bf16.msra.mxu0 %v12135_v52  ;;  %2297 = vmatpush1.bf16.msra.mxu1 %v12138_v18 }
 0x2c9   :  { %v1127_v13 = vadd.bf16 %v14246_v20, %v1041_v62  ;;  %v14289_v14 = vadd.bf16 %v14249_v22, %v1043_v0  ;;  %2072 = vmatprep.subr.bf16.mxu0 %v12143_v1  ;;  %2298 = vmatprep.subr.bf16.mxu1 %v12146_v58  ;;  %v12168_v62 = vld [vmem:[#allocation9 + $0x348] ss:$16 sps:$4 sm:$0xff]  }
 0x2ca   :  { %v1128_v49 = vadd.bf16 %v14252_v25, %v1042_v6  ;;  %v14293_v19 = vadd.bf16 %v14255_v26, %v1044_v7  ;;  %v12173_v6 = vld [vmem:[#allocation9 + $0x364] ss:$16 sps:$4 sm:$0xff]   ;;  %v12176_v7 = vld [vmem:[#allocation9 + $0x36c] ss:$16 sps:$4 sm:$0xff]  }
 0x2cb   :  { %v1159_v28 = vmax.bf16 %v15721_v2, %v1127_v13  ;;  %v12174_v13 = vld [vmem:[#allocation9 + $0x368] ss:$16 sps:$4 sm:$0xff]  }
 0x2cc   :  { %v1160_v23 = vmax.bf16 %v15721_v2, %v1128_v49  ;;  %2073 = vmatpush1.bf16.msra.mxu0 %v12141_v10  ;;  %2299 = vmatpush1.bf16.msra.mxu1 %v12144_v12  ;;  %v12171_v12 = vld [vmem:[#allocation9 + $0x360] ss:$16 sps:$4 sm:$0xff]   ;;  %v12179_v49 = vld [vmem:[#allocation9 + $0x384] ss:$16 sps:$4 sm:$0xff]  }
 0x2cd   :  { %2074 = vmatprep.subr.bf16.mxu0 %v12149_v16  ;;  %2300 = vmatprep.subr.bf16.mxu1 %v12152_v17 }
 0x2ce   :  { %2009 = vmatprep.mubr.bf16.mxu0 %v1160_v23  ;;  %2235 = vmatprep.mubr.bf16.mxu1 %v1160_v23  ;;  %v12182_v23 = vld [vmem:[#allocation9 + $0x38c] ss:$16 sps:$4 sm:$0xff]  }
 0x2cf   :  { %2010 = vmatmul.mubr.bf16.gmra.mrb[44].mxu0 %v1159_v28  ;;  %2236 = vmatmul.mubr.bf16.gmra.mrb[44].mxu1 %v1159_v28 }
 0x2d0   :  { %2075 = vmatpush1.bf16.msra.mxu0 %v12147_v24  ;;  %2301 = vmatpush1.bf16.msra.mxu1 %v12150_v27 }
 0x2d1   :  { %2076 = vmatprep.subr.bf16.mxu0 %v12155_v29  ;;  %2302 = vmatprep.subr.bf16.mxu1 %v12158_v30 }
 0x2d3   :  { %v877_v38 = vpop.f32.mrb[16].mxu0  ;;  %v990_v39 = vpop.f32.mrb[16].mxu1 }
 0x2d4   :  { %v879_v41 = vpop.f32.mrb[17].mxu0  ;;  %v992_v42 = vpop.f32.mrb[17].mxu1  ;;  %2077 = vmatpush1.bf16.msra.mxu0 %v12153_v31  ;;  %2303 = vmatpush1.bf16.msra.mxu1 %v12156_v32 }
 0x2d5   :  { %v881_v46 = vpop.f32.mrb[18].mxu0  ;;  %v994_v53 = vpop.f32.mrb[18].mxu1  ;;  %2078 = vmatprep.subr.bf16.mxu0 %v12161_v34  ;;  %2304 = vmatprep.subr.bf16.mxu1 %v12164_v36  ;;  %v12177_v36 = vld [vmem:[#allocation9 + $0x380] ss:$16 sps:$4 sm:$0xff]  }
 0x2d6   :  { %v1045_v52 = vpack.c.bf16 %v881_v46, %v877_v38  ;;  %v1047_v18 = vpack.c.bf16 %v994_v53, %v990_v39  ;;  %v883_v55 = vpop.f32.mrb[19].mxu0  ;;  %v996_v56 = vpop.f32.mrb[19].mxu1  ;;  %v12180_v38 = vld [vmem:[#allocation9 + $0x388] ss:$16 sps:$4 sm:$0xff]  }
 0x2d7   :  { %v1046_v57 = vpack.c.bf16 %v883_v55, %v879_v41  ;;  %v1048_v1 = vpack.c.bf16 %v996_v56, %v992_v42  ;;  %v12185_v42 = vld [vmem:[#allocation9 + $0x3a4] ss:$16 sps:$4 sm:$0xff]  }
 0x2d8   :  { %v1131_v58 = vadd.bf16 %v14246_v20, %v1045_v52  ;;  %v14299_v59 = vadd.bf16 %v14249_v22, %v1047_v18  ;;  %2079 = vmatpush1.bf16.msra.mxu0 %v12159_v44  ;;  %2305 = vmatpush1.bf16.msra.mxu1 %v12162_v45  ;;  %v12188_v44 = vld [vmem:[#allocation9 + $0x3ac] ss:$16 sps:$4 sm:$0xff]   ;;  %v12183_v52 = vld [vmem:[#allocation9 + $0x3a0] ss:$16 sps:$4 sm:$0xff]   ;;  %v12186_v18 = vld [vmem:[#allocation9 + $0x3a8] ss:$16 sps:$4 sm:$0xff]  }
 0x2d9   :  { %v1132_v0 = vadd.bf16 %v14252_v25, %v1046_v57  ;;  %v14303_v3 = vadd.bf16 %v14255_v26, %v1048_v1  ;;  %2080 = vmatprep.subr.bf16.mxu0 %v12167_v50  ;;  %2306 = vmatprep.subr.bf16.mxu1 %v12170_v51  ;;  %v12191_v56 = vld [vmem:[#allocation9 + $0x3c4] ss:$16 sps:$4 sm:$0xff]   ;;  %v12194_v57 = vld [vmem:[#allocation9 + $0x3cc] ss:$16 sps:$4 sm:$0xff]   ;;  %v12189_v1 = vld [vmem:[#allocation9 + $0x3c0] ss:$16 sps:$4 sm:$0xff]  }
 0x2da   :  { %v1163_v10 = vmax.bf16 %v15721_v2, %v1131_v58  ;;  %v12192_v58 = vld [vmem:[#allocation9 + $0x3c8] ss:$16 sps:$4 sm:$0xff]  }
 0x2db   :  { %v1164_v5 = vmax.bf16 %v15721_v2, %v1132_v0 }
 0x2dc   :  { %2081 = vmatpush1.bf16.msra.mxu0 %v12165_v60  ;;  %2307 = vmatpush1.bf16.msra.mxu1 %v12168_v62  ;;  %v12197_v60 = vld [vmem:[#allocation9 + $0x3e4] ss:$16 sps:$4 sm:$0xff]   ;;  %v12200_v62 = vld [vmem:[#allocation9 + $0x3ec] ss:$16 sps:$4 sm:$0xff]  }
 0x2dd   :  { %v887_v16 = vpop.f32.mrb[20].mxu0  ;;  %v1000_v17 = vpop.f32.mrb[20].mxu1  ;;  %2019 = vmatprep.mubr.bf16.mxu0 %v1164_v5  ;;  %2245 = vmatprep.mubr.bf16.mxu1 %v1164_v5 }
 0x2de   :  { %v889_v24 = vpop.f32.mrb[21].mxu0  ;;  %v1002_v27 = vpop.f32.mrb[21].mxu1  ;;  %2020 = vmatmul.mubr.bf16.gmra.mrb[48].mxu0 %v1163_v10  ;;  %2246 = vmatmul.mubr.bf16.gmra.mrb[48].mxu1 %v1163_v10  ;;  %v12195_v10 = vld [vmem:[#allocation9 + $0x3e0] ss:$16 sps:$4 sm:$0xff]  }
 0x2df   :  { %v891_v28 = vpop.f32.mrb[22].mxu0  ;;  %v1004_v29 = vpop.f32.mrb[22].mxu1  ;;  %2082 = vmatprep.subr.bf16.mxu0 %v12173_v6  ;;  %2308 = vmatprep.subr.bf16.mxu1 %v12176_v7 }
 0x2e0   :  { %v1049_v30 = vpack.c.bf16 %v891_v28, %v887_v16  ;;  %v1051_v31 = vpack.c.bf16 %v1004_v29, %v1000_v17  ;;  %v893_v32 = vpop.f32.mrb[23].mxu0  ;;  %v1006_v34 = vpop.f32.mrb[23].mxu1  ;;  %2083 = vmatpush1.bf16.msra.mxu0 %v12171_v12  ;;  %2309 = vmatpush1.bf16.msra.mxu1 %v12174_v13  ;;  %v12198_v12 = vld [vmem:[#allocation9 + $0x3e8] ss:$16 sps:$4 sm:$0xff]  }
 0x2e1   :  { %v1050_v39 = vpack.c.bf16 %v893_v32, %v889_v24  ;;  %v1052_v41 = vpack.c.bf16 %v1006_v34, %v1002_v27  ;;  %2084 = vmatprep.subr.bf16.mxu0 %v12179_v49  ;;  %2310 = vmatprep.subr.bf16.mxu1 %v12182_v23  ;;  %v12203_v17 = vld [vmem:[#allocation12 + $0x4] ss:$16 sps:$4 sm:$0xff]   ;;  %v12206_v49 = vld [vmem:[#allocation12 + $0xc] ss:$16 sps:$4 sm:$0xff]  }
 0x2e2   :  { %v1135_v45 = vadd.bf16 %v14246_v20, %v1049_v30  ;;  %v14309_v46 = vadd.bf16 %v14249_v22, %v1051_v31 }
 0x2e3   :  { %v1136_v53 = vadd.bf16 %v14252_v25, %v1050_v39  ;;  %v14313_v50 = vadd.bf16 %v14255_v26, %v1052_v41 }
 0x2e4   :  { %2085 = vmatpush1.bf16.msra.mxu0 %v12177_v36  ;;  %2311 = vmatpush1.bf16.msra.mxu1 %v12180_v38  ;;  %v1167_v55 = vmax.bf16 %v15721_v2, %v1135_v45 }
 0x2e5   :  { %v1168_v51 = vmax.bf16 %v15721_v2, %v1136_v53  ;;  %2086 = vmatprep.subr.bf16.mxu0 %v12185_v42  ;;  %2312 = vmatprep.subr.bf16.mxu1 %v12188_v44 }
 0x2e7   :  { %2029 = vmatprep.mubr.bf16.mxu0 %v1168_v51  ;;  %2255 = vmatprep.mubr.bf16.mxu1 %v1168_v51 }
 0x2e8   :  { %2030 = vmatmul.mubr.bf16.gmra.mrb[52].mxu0 %v1167_v55  ;;  %2256 = vmatmul.mubr.bf16.gmra.mrb[52].mxu1 %v1167_v55 }
 0x2e9   :  { %2087 = vmatpush1.bf16.msra.mxu0 %v12183_v52  ;;  %2313 = vmatpush1.bf16.msra.mxu1 %v12186_v18 }
 0x2ea   :  { %2088 = vmatprep.subr.bf16.mxu0 %v12191_v56  ;;  %2314 = vmatprep.subr.bf16.mxu1 %v12194_v57 }
 0x2ec   :  { %v897_v0 = vpop.f32.mrb[24].mxu0  ;;  %v1010_v5 = vpop.f32.mrb[24].mxu1 }
 0x2ed   :  { %v899_v6 = vpop.f32.mrb[25].mxu0  ;;  %v1012_v7 = vpop.f32.mrb[25].mxu1  ;;  %2089 = vmatpush1.bf16.msra.mxu0 %v12189_v1  ;;  %2315 = vmatpush1.bf16.msra.mxu1 %v12192_v58 }
 0x2ee   :  { %v901_v13 = vpop.f32.mrb[26].mxu0  ;;  %v1014_v16 = vpop.f32.mrb[26].mxu1  ;;  %2090 = vmatprep.subr.bf16.mxu0 %v12197_v60  ;;  %2316 = vmatprep.subr.bf16.mxu1 %v12200_v62 }
 0x2ef   :  { %v1053_v23 = vpack.c.bf16 %v901_v13, %v897_v0  ;;  %v1055_v24 = vpack.c.bf16 %v1014_v16, %v1010_v5  ;;  %v903_v27 = vpop.f32.mrb[27].mxu0  ;;  %v1016_v28 = vpop.f32.mrb[27].mxu1  ;;  %v12210_v13 = vld [vmem:[#allocation12 + $0x28] ss:$16 sps:$4 sm:$0xff]   ;;  %v12215_v16 = vld [vmem:[#allocation12 + $0x44] ss:$16 sps:$4 sm:$0xff]  }
 0x2f0   :  { %v1054_v29 = vpack.c.bf16 %v903_v27, %v899_v6  ;;  %v1056_v30 = vpack.c.bf16 %v1016_v28, %v1012_v7  ;;  %v1150_v7 = vmax.bf16 %v15721_v2, %v14263_v37  ;;  %v12207_v37 = vld [vmem:[#allocation12 + $0x20] ss:$16 sps:$4 sm:$0xff]   ;;  %v12224_v27 = vld [vmem:[#allocation12 + $0x6c] ss:$16 sps:$4 sm:$0xff]  }
 0x2f1   :  { %v1139_v31 = vadd.bf16 %v14246_v20, %v1053_v23  ;;  %v14319_v32 = vadd.bf16 %v14249_v22, %v1055_v24  ;;  %2091 = vmatpush1.bf16.msra.mxu0 %v12195_v10  ;;  %2317 = vmatpush1.bf16.msra.mxu1 %v12198_v12  ;;  %v12209_v10 = vld [vmem:[#allocation12 + $0x24] ss:$16 sps:$4 sm:$0xff]   ;;  %v12212_v12 = vld [vmem:[#allocation12 + $0x2c] ss:$16 sps:$4 sm:$0xff]   ;;  %v1158_v23 = vmax.bf16 %v15721_v2, %v14283_v47  ;;  %v12219_v28 = vld [vmem:[#allocation12 + $0x60] ss:$16 sps:$4 sm:$0xff]  }
 0x2f2   :  { %v1140_v34 = vadd.bf16 %v14252_v25, %v1054_v29  ;;  %v14323_v36 = vadd.bf16 %v14255_v26, %v1056_v30  ;;  %3317 = vmatprep.subr.bf16.mxu0 %v12203_v17  ;;  %3543 = vmatprep.subr.bf16.mxu1 %v12206_v49  ;;  %v12218_v17 = vld [vmem:[#allocation12 + $0x4c] ss:$16 sps:$4 sm:$0xff]   ;;  %v12216_v49 = vld [vmem:[#allocation12 + $0x48] ss:$16 sps:$4 sm:$0xff]   ;;  %v12221_v24 = vld [vmem:[#allocation12 + $0x64] ss:$16 sps:$4 sm:$0xff]  }
 0x2f3   :  { %v1171_v39 = vmax.bf16 %v15721_v2, %v1139_v31  ;;  %v12222_v29 = vld [vmem:[#allocation12 + $0x68] ss:$16 sps:$4 sm:$0xff]   ;;  %v12230_v30 = vld [vmem:[#allocation12 + $0x8c] ss:$16 sps:$4 sm:$0xff]   ;;  %v1157_v31 = vmax.bf16 %v15721_v2, %v14279_v43  ;;  %v12225_v47 = vld [vmem:[#allocation12 + $0x80] ss:$16 sps:$4 sm:$0xff]  }
 0x2f4   :  { %v1172_v38 = vmax.bf16 %v15721_v2, %v1140_v34  ;;  %v12228_v34 = vld [vmem:[#allocation12 + $0x88] ss:$16 sps:$4 sm:$0xff]   ;;  %v12239_v43 = vld [vmem:[#allocation12 + $0xc4] ss:$16 sps:$4 sm:$0xff]  }
 0x2f6   :  { %v907_v41 = vpop.f32.mrb[28].mxu0  ;;  %v1020_v42 = vpop.f32.mrb[28].mxu1  ;;  %2039 = vmatprep.mubr.bf16.mxu0 %v1172_v38  ;;  %2265 = vmatprep.mubr.bf16.mxu1 %v1172_v38  ;;  %v1162_v38 = vmax.bf16 %v15721_v2, %v14293_v19  ;;  %v12237_v19 = vld [vmem:[#allocation12 + $0xc0] ss:$16 sps:$4 sm:$0xff]  }
 0x2f7   :  { %v909_v44 = vpop.f32.mrb[29].mxu0  ;;  %v1022_v45 = vpop.f32.mrb[29].mxu1  ;;  %2040 = vmatmul.mubr.bf16.gmra.mrb[56].mxu0 %v1171_v39  ;;  %2266 = vmatmul.mubr.bf16.gmra.mrb[56].mxu1 %v1171_v39  ;;  %v12233_v39 = vld [vmem:[#allocation12 + $0xa4] ss:$16 sps:$4 sm:$0xff]  }
 0x2f8   :  { %v911_v53 = vpop.f32.mrb[30].mxu0  ;;  %v1024_v51 = vpop.f32.mrb[30].mxu1 }
 0x2f9   :  { %v1057_v52 = vpack.c.bf16 %v911_v53, %v907_v41  ;;  %v1059_v18 = vpack.c.bf16 %v1024_v51, %v1020_v42  ;;  %v913_v55 = vpop.f32.mrb[31].mxu0  ;;  %v1026_v56 = vpop.f32.mrb[31].mxu1  ;;  %v12236_v41 = vld [vmem:[#allocation12 + $0xac] ss:$16 sps:$4 sm:$0xff]   ;;  %v12231_v42 = vld [vmem:[#allocation12 + $0xa0] ss:$16 sps:$4 sm:$0xff]   ;;  %v1161_v53 = vmax.bf16 %v15721_v2, %v14289_v14 }
 0x2fa   :  { %v1058_v57 = vpack.c.bf16 %v913_v55, %v909_v44  ;;  %v1060_v1 = vpack.c.bf16 %v1026_v56, %v1022_v45  ;;  %v12234_v44 = vld [vmem:[#allocation12 + $0xa8] ss:$16 sps:$4 sm:$0xff]   ;;  %v12242_v45 = vld [vmem:[#allocation12 + $0xcc] ss:$16 sps:$4 sm:$0xff]   ;;  %v12243_v56 = vld [vmem:[#allocation12 + $0xe0] ss:$16 sps:$4 sm:$0xff]  }
 0x2fb   :  { %v1143_v58 = vadd.bf16 %v14246_v20, %v1057_v52  ;;  %v14329_v60 = vadd.bf16 %v14249_v22, %v1059_v18  ;;  %v1149_v20 = vmax.bf16 %v15721_v2, %v14259_v35  ;;  %v12201_v22 = vld [vmem:[#allocation12] ss:$16 sps:$4 sm:$0xff]   ;;  %v1153_v35 = vmax.bf16 %v15721_v2, %v14269_v9  ;;  %v12227_v9 = vld [vmem:[#allocation12 + $0x84] ss:$16 sps:$4 sm:$0xff]   ;;  %v12240_v51 = vld [vmem:[#allocation12 + $0xc8] ss:$16 sps:$4 sm:$0xff]  }
 0x2fc   :  { %v1144_v62 = vadd.bf16 %v14252_v25, %v1058_v57  ;;  %v14333_v0 = vadd.bf16 %v14255_v26, %v1060_v1  ;;  %v12204_v25 = vld [vmem:[#allocation12 + $0x8] ss:$16 sps:$4 sm:$0xff]   ;;  %v1154_v26 = vmax.bf16 %v15721_v2, %v14273_v11  ;;  %v12213_v11 = vld [vmem:[#allocation12 + $0x40] ss:$16 sps:$4 sm:$0xff]   ;;  %v1166_v52 = vmax.bf16 %v15721_v2, %v14303_v3  ;;  %v12245_v18 = vld [vmem:[#allocation12 + $0xe4] ss:$16 sps:$4 sm:$0xff]  }
 0x2fd   :  { %v1175_v6 = vmax.bf16 %v15721_v2, %v1143_v58  ;;  %v12248_v55 = vld [vmem:[#allocation12 + $0xec] ss:$16 sps:$4 sm:$0xff]   ;;  %v12246_v57 = vld [vmem:[#allocation12 + $0xe8] ss:$16 sps:$4 sm:$0xff]   ;;  %v12251_v14 = vld [vmem:[#allocation12 + $0x104] ss:$16 sps:$4 sm:$0xff]   ;;  %v1165_v58 = vmax.bf16 %v15721_v2, %v14299_v59 }
 0x2fe   :  { %v1176_v5 = vmax.bf16 %v15721_v2, %v1144_v62  ;;  %v12254_v1 = vld [vmem:[#allocation12 + $0x10c] ss:$16 sps:$4 sm:$0xff]   ;;  %v12249_v3 = vld [vmem:[#allocation12 + $0x100] ss:$16 sps:$4 sm:$0xff]   ;;  %v12252_v62 = vld [vmem:[#allocation12 + $0x108] ss:$16 sps:$4 sm:$0xff]  }
 0x2ff   :  { %v12263_v59 = vld [vmem:[#allocation12 + $0x144] ss:$16 sps:$4 sm:$0xff]  }
 0x300   :  { %2049 = vmatprep.mubr.bf16.mxu0 %v1176_v5  ;;  %2275 = vmatprep.mubr.bf16.mxu1 %v1176_v5  ;;  %v1170_v5 = vmax.bf16 %v15721_v2, %v14313_v50  ;;  %v12261_v50 = vld [vmem:[#allocation12 + $0x140] ss:$16 sps:$4 sm:$0xff]  }
 0x301   :  { %2050 = vmatmul.mubr.bf16.gmra.mrb[60].mxu0 %v1175_v6  ;;  %2276 = vmatmul.mubr.bf16.gmra.mrb[60].mxu1 %v1175_v6  ;;  %v12257_v6 = vld [vmem:[#allocation12 + $0x124] ss:$16 sps:$4 sm:$0xff]  }
 0x302   :  { %2092 = vmatprep.mubr.bf16.mxu0 %v1150_v7  ;;  %2318 = vmatprep.mubr.bf16.mxu1 %v1150_v7  ;;  %v12260_v7 = vld [vmem:[#allocation12 + $0x12c] ss:$16 sps:$4 sm:$0xff]  }
 0x309   :  { %2093 = vmatmul.mubr.bf16.vlgmr.msra.gmra.mrb[32].mxu0 %v1149_v20  ;;  %2319 = vmatmul.mubr.bf16.vlgmr.msra.gmra.mrb[32].mxu1 %v1149_v20  ;;  %v12255_v20 = vld [vmem:[#allocation12 + $0x120] ss:$16 sps:$4 sm:$0xff]  }
 0x30a   :  { %2102 = vmatprep.mubr.bf16.mxu0 %v1154_v26  ;;  %2328 = vmatprep.mubr.bf16.mxu1 %v1154_v26  ;;  %v1169_v26 = vmax.bf16 %v15721_v2, %v14309_v46  ;;  %v12275_v46 = vld [vmem:[#allocation12 + $0x184] ss:$16 sps:$4 sm:$0xff]  }
 0x30b   :  { %3318 = vmatpush1.bf16.msra.mxu0 %v12201_v22  ;;  %3544 = vmatpush1.bf16.msra.mxu1 %v12204_v25  ;;  %v12258_v22 = vld [vmem:[#allocation12 + $0x128] ss:$16 sps:$4 sm:$0xff]   ;;  %v12266_v25 = vld [vmem:[#allocation12 + $0x14c] ss:$16 sps:$4 sm:$0xff]  }
 0x30c   :  { %3319 = vmatprep.subr.bf16.mxu0 %v12209_v10  ;;  %3545 = vmatprep.subr.bf16.mxu1 %v12212_v12  ;;  %v12264_v10 = vld [vmem:[#allocation12 + $0x148] ss:$16 sps:$4 sm:$0xff]   ;;  %v1174_v12 = vmax.bf16 %v15721_v2, %v14323_v36  ;;  %v12273_v36 = vld [vmem:[#allocation12 + $0x180] ss:$16 sps:$4 sm:$0xff]  }
 0x30f   :  { %3320 = vmatpush1.bf16.msra.mxu0 %v12207_v37  ;;  %3546 = vmatpush1.bf16.msra.mxu1 %v12210_v13  ;;  %v12269_v37 = vld [vmem:[#allocation12 + $0x164] ss:$16 sps:$4 sm:$0xff]   ;;  %v12272_v13 = vld [vmem:[#allocation12 + $0x16c] ss:$16 sps:$4 sm:$0xff]  }
 0x310   :  { %3321 = vmatprep.subr.bf16.mxu0 %v12215_v16  ;;  %3547 = vmatprep.subr.bf16.mxu1 %v12218_v17  ;;  %v12267_v16 = vld [vmem:[#allocation12 + $0x160] ss:$16 sps:$4 sm:$0xff]   ;;  %v12270_v17 = vld [vmem:[#allocation12 + $0x168] ss:$16 sps:$4 sm:$0xff]  }
 0x311   :  { %2103 = vmatmul.mubr.bf16.gmra.mrb[36].mxu0 %v1153_v35  ;;  %2329 = vmatmul.mubr.bf16.gmra.mrb[36].mxu1 %v1153_v35  ;;  %v12278_v35 = vld [vmem:[#allocation12 + $0x18c] ss:$16 sps:$4 sm:$0xff]  }
 0x312   :  { %2112 = vmatprep.mubr.bf16.mxu0 %v1158_v23  ;;  %2338 = vmatprep.mubr.bf16.mxu1 %v1158_v23  ;;  %v1178_v23 = vmax.bf16 %v15721_v2, %v14333_v0  ;;  %v12287_v0 = vld [vmem:[#allocation12 + $0x1c4] ss:$16 sps:$4 sm:$0xff]  }
 0x313   :  { %3322 = vmatpush1.bf16.msra.mxu0 %v12213_v11  ;;  %3548 = vmatpush1.bf16.msra.mxu1 %v12216_v49  ;;  %v1173_v11 = vmax.bf16 %v15721_v2, %v14319_v32  ;;  %v12276_v49 = vld [vmem:[#allocation12 + $0x188] ss:$16 sps:$4 sm:$0xff]   ;;  %v1177_v32 = vmax.bf16 %v15721_v2, %v14329_v60  ;;  %v12299_v60 = vld [vmem:[#allocation12 + $0x204] ss:$16 sps:$4 sm:$0xff]  }
 0x314   :  { %3323 = vmatprep.subr.bf16.mxu0 %v12221_v24  ;;  %3549 = vmatprep.subr.bf16.mxu1 %v12224_v27  ;;  %v12281_v24 = vld [vmem:[#allocation12 + $0x1a4] ss:$16 sps:$4 sm:$0xff]   ;;  %v12284_v27 = vld [vmem:[#allocation12 + $0x1ac] ss:$16 sps:$4 sm:$0xff]  }
 0x317   :  { %3324 = vmatpush1.bf16.msra.mxu0 %v12219_v28  ;;  %3550 = vmatpush1.bf16.msra.mxu1 %v12222_v29  ;;  %v12279_v28 = vld [vmem:[#allocation12 + $0x1a0] ss:$16 sps:$4 sm:$0xff]   ;;  %v12282_v29 = vld [vmem:[#allocation12 + $0x1a8] ss:$16 sps:$4 sm:$0xff]  }
 0x318   :  { %3325 = vmatprep.subr.bf16.mxu0 %v12227_v9  ;;  %3551 = vmatprep.subr.bf16.mxu1 %v12230_v30  ;;  %v12290_v9 = vld [vmem:[#allocation12 + $0x1cc] ss:$16 sps:$4 sm:$0xff]   ;;  %v12285_v30 = vld [vmem:[#allocation12 + $0x1c0] ss:$16 sps:$4 sm:$0xff]  }
 0x319   :  { %2113 = vmatmul.mubr.bf16.gmra.mrb[40].mxu0 %v1157_v31  ;;  %2339 = vmatmul.mubr.bf16.gmra.mrb[40].mxu1 %v1157_v31  ;;  %v12288_v31 = vld [vmem:[#allocation12 + $0x1c8] ss:$16 sps:$4 sm:$0xff]  }
 0x31a   :  { %2122 = vmatprep.mubr.bf16.mxu0 %v1162_v38  ;;  %2348 = vmatprep.mubr.bf16.mxu1 %v1162_v38  ;;  %v12291_v38 = vld [vmem:[#allocation12 + $0x1e0] ss:$16 sps:$4 sm:$0xff]  }
 0x31b   :  { %3326 = vmatpush1.bf16.msra.mxu0 %v12225_v47  ;;  %3552 = vmatpush1.bf16.msra.mxu1 %v12228_v34  ;;  %v12293_v47 = vld [vmem:[#allocation12 + $0x1e4] ss:$16 sps:$4 sm:$0xff]   ;;  %v12296_v34 = vld [vmem:[#allocation12 + $0x1ec] ss:$16 sps:$4 sm:$0xff]  }
 0x31c   :  { %3327 = vmatprep.subr.bf16.mxu0 %v12233_v39  ;;  %3553 = vmatprep.subr.bf16.mxu1 %v12236_v41  ;;  %v12294_v39 = vld [vmem:[#allocation12 + $0x1e8] ss:$16 sps:$4 sm:$0xff]   ;;  %v12302_v41 = vld [vmem:[#allocation12 + $0x20c] ss:$16 sps:$4 sm:$0xff]  }
 0x31f   :  { %3328 = vmatpush1.bf16.msra.mxu0 %v12231_v42  ;;  %3554 = vmatpush1.bf16.msra.mxu1 %v12234_v44  ;;  %v10509_v42 = vld.sshfl [vmem:[#allocation11] sm:$0x33 pattern:$0x75316420] }
 0x320   :  { %3329 = vmatprep.subr.bf16.mxu0 %v12239_v43  ;;  %3555 = vmatprep.subr.bf16.mxu1 %v12242_v45  ;;  %v2440_v44 = vcombine.high %v10509_v42, %v10509_v42  ;;  %v14370_v43 = vrot.slane %v10509_v42, %v14241_v4 }
 0x321   :  { %2123 = vmatmul.mubr.bf16.gmra.mrb[44].mxu0 %v1161_v53  ;;  %2349 = vmatmul.mubr.bf16.gmra.mrb[44].mxu1 %v1161_v53 }
 0x322   :  { %2132 = vmatprep.mubr.bf16.mxu0 %v1166_v52  ;;  %2358 = vmatprep.mubr.bf16.mxu1 %v1166_v52  ;;  %v14373_v45 = vrot.slane %v2440_v44, %v14241_v4  ;;  %v2458_v53 = vpack.i.b16 %v14370_v43, %v14370_v43  ;;  %v12317_v44 = vld [vmem:[#allocation12 + $0x264] ss:$16 sps:$4 sm:$0xff]  }
 0x323   :  { %3330 = vmatpush1.bf16.msra.mxu0 %v12237_v19  ;;  %3556 = vmatpush1.bf16.msra.mxu1 %v12240_v51 }
 0x324   :  { %3331 = vmatprep.subr.bf16.mxu0 %v12245_v18  ;;  %3557 = vmatprep.subr.bf16.mxu1 %v12248_v55  ;;  %v2465_v19 = vpack.i.b16 %v14373_v45, %v14373_v45 }
 0x327   :  { %3332 = vmatpush1.bf16.msra.mxu0 %v12243_v56  ;;  %3558 = vmatpush1.bf16.msra.mxu1 %v12246_v57  ;;  %v14384_v56 = vrot.slane %v2458_v53, %v14239_v63  ;;  %v12320_v53 = vld [vmem:[#allocation12 + $0x26c] ss:$16 sps:$4 sm:$0xff]  }
 0x328   :  { %3333 = vmatprep.subr.bf16.mxu0 %v12251_v14  ;;  %3559 = vmatprep.subr.bf16.mxu1 %v12254_v1  ;;  %v14389_v1 = vrot.slane %v2465_v19, %v14239_v63 }
 0x329   :  { %2133 = vmatmul.mubr.bf16.gmra.mrb[48].mxu0 %v1165_v58  ;;  %2359 = vmatmul.mubr.bf16.gmra.mrb[48].mxu1 %v1165_v58 }
 0x32a   :  { %2142 = vmatprep.mubr.bf16.mxu0 %v1170_v5  ;;  %2368 = vmatprep.mubr.bf16.mxu1 %v1170_v5 }
 0x32b   :  { %3334 = vmatpush1.bf16.msra.mxu0 %v12249_v3  ;;  %3560 = vmatpush1.bf16.msra.mxu1 %v12252_v62 }
 0x32c   :  { %3335 = vmatprep.subr.bf16.mxu0 %v12257_v6  ;;  %3561 = vmatprep.subr.bf16.mxu1 %v12260_v7 }
 0x32f   :  { %3336 = vmatpush1.bf16.msra.mxu0 %v12255_v20  ;;  %3562 = vmatpush1.bf16.msra.mxu1 %v12258_v22 }
 0x330   :  { %3337 = vmatprep.subr.bf16.mxu0 %v12263_v59  ;;  %3563 = vmatprep.subr.bf16.mxu1 %v12266_v25 }
 0x331   :  { %2143 = vmatmul.mubr.bf16.gmra.mrb[52].mxu0 %v1169_v26  ;;  %2369 = vmatmul.mubr.bf16.gmra.mrb[52].mxu1 %v1169_v26 }
 0x332   :  { %2152 = vmatprep.mubr.bf16.mxu0 %v1174_v12  ;;  %2378 = vmatprep.mubr.bf16.mxu1 %v1174_v12 }
 0x333   :  { %3338 = vmatpush1.bf16.msra.mxu0 %v12261_v50  ;;  %3564 = vmatpush1.bf16.msra.mxu1 %v12264_v10  ;;  %v12297_v50 = vld [vmem:[#allocation12 + $0x200] ss:$16 sps:$4 sm:$0xff]   ;;  %v12300_v10 = vld [vmem:[#allocation12 + $0x208] ss:$16 sps:$4 sm:$0xff]  }
 0x334   :  { %3339 = vmatprep.subr.bf16.mxu0 %v12269_v37  ;;  %3565 = vmatprep.subr.bf16.mxu1 %v12272_v13 }
 0x337   :  { %3340 = vmatpush1.bf16.msra.mxu0 %v12267_v16  ;;  %3566 = vmatpush1.bf16.msra.mxu1 %v12270_v17  ;;  %v12305_v16 = vld [vmem:[#allocation12 + $0x224] ss:$16 sps:$4 sm:$0xff]   ;;  %v12308_v17 = vld [vmem:[#allocation12 + $0x22c] ss:$16 sps:$4 sm:$0xff]  }
 0x338   :  { %3341 = vmatprep.subr.bf16.mxu0 %v12275_v46  ;;  %3567 = vmatprep.subr.bf16.mxu1 %v12278_v35 }
 0x339   :  { %2153 = vmatmul.mubr.bf16.gmra.mrb[56].mxu0 %v1173_v11  ;;  %2379 = vmatmul.mubr.bf16.gmra.mrb[56].mxu1 %v1173_v11 }
 0x33a   :  { %2162 = vmatprep.mubr.bf16.mxu0 %v1178_v23  ;;  %2388 = vmatprep.mubr.bf16.mxu1 %v1178_v23 }
 0x33b   :  { %3342 = vmatpush1.bf16.msra.mxu0 %v12273_v36  ;;  %3568 = vmatpush1.bf16.msra.mxu1 %v12276_v49 }
 0x33c   :  { %3343 = vmatprep.subr.bf16.mxu0 %v12281_v24  ;;  %3569 = vmatprep.subr.bf16.mxu1 %v12284_v27 }
 0x33f   :  { %3344 = vmatpush1.bf16.msra.mxu0 %v12279_v28  ;;  %3570 = vmatpush1.bf16.msra.mxu1 %v12282_v29  ;;  %v12303_v28 = vld [vmem:[#allocation12 + $0x220] ss:$16 sps:$4 sm:$0xff]   ;;  %v12306_v29 = vld [vmem:[#allocation12 + $0x228] ss:$16 sps:$4 sm:$0xff]  }
 0x340   :  { %3345 = vmatprep.subr.bf16.mxu0 %v12287_v0  ;;  %3571 = vmatprep.subr.bf16.mxu1 %v12290_v9  ;;  %v12311_v0 = vld [vmem:[#allocation12 + $0x244] ss:$16 sps:$4 sm:$0xff]   ;;  %v12314_v9 = vld [vmem:[#allocation12 + $0x24c] ss:$16 sps:$4 sm:$0xff]  }
 0x341   :  { %2163 = vmatmul.mubr.bf16.gmra.mrb[60].mxu0 %v1177_v32  ;;  %2389 = vmatmul.mubr.bf16.gmra.mrb[60].mxu1 %v1177_v32 }
 0x343   :  { %3346 = vmatpush1.bf16.msra.mxu0 %v12285_v30  ;;  %3572 = vmatpush1.bf16.msra.mxu1 %v12288_v31 }
 0x344   :  { %3347 = vmatprep.subr.bf16.mxu0 %v12293_v47  ;;  %3573 = vmatprep.subr.bf16.mxu1 %v12296_v34 }
 0x347   :  { %3348 = vmatpush1.bf16.msra.mxu0 %v12291_v38  ;;  %3574 = vmatpush1.bf16.msra.mxu1 %v12294_v39  ;;  %v12309_v38 = vld [vmem:[#allocation12 + $0x240] ss:$16 sps:$4 sm:$0xff]   ;;  %v12312_v39 = vld [vmem:[#allocation12 + $0x248] ss:$16 sps:$4 sm:$0xff]  }
 0x348   :  { %3430 = vmatprep.subr.bf16.mxu0 %v12299_v60  ;;  %3656 = vmatprep.subr.bf16.mxu1 %v12302_v41 }
 0x3dc   :  { %v2094_v51 = vpop.f32.mrb[32].mxu0  ;;  %v14379_v52 = vpop.f32.mrb[32].mxu1 }
 0x3dd   :  { %v2096_v18 = vpop.f32.mrb[33].mxu0  ;;  %v14381_v55 = vpop.f32.mrb[33].mxu1 }
 0x3de   :  { %v2098_v57 = vpop.f32.mrb[34].mxu0  ;;  %v14386_v14 = vpop.f32.mrb[34].mxu1 }
 0x3df   :  { %v2399_v58 = vpack.c.bf16 %v2098_v57, %v2094_v51  ;;  %v2100_v62 = vpop.f32.mrb[35].mxu0  ;;  %v14393_v5 = vpop.f32.mrb[35].mxu1 }
 0x3e0   :  { %v2400_v6 = vpack.c.bf16 %v2100_v62, %v2096_v18  ;;  %v2402_v7 = vpack.c.bf16 %v14393_v5, %v14381_v55  ;;  %v12389_v5 = vld [vmem:[#allocation12 + $0x3e4] ss:$16 sps:$4 sm:$0xff]  }
 0x3e1   :  { %v2485_v20 = vadd.bf16 %v14384_v56, %v2399_v58 }
 0x3e2   :  { %v2486_v22 = vadd.bf16 %v14389_v1, %v2400_v6 }
 0x3e3   :  { %v2517_v12 = vmax.bf16 %v15721_v2, %v2485_v20 }
 0x3e4   :  { %v2104_v59 = vpop.f32.mrb[36].mxu0  ;;  %v14399_v25 = vpop.f32.mrb[36].mxu1  ;;  %v2518_v26 = vmax.bf16 %v15721_v2, %v2486_v22  ;;  %v12315_v22 = vld [vmem:[#allocation12 + $0x260] ss:$16 sps:$4 sm:$0xff]  }
 0x3e5   :  { %v2106_v37 = vpop.f32.mrb[37].mxu0  ;;  %v14403_v13 = vpop.f32.mrb[37].mxu1 }
 0x3e6   :  { %v2108_v46 = vpop.f32.mrb[38].mxu0  ;;  %v14405_v35 = vpop.f32.mrb[38].mxu1  ;;  %3349 = vmatprep.mubr.bf16.mxu0 %v2518_v26  ;;  %3575 = vmatprep.mubr.bf16.mxu1 %v2518_v26 }
 0x3e7   :  { %v2403_v11 = vpack.c.bf16 %v2108_v46, %v2104_v59  ;;  %v2110_v49 = vpop.f32.mrb[39].mxu0  ;;  %v14409_v23 = vpop.f32.mrb[39].mxu1  ;;  %3350 = vmatmul.mubr.bf16.vlgmr.msra.gmra.mrb[64].mxu0 %v2517_v12  ;;  %3576 = vmatmul.mubr.bf16.vlgmr.msra.gmra.mrb[64].mxu1 %v2517_v12  ;;  %v12318_v59 = vld [vmem:[#allocation12 + $0x268] ss:$16 sps:$4 sm:$0xff]   ;;  %v12321_v46 = vld [vmem:[#allocation12 + $0x280] ss:$16 sps:$4 sm:$0xff]  }
 0x3e8   :  { %v2404_v24 = vpack.c.bf16 %v2110_v49, %v2106_v37  ;;  %3431 = vmatpush1.bf16.msra.mxu0 %v12297_v50  ;;  %3657 = vmatpush1.bf16.msra.mxu1 %v12300_v10  ;;  %v12323_v50 = vld [vmem:[#allocation12 + $0x284] ss:$16 sps:$4 sm:$0xff]   ;;  %v12326_v10 = vld [vmem:[#allocation12 + $0x28c] ss:$16 sps:$4 sm:$0xff]  }
 0x3e9   :  { %v2489_v32 = vadd.bf16 %v14384_v56, %v2403_v11  ;;  %3432 = vmatprep.subr.bf16.mxu0 %v12305_v16  ;;  %3658 = vmatprep.subr.bf16.mxu1 %v12308_v17  ;;  %v12324_v11 = vld [vmem:[#allocation12 + $0x288] ss:$16 sps:$4 sm:$0xff]  }
 0x3ea   :  { %v2490_v30 = vadd.bf16 %v14389_v1, %v2404_v24 }
 0x3eb   :  { %v2521_v42 = vmax.bf16 %v15721_v2, %v2489_v32  ;;  %v12332_v32 = vld [vmem:[#allocation12 + $0x2ac] ss:$16 sps:$4 sm:$0xff]  }
 0x3ec   :  { %3433 = vmatpush1.bf16.msra.mxu0 %v12303_v28  ;;  %v2114_v31 = vpop.f32.mrb[40].mxu0  ;;  %v14415_v47 = vpop.f32.mrb[40].mxu1  ;;  %3659 = vmatpush1.bf16.msra.mxu1 %v12306_v29  ;;  %v2522_v34 = vmax.bf16 %v15721_v2, %v2490_v30  ;;  %v12329_v29 = vld [vmem:[#allocation12 + $0x2a4] ss:$16 sps:$4 sm:$0xff]  }
 0x3ed   :  { %v2116_v60 = vpop.f32.mrb[41].mxu0  ;;  %v14418_v41 = vpop.f32.mrb[41].mxu1  ;;  %3434 = vmatprep.subr.bf16.mxu0 %v12311_v0  ;;  %3660 = vmatprep.subr.bf16.mxu1 %v12314_v9 }
 0x3ee   :  { %v2118_v19 = vpop.f32.mrb[42].mxu0  ;;  %v14421_v51 = vpop.f32.mrb[42].mxu1  ;;  %3359 = vmatprep.mubr.bf16.mxu0 %v2522_v34  ;;  %3585 = vmatprep.mubr.bf16.mxu1 %v2522_v34 }
 0x3ef   :  { %v2407_v18 = vpack.c.bf16 %v2118_v19, %v2114_v31  ;;  %v2120_v58 = vpop.f32.mrb[43].mxu0  ;;  %v14425_v62 = vpop.f32.mrb[43].mxu1  ;;  %3360 = vmatmul.mubr.bf16.gmra.mrb[68].mxu0 %v2521_v42  ;;  %3586 = vmatmul.mubr.bf16.gmra.mrb[68].mxu1 %v2521_v42  ;;  %v12327_v42 = vld [vmem:[#allocation12 + $0x2a0] ss:$16 sps:$4 sm:$0xff]   ;;  %v12335_v19 = vld [vmem:[#allocation12 + $0x2c4] ss:$16 sps:$4 sm:$0xff]  }
 0x3f0   :  { %v2408_v6 = vpack.c.bf16 %v2120_v58, %v2116_v60  ;;  %3435 = vmatpush1.bf16.msra.mxu0 %v12309_v38  ;;  %3661 = vmatpush1.bf16.msra.mxu1 %v12312_v39 }
 0x3f1   :  { %v2493_v26 = vadd.bf16 %v14384_v56, %v2407_v18  ;;  %3436 = vmatprep.subr.bf16.mxu0 %v12317_v44  ;;  %3662 = vmatprep.subr.bf16.mxu1 %v12320_v53  ;;  %v12330_v44 = vld [vmem:[#allocation12 + $0x2a8] ss:$16 sps:$4 sm:$0xff]   ;;  %v12338_v18 = vld [vmem:[#allocation12 + $0x2cc] ss:$16 sps:$4 sm:$0xff]  }
 0x3f2   :  { %v2494_v12 = vadd.bf16 %v14389_v1, %v2408_v6 }
 0x3f3   :  { %v2525_v28 = vmax.bf16 %v15721_v2, %v2493_v26  ;;  %v12333_v26 = vld [vmem:[#allocation12 + $0x2c0] ss:$16 sps:$4 sm:$0xff]  }
 0x3f4   :  { %3437 = vmatpush1.bf16.msra.mxu0 %v12315_v22  ;;  %v2124_v37 = vpop.f32.mrb[44].mxu0  ;;  %v14431_v16 = vpop.f32.mrb[44].mxu1  ;;  %3663 = vmatpush1.bf16.msra.mxu1 %v12318_v59  ;;  %v2526_v17 = vmax.bf16 %v15721_v2, %v2494_v12 }
 0x3f5   :  { %v2126_v49 = vpop.f32.mrb[45].mxu0  ;;  %v14434_v24 = vpop.f32.mrb[45].mxu1  ;;  %3438 = vmatprep.subr.bf16.mxu0 %v12323_v50  ;;  %3664 = vmatprep.subr.bf16.mxu1 %v12326_v10  ;;  %v12336_v50 = vld [vmem:[#allocation12 + $0x2c8] ss:$16 sps:$4 sm:$0xff]  }
 0x3f6   :  { %v2128_v0 = vpop.f32.mrb[46].mxu0  ;;  %v14437_v9 = vpop.f32.mrb[46].mxu1  ;;  %3369 = vmatprep.mubr.bf16.mxu0 %v2526_v17  ;;  %3595 = vmatprep.mubr.bf16.mxu1 %v2526_v17  ;;  %v12341_v17 = vld [vmem:[#allocation12 + $0x2e4] ss:$16 sps:$4 sm:$0xff]  }
 0x3f7   :  { %v2411_v30 = vpack.c.bf16 %v2128_v0, %v2124_v37  ;;  %v2130_v34 = vpop.f32.mrb[47].mxu0  ;;  %v14441_v38 = vpop.f32.mrb[47].mxu1  ;;  %3370 = vmatmul.mubr.bf16.gmra.mrb[72].mxu0 %v2525_v28  ;;  %3596 = vmatmul.mubr.bf16.gmra.mrb[72].mxu1 %v2525_v28 }
 0x3f8   :  { %v2412_v39 = vpack.c.bf16 %v2130_v34, %v2126_v49  ;;  %3439 = vmatpush1.bf16.msra.mxu0 %v12321_v46  ;;  %3665 = vmatpush1.bf16.msra.mxu1 %v12324_v11  ;;  %v12344_v46 = vld [vmem:[#allocation12 + $0x2ec] ss:$16 sps:$4 sm:$0xff]  }
 0x3f9   :  { %v2497_v53 = vadd.bf16 %v14384_v56, %v2411_v30  ;;  %3440 = vmatprep.subr.bf16.mxu0 %v12329_v29  ;;  %3666 = vmatprep.subr.bf16.mxu1 %v12332_v32  ;;  %v12354_v29 = vld [vmem:[#allocation12 + $0x328] ss:$16 sps:$4 sm:$0xff]  }
 0x3fa   :  { %v2498_v58 = vadd.bf16 %v14389_v1, %v2412_v39  ;;  %v12339_v39 = vld [vmem:[#allocation12 + $0x2e0] ss:$16 sps:$4 sm:$0xff]  }
 0x3fb   :  { %v2529_v37 = vmax.bf16 %v15721_v2, %v2497_v53  ;;  %v12347_v53 = vld [vmem:[#allocation12 + $0x304] ss:$16 sps:$4 sm:$0xff]  }
 0x3fc   :  { %3441 = vmatpush1.bf16.msra.mxu0 %v12327_v42  ;;  %v2134_v6 = vpop.f32.mrb[48].mxu0  ;;  %v14447_v22 = vpop.f32.mrb[48].mxu1  ;;  %3667 = vmatpush1.bf16.msra.mxu1 %v12330_v44  ;;  %v2530_v59 = vmax.bf16 %v15721_v2, %v2498_v58  ;;  %v12342_v42 = vld [vmem:[#allocation12 + $0x2e8] ss:$16 sps:$4 sm:$0xff]  }
 0x3fd   :  { %v2136_v10 = vpop.f32.mrb[49].mxu0  ;;  %v14450_v12 = vpop.f32.mrb[49].mxu1  ;;  %3442 = vmatprep.subr.bf16.mxu0 %v12335_v19  ;;  %3668 = vmatprep.subr.bf16.mxu1 %v12338_v18  ;;  %v12350_v19 = vld [vmem:[#allocation12 + $0x30c] ss:$16 sps:$4 sm:$0xff]  }
 0x3fe   :  { %v2138_v11 = vpop.f32.mrb[50].mxu0  ;;  %v14453_v49 = vpop.f32.mrb[50].mxu1  ;;  %3379 = vmatprep.mubr.bf16.mxu0 %v2530_v59  ;;  %3605 = vmatprep.mubr.bf16.mxu1 %v2530_v59 }
 0x3ff   :  { %v2415_v28 = vpack.c.bf16 %v2138_v11, %v2134_v6  ;;  %v2140_v32 = vpop.f32.mrb[51].mxu0  ;;  %v14457_v0 = vpop.f32.mrb[51].mxu1  ;;  %3380 = vmatmul.mubr.bf16.gmra.mrb[76].mxu0 %v2529_v37  ;;  %3606 = vmatmul.mubr.bf16.gmra.mrb[76].mxu1 %v2529_v37  ;;  %v12356_v11 = vld [vmem:[#allocation12 + $0x32c] ss:$16 sps:$4 sm:$0xff]  }
 0x400   :  { %v2416_v30 = vpack.c.bf16 %v2140_v32, %v2136_v10  ;;  %3443 = vmatpush1.bf16.msra.mxu0 %v12333_v26  ;;  %3669 = vmatpush1.bf16.msra.mxu1 %v12336_v50  ;;  %v12345_v10 = vld [vmem:[#allocation12 + $0x300] ss:$16 sps:$4 sm:$0xff]   ;;  %v12348_v26 = vld [vmem:[#allocation12 + $0x308] ss:$16 sps:$4 sm:$0xff]  }
 0x401   :  { %v2501_v44 = vadd.bf16 %v14384_v56, %v2415_v28  ;;  %3444 = vmatprep.subr.bf16.mxu0 %v12341_v17  ;;  %3670 = vmatprep.subr.bf16.mxu1 %v12344_v46  ;;  %v12353_v46 = vld [vmem:[#allocation12 + $0x324] ss:$16 sps:$4 sm:$0xff]  }
 0x402   :  { %v2502_v18 = vadd.bf16 %v14389_v1, %v2416_v30 }
 0x403   :  { %v2533_v17 = vmax.bf16 %v15721_v2, %v2501_v44 }
 0x404   :  { %3445 = vmatpush1.bf16.msra.mxu0 %v12339_v39  ;;  %v2144_v58 = vpop.f32.mrb[52].mxu0  ;;  %v14463_v6 = vpop.f32.mrb[52].mxu1  ;;  %3671 = vmatpush1.bf16.msra.mxu1 %v12342_v42  ;;  %v2534_v59 = vmax.bf16 %v15721_v2, %v2502_v18 }
 0x405   :  { %v2146_v50 = vpop.f32.mrb[53].mxu0  ;;  %v14466_v37 = vpop.f32.mrb[53].mxu1  ;;  %3446 = vmatprep.subr.bf16.mxu0 %v12347_v53  ;;  %3672 = vmatprep.subr.bf16.mxu1 %v12350_v19  ;;  %v12351_v19 = vld [vmem:[#allocation12 + $0x320] ss:$16 sps:$4 sm:$0xff]  }
 0x406   :  { %v2148_v28 = vpop.f32.mrb[54].mxu0  ;;  %v14469_v32 = vpop.f32.mrb[54].mxu1  ;;  %3389 = vmatprep.mubr.bf16.mxu0 %v2534_v59  ;;  %3615 = vmatprep.mubr.bf16.mxu1 %v2534_v59  ;;  %v12362_v59 = vld [vmem:[#allocation12 + $0x34c] ss:$16 sps:$4 sm:$0xff]  }
 0x407   :  { %v2419_v30 = vpack.c.bf16 %v2148_v28, %v2144_v58  ;;  %v2150_v42 = vpop.f32.mrb[55].mxu0  ;;  %v14473_v18 = vpop.f32.mrb[55].mxu1  ;;  %3390 = vmatmul.mubr.bf16.gmra.mrb[80].mxu0 %v2533_v17  ;;  %3616 = vmatmul.mubr.bf16.gmra.mrb[80].mxu1 %v2533_v17  ;;  %v12359_v58 = vld [vmem:[#allocation12 + $0x344] ss:$16 sps:$4 sm:$0xff]   ;;  %v12357_v17 = vld [vmem:[#allocation12 + $0x340] ss:$16 sps:$4 sm:$0xff]  }
 0x408   :  { %v2420_v53 = vpack.c.bf16 %v2150_v42, %v2146_v50  ;;  %3447 = vmatpush1.bf16.msra.mxu0 %v12345_v10  ;;  %3673 = vmatpush1.bf16.msra.mxu1 %v12348_v26  ;;  %v12360_v10 = vld [vmem:[#allocation12 + $0x348] ss:$16 sps:$4 sm:$0xff]  }
 0x409   :  { %v2505_v34 = vadd.bf16 %v14384_v56, %v2419_v30  ;;  %3448 = vmatprep.subr.bf16.mxu0 %v12353_v46  ;;  %3674 = vmatprep.subr.bf16.mxu1 %v12356_v11  ;;  %v12365_v11 = vld [vmem:[#allocation12 + $0x364] ss:$16 sps:$4 sm:$0xff]   ;;  %v12368_v30 = vld [vmem:[#allocation12 + $0x36c] ss:$16 sps:$4 sm:$0xff]  }
 0x40a   :  { %v2506_v28 = vadd.bf16 %v14389_v1, %v2420_v53  ;;  %v2456_v53 = vcombine.high %v14373_v45, %v14373_v45  ;;  %v12363_v45 = vld [vmem:[#allocation12 + $0x360] ss:$16 sps:$4 sm:$0xff]  }
 0x40b   :  { %v2537_v46 = vmax.bf16 %v15721_v2, %v2505_v34 }
 0x40c   :  { %3449 = vmatpush1.bf16.msra.mxu0 %v12351_v19  ;;  %v2154_v39 = vpop.f32.mrb[56].mxu0  ;;  %v14479_v31 = vpop.f32.mrb[56].mxu1  ;;  %3675 = vmatpush1.bf16.msra.mxu1 %v12354_v29  ;;  %v2538_v50 = vmax.bf16 %v15721_v2, %v2506_v28 }
 0x40d   :  { %v2156_v26 = vpop.f32.mrb[57].mxu0  ;;  %v14482_v42 = vpop.f32.mrb[57].mxu1  ;;  %3450 = vmatprep.subr.bf16.mxu0 %v12359_v58  ;;  %3676 = vmatprep.subr.bf16.mxu1 %v12362_v59  ;;  %v12366_v59 = vld [vmem:[#allocation12 + $0x368] ss:$16 sps:$4 sm:$0xff]  }
 0x40e   :  { %v2158_v19 = vpop.f32.mrb[58].mxu0  ;;  %v14487_v44 = vpop.f32.mrb[58].mxu1  ;;  %3399 = vmatprep.mubr.bf16.mxu0 %v2538_v50  ;;  %3625 = vmatprep.mubr.bf16.mxu1 %v2538_v50  ;;  %v12374_v50 = vld [vmem:[#allocation12 + $0x38c] ss:$16 sps:$4 sm:$0xff]  }
 0x40f   :  { %v2423_v29 = vpack.c.bf16 %v2158_v19, %v2154_v39  ;;  %v2160_v60 = vpop.f32.mrb[59].mxu0  ;;  %v14491_v57 = vpop.f32.mrb[59].mxu1  ;;  %3400 = vmatmul.mubr.bf16.gmra.mrb[84].mxu0 %v2537_v46  ;;  %3626 = vmatmul.mubr.bf16.gmra.mrb[84].mxu1 %v2537_v46  ;;  %v12371_v39 = vld [vmem:[#allocation12 + $0x384] ss:$16 sps:$4 sm:$0xff]   ;;  %v2479_v19 = vpack.i.b16 %v2456_v53, %v2456_v53 }
 0x410   :  { %v2424_v34 = vpack.c.bf16 %v2160_v60, %v2156_v26  ;;  %3451 = vmatpush1.bf16.msra.mxu0 %v12357_v17  ;;  %3677 = vmatpush1.bf16.msra.mxu1 %v12360_v10  ;;  %v12369_v17 = vld [vmem:[#allocation12 + $0x380] ss:$16 sps:$4 sm:$0xff]   ;;  %v12372_v10 = vld [vmem:[#allocation12 + $0x388] ss:$16 sps:$4 sm:$0xff]   ;;  %v2455_v26 = vcombine.high %v14370_v43, %v14370_v43  ;;  %v12377_v53 = vld [vmem:[#allocation12 + $0x3a4] ss:$16 sps:$4 sm:$0xff]  }
 0x411   :  { %v2509_v20 = vadd.bf16 %v14384_v56, %v2423_v29  ;;  %3452 = vmatprep.subr.bf16.mxu0 %v12365_v11  ;;  %3678 = vmatprep.subr.bf16.mxu1 %v12368_v30 }
 0x412   :  { %v2510_v28 = vadd.bf16 %v14389_v1, %v2424_v34  ;;  %v12380_v34 = vld [vmem:[#allocation12 + $0x3ac] ss:$16 sps:$4 sm:$0xff]  }
 0x413   :  { %v2541_v30 = vmax.bf16 %v15721_v2, %v2509_v20 }
 0x414   :  { %3453 = vmatpush1.bf16.msra.mxu0 %v12363_v45  ;;  %v2164_v36 = vpop.f32.mrb[60].mxu0  ;;  %v14497_v46 = vpop.f32.mrb[60].mxu1  ;;  %3679 = vmatpush1.bf16.msra.mxu1 %v12366_v59  ;;  %v2542_v60 = vmax.bf16 %v15721_v2, %v2510_v28  ;;  %v14506_v45 = vrot.slane %v2479_v19, %v14239_v63  ;;  %v12378_v19 = vld [vmem:[#allocation12 + $0x3a8] ss:$16 sps:$4 sm:$0xff]   ;;  %v2472_v2 = vpack.i.b16 %v2455_v26, %v2455_v26 }
 0x415   :  { %v2166_v29 = vpop.f32.mrb[61].mxu0  ;;  %v14502_v11 = vpop.f32.mrb[61].mxu1  ;;  %3454 = vmatprep.subr.bf16.mxu0 %v12371_v39  ;;  %3680 = vmatprep.subr.bf16.mxu1 %v12374_v50  ;;  %v12375_v50 = vld [vmem:[#allocation12 + $0x3a0] ss:$16 sps:$4 sm:$0xff]  }
 0x416   :  { %v2168_v59 = vpop.f32.mrb[62].mxu0  ;;  %v14508_v58 = vpop.f32.mrb[62].mxu1  ;;  %3409 = vmatprep.mubr.bf16.mxu0 %v2542_v60  ;;  %3635 = vmatprep.mubr.bf16.mxu1 %v2542_v60  ;;  %v14524_v26 = vrot.slane %v2472_v2, %v14239_v63  ;;  %v15731_v2 = vpack.c.bf16 %v14386_v14, %v14379_v52  ;;  %v12396_v14 = vld [vmem:[#allocation15 + $0x8] ss:$16 sps:$4 sm:$0xff]  }
 0x417   :  { %v2427_v28 = vpack.c.bf16 %v2168_v59, %v2164_v36  ;;  %v2429_v43 = vpack.c.bf16 %v14508_v58, %v14497_v46  ;;  %v2170_v27 = vpop.f32.mrb[63].mxu0  ;;  %v14512_v3 = vpop.f32.mrb[63].mxu1  ;;  %3410 = vmatmul.mubr.bf16.gmra.mrb[88].mxu0 %v2541_v30  ;;  %3636 = vmatmul.mubr.bf16.gmra.mrb[88].mxu1 %v2541_v30  ;;  %v12383_v36 = vld [vmem:[#allocation12 + $0x3c4] ss:$16 sps:$4 sm:$0xff]   ;;  %v12386_v59 = vld [vmem:[#allocation12 + $0x3cc] ss:$16 sps:$4 sm:$0xff]   ;;  %v2488_v30 = vadd.bf16 %v14506_v45, %v2402_v7 }
 0x418   :  { %v2428_v20 = vpack.c.bf16 %v2170_v27, %v2166_v29  ;;  %v2430_v39 = vpack.c.bf16 %v14512_v3, %v14502_v11  ;;  %3455 = vmatpush1.bf16.msra.mxu0 %v12369_v17  ;;  %3681 = vmatpush1.bf16.msra.mxu1 %v12372_v10  ;;  %v15730_v17 = vmov 0   ;;  %v12381_v29 = vld [vmem:[#allocation12 + $0x3c0] ss:$16 sps:$4 sm:$0xff]   ;;  %v12392_v7 = vld [vmem:[#allocation12 + $0x3ec] ss:$16 sps:$4 sm:$0xff]  }
 0x419   :  { %v2513_v60 = vadd.bf16 %v14384_v56, %v2427_v28  ;;  %3456 = vmatprep.subr.bf16.mxu0 %v12377_v53  ;;  %3682 = vmatprep.subr.bf16.mxu1 %v12380_v34  ;;  %v12384_v53 = vld [vmem:[#allocation12 + $0x3c8] ss:$16 sps:$4 sm:$0xff]   ;;  %v2520_v55 = vmax.bf16 %v15730_v17, %v2488_v30  ;;  %v2487_v34 = vadd.bf16 %v14524_v26, %v15731_v2  ;;  %v12476_v3 = vld [vmem:[#allocation15 + $0x1ac] ss:$16 sps:$4 sm:$0xff]  }
 0x41a   :  { %v2514_v27 = vadd.bf16 %v14389_v1, %v2428_v20  ;;  %v12387_v1 = vld [vmem:[#allocation12 + $0x3e0] ss:$16 sps:$4 sm:$0xff]   ;;  %v12390_v28 = vld [vmem:[#allocation12 + $0x3e8] ss:$16 sps:$4 sm:$0xff]   ;;  %v2515_v11 = vadd.bf16 %v14524_v26, %v2429_v43  ;;  %v12483_v43 = vld [vmem:[#allocation15 + $0x1e0] ss:$16 sps:$4 sm:$0xff]  }
 0x41b   :  { %v2545_v56 = vmax.bf16 %v15730_v17, %v2513_v60  ;;  %v12395_v20 = vld [vmem:[#allocation15 + $0x4] ss:$16 sps:$4 sm:$0xff]   ;;  %v12398_v60 = vld [vmem:[#allocation15 + $0xc] ss:$16 sps:$4 sm:$0xff]  }
 0x41c   :  { %3457 = vmatpush1.bf16.msra.mxu0 %v12375_v50  ;;  %3683 = vmatpush1.bf16.msra.mxu1 %v12378_v19  ;;  %v2546_v10 = vmax.bf16 %v15730_v17, %v2514_v27  ;;  %v15732_v50 = vpack.c.bf16 %v14409_v23, %v14403_v13  ;;  %v12401_v30 = vld [vmem:[#allocation15 + $0x24] ss:$16 sps:$4 sm:$0xff]   ;;  %v12404_v27 = vld [vmem:[#allocation15 + $0x2c] ss:$16 sps:$4 sm:$0xff]   ;;  %v15733_v13 = vpack.c.bf16 %v14405_v35, %v14399_v25  ;;  %v12405_v25 = vld [vmem:[#allocation15 + $0x40] ss:$16 sps:$4 sm:$0xff]  }
 0x41d   :  { %3458 = vmatprep.subr.bf16.mxu0 %v12383_v36  ;;  %3684 = vmatprep.subr.bf16.mxu1 %v12386_v59  ;;  %v2519_v36 = vmax.bf16 %v15730_v17, %v2487_v34  ;;  %v12393_v59 = vld [vmem:[#allocation15] ss:$16 sps:$4 sm:$0xff]   ;;  %v12413_v2 = vld [vmem:[#allocation15 + $0x64] ss:$16 sps:$4 sm:$0xff]   ;;  %v12488_v46 = vld [vmem:[#allocation15 + $0x1ec] ss:$16 sps:$4 sm:$0xff]  }
 0x41e   :  { %3419 = vmatprep.mubr.bf16.mxu0 %v2546_v10  ;;  %3645 = vmatprep.mubr.bf16.mxu1 %v2546_v10  ;;  %v2492_v19 = vadd.bf16 %v14506_v45, %v15732_v50  ;;  %v2491_v23 = vadd.bf16 %v14524_v26, %v15733_v13  ;;  %v12399_v10 = vld [vmem:[#allocation15 + $0x20] ss:$16 sps:$4 sm:$0xff]   ;;  %v15738_v13 = vpack.c.bf16 %v14457_v0, %v14450_v12  ;;  %v12440_v12 = vld [vmem:[#allocation15 + $0xec] ss:$16 sps:$4 sm:$0xff]   ;;  %v12485_v58 = vld [vmem:[#allocation15 + $0x1e4] ss:$16 sps:$4 sm:$0xff]  }
 0x41f   :  { %3420 = vmatmul.mubr.bf16.gmra.mrb[92].mxu0 %v2545_v56  ;;  %3646 = vmatmul.mubr.bf16.gmra.mrb[92].mxu1 %v2545_v56  ;;  %v15739_v0 = vpack.c.bf16 %v14453_v49, %v14447_v22  ;;  %v12441_v22 = vld [vmem:[#allocation15 + $0x100] ss:$16 sps:$4 sm:$0xff]  }
 0x420   :  { %3459 = vmatpush1.bf16.msra.mxu0 %v12381_v29  ;;  %3462 = vmatprep.mubr.bf16.mxu0 %v2520_v55  ;;  %v2524_v52 = vmax.bf16 %v15730_v17, %v2492_v19  ;;  %v15734_v29 = vpack.c.bf16 %v14425_v62, %v14418_v41  ;;  %v12416_v41 = vld [vmem:[#allocation15 + $0x6c] ss:$16 sps:$4 sm:$0xff]   ;;  %v15735_v62 = vpack.c.bf16 %v14421_v51, %v14415_v47  ;;  %v12414_v19 = vld [vmem:[#allocation15 + $0x68] ss:$16 sps:$4 sm:$0xff]   ;;  %v12417_v47 = vld [vmem:[#allocation15 + $0x80] ss:$16 sps:$4 sm:$0xff]  }
 0x421   :  { %3685 = vmatpush1.bf16.msra.mxu1 %v12384_v53  ;;  %3688 = vmatprep.mubr.bf16.mxu1 %v2520_v55  ;;  %v12402_v53 = vld [vmem:[#allocation15 + $0x28] ss:$16 sps:$4 sm:$0xff]   ;;  %v12407_v55 = vld [vmem:[#allocation15 + $0x44] ss:$16 sps:$4 sm:$0xff]  }
 0x422   :  { %3460 = vmatprep.subr.bf16.mxu0 %v12389_v5  ;;  %3686 = vmatprep.subr.bf16.mxu1 %v12392_v7  ;;  %v2496_v56 = vadd.bf16 %v14506_v45, %v15734_v29  ;;  %v12410_v5 = vld [vmem:[#allocation15 + $0x4c] ss:$16 sps:$4 sm:$0xff]   ;;  %v2523_v7 = vmax.bf16 %v15730_v17, %v2491_v23  ;;  %v2495_v34 = vadd.bf16 %v14524_v26, %v15735_v62  ;;  %v12431_v29 = vld [vmem:[#allocation15 + $0xc4] ss:$16 sps:$4 sm:$0xff]  }
 0x423   :  { %v2504_v23 = vadd.bf16 %v14506_v45, %v15738_v13  ;;  %v12446_v62 = vld [vmem:[#allocation15 + $0x10c] ss:$16 sps:$4 sm:$0xff]   ;;  %v12462_v13 = vld [vmem:[#allocation15 + $0x168] ss:$16 sps:$4 sm:$0xff]  }
 0x424   :  { %3461 = vmatpush1.bf16.msra.mxu0 %v12387_v1  ;;  %v2528_v35 = vmax.bf16 %v15730_v17, %v2496_v56  ;;  %v12408_v1 = vld [vmem:[#allocation15 + $0x48] ss:$16 sps:$4 sm:$0xff]   ;;  %v12434_v56 = vld [vmem:[#allocation15 + $0xcc] ss:$16 sps:$4 sm:$0xff]  }
 0x425   :  { %3687 = vmatpush1.bf16.msra.mxu1 %v12390_v28  ;;  %4687 = vmatprep.subr.bf16.mxu0 %v12395_v20  ;;  %v12411_v28 = vld [vmem:[#allocation15 + $0x60] ss:$16 sps:$4 sm:$0xff]   ;;  %v15736_v20 = vpack.c.bf16 %v14441_v38, %v14434_v24  ;;  %v12428_v24 = vld [vmem:[#allocation15 + $0xac] ss:$16 sps:$4 sm:$0xff]   ;;  %v15737_v38 = vpack.c.bf16 %v14437_v9, %v14431_v16  ;;  %v2536_v9 = vmax.bf16 %v15730_v17, %v2504_v23  ;;  %v12467_v23 = vld [vmem:[#allocation15 + $0x184] ss:$16 sps:$4 sm:$0xff]  }
 0x426   :  { %4913 = vmatprep.subr.bf16.mxu1 %v12398_v60  ;;  %v12419_v60 = vld [vmem:[#allocation15 + $0x84] ss:$16 sps:$4 sm:$0xff]   ;;  %v12429_v16 = vld [vmem:[#allocation15 + $0xc0] ss:$16 sps:$4 sm:$0xff]  }
 0x427   :  { %3463 = vmatmul.mubr.bf16.vlgmr.msra.gmra.mrb[64].mxu0 %v2519_v36  ;;  %v2500_v50 = vadd.bf16 %v14506_v45, %v15736_v20  ;;  %v12449_v20 = vld [vmem:[#allocation15 + $0x124] ss:$16 sps:$4 sm:$0xff]  }
 0x428   :  { %3689 = vmatmul.mubr.bf16.vlgmr.msra.gmra.mrb[64].mxu1 %v2519_v36  ;;  %3472 = vmatprep.mubr.bf16.mxu0 %v2524_v52  ;;  %v12422_v36 = vld [vmem:[#allocation15 + $0x8c] ss:$16 sps:$4 sm:$0xff]  }
 0x429   :  { %3698 = vmatprep.mubr.bf16.mxu1 %v2524_v52  ;;  %4688 = vmatpush1.bf16.msra.mxu0 %v12393_v59  ;;  %v2527_v59 = vmax.bf16 %v15730_v17, %v2495_v34  ;;  %v2532_v51 = vmax.bf16 %v15730_v17, %v2500_v50  ;;  %v12420_v52 = vld [vmem:[#allocation15 + $0x88] ss:$16 sps:$4 sm:$0xff]  }
 0x42a   :  { %4914 = vmatpush1.bf16.msra.mxu1 %v12396_v14  ;;  %4689 = vmatprep.subr.bf16.mxu0 %v12401_v30  ;;  %v12425_v14 = vld [vmem:[#allocation15 + $0xa4] ss:$16 sps:$4 sm:$0xff]   ;;  %v2499_v30 = vadd.bf16 %v14524_v26, %v15737_v38 }
 0x42b   :  { %4915 = vmatprep.subr.bf16.mxu1 %v12404_v27  ;;  %v12423_v27 = vld [vmem:[#allocation15 + $0xa0] ss:$16 sps:$4 sm:$0xff]  }
 0x42d   :  { %4690 = vmatpush1.bf16.msra.mxu0 %v12399_v10  ;;  %v12426_v10 = vld [vmem:[#allocation15 + $0xa8] ss:$16 sps:$4 sm:$0xff]  }
 0x42e   :  { %4916 = vmatpush1.bf16.msra.mxu1 %v12402_v53  ;;  %4691 = vmatprep.subr.bf16.mxu0 %v12407_v55  ;;  %v2531_v53 = vmax.bf16 %v15730_v17, %v2499_v30  ;;  %v12432_v55 = vld [vmem:[#allocation15 + $0xc8] ss:$16 sps:$4 sm:$0xff]   ;;  %v12459_v30 = vld [vmem:[#allocation15 + $0x160] ss:$16 sps:$4 sm:$0xff]  }
 0x42f   :  { %3473 = vmatmul.mubr.bf16.gmra.mrb[68].mxu0 %v2523_v7  ;;  %4917 = vmatprep.subr.bf16.mxu1 %v12410_v5  ;;  %v12437_v5 = vld [vmem:[#allocation15 + $0xe4] ss:$16 sps:$4 sm:$0xff]  }
 0x430   :  { %3699 = vmatmul.mubr.bf16.gmra.mrb[68].mxu1 %v2523_v7  ;;  %3482 = vmatprep.mubr.bf16.mxu0 %v2528_v35  ;;  %v2503_v7 = vadd.bf16 %v14524_v26, %v15739_v0  ;;  %v12491_v0 = vld [vmem:[#allocation15 + $0x204] ss:$16 sps:$4 sm:$0xff]  }
 0x431   :  { %3708 = vmatprep.mubr.bf16.mxu1 %v2528_v35  ;;  %4692 = vmatpush1.bf16.msra.mxu0 %v12405_v25  ;;  %v12435_v25 = vld [vmem:[#allocation15 + $0xe0] ss:$16 sps:$4 sm:$0xff]   ;;  %v15740_v35 = vpack.c.bf16 %v14473_v18, %v14466_v37  ;;  %v12452_v37 = vld [vmem:[#allocation15 + $0x12c] ss:$16 sps:$4 sm:$0xff]   ;;  %v15741_v18 = vpack.c.bf16 %v14469_v32, %v14463_v6 }
 0x432   :  { %4918 = vmatpush1.bf16.msra.mxu1 %v12408_v1  ;;  %4693 = vmatprep.subr.bf16.mxu0 %v12413_v2  ;;  %v12438_v2 = vld [vmem:[#allocation15 + $0xe8] ss:$16 sps:$4 sm:$0xff]   ;;  %v2535_v34 = vmax.bf16 %v15730_v17, %v2503_v7  ;;  %v12453_v6 = vld [vmem:[#allocation15 + $0x140] ss:$16 sps:$4 sm:$0xff]   ;;  %v12494_v7 = vld [vmem:[#allocation15 + $0x20c] ss:$16 sps:$4 sm:$0xff]  }
 0x433   :  { %4919 = vmatprep.subr.bf16.mxu1 %v12416_v41  ;;  %v2508_v1 = vadd.bf16 %v14506_v45, %v15740_v35  ;;  %v12443_v41 = vld [vmem:[#allocation15 + $0x104] ss:$16 sps:$4 sm:$0xff]   ;;  %v2507_v50 = vadd.bf16 %v14524_v26, %v15741_v18 }
 0x435   :  { %4694 = vmatpush1.bf16.msra.mxu0 %v12411_v28  ;;  %v2540_v49 = vmax.bf16 %v15730_v17, %v2508_v1  ;;  %v12444_v28 = vld [vmem:[#allocation15 + $0x108] ss:$16 sps:$4 sm:$0xff]  }
 0x436   :  { %4920 = vmatpush1.bf16.msra.mxu1 %v12414_v19  ;;  %4695 = vmatprep.subr.bf16.mxu0 %v12419_v60  ;;  %v12447_v19 = vld [vmem:[#allocation15 + $0x120] ss:$16 sps:$4 sm:$0xff]   ;;  %v15742_v60 = vpack.c.bf16 %v14491_v57, %v14482_v42  ;;  %v12464_v57 = vld [vmem:[#allocation15 + $0x16c] ss:$16 sps:$4 sm:$0xff]   ;;  %v15743_v42 = vpack.c.bf16 %v14487_v44, %v14479_v31 }
 0x437   :  { %3483 = vmatmul.mubr.bf16.gmra.mrb[72].mxu0 %v2527_v59  ;;  %4921 = vmatprep.subr.bf16.mxu1 %v12422_v36  ;;  %v12465_v31 = vld [vmem:[#allocation15 + $0x180] ss:$16 sps:$4 sm:$0xff]  }
 0x438   :  { %3709 = vmatmul.mubr.bf16.gmra.mrb[72].mxu1 %v2527_v59  ;;  %3492 = vmatprep.mubr.bf16.mxu0 %v2532_v51  ;;  %v2512_v36 = vadd.bf16 %v14506_v45, %v15742_v60  ;;  %v12450_v59 = vld [vmem:[#allocation15 + $0x128] ss:$16 sps:$4 sm:$0xff]   ;;  %v2511_v38 = vadd.bf16 %v14524_v26, %v15743_v42 }
 0x439   :  { %3718 = vmatprep.mubr.bf16.mxu1 %v2532_v51  ;;  %4696 = vmatpush1.bf16.msra.mxu0 %v12417_v47  ;;  %v12455_v47 = vld [vmem:[#allocation15 + $0x144] ss:$16 sps:$4 sm:$0xff]   ;;  %v12458_v51 = vld [vmem:[#allocation15 + $0x14c] ss:$16 sps:$4 sm:$0xff]   ;;  %v12486_v26 = vld [vmem:[#allocation15 + $0x1e8] ss:$16 sps:$4 sm:$0xff]  }
 0x43a   :  { %4922 = vmatpush1.bf16.msra.mxu1 %v12420_v52  ;;  %4697 = vmatprep.subr.bf16.mxu0 %v12425_v14  ;;  %v2539_v52 = vmax.bf16 %v15730_v17, %v2507_v50  ;;  %v2544_v32 = vmax.bf16 %v15730_v17, %v2512_v36  ;;  %v12456_v14 = vld [vmem:[#allocation15 + $0x148] ss:$16 sps:$4 sm:$0xff]  }
 0x43b   :  { %4923 = vmatprep.subr.bf16.mxu1 %v12428_v24  ;;  %v12461_v24 = vld [vmem:[#allocation15 + $0x164] ss:$16 sps:$4 sm:$0xff]  }
 0x43d   :  { %4698 = vmatpush1.bf16.msra.mxu0 %v12423_v27  ;;  %v2516_v27 = vadd.bf16 %v14506_v45, %v2430_v39  ;;  %v12471_v45 = vld [vmem:[#allocation15 + $0x1a0] ss:$16 sps:$4 sm:$0xff]   ;;  %v12474_v39 = vld [vmem:[#allocation15 + $0x1a8] ss:$16 sps:$4 sm:$0xff]  }
 0x43e   :  { %4924 = vmatpush1.bf16.msra.mxu1 %v12426_v10  ;;  %4699 = vmatprep.subr.bf16.mxu0 %v12431_v29  ;;  %v12470_v10 = vld [vmem:[#allocation15 + $0x18c] ss:$16 sps:$4 sm:$0xff]   ;;  %v2543_v29 = vmax.bf16 %v15730_v17, %v2511_v38 }
 0x43f   :  { %3493 = vmatmul.mubr.bf16.gmra.mrb[76].mxu0 %v2531_v53  ;;  %4925 = vmatprep.subr.bf16.mxu1 %v12434_v56  ;;  %v2548_v44 = vmax.bf16 %v15730_v17, %v2516_v27  ;;  %v12468_v56 = vld [vmem:[#allocation15 + $0x188] ss:$16 sps:$4 sm:$0xff]   ;;  %v12497_v27 = vld [vmem:[#allocation15 + $0x224] ss:$16 sps:$4 sm:$0xff]  }
 0x440   :  { %3719 = vmatmul.mubr.bf16.gmra.mrb[76].mxu1 %v2531_v53  ;;  %3502 = vmatprep.mubr.bf16.mxu0 %v2536_v9  ;;  %v12473_v53 = vld [vmem:[#allocation15 + $0x1a4] ss:$16 sps:$4 sm:$0xff]  }
 0x441   :  { %3728 = vmatprep.mubr.bf16.mxu1 %v2536_v9  ;;  %4700 = vmatpush1.bf16.msra.mxu0 %v12429_v16  ;;  %v2547_v16 = vmax.bf16 %v15730_v17, %v2515_v11  ;;  %v12479_v9 = vld [vmem:[#allocation15 + $0x1c4] ss:$16 sps:$4 sm:$0xff]   ;;  %v12495_v11 = vld [vmem:[#allocation15 + $0x220] ss:$16 sps:$4 sm:$0xff]  }
 0x442   :  { %4926 = vmatpush1.bf16.msra.mxu1 %v12432_v55  ;;  %4701 = vmatprep.subr.bf16.mxu0 %v12437_v5  ;;  %v12482_v55 = vld [vmem:[#allocation15 + $0x1cc] ss:$16 sps:$4 sm:$0xff]   ;;  %v12477_v5 = vld [vmem:[#allocation15 + $0x1c0] ss:$16 sps:$4 sm:$0xff]  }
 0x443   :  { %4927 = vmatprep.subr.bf16.mxu1 %v12440_v12  ;;  %v12480_v12 = vld [vmem:[#allocation15 + $0x1c8] ss:$16 sps:$4 sm:$0xff]  }
 0x445   :  { %4702 = vmatpush1.bf16.msra.mxu0 %v12435_v25  ;;  %v10638_v25 = vld.sshfl [vmem:[#allocation14] sm:$0x33 pattern:$0x75316420] }
 0x446   :  { %4928 = vmatpush1.bf16.msra.mxu1 %v12438_v2  ;;  %4703 = vmatprep.subr.bf16.mxu0 %v12443_v41  ;;  %v3810_v35 = vcombine.high %v10638_v25, %v10638_v25  ;;  %v14604_v1 = vrot.slane %v10638_v25, %v14241_v4  ;;  %v12509_v25 = vld [vmem:[#allocation15 + $0x264] ss:$16 sps:$4 sm:$0xff]  }
 0x447   :  { %3503 = vmatmul.mubr.bf16.gmra.mrb[80].mxu0 %v2535_v34  ;;  %4929 = vmatprep.subr.bf16.mxu1 %v12446_v62 }
 0x448   :  { %3729 = vmatmul.mubr.bf16.gmra.mrb[80].mxu1 %v2535_v34  ;;  %3512 = vmatprep.mubr.bf16.mxu0 %v2540_v49  ;;  %v14607_v2 = vrot.slane %v3810_v35, %v14241_v4  ;;  %v3828_v41 = vpack.i.b16 %v14604_v1, %v14604_v1  ;;  %v12512_v35 = vld [vmem:[#allocation15 + $0x26c] ss:$16 sps:$4 sm:$0xff]  }
 0x449   :  { %3738 = vmatprep.mubr.bf16.mxu1 %v2540_v49  ;;  %4704 = vmatpush1.bf16.msra.mxu0 %v12441_v22 }
 0x44a   :  { %4930 = vmatpush1.bf16.msra.mxu1 %v12444_v28  ;;  %4705 = vmatprep.subr.bf16.mxu0 %v12449_v20  ;;  %v3835_v62 = vpack.i.b16 %v14607_v2, %v14607_v2  ;;  %v14616_v28 = vrot.slane %v3828_v41, %v14239_v63 }
 0x44b   :  { %4931 = vmatprep.subr.bf16.mxu1 %v12452_v37 }
 0x44c   :  { %v14621_v18 = vrot.slane %v3835_v62, %v14239_v63 }
 0x44d   :  { %4706 = vmatpush1.bf16.msra.mxu0 %v12447_v19 }
 0x44e   :  { %4932 = vmatpush1.bf16.msra.mxu1 %v12450_v59  ;;  %4707 = vmatprep.subr.bf16.mxu0 %v12455_v47 }
 0x44f   :  { %3513 = vmatmul.mubr.bf16.gmra.mrb[84].mxu0 %v2539_v52  ;;  %4933 = vmatprep.subr.bf16.mxu1 %v12458_v51 }
 0x450   :  { %3739 = vmatmul.mubr.bf16.gmra.mrb[84].mxu1 %v2539_v52  ;;  %3522 = vmatprep.mubr.bf16.mxu0 %v2544_v32 }
 0x451   :  { %3748 = vmatprep.mubr.bf16.mxu1 %v2544_v32  ;;  %4708 = vmatpush1.bf16.msra.mxu0 %v12453_v6 }
 0x452   :  { %4934 = vmatpush1.bf16.msra.mxu1 %v12456_v14  ;;  %4709 = vmatprep.subr.bf16.mxu0 %v12461_v24  ;;  %v12489_v24 = vld [vmem:[#allocation15 + $0x200] ss:$16 sps:$4 sm:$0xff]  }
 0x453   :  { %4935 = vmatprep.subr.bf16.mxu1 %v12464_v57  ;;  %v12492_v57 = vld [vmem:[#allocation15 + $0x208] ss:$16 sps:$4 sm:$0xff]  }
 0x455   :  { %4710 = vmatpush1.bf16.msra.mxu0 %v12459_v30 }
 0x456   :  { %4936 = vmatpush1.bf16.msra.mxu1 %v12462_v13  ;;  %4711 = vmatprep.subr.bf16.mxu0 %v12467_v23  ;;  %v12500_v13 = vld [vmem:[#allocation15 + $0x22c] ss:$16 sps:$4 sm:$0xff]  }
 0x457   :  { %3523 = vmatmul.mubr.bf16.gmra.mrb[88].mxu0 %v2543_v29  ;;  %4937 = vmatprep.subr.bf16.mxu1 %v12470_v10 }
 0x458   :  { %3749 = vmatmul.mubr.bf16.gmra.mrb[88].mxu1 %v2543_v29  ;;  %3532 = vmatprep.mubr.bf16.mxu0 %v2548_v44 }
 0x459   :  { %3758 = vmatprep.mubr.bf16.mxu1 %v2548_v44  ;;  %4712 = vmatpush1.bf16.msra.mxu0 %v12465_v31 }
 0x45a   :  { %4938 = vmatpush1.bf16.msra.mxu1 %v12468_v56  ;;  %4713 = vmatprep.subr.bf16.mxu0 %v12473_v53 }
 0x45b   :  { %4939 = vmatprep.subr.bf16.mxu1 %v12476_v3 }
 0x45d   :  { %4714 = vmatpush1.bf16.msra.mxu0 %v12471_v45  ;;  %v12498_v45 = vld [vmem:[#allocation15 + $0x228] ss:$16 sps:$4 sm:$0xff]  }
 0x45e   :  { %4940 = vmatpush1.bf16.msra.mxu1 %v12474_v39  ;;  %4715 = vmatprep.subr.bf16.mxu0 %v12479_v9  ;;  %v12503_v9 = vld [vmem:[#allocation15 + $0x244] ss:$16 sps:$4 sm:$0xff]  }
 0x45f   :  { %3533 = vmatmul.mubr.bf16.gmra.mrb[92].mxu0 %v2547_v16  ;;  %4941 = vmatprep.subr.bf16.mxu1 %v12482_v55  ;;  %v12506_v55 = vld [vmem:[#allocation15 + $0x24c] ss:$16 sps:$4 sm:$0xff]  }
 0x460   :  { %3759 = vmatmul.mubr.bf16.gmra.mrb[92].mxu1 %v2547_v16  ;;  %v12570_v16 = vld [vmem:[#allocation15 + $0x3a8] ss:$16 sps:$4 sm:$0xff]  }
 0x461   :  { %4716 = vmatpush1.bf16.msra.mxu0 %v12477_v5 }
 0x462   :  { %4942 = vmatpush1.bf16.msra.mxu1 %v12480_v12  ;;  %4717 = vmatprep.subr.bf16.mxu0 %v12485_v58 }
 0x463   :  { %4943 = vmatprep.subr.bf16.mxu1 %v12488_v46  ;;  %v12501_v46 = vld [vmem:[#allocation15 + $0x240] ss:$16 sps:$4 sm:$0xff]  }
 0x465   :  { %4718 = vmatpush1.bf16.msra.mxu0 %v12483_v43  ;;  %v12504_v43 = vld [vmem:[#allocation15 + $0x248] ss:$16 sps:$4 sm:$0xff]  }
 0x466   :  { %4944 = vmatpush1.bf16.msra.mxu1 %v12486_v26  ;;  %4800 = vmatprep.subr.bf16.mxu0 %v12491_v0 }
 0x467   :  { %5026 = vmatprep.subr.bf16.mxu1 %v12494_v7 }
 0x4fa   :  { %v3464_v34 = vpop.f32.mrb[64].mxu0 }
 0x4fb   :  { %v14613_v22 = vpop.f32.mrb[64].mxu1  ;;  %v3466_v49 = vpop.f32.mrb[65].mxu0 }
 0x4fc   :  { %v14618_v20 = vpop.f32.mrb[65].mxu1  ;;  %v3468_v37 = vpop.f32.mrb[66].mxu0 }
 0x4fd   :  { %v3769_v50 = vpack.c.bf16 %v3468_v37, %v3464_v34  ;;  %v14623_v19 = vpop.f32.mrb[66].mxu1  ;;  %v3470_v60 = vpop.f32.mrb[67].mxu0 }
 0x4fe   :  { %v3770_v59 = vpack.c.bf16 %v3470_v60, %v3466_v49  ;;  %v14627_v47 = vpop.f32.mrb[67].mxu1 }
 0x4ff   :  { %v3855_v51 = vadd.bf16 %v14616_v28, %v3769_v50 }
 0x500   :  { %v3856_v6 = vadd.bf16 %v14621_v18, %v3770_v59 }
 0x501   :  { %v3887_v42 = vmax.bf16 %v15730_v17, %v3855_v51  ;;  %v12507_v51 = vld [vmem:[#allocation15 + $0x260] ss:$16 sps:$4 sm:$0xff]  }
 0x502   :  { %v3474_v32 = vpop.f32.mrb[68].mxu0  ;;  %v3888_v14 = vmax.bf16 %v15730_v17, %v3856_v6  ;;  %v12510_v6 = vld [vmem:[#allocation15 + $0x268] ss:$16 sps:$4 sm:$0xff]  }
 0x503   :  { %v14635_v38 = vpop.f32.mrb[68].mxu1  ;;  %v3476_v30 = vpop.f32.mrb[69].mxu0 }
 0x504   :  { %v14637_v23 = vpop.f32.mrb[69].mxu1  ;;  %v3478_v10 = vpop.f32.mrb[70].mxu0  ;;  %4719 = vmatprep.mubr.bf16.mxu0 %v3888_v14  ;;  %4945 = vmatprep.mubr.bf16.mxu1 %v3888_v14 }
 0x505   :  { %v3773_v29 = vpack.c.bf16 %v3478_v10, %v3474_v32  ;;  %v14639_v31 = vpop.f32.mrb[70].mxu1  ;;  %v3480_v44 = vpop.f32.mrb[71].mxu0  ;;  %4720 = vmatmul.mubr.bf16.vlgmr.msra.gmra.mrb[96].mxu0 %v3887_v42  ;;  %4946 = vmatmul.mubr.bf16.vlgmr.msra.gmra.mrb[96].mxu1 %v3887_v42  ;;  %v12516_v10 = vld [vmem:[#allocation15 + $0x288] ss:$16 sps:$4 sm:$0xff]  }
 0x506   :  { %v3774_v53 = vpack.c.bf16 %v3480_v44, %v3476_v30  ;;  %v14643_v3 = vpop.f32.mrb[71].mxu1  ;;  %4801 = vmatpush1.bf16.msra.mxu0 %v12489_v24  ;;  %5027 = vmatpush1.bf16.msra.mxu1 %v12492_v57  ;;  %v12515_v24 = vld [vmem:[#allocation15 + $0x284] ss:$16 sps:$4 sm:$0xff]   ;;  %v12518_v57 = vld [vmem:[#allocation15 + $0x28c] ss:$16 sps:$4 sm:$0xff]  }
 0x507   :  { %v3859_v39 = vadd.bf16 %v14616_v28, %v3773_v29  ;;  %4802 = vmatprep.subr.bf16.mxu0 %v12497_v27  ;;  %5028 = vmatprep.subr.bf16.mxu1 %v12500_v13  ;;  %v12513_v13 = vld [vmem:[#allocation15 + $0x280] ss:$16 sps:$4 sm:$0xff]  }
 0x508   :  { %v3860_v5 = vadd.bf16 %v14621_v18, %v3774_v53 }
 0x509   :  { %v3891_v7 = vmax.bf16 %v15730_v17, %v3859_v39 }
 0x50a   :  { %4803 = vmatpush1.bf16.msra.mxu0 %v12495_v11  ;;  %v3484_v12 = vpop.f32.mrb[72].mxu0  ;;  %5029 = vmatpush1.bf16.msra.mxu1 %v12498_v45  ;;  %v3892_v58 = vmax.bf16 %v15730_v17, %v3860_v5  ;;  %v12521_v11 = vld [vmem:[#allocation15 + $0x2a4] ss:$16 sps:$4 sm:$0xff]   ;;  %v12524_v45 = vld [vmem:[#allocation15 + $0x2ac] ss:$16 sps:$4 sm:$0xff]  }
 0x50b   :  { %v14650_v26 = vpop.f32.mrb[72].mxu1  ;;  %v3486_v0 = vpop.f32.mrb[73].mxu0  ;;  %4804 = vmatprep.subr.bf16.mxu0 %v12503_v9  ;;  %5030 = vmatprep.subr.bf16.mxu1 %v12506_v55 }
 0x50c   :  { %v14653_v41 = vpop.f32.mrb[73].mxu1  ;;  %v3488_v62 = vpop.f32.mrb[74].mxu0  ;;  %4729 = vmatprep.mubr.bf16.mxu0 %v3892_v58  ;;  %4955 = vmatprep.mubr.bf16.mxu1 %v3892_v58 }
 0x50d   :  { %v3777_v34 = vpack.c.bf16 %v3488_v62, %v3484_v12  ;;  %v14655_v49 = vpop.f32.mrb[74].mxu1  ;;  %v3490_v37 = vpop.f32.mrb[75].mxu0  ;;  %4730 = vmatmul.mubr.bf16.gmra.mrb[100].mxu0 %v3891_v7  ;;  %4956 = vmatmul.mubr.bf16.gmra.mrb[100].mxu1 %v3891_v7  ;;  %v12522_v7 = vld [vmem:[#allocation15 + $0x2a8] ss:$16 sps:$4 sm:$0xff]   ;;  %v12527_v62 = vld [vmem:[#allocation15 + $0x2c4] ss:$16 sps:$4 sm:$0xff]  }
 0x50e   :  { %v3778_v60 = vpack.c.bf16 %v3490_v37, %v3486_v0  ;;  %v14659_v59 = vpop.f32.mrb[75].mxu1  ;;  %4805 = vmatpush1.bf16.msra.mxu0 %v12501_v46  ;;  %5031 = vmatpush1.bf16.msra.mxu1 %v12504_v43  ;;  %v12519_v0 = vld [vmem:[#allocation15 + $0x2a0] ss:$16 sps:$4 sm:$0xff]  }
 0x50f   :  { %v3863_v32 = vadd.bf16 %v14616_v28, %v3777_v34  ;;  %4806 = vmatprep.subr.bf16.mxu0 %v12509_v25  ;;  %5032 = vmatprep.subr.bf16.mxu1 %v12512_v35  ;;  %v12530_v34 = vld [vmem:[#allocation15 + $0x2cc] ss:$16 sps:$4 sm:$0xff]   ;;  %v12558_v35 = vld [vmem:[#allocation15 + $0x368] ss:$16 sps:$4 sm:$0xff]  }
 0x510   :  { %v3864_v42 = vadd.bf16 %v14621_v18, %v3778_v60 }
 0x511   :  { %v3895_v53 = vmax.bf16 %v15730_v17, %v3863_v32  ;;  %v12528_v32 = vld [vmem:[#allocation15 + $0x2c8] ss:$16 sps:$4 sm:$0xff]  }
 0x512   :  { %4807 = vmatpush1.bf16.msra.mxu0 %v12507_v51  ;;  %v3494_v30 = vpop.f32.mrb[76].mxu0  ;;  %5033 = vmatpush1.bf16.msra.mxu1 %v12510_v6  ;;  %v3896_v27 = vmax.bf16 %v15730_v17, %v3864_v42  ;;  %v12525_v6 = vld [vmem:[#allocation15 + $0x2c0] ss:$16 sps:$4 sm:$0xff]  }
 0x513   :  { %v14666_v29 = vpop.f32.mrb[76].mxu1  ;;  %v3496_v44 = vpop.f32.mrb[77].mxu0  ;;  %4808 = vmatprep.subr.bf16.mxu0 %v12515_v24  ;;  %5034 = vmatprep.subr.bf16.mxu1 %v12518_v57 }
 0x514   :  { %v14669_v39 = vpop.f32.mrb[77].mxu1  ;;  %v3498_v9 = vpop.f32.mrb[78].mxu0  ;;  %4739 = vmatprep.mubr.bf16.mxu0 %v3896_v27  ;;  %4965 = vmatprep.mubr.bf16.mxu1 %v3896_v27  ;;  %v12536_v27 = vld [vmem:[#allocation15 + $0x2ec] ss:$16 sps:$4 sm:$0xff]  }
 0x515   :  { %v3781_v55 = vpack.c.bf16 %v3498_v9, %v3494_v30  ;;  %v14671_v5 = vpop.f32.mrb[78].mxu1  ;;  %v3500_v12 = vpop.f32.mrb[79].mxu0  ;;  %4740 = vmatmul.mubr.bf16.gmra.mrb[104].mxu0 %v3895_v53  ;;  %4966 = vmatmul.mubr.bf16.gmra.mrb[104].mxu1 %v3895_v53  ;;  %v12533_v30 = vld [vmem:[#allocation15 + $0x2e4] ss:$16 sps:$4 sm:$0xff]  }
 0x516   :  { %v3782_v46 = vpack.c.bf16 %v3500_v12, %v3496_v44  ;;  %v14675_v43 = vpop.f32.mrb[79].mxu1  ;;  %4809 = vmatpush1.bf16.msra.mxu0 %v12513_v13  ;;  %5035 = vmatpush1.bf16.msra.mxu1 %v12516_v10  ;;  %v12531_v12 = vld [vmem:[#allocation15 + $0x2e0] ss:$16 sps:$4 sm:$0xff]  }
 0x517   :  { %v3867_v25 = vadd.bf16 %v14616_v28, %v3781_v55  ;;  %4810 = vmatprep.subr.bf16.mxu0 %v12521_v11  ;;  %5036 = vmatprep.subr.bf16.mxu1 %v12524_v45 }
 0x518   :  { %v3868_v37 = vadd.bf16 %v14621_v18, %v3782_v46  ;;  %v12534_v46 = vld [vmem:[#allocation15 + $0x2e8] ss:$16 sps:$4 sm:$0xff]  }
 0x519   :  { %v3899_v42 = vmax.bf16 %v15730_v17, %v3867_v25  ;;  %v12539_v25 = vld [vmem:[#allocation15 + $0x304] ss:$16 sps:$4 sm:$0xff]  }
 0x51a   :  { %4811 = vmatpush1.bf16.msra.mxu0 %v12519_v0  ;;  %v3504_v60 = vpop.f32.mrb[80].mxu0  ;;  %5037 = vmatpush1.bf16.msra.mxu1 %v12522_v7  ;;  %v3900_v51 = vmax.bf16 %v15730_v17, %v3868_v37 }
 0x51b   :  { %v14682_v24 = vpop.f32.mrb[80].mxu1  ;;  %v3506_v57 = vpop.f32.mrb[81].mxu0  ;;  %4812 = vmatprep.subr.bf16.mxu0 %v12527_v62  ;;  %5038 = vmatprep.subr.bf16.mxu1 %v12530_v34  ;;  %v12542_v62 = vld [vmem:[#allocation15 + $0x30c] ss:$16 sps:$4 sm:$0xff]  }
 0x51c   :  { %v14685_v13 = vpop.f32.mrb[81].mxu1  ;;  %v3508_v10 = vpop.f32.mrb[82].mxu0  ;;  %4749 = vmatprep.mubr.bf16.mxu0 %v3900_v51  ;;  %4975 = vmatprep.mubr.bf16.mxu1 %v3900_v51  ;;  %v12537_v51 = vld [vmem:[#allocation15 + $0x300] ss:$16 sps:$4 sm:$0xff]  }
 0x51d   :  { %v3785_v44 = vpack.c.bf16 %v3508_v10, %v3504_v60  ;;  %v14687_v53 = vpop.f32.mrb[82].mxu1  ;;  %v3510_v11 = vpop.f32.mrb[83].mxu0  ;;  %4750 = vmatmul.mubr.bf16.gmra.mrb[108].mxu0 %v3899_v42  ;;  %4976 = vmatmul.mubr.bf16.gmra.mrb[108].mxu1 %v3899_v42 }
 0x51e   :  { %v3786_v9 = vpack.c.bf16 %v3510_v11, %v3506_v57  ;;  %v14691_v55 = vpop.f32.mrb[83].mxu1  ;;  %4813 = vmatpush1.bf16.msra.mxu0 %v12525_v6  ;;  %5039 = vmatpush1.bf16.msra.mxu1 %v12528_v32  ;;  %v12540_v6 = vld [vmem:[#allocation15 + $0x308] ss:$16 sps:$4 sm:$0xff]  }
 0x51f   :  { %v3871_v0 = vadd.bf16 %v14616_v28, %v3785_v44  ;;  %4814 = vmatprep.subr.bf16.mxu0 %v12533_v30  ;;  %5040 = vmatprep.subr.bf16.mxu1 %v12536_v27  ;;  %v12545_v30 = vld [vmem:[#allocation15 + $0x324] ss:$16 sps:$4 sm:$0xff]   ;;  %v12548_v27 = vld [vmem:[#allocation15 + $0x32c] ss:$16 sps:$4 sm:$0xff]  }
 0x520   :  { %v3872_v34 = vadd.bf16 %v14621_v18, %v3786_v9 }
 0x521   :  { %v3903_v42 = vmax.bf16 %v15730_v17, %v3871_v0  ;;  %v12543_v0 = vld [vmem:[#allocation15 + $0x320] ss:$16 sps:$4 sm:$0xff]  }
 0x522   :  { %4815 = vmatpush1.bf16.msra.mxu0 %v12531_v12  ;;  %v3514_v37 = vpop.f32.mrb[84].mxu0  ;;  %5041 = vmatpush1.bf16.msra.mxu1 %v12534_v46  ;;  %v3904_v60 = vmax.bf16 %v15730_v17, %v3872_v34 }
 0x523   :  { %v14698_v32 = vpop.f32.mrb[84].mxu1  ;;  %v3516_v57 = vpop.f32.mrb[85].mxu0  ;;  %4816 = vmatprep.subr.bf16.mxu0 %v12539_v25  ;;  %5042 = vmatprep.subr.bf16.mxu1 %v12542_v62  ;;  %v12546_v62 = vld [vmem:[#allocation15 + $0x328] ss:$16 sps:$4 sm:$0xff]  }
 0x524   :  { %v14701_v10 = vpop.f32.mrb[85].mxu1  ;;  %v3518_v44 = vpop.f32.mrb[86].mxu0  ;;  %4759 = vmatprep.mubr.bf16.mxu0 %v3904_v60  ;;  %4985 = vmatprep.mubr.bf16.mxu1 %v3904_v60  ;;  %v12551_v60 = vld [vmem:[#allocation15 + $0x344] ss:$16 sps:$4 sm:$0xff]  }
 0x525   :  { %v3789_v11 = vpack.c.bf16 %v3518_v44, %v3514_v37  ;;  %v14703_v9 = vpop.f32.mrb[86].mxu1  ;;  %v3520_v12 = vpop.f32.mrb[87].mxu0  ;;  %4760 = vmatmul.mubr.bf16.gmra.mrb[112].mxu0 %v3903_v42  ;;  %4986 = vmatmul.mubr.bf16.gmra.mrb[112].mxu1 %v3903_v42  ;;  %v12554_v44 = vld [vmem:[#allocation15 + $0x34c] ss:$16 sps:$4 sm:$0xff]   ;;  %v3826_v37 = vcombine.high %v14607_v2, %v14607_v2  ;;  %v12555_v2 = vld [vmem:[#allocation15 + $0x360] ss:$16 sps:$4 sm:$0xff]  }
 0x526   :  { %v3790_v25 = vpack.c.bf16 %v3520_v12, %v3516_v57  ;;  %v14707_v34 = vpop.f32.mrb[87].mxu1  ;;  %4817 = vmatpush1.bf16.msra.mxu0 %v12537_v51  ;;  %5043 = vmatpush1.bf16.msra.mxu1 %v12540_v6  ;;  %v12549_v51 = vld [vmem:[#allocation15 + $0x340] ss:$16 sps:$4 sm:$0xff]   ;;  %v12552_v6 = vld [vmem:[#allocation15 + $0x348] ss:$16 sps:$4 sm:$0xff]  }
 0x527   :  { %v3875_v45 = vadd.bf16 %v14616_v28, %v3789_v11  ;;  %4818 = vmatprep.subr.bf16.mxu0 %v12545_v30  ;;  %5044 = vmatprep.subr.bf16.mxu1 %v12548_v27  ;;  %v12557_v30 = vld [vmem:[#allocation15 + $0x364] ss:$16 sps:$4 sm:$0xff]   ;;  %v12560_v27 = vld [vmem:[#allocation15 + $0x36c] ss:$16 sps:$4 sm:$0xff]  }
 0x528   :  { %v3876_v42 = vadd.bf16 %v14621_v18, %v3790_v25 }
 0x529   :  { %v3907_v11 = vmax.bf16 %v15730_v17, %v3875_v45 }
 0x52a   :  { %4819 = vmatpush1.bf16.msra.mxu0 %v12543_v0  ;;  %v3524_v46 = vpop.f32.mrb[88].mxu0  ;;  %5045 = vmatpush1.bf16.msra.mxu1 %v12546_v62  ;;  %v3908_v57 = vmax.bf16 %v15730_v17, %v3876_v42 }
 0x52b   :  { %v14714_v12 = vpop.f32.mrb[88].mxu1  ;;  %v3526_v7 = vpop.f32.mrb[89].mxu0  ;;  %4820 = vmatprep.subr.bf16.mxu0 %v12551_v60  ;;  %5046 = vmatprep.subr.bf16.mxu1 %v12554_v44 }
 0x52c   :  { %v14719_v25 = vpop.f32.mrb[89].mxu1  ;;  %v3528_v0 = vpop.f32.mrb[90].mxu0  ;;  %4769 = vmatprep.mubr.bf16.mxu0 %v3908_v57  ;;  %4995 = vmatprep.mubr.bf16.mxu1 %v3908_v57  ;;  %v12563_v57 = vld [vmem:[#allocation15 + $0x384] ss:$16 sps:$4 sm:$0xff]  }
 0x52d   :  { %v3793_v62 = vpack.c.bf16 %v3528_v0, %v3524_v46  ;;  %v14721_v42 = vpop.f32.mrb[90].mxu1  ;;  %v3530_v58 = vpop.f32.mrb[91].mxu0  ;;  %4770 = vmatmul.mubr.bf16.gmra.mrb[116].mxu0 %v3907_v11  ;;  %4996 = vmatmul.mubr.bf16.gmra.mrb[116].mxu1 %v3907_v11  ;;  %v12566_v0 = vld [vmem:[#allocation15 + $0x38c] ss:$16 sps:$4 sm:$0xff]   ;;  %v3849_v11 = vpack.i.b16 %v3826_v37, %v3826_v37  ;;  %v12569_v37 = vld [vmem:[#allocation15 + $0x3a4] ss:$16 sps:$4 sm:$0xff]  }
 0x52e   :  { %v3794_v60 = vpack.c.bf16 %v3530_v58, %v3526_v7  ;;  %v14725_v44 = vpop.f32.mrb[91].mxu1  ;;  %4821 = vmatpush1.bf16.msra.mxu0 %v12549_v51  ;;  %5047 = vmatpush1.bf16.msra.mxu1 %v12552_v6  ;;  %v12561_v51 = vld [vmem:[#allocation15 + $0x380] ss:$16 sps:$4 sm:$0xff]   ;;  %v12564_v6 = vld [vmem:[#allocation15 + $0x388] ss:$16 sps:$4 sm:$0xff]  }
 0x52f   :  { %v3879_v50 = vadd.bf16 %v14616_v28, %v3793_v62  ;;  %4822 = vmatprep.subr.bf16.mxu0 %v12557_v30  ;;  %5048 = vmatprep.subr.bf16.mxu1 %v12560_v27  ;;  %v3825_v62 = vcombine.high %v14604_v1, %v14604_v1  ;;  %v12572_v27 = vld [vmem:[#allocation15 + $0x3ac] ss:$16 sps:$4 sm:$0xff]  }
 0x530   :  { %v3880_v14 = vadd.bf16 %v14621_v18, %v3794_v60  ;;  %v14738_v60 = vrot.slane %v3849_v11, %v14239_v63  ;;  %v12567_v11 = vld [vmem:[#allocation15 + $0x3a0] ss:$16 sps:$4 sm:$0xff]  }
 0x531   :  { %v3911_v30 = vmax.bf16 %v15730_v17, %v3879_v50  ;;  %v3842_v36 = vpack.i.b16 %v3825_v62, %v3825_v62  ;;  %v12573_v62 = vld [vmem:[#allocation15 + $0x3c0] ss:$16 sps:$4 sm:$0xff]  }
 0x532   :  { %4823 = vmatpush1.bf16.msra.mxu0 %v12555_v2  ;;  %v3534_v58 = vpop.f32.mrb[92].mxu0  ;;  %5049 = vmatpush1.bf16.msra.mxu1 %v12558_v35  ;;  %v3912_v7 = vmax.bf16 %v15730_v17, %v3880_v14 }
 0x533   :  { %v14734_v45 = vpop.f32.mrb[92].mxu1  ;;  %v3536_v46 = vpop.f32.mrb[93].mxu0  ;;  %4824 = vmatprep.subr.bf16.mxu0 %v12563_v57  ;;  %5050 = vmatprep.subr.bf16.mxu1 %v12566_v0 }
 0x534   :  { %v14740_v35 = vpop.f32.mrb[93].mxu1  ;;  %v3538_v14 = vpop.f32.mrb[94].mxu0  ;;  %4779 = vmatprep.mubr.bf16.mxu0 %v3912_v7  ;;  %5005 = vmatprep.mubr.bf16.mxu1 %v3912_v7  ;;  %v12575_v7 = vld [vmem:[#allocation15 + $0x3c4] ss:$16 sps:$4 sm:$0xff]  }
 0x535   :  { %v3797_v2 = vpack.c.bf16 %v3538_v14, %v3534_v58  ;;  %v14742_v56 = vpop.f32.mrb[94].mxu1  ;;  %v3540_v1 = vpop.f32.mrb[95].mxu0  ;;  %4780 = vmatmul.mubr.bf16.gmra.mrb[120].mxu0 %v3911_v30  ;;  %5006 = vmatmul.mubr.bf16.gmra.mrb[120].mxu1 %v3911_v30  ;;  %v12578_v30 = vld [vmem:[#allocation15 + $0x3cc] ss:$16 sps:$4 sm:$0xff]   ;;  %v15744_v14 = vpack.c.bf16 %v14627_v47, %v14618_v20  ;;  %v12581_v47 = vld [vmem:[#allocation15 + $0x3e4] ss:$16 sps:$4 sm:$0xff]  }
 0x536   :  { %v3799_v50 = vpack.c.bf16 %v14742_v56, %v14734_v45  ;;  %v3798_v57 = vpack.c.bf16 %v3540_v1, %v3536_v46  ;;  %v14746_v0 = vpop.f32.mrb[95].mxu1  ;;  %4825 = vmatpush1.bf16.msra.mxu0 %v12561_v51  ;;  %5051 = vmatpush1.bf16.msra.mxu1 %v12564_v6  ;;  %v12587_v1 = vld [vmem:[#allocation20 + $0x4] ss:$16 sps:$4 sm:$0xff]   ;;  %v12680_v45 = vld [vmem:[#allocation20 + $0x1ec] ss:$16 sps:$4 sm:$0xff]  }
 0x537   :  { %v3883_v52 = vadd.bf16 %v14616_v28, %v3797_v2  ;;  %v3800_v58 = vpack.c.bf16 %v14746_v0, %v14740_v35  ;;  %4826 = vmatprep.subr.bf16.mxu0 %v12569_v37  ;;  %5052 = vmatprep.subr.bf16.mxu1 %v12572_v27  ;;  %v3858_v46 = vadd.bf16 %v14738_v60, %v15744_v14  ;;  %v12576_v27 = vld [vmem:[#allocation15 + $0x3c8] ss:$16 sps:$4 sm:$0xff]   ;;  %v12584_v2 = vld [vmem:[#allocation15 + $0x3ec] ss:$16 sps:$4 sm:$0xff]   ;;  %v12585_v14 = vld [vmem:[#allocation20] ss:$16 sps:$4 sm:$0xff]  }
 0x538   :  { %v3884_v51 = vadd.bf16 %v14621_v18, %v3798_v57  ;;  %v14758_v28 = vrot.slane %v3842_v36, %v14239_v63  ;;  %v12579_v18 = vld [vmem:[#allocation15 + $0x3e0] ss:$16 sps:$4 sm:$0xff]   ;;  %v15745_v36 = vpack.c.bf16 %v14623_v19, %v14613_v22  ;;  %v15746_v57 = vpack.c.bf16 %v14643_v3, %v14637_v23  ;;  %v12588_v19 = vld [vmem:[#allocation20 + $0x8] ss:$16 sps:$4 sm:$0xff]   ;;  %v12663_v0 = vld [vmem:[#allocation20 + $0x1a0] ss:$16 sps:$4 sm:$0xff]  }
 0x539   :  { %v3915_v37 = vmax.bf16 %v15730_v17, %v3883_v52  ;;  %v3890_v20 = vmax.bf16 %v15730_v17, %v3858_v46  ;;  %v12582_v52 = vld [vmem:[#allocation15 + $0x3e8] ss:$16 sps:$4 sm:$0xff]   ;;  %v15747_v23 = vpack.c.bf16 %v14639_v31, %v14635_v38  ;;  %v12597_v38 = vld [vmem:[#allocation20 + $0x40] ss:$16 sps:$4 sm:$0xff]   ;;  %v12668_v35 = vld [vmem:[#allocation20 + $0x1ac] ss:$16 sps:$4 sm:$0xff]  }
 0x53a   :  { %4827 = vmatpush1.bf16.msra.mxu0 %v12567_v11  ;;  %5053 = vmatpush1.bf16.msra.mxu1 %v12570_v16  ;;  %v3916_v6 = vmax.bf16 %v15730_v17, %v3884_v51  ;;  %v3857_v16 = vadd.bf16 %v14758_v28, %v15745_v36  ;;  %v3862_v11 = vadd.bf16 %v14738_v60, %v15746_v57  ;;  %v12593_v46 = vld [vmem:[#allocation20 + $0x24] ss:$16 sps:$4 sm:$0xff]   ;;  %v12596_v51 = vld [vmem:[#allocation20 + $0x2c] ss:$16 sps:$4 sm:$0xff]  }
 0x53b   :  { %4828 = vmatprep.subr.bf16.mxu0 %v12575_v7  ;;  %5054 = vmatprep.subr.bf16.mxu1 %v12578_v30  ;;  %v12590_v7 = vld [vmem:[#allocation20 + $0xc] ss:$16 sps:$4 sm:$0xff]   ;;  %v3861_v3 = vadd.bf16 %v14758_v28, %v15747_v23  ;;  %v12605_v36 = vld [vmem:[#allocation20 + $0x64] ss:$16 sps:$4 sm:$0xff]   ;;  %v15752_v23 = vpack.c.bf16 %v14691_v55, %v14685_v13  ;;  %v15753_v55 = vpack.c.bf16 %v14687_v53, %v14682_v24  ;;  %v12633_v24 = vld [vmem:[#allocation20 + $0x100] ss:$16 sps:$4 sm:$0xff]  }
 0x53c   :  { %4789 = vmatprep.mubr.bf16.mxu0 %v3916_v6  ;;  %5015 = vmatprep.mubr.bf16.mxu1 %v3916_v6  ;;  %v3889_v30 = vmax.bf16 %v15730_v17, %v3857_v16  ;;  %v3894_v22 = vmax.bf16 %v15730_v17, %v3862_v11  ;;  %v12591_v6 = vld [vmem:[#allocation20 + $0x20] ss:$16 sps:$4 sm:$0xff]   ;;  %v12606_v11 = vld [vmem:[#allocation20 + $0x68] ss:$16 sps:$4 sm:$0xff]   ;;  %v12632_v13 = vld [vmem:[#allocation20 + $0xec] ss:$16 sps:$4 sm:$0xff]  }
 0x53d   :  { %4790 = vmatmul.mubr.bf16.gmra.mrb[124].mxu0 %v3915_v37  ;;  %5016 = vmatmul.mubr.bf16.gmra.mrb[124].mxu1 %v3915_v37  ;;  %v12677_v56 = vld [vmem:[#allocation20 + $0x1e4] ss:$16 sps:$4 sm:$0xff]  }
 0x53e   :  { %4829 = vmatpush1.bf16.msra.mxu0 %v12573_v62  ;;  %4832 = vmatprep.mubr.bf16.mxu0 %v3890_v20  ;;  %v15748_v62 = vpack.c.bf16 %v14659_v59, %v14653_v41  ;;  %v12608_v41 = vld [vmem:[#allocation20 + $0x6c] ss:$16 sps:$4 sm:$0xff]   ;;  %v15749_v59 = vpack.c.bf16 %v14655_v49, %v14650_v26  ;;  %v12609_v26 = vld [vmem:[#allocation20 + $0x80] ss:$16 sps:$4 sm:$0xff]  }
 0x53f   :  { %5055 = vmatpush1.bf16.msra.mxu1 %v12576_v27  ;;  %5058 = vmatprep.mubr.bf16.mxu1 %v3890_v20  ;;  %v12594_v27 = vld [vmem:[#allocation20 + $0x28] ss:$16 sps:$4 sm:$0xff]   ;;  %v12599_v20 = vld [vmem:[#allocation20 + $0x44] ss:$16 sps:$4 sm:$0xff]  }
 0x540   :  { %4830 = vmatprep.subr.bf16.mxu0 %v12581_v47  ;;  %5056 = vmatprep.subr.bf16.mxu1 %v12584_v2  ;;  %v3866_v37 = vadd.bf16 %v14738_v60, %v15748_v62  ;;  %v12602_v47 = vld [vmem:[#allocation20 + $0x4c] ss:$16 sps:$4 sm:$0xff]   ;;  %v3893_v2 = vmax.bf16 %v15730_v17, %v3861_v3  ;;  %v3865_v16 = vadd.bf16 %v14758_v28, %v15749_v59  ;;  %v12623_v62 = vld [vmem:[#allocation20 + $0xc4] ss:$16 sps:$4 sm:$0xff]  }
 0x541   :  { %v3874_v3 = vadd.bf16 %v14738_v60, %v15752_v23  ;;  %v12638_v59 = vld [vmem:[#allocation20 + $0x10c] ss:$16 sps:$4 sm:$0xff]   ;;  %v12654_v23 = vld [vmem:[#allocation20 + $0x168] ss:$16 sps:$4 sm:$0xff]  }
 0x542   :  { %4831 = vmatpush1.bf16.msra.mxu0 %v12579_v18  ;;  %v3898_v31 = vmax.bf16 %v15730_v17, %v3866_v37  ;;  %v12600_v18 = vld [vmem:[#allocation20 + $0x48] ss:$16 sps:$4 sm:$0xff]   ;;  %v12626_v37 = vld [vmem:[#allocation20 + $0xcc] ss:$16 sps:$4 sm:$0xff]  }
 0x543   :  { %5057 = vmatpush1.bf16.msra.mxu1 %v12582_v52  ;;  %6089 = vmatprep.subr.bf16.mxu0 %v12587_v1  ;;  %v12603_v52 = vld [vmem:[#allocation20 + $0x60] ss:$16 sps:$4 sm:$0xff]   ;;  %v15750_v1 = vpack.c.bf16 %v14675_v43, %v14669_v39  ;;  %v12620_v39 = vld [vmem:[#allocation20 + $0xac] ss:$16 sps:$4 sm:$0xff]   ;;  %v15751_v43 = vpack.c.bf16 %v14671_v5, %v14666_v29  ;;  %v3906_v5 = vmax.bf16 %v15730_v17, %v3874_v3  ;;  %v12659_v3 = vld [vmem:[#allocation20 + $0x184] ss:$16 sps:$4 sm:$0xff]  }
 0x544   :  { %6315 = vmatprep.subr.bf16.mxu1 %v12590_v7  ;;  %v12611_v7 = vld [vmem:[#allocation20 + $0x84] ss:$16 sps:$4 sm:$0xff]   ;;  %v12621_v29 = vld [vmem:[#allocation20 + $0xc0] ss:$16 sps:$4 sm:$0xff]  }
 0x545   :  { %4833 = vmatmul.mubr.bf16.vlgmr.msra.gmra.mrb[96].mxu0 %v3889_v30  ;;  %v3870_v57 = vadd.bf16 %v14738_v60, %v15750_v1  ;;  %v12641_v1 = vld [vmem:[#allocation20 + $0x124] ss:$16 sps:$4 sm:$0xff]  }
 0x546   :  { %5059 = vmatmul.mubr.bf16.vlgmr.msra.gmra.mrb[96].mxu1 %v3889_v30  ;;  %4842 = vmatprep.mubr.bf16.mxu0 %v3894_v22  ;;  %v12614_v30 = vld [vmem:[#allocation20 + $0x8c] ss:$16 sps:$4 sm:$0xff]  }
 0x547   :  { %5068 = vmatprep.mubr.bf16.mxu1 %v3894_v22  ;;  %6090 = vmatpush1.bf16.msra.mxu0 %v12585_v14  ;;  %v3897_v14 = vmax.bf16 %v15730_v17, %v3865_v16  ;;  %v3902_v49 = vmax.bf16 %v15730_v17, %v3870_v57  ;;  %v12612_v22 = vld [vmem:[#allocation20 + $0x88] ss:$16 sps:$4 sm:$0xff]  }
 0x548   :  { %6316 = vmatpush1.bf16.msra.mxu1 %v12588_v19  ;;  %6091 = vmatprep.subr.bf16.mxu0 %v12593_v46  ;;  %v12617_v19 = vld [vmem:[#allocation20 + $0xa4] ss:$16 sps:$4 sm:$0xff]   ;;  %v3869_v46 = vadd.bf16 %v14758_v28, %v15751_v43 }
 0x549   :  { %6317 = vmatprep.subr.bf16.mxu1 %v12596_v51  ;;  %v12615_v51 = vld [vmem:[#allocation20 + $0xa0] ss:$16 sps:$4 sm:$0xff]  }
 0x54b   :  { %6092 = vmatpush1.bf16.msra.mxu0 %v12591_v6  ;;  %v12618_v6 = vld [vmem:[#allocation20 + $0xa8] ss:$16 sps:$4 sm:$0xff]  }
 0x54c   :  { %6318 = vmatpush1.bf16.msra.mxu1 %v12594_v27  ;;  %6093 = vmatprep.subr.bf16.mxu0 %v12599_v20  ;;  %v3901_v27 = vmax.bf16 %v15730_v17, %v3869_v46  ;;  %v12624_v20 = vld [vmem:[#allocation20 + $0xc8] ss:$16 sps:$4 sm:$0xff]   ;;  %v12651_v46 = vld [vmem:[#allocation20 + $0x160] ss:$16 sps:$4 sm:$0xff]  }
 0x54d   :  { %4843 = vmatmul.mubr.bf16.gmra.mrb[100].mxu0 %v3893_v2  ;;  %6319 = vmatprep.subr.bf16.mxu1 %v12602_v47  ;;  %v12629_v47 = vld [vmem:[#allocation20 + $0xe4] ss:$16 sps:$4 sm:$0xff]  }
 0x54e   :  { %5069 = vmatmul.mubr.bf16.gmra.mrb[100].mxu1 %v3893_v2  ;;  %4852 = vmatprep.mubr.bf16.mxu0 %v3898_v31  ;;  %v3873_v2 = vadd.bf16 %v14758_v28, %v15753_v55  ;;  %v12683_v55 = vld [vmem:[#allocation20 + $0x204] ss:$16 sps:$4 sm:$0xff]  }
 0x54f   :  { %5078 = vmatprep.mubr.bf16.mxu1 %v3898_v31  ;;  %6094 = vmatpush1.bf16.msra.mxu0 %v12597_v38  ;;  %v12627_v38 = vld [vmem:[#allocation20 + $0xe0] ss:$16 sps:$4 sm:$0xff]   ;;  %v15754_v31 = vpack.c.bf16 %v14707_v34, %v14701_v10  ;;  %v12644_v10 = vld [vmem:[#allocation20 + $0x12c] ss:$16 sps:$4 sm:$0xff]   ;;  %v15755_v34 = vpack.c.bf16 %v14703_v9, %v14698_v32 }
 0x550   :  { %6320 = vmatpush1.bf16.msra.mxu1 %v12600_v18  ;;  %6095 = vmatprep.subr.bf16.mxu0 %v12605_v36  ;;  %v12630_v36 = vld [vmem:[#allocation20 + $0xe8] ss:$16 sps:$4 sm:$0xff]   ;;  %v3905_v16 = vmax.bf16 %v15730_v17, %v3873_v2  ;;  %v12645_v32 = vld [vmem:[#allocation20 + $0x140] ss:$16 sps:$4 sm:$0xff]   ;;  %v12686_v2 = vld [vmem:[#allocation20 + $0x20c] ss:$16 sps:$4 sm:$0xff]  }
 0x551   :  { %6321 = vmatprep.subr.bf16.mxu1 %v12608_v41  ;;  %v3878_v18 = vadd.bf16 %v14738_v60, %v15754_v31  ;;  %v12635_v41 = vld [vmem:[#allocation20 + $0x104] ss:$16 sps:$4 sm:$0xff]   ;;  %v3877_v57 = vadd.bf16 %v14758_v28, %v15755_v34 }
 0x553   :  { %6096 = vmatpush1.bf16.msra.mxu0 %v12603_v52  ;;  %v3910_v53 = vmax.bf16 %v15730_v17, %v3878_v18  ;;  %v12636_v52 = vld [vmem:[#allocation20 + $0x108] ss:$16 sps:$4 sm:$0xff]  }
 0x554   :  { %6322 = vmatpush1.bf16.msra.mxu1 %v12606_v11  ;;  %6097 = vmatprep.subr.bf16.mxu0 %v12611_v7  ;;  %v12639_v11 = vld [vmem:[#allocation20 + $0x120] ss:$16 sps:$4 sm:$0xff]   ;;  %v15756_v7 = vpack.c.bf16 %v14725_v44, %v14719_v25  ;;  %v12656_v25 = vld [vmem:[#allocation20 + $0x16c] ss:$16 sps:$4 sm:$0xff]   ;;  %v15757_v44 = vpack.c.bf16 %v14721_v42, %v14714_v12 }
 0x555   :  { %4853 = vmatmul.mubr.bf16.gmra.mrb[104].mxu0 %v3897_v14  ;;  %6323 = vmatprep.subr.bf16.mxu1 %v12614_v30  ;;  %v12657_v12 = vld [vmem:[#allocation20 + $0x180] ss:$16 sps:$4 sm:$0xff]  }
 0x556   :  { %5079 = vmatmul.mubr.bf16.gmra.mrb[104].mxu1 %v3897_v14  ;;  %4862 = vmatprep.mubr.bf16.mxu0 %v3902_v49  ;;  %v3882_v30 = vadd.bf16 %v14738_v60, %v15756_v7  ;;  %v12642_v14 = vld [vmem:[#allocation20 + $0x128] ss:$16 sps:$4 sm:$0xff]   ;;  %v3881_v43 = vadd.bf16 %v14758_v28, %v15757_v44 }
 0x557   :  { %5088 = vmatprep.mubr.bf16.mxu1 %v3902_v49  ;;  %6098 = vmatpush1.bf16.msra.mxu0 %v12609_v26  ;;  %v12647_v26 = vld [vmem:[#allocation20 + $0x144] ss:$16 sps:$4 sm:$0xff]   ;;  %v12650_v49 = vld [vmem:[#allocation20 + $0x14c] ss:$16 sps:$4 sm:$0xff]  }
 0x558   :  { %6324 = vmatpush1.bf16.msra.mxu1 %v12612_v22  ;;  %6099 = vmatprep.subr.bf16.mxu0 %v12617_v19  ;;  %v3909_v22 = vmax.bf16 %v15730_v17, %v3877_v57  ;;  %v3914_v9 = vmax.bf16 %v15730_v17, %v3882_v30  ;;  %v12648_v19 = vld [vmem:[#allocation20 + $0x148] ss:$16 sps:$4 sm:$0xff]  }
 0x559   :  { %6325 = vmatprep.subr.bf16.mxu1 %v12620_v39  ;;  %v12653_v39 = vld [vmem:[#allocation20 + $0x164] ss:$16 sps:$4 sm:$0xff]  }
 0x55b   :  { %6100 = vmatpush1.bf16.msra.mxu0 %v12615_v51  ;;  %v3886_v51 = vadd.bf16 %v14738_v60, %v3800_v58  ;;  %v3885_v60 = vadd.bf16 %v14758_v28, %v3799_v50  ;;  %v12666_v58 = vld [vmem:[#allocation20 + $0x1a8] ss:$16 sps:$4 sm:$0xff]   ;;  %v12675_v50 = vld [vmem:[#allocation20 + $0x1e0] ss:$16 sps:$4 sm:$0xff]  }
 0x55c   :  { %6326 = vmatpush1.bf16.msra.mxu1 %v12618_v6  ;;  %6101 = vmatprep.subr.bf16.mxu0 %v12623_v62  ;;  %v12662_v6 = vld [vmem:[#allocation20 + $0x18c] ss:$16 sps:$4 sm:$0xff]   ;;  %v3913_v62 = vmax.bf16 %v15730_v17, %v3881_v43  ;;  %v12678_v28 = vld [vmem:[#allocation20 + $0x1e8] ss:$16 sps:$4 sm:$0xff]  }
 0x55d   :  { %4863 = vmatmul.mubr.bf16.gmra.mrb[108].mxu0 %v3901_v27  ;;  %6327 = vmatprep.subr.bf16.mxu1 %v12626_v37  ;;  %v3918_v42 = vmax.bf16 %v15730_v17, %v3886_v51  ;;  %v12660_v37 = vld [vmem:[#allocation20 + $0x188] ss:$16 sps:$4 sm:$0xff]   ;;  %v12689_v51 = vld [vmem:[#allocation20 + $0x224] ss:$16 sps:$4 sm:$0xff]  }
 0x55e   :  { %5089 = vmatmul.mubr.bf16.gmra.mrb[108].mxu1 %v3901_v27  ;;  %4872 = vmatprep.mubr.bf16.mxu0 %v3906_v5  ;;  %v12665_v27 = vld [vmem:[#allocation20 + $0x1a4] ss:$16 sps:$4 sm:$0xff]  }
 0x55f   :  { %5098 = vmatprep.mubr.bf16.mxu1 %v3906_v5  ;;  %6102 = vmatpush1.bf16.msra.mxu0 %v12621_v29  ;;  %v3917_v29 = vmax.bf16 %v15730_v17, %v3885_v60  ;;  %v12671_v5 = vld [vmem:[#allocation20 + $0x1c4] ss:$16 sps:$4 sm:$0xff]   ;;  %v12687_v60 = vld [vmem:[#allocation20 + $0x220] ss:$16 sps:$4 sm:$0xff]  }
 0x560   :  { %6328 = vmatpush1.bf16.msra.mxu1 %v12624_v20  ;;  %6103 = vmatprep.subr.bf16.mxu0 %v12629_v47  ;;  %v12674_v20 = vld [vmem:[#allocation20 + $0x1cc] ss:$16 sps:$4 sm:$0xff]   ;;  %v12669_v47 = vld [vmem:[#allocation20 + $0x1c0] ss:$16 sps:$4 sm:$0xff]  }
 0x561   :  { %6329 = vmatprep.subr.bf16.mxu1 %v12632_v13  ;;  %v12672_v13 = vld [vmem:[#allocation20 + $0x1c8] ss:$16 sps:$4 sm:$0xff]  }
 0x563   :  { %6104 = vmatpush1.bf16.msra.mxu0 %v12627_v38  ;;  %v10767_v38 = vld.sshfl [vmem:[#allocation17] sm:$0x33 pattern:$0x75316420] }
 0x564   :  { %6330 = vmatpush1.bf16.msra.mxu1 %v12630_v36  ;;  %6105 = vmatprep.subr.bf16.mxu0 %v12635_v41  ;;  %v5180_v31 = vcombine.high %v10767_v38, %v10767_v38  ;;  %v14838_v18 = vrot.slane %v10767_v38, %v14241_v4  ;;  %v12701_v38 = vld [vmem:[#allocation20 + $0x264] ss:$16 sps:$4 sm:$0xff]  }
 0x565   :  { %4873 = vmatmul.mubr.bf16.gmra.mrb[112].mxu0 %v3905_v16  ;;  %6331 = vmatprep.subr.bf16.mxu1 %v12638_v59 }
 0x566   :  { %5099 = vmatmul.mubr.bf16.gmra.mrb[112].mxu1 %v3905_v16  ;;  %4882 = vmatprep.mubr.bf16.mxu0 %v3910_v53  ;;  %v14841_v36 = vrot.slane %v5180_v31, %v14241_v4  ;;  %v5198_v41 = vpack.i.b16 %v14838_v18, %v14838_v18  ;;  %v12704_v31 = vld [vmem:[#allocation20 + $0x26c] ss:$16 sps:$4 sm:$0xff]  }
 0x567   :  { %5108 = vmatprep.mubr.bf16.mxu1 %v3910_v53  ;;  %6106 = vmatpush1.bf16.msra.mxu0 %v12633_v24 }
 0x568   :  { %6332 = vmatpush1.bf16.msra.mxu1 %v12636_v52  ;;  %6107 = vmatprep.subr.bf16.mxu0 %v12641_v1  ;;  %v5205_v59 = vpack.i.b16 %v14841_v36, %v14841_v36  ;;  %v14850_v52 = vrot.slane %v5198_v41, %v14239_v63 }
 0x569   :  { %6333 = vmatprep.subr.bf16.mxu1 %v12644_v10 }
 0x56a   :  { %v14855_v34 = vrot.slane %v5205_v59, %v14239_v63 }
 0x56b   :  { %6108 = vmatpush1.bf16.msra.mxu0 %v12639_v11 }
 0x56c   :  { %6334 = vmatpush1.bf16.msra.mxu1 %v12642_v14  ;;  %6109 = vmatprep.subr.bf16.mxu0 %v12647_v26 }
 0x56d   :  { %4883 = vmatmul.mubr.bf16.gmra.mrb[116].mxu0 %v3909_v22  ;;  %6335 = vmatprep.subr.bf16.mxu1 %v12650_v49 }
 0x56e   :  { %5109 = vmatmul.mubr.bf16.gmra.mrb[116].mxu1 %v3909_v22  ;;  %4892 = vmatprep.mubr.bf16.mxu0 %v3914_v9 }
 0x56f   :  { %5118 = vmatprep.mubr.bf16.mxu1 %v3914_v9  ;;  %6110 = vmatpush1.bf16.msra.mxu0 %v12645_v32 }
 0x570   :  { %6336 = vmatpush1.bf16.msra.mxu1 %v12648_v19  ;;  %6111 = vmatprep.subr.bf16.mxu0 %v12653_v39  ;;  %v12681_v39 = vld [vmem:[#allocation20 + $0x200] ss:$16 sps:$4 sm:$0xff]  }
 0x571   :  { %6337 = vmatprep.subr.bf16.mxu1 %v12656_v25  ;;  %v12684_v25 = vld [vmem:[#allocation20 + $0x208] ss:$16 sps:$4 sm:$0xff]  }
 0x573   :  { %6112 = vmatpush1.bf16.msra.mxu0 %v12651_v46 }
 0x574   :  { %6338 = vmatpush1.bf16.msra.mxu1 %v12654_v23  ;;  %6113 = vmatprep.subr.bf16.mxu0 %v12659_v3  ;;  %v12692_v23 = vld [vmem:[#allocation20 + $0x22c] ss:$16 sps:$4 sm:$0xff]  }
 0x575   :  { %4893 = vmatmul.mubr.bf16.gmra.mrb[120].mxu0 %v3913_v62  ;;  %6339 = vmatprep.subr.bf16.mxu1 %v12662_v6 }
 0x576   :  { %5119 = vmatmul.mubr.bf16.gmra.mrb[120].mxu1 %v3913_v62  ;;  %4902 = vmatprep.mubr.bf16.mxu0 %v3918_v42 }
 0x577   :  { %5128 = vmatprep.mubr.bf16.mxu1 %v3918_v42  ;;  %6114 = vmatpush1.bf16.msra.mxu0 %v12657_v12 }
 0x578   :  { %6340 = vmatpush1.bf16.msra.mxu1 %v12660_v37  ;;  %6115 = vmatprep.subr.bf16.mxu0 %v12665_v27 }
 0x579   :  { %6341 = vmatprep.subr.bf16.mxu1 %v12668_v35 }
 0x57b   :  { %6116 = vmatpush1.bf16.msra.mxu0 %v12663_v0  ;;  %v12690_v0 = vld [vmem:[#allocation20 + $0x228] ss:$16 sps:$4 sm:$0xff]  }
 0x57c   :  { %6342 = vmatpush1.bf16.msra.mxu1 %v12666_v58  ;;  %6117 = vmatprep.subr.bf16.mxu0 %v12671_v5  ;;  %v12695_v5 = vld [vmem:[#allocation20 + $0x244] ss:$16 sps:$4 sm:$0xff]  }
 0x57d   :  { %4903 = vmatmul.mubr.bf16.gmra.mrb[124].mxu0 %v3917_v29  ;;  %6343 = vmatprep.subr.bf16.mxu1 %v12674_v20  ;;  %v12698_v20 = vld [vmem:[#allocation20 + $0x24c] ss:$16 sps:$4 sm:$0xff]  }
 0x57e   :  { %5129 = vmatmul.mubr.bf16.gmra.mrb[124].mxu1 %v3917_v29  ;;  %v12762_v29 = vld [vmem:[#allocation20 + $0x3a8] ss:$16 sps:$4 sm:$0xff]  }
 0x57f   :  { %6118 = vmatpush1.bf16.msra.mxu0 %v12669_v47 }
 0x580   :  { %6344 = vmatpush1.bf16.msra.mxu1 %v12672_v13  ;;  %6119 = vmatprep.subr.bf16.mxu0 %v12677_v56 }
 0x581   :  { %6345 = vmatprep.subr.bf16.mxu1 %v12680_v45  ;;  %v12693_v45 = vld [vmem:[#allocation20 + $0x240] ss:$16 sps:$4 sm:$0xff]  }
 0x583   :  { %6120 = vmatpush1.bf16.msra.mxu0 %v12675_v50  ;;  %v12696_v50 = vld [vmem:[#allocation20 + $0x248] ss:$16 sps:$4 sm:$0xff]  }
 0x584   :  { %6346 = vmatpush1.bf16.msra.mxu1 %v12678_v28  ;;  %6202 = vmatprep.subr.bf16.mxu0 %v12683_v55 }
 0x585   :  { %6428 = vmatprep.subr.bf16.mxu1 %v12686_v2 }
 0x618   :  { %v4834_v16 = vpop.f32.mrb[96].mxu0 }
 0x619   :  { %v14847_v24 = vpop.f32.mrb[96].mxu1  ;;  %v4836_v53 = vpop.f32.mrb[97].mxu0 }
 0x61a   :  { %v14852_v1 = vpop.f32.mrb[97].mxu1  ;;  %v4838_v10 = vpop.f32.mrb[98].mxu0 }
 0x61b   :  { %v5139_v57 = vpack.c.bf16 %v4838_v10, %v4834_v16  ;;  %v14857_v11 = vpop.f32.mrb[98].mxu1  ;;  %v4840_v7 = vpop.f32.mrb[99].mxu0 }
 0x61c   :  { %v5140_v14 = vpack.c.bf16 %v4840_v7, %v4836_v53  ;;  %v14861_v26 = vpop.f32.mrb[99].mxu1 }
 0x61d   :  { %v5225_v49 = vadd.bf16 %v14850_v52, %v5139_v57 }
 0x61e   :  { %v5226_v32 = vadd.bf16 %v14855_v34, %v5140_v14 }
 0x61f   :  { %v5257_v44 = vmax.bf16 %v15730_v17, %v5225_v49  ;;  %v12699_v49 = vld [vmem:[#allocation20 + $0x260] ss:$16 sps:$4 sm:$0xff]  }
 0x620   :  { %v4844_v9 = vpop.f32.mrb[100].mxu0  ;;  %v5258_v19 = vmax.bf16 %v15730_v17, %v5226_v32  ;;  %v12702_v32 = vld [vmem:[#allocation20 + $0x268] ss:$16 sps:$4 sm:$0xff]  }
 0x621   :  { %v14869_v43 = vpop.f32.mrb[100].mxu1  ;;  %v4846_v46 = vpop.f32.mrb[101].mxu0 }
 0x622   :  { %v14871_v3 = vpop.f32.mrb[101].mxu1  ;;  %v4848_v6 = vpop.f32.mrb[102].mxu0  ;;  %6121 = vmatprep.mubr.bf16.mxu0 %v5258_v19  ;;  %6347 = vmatprep.mubr.bf16.mxu1 %v5258_v19 }
 0x623   :  { %v5143_v62 = vpack.c.bf16 %v4848_v6, %v4844_v9  ;;  %v14873_v12 = vpop.f32.mrb[102].mxu1  ;;  %v4850_v42 = vpop.f32.mrb[103].mxu0  ;;  %6122 = vmatmul.mubr.bf16.vlgmr.msra.gmra.mrb[128].mxu0 %v5257_v44  ;;  %6348 = vmatmul.mubr.bf16.vlgmr.msra.gmra.mrb[128].mxu1 %v5257_v44  ;;  %v12708_v6 = vld [vmem:[#allocation20 + $0x288] ss:$16 sps:$4 sm:$0xff]  }
 0x624   :  { %v5144_v27 = vpack.c.bf16 %v4850_v42, %v4846_v46  ;;  %v14877_v35 = vpop.f32.mrb[103].mxu1  ;;  %6203 = vmatpush1.bf16.msra.mxu0 %v12681_v39  ;;  %6429 = vmatpush1.bf16.msra.mxu1 %v12684_v25  ;;  %v12707_v39 = vld [vmem:[#allocation20 + $0x284] ss:$16 sps:$4 sm:$0xff]   ;;  %v12710_v25 = vld [vmem:[#allocation20 + $0x28c] ss:$16 sps:$4 sm:$0xff]  }
 0x625   :  { %v5229_v58 = vadd.bf16 %v14850_v52, %v5143_v62  ;;  %6204 = vmatprep.subr.bf16.mxu0 %v12689_v51  ;;  %6430 = vmatprep.subr.bf16.mxu1 %v12692_v23  ;;  %v12705_v23 = vld [vmem:[#allocation20 + $0x280] ss:$16 sps:$4 sm:$0xff]  }
 0x626   :  { %v5230_v47 = vadd.bf16 %v14855_v34, %v5144_v27 }
 0x627   :  { %v5261_v2 = vmax.bf16 %v15730_v17, %v5229_v58 }
 0x628   :  { %6205 = vmatpush1.bf16.msra.mxu0 %v12687_v60  ;;  %v4854_v13 = vpop.f32.mrb[104].mxu0  ;;  %6431 = vmatpush1.bf16.msra.mxu1 %v12690_v0  ;;  %v5262_v56 = vmax.bf16 %v15730_v17, %v5230_v47  ;;  %v12713_v60 = vld [vmem:[#allocation20 + $0x2a4] ss:$16 sps:$4 sm:$0xff]   ;;  %v12716_v0 = vld [vmem:[#allocation20 + $0x2ac] ss:$16 sps:$4 sm:$0xff]  }
 0x629   :  { %v14884_v28 = vpop.f32.mrb[104].mxu1  ;;  %v4856_v55 = vpop.f32.mrb[105].mxu0  ;;  %6206 = vmatprep.subr.bf16.mxu0 %v12695_v5  ;;  %6432 = vmatprep.subr.bf16.mxu1 %v12698_v20 }
 0x62a   :  { %v14887_v41 = vpop.f32.mrb[105].mxu1  ;;  %v4858_v59 = vpop.f32.mrb[106].mxu0  ;;  %6131 = vmatprep.mubr.bf16.mxu0 %v5262_v56  ;;  %6357 = vmatprep.mubr.bf16.mxu1 %v5262_v56 }
 0x62b   :  { %v5147_v16 = vpack.c.bf16 %v4858_v59, %v4854_v13  ;;  %v14889_v53 = vpop.f32.mrb[106].mxu1  ;;  %v4860_v10 = vpop.f32.mrb[107].mxu0  ;;  %6132 = vmatmul.mubr.bf16.gmra.mrb[132].mxu0 %v5261_v2  ;;  %6358 = vmatmul.mubr.bf16.gmra.mrb[132].mxu1 %v5261_v2  ;;  %v12714_v2 = vld [vmem:[#allocation20 + $0x2a8] ss:$16 sps:$4 sm:$0xff]   ;;  %v12719_v59 = vld [vmem:[#allocation20 + $0x2c4] ss:$16 sps:$4 sm:$0xff]  }
 0x62c   :  { %v5148_v7 = vpack.c.bf16 %v4860_v10, %v4856_v55  ;;  %v14893_v14 = vpop.f32.mrb[107].mxu1  ;;  %6207 = vmatpush1.bf16.msra.mxu0 %v12693_v45  ;;  %6433 = vmatpush1.bf16.msra.mxu1 %v12696_v50  ;;  %v12711_v55 = vld [vmem:[#allocation20 + $0x2a0] ss:$16 sps:$4 sm:$0xff]  }
 0x62d   :  { %v5233_v9 = vadd.bf16 %v14850_v52, %v5147_v16  ;;  %6208 = vmatprep.subr.bf16.mxu0 %v12701_v38  ;;  %6434 = vmatprep.subr.bf16.mxu1 %v12704_v31  ;;  %v12722_v16 = vld [vmem:[#allocation20 + $0x2cc] ss:$16 sps:$4 sm:$0xff]   ;;  %v12750_v31 = vld [vmem:[#allocation20 + $0x368] ss:$16 sps:$4 sm:$0xff]  }
 0x62e   :  { %v5234_v44 = vadd.bf16 %v14855_v34, %v5148_v7 }
 0x62f   :  { %v5265_v27 = vmax.bf16 %v15730_v17, %v5233_v9  ;;  %v12720_v9 = vld [vmem:[#allocation20 + $0x2c8] ss:$16 sps:$4 sm:$0xff]  }
 0x630   :  { %6209 = vmatpush1.bf16.msra.mxu0 %v12699_v49  ;;  %v4864_v46 = vpop.f32.mrb[108].mxu0  ;;  %6435 = vmatpush1.bf16.msra.mxu1 %v12702_v32  ;;  %v5266_v51 = vmax.bf16 %v15730_v17, %v5234_v44  ;;  %v12717_v32 = vld [vmem:[#allocation20 + $0x2c0] ss:$16 sps:$4 sm:$0xff]  }
 0x631   :  { %v14900_v62 = vpop.f32.mrb[108].mxu1  ;;  %v4866_v42 = vpop.f32.mrb[109].mxu0  ;;  %6210 = vmatprep.subr.bf16.mxu0 %v12707_v39  ;;  %6436 = vmatprep.subr.bf16.mxu1 %v12710_v25 }
 0x632   :  { %v14903_v58 = vpop.f32.mrb[109].mxu1  ;;  %v4868_v5 = vpop.f32.mrb[110].mxu0  ;;  %6141 = vmatprep.mubr.bf16.mxu0 %v5266_v51  ;;  %6367 = vmatprep.mubr.bf16.mxu1 %v5266_v51  ;;  %v12728_v51 = vld [vmem:[#allocation20 + $0x2ec] ss:$16 sps:$4 sm:$0xff]  }
 0x633   :  { %v5151_v20 = vpack.c.bf16 %v4868_v5, %v4864_v46  ;;  %v14905_v47 = vpop.f32.mrb[110].mxu1  ;;  %v4870_v13 = vpop.f32.mrb[111].mxu0  ;;  %6142 = vmatmul.mubr.bf16.gmra.mrb[136].mxu0 %v5265_v27  ;;  %6368 = vmatmul.mubr.bf16.gmra.mrb[136].mxu1 %v5265_v27  ;;  %v12725_v46 = vld [vmem:[#allocation20 + $0x2e4] ss:$16 sps:$4 sm:$0xff]  }
 0x634   :  { %v5152_v45 = vpack.c.bf16 %v4870_v13, %v4866_v42  ;;  %v14909_v50 = vpop.f32.mrb[111].mxu1  ;;  %6211 = vmatpush1.bf16.msra.mxu0 %v12705_v23  ;;  %6437 = vmatpush1.bf16.msra.mxu1 %v12708_v6  ;;  %v12723_v13 = vld [vmem:[#allocation20 + $0x2e0] ss:$16 sps:$4 sm:$0xff]  }
 0x635   :  { %v5237_v38 = vadd.bf16 %v14850_v52, %v5151_v20  ;;  %6212 = vmatprep.subr.bf16.mxu0 %v12713_v60  ;;  %6438 = vmatprep.subr.bf16.mxu1 %v12716_v0 }
 0x636   :  { %v5238_v10 = vadd.bf16 %v14855_v34, %v5152_v45  ;;  %v12726_v45 = vld [vmem:[#allocation20 + $0x2e8] ss:$16 sps:$4 sm:$0xff]  }
 0x637   :  { %v5269_v44 = vmax.bf16 %v15730_v17, %v5237_v38  ;;  %v12731_v38 = vld [vmem:[#allocation20 + $0x304] ss:$16 sps:$4 sm:$0xff]  }
 0x638   :  { %6213 = vmatpush1.bf16.msra.mxu0 %v12711_v55  ;;  %v4874_v7 = vpop.f32.mrb[112].mxu0  ;;  %6439 = vmatpush1.bf16.msra.mxu1 %v12714_v2  ;;  %v5270_v49 = vmax.bf16 %v15730_v17, %v5238_v10 }
 0x639   :  { %v14916_v39 = vpop.f32.mrb[112].mxu1  ;;  %v4876_v25 = vpop.f32.mrb[113].mxu0  ;;  %6214 = vmatprep.subr.bf16.mxu0 %v12719_v59  ;;  %6440 = vmatprep.subr.bf16.mxu1 %v12722_v16  ;;  %v12734_v59 = vld [vmem:[#allocation20 + $0x30c] ss:$16 sps:$4 sm:$0xff]  }
 0x63a   :  { %v14919_v23 = vpop.f32.mrb[113].mxu1  ;;  %v4878_v6 = vpop.f32.mrb[114].mxu0  ;;  %6151 = vmatprep.mubr.bf16.mxu0 %v5270_v49  ;;  %6377 = vmatprep.mubr.bf16.mxu1 %v5270_v49  ;;  %v12729_v49 = vld [vmem:[#allocation20 + $0x300] ss:$16 sps:$4 sm:$0xff]  }
 0x63b   :  { %v5155_v42 = vpack.c.bf16 %v4878_v6, %v4874_v7  ;;  %v14921_v27 = vpop.f32.mrb[114].mxu1  ;;  %v4880_v60 = vpop.f32.mrb[115].mxu0  ;;  %6152 = vmatmul.mubr.bf16.gmra.mrb[140].mxu0 %v5269_v44  ;;  %6378 = vmatmul.mubr.bf16.gmra.mrb[140].mxu1 %v5269_v44 }
 0x63c   :  { %v5156_v5 = vpack.c.bf16 %v4880_v60, %v4876_v25  ;;  %v14925_v20 = vpop.f32.mrb[115].mxu1  ;;  %6215 = vmatpush1.bf16.msra.mxu0 %v12717_v32  ;;  %6441 = vmatpush1.bf16.msra.mxu1 %v12720_v9  ;;  %v12732_v32 = vld [vmem:[#allocation20 + $0x308] ss:$16 sps:$4 sm:$0xff]  }
 0x63d   :  { %v5241_v55 = vadd.bf16 %v14850_v52, %v5155_v42  ;;  %6216 = vmatprep.subr.bf16.mxu0 %v12725_v46  ;;  %6442 = vmatprep.subr.bf16.mxu1 %v12728_v51  ;;  %v12737_v46 = vld [vmem:[#allocation20 + $0x324] ss:$16 sps:$4 sm:$0xff]   ;;  %v12740_v51 = vld [vmem:[#allocation20 + $0x32c] ss:$16 sps:$4 sm:$0xff]  }
 0x63e   :  { %v5242_v16 = vadd.bf16 %v14855_v34, %v5156_v5 }
 0x63f   :  { %v5273_v44 = vmax.bf16 %v15730_v17, %v5241_v55  ;;  %v12735_v55 = vld [vmem:[#allocation20 + $0x320] ss:$16 sps:$4 sm:$0xff]  }
 0x640   :  { %6217 = vmatpush1.bf16.msra.mxu0 %v12723_v13  ;;  %v4884_v10 = vpop.f32.mrb[116].mxu0  ;;  %6443 = vmatpush1.bf16.msra.mxu1 %v12726_v45  ;;  %v5274_v7 = vmax.bf16 %v15730_v17, %v5242_v16 }
 0x641   :  { %v14932_v9 = vpop.f32.mrb[116].mxu1  ;;  %v4886_v25 = vpop.f32.mrb[117].mxu0  ;;  %6218 = vmatprep.subr.bf16.mxu0 %v12731_v38  ;;  %6444 = vmatprep.subr.bf16.mxu1 %v12734_v59  ;;  %v12738_v59 = vld [vmem:[#allocation20 + $0x328] ss:$16 sps:$4 sm:$0xff]  }
 0x642   :  { %v14935_v6 = vpop.f32.mrb[117].mxu1  ;;  %v4888_v42 = vpop.f32.mrb[118].mxu0  ;;  %6161 = vmatprep.mubr.bf16.mxu0 %v5274_v7  ;;  %6387 = vmatprep.mubr.bf16.mxu1 %v5274_v7  ;;  %v12743_v7 = vld [vmem:[#allocation20 + $0x344] ss:$16 sps:$4 sm:$0xff]  }
 0x643   :  { %v5159_v60 = vpack.c.bf16 %v4888_v42, %v4884_v10  ;;  %v14937_v5 = vpop.f32.mrb[118].mxu1  ;;  %v4890_v13 = vpop.f32.mrb[119].mxu0  ;;  %6162 = vmatmul.mubr.bf16.gmra.mrb[144].mxu0 %v5273_v44  ;;  %6388 = vmatmul.mubr.bf16.gmra.mrb[144].mxu1 %v5273_v44  ;;  %v12746_v42 = vld [vmem:[#allocation20 + $0x34c] ss:$16 sps:$4 sm:$0xff]   ;;  %v5196_v10 = vcombine.high %v14841_v36, %v14841_v36  ;;  %v12747_v36 = vld [vmem:[#allocation20 + $0x360] ss:$16 sps:$4 sm:$0xff]  }
 0x644   :  { %v5160_v38 = vpack.c.bf16 %v4890_v13, %v4886_v25  ;;  %v14941_v16 = vpop.f32.mrb[119].mxu1  ;;  %6219 = vmatpush1.bf16.msra.mxu0 %v12729_v49  ;;  %6445 = vmatpush1.bf16.msra.mxu1 %v12732_v32  ;;  %v12741_v49 = vld [vmem:[#allocation20 + $0x340] ss:$16 sps:$4 sm:$0xff]   ;;  %v12744_v32 = vld [vmem:[#allocation20 + $0x348] ss:$16 sps:$4 sm:$0xff]  }
 0x645   :  { %v5245_v0 = vadd.bf16 %v14850_v52, %v5159_v60  ;;  %6220 = vmatprep.subr.bf16.mxu0 %v12737_v46  ;;  %6446 = vmatprep.subr.bf16.mxu1 %v12740_v51  ;;  %v12749_v46 = vld [vmem:[#allocation20 + $0x364] ss:$16 sps:$4 sm:$0xff]   ;;  %v12752_v51 = vld [vmem:[#allocation20 + $0x36c] ss:$16 sps:$4 sm:$0xff]  }
 0x646   :  { %v5246_v44 = vadd.bf16 %v14855_v34, %v5160_v38 }
 0x647   :  { %v5277_v60 = vmax.bf16 %v15730_v17, %v5245_v0 }
 0x648   :  { %6221 = vmatpush1.bf16.msra.mxu0 %v12735_v55  ;;  %v4894_v45 = vpop.f32.mrb[120].mxu0  ;;  %6447 = vmatpush1.bf16.msra.mxu1 %v12738_v59  ;;  %v5278_v25 = vmax.bf16 %v15730_v17, %v5246_v44 }
 0x649   :  { %v14948_v13 = vpop.f32.mrb[120].mxu1  ;;  %v4896_v2 = vpop.f32.mrb[121].mxu0  ;;  %6222 = vmatprep.subr.bf16.mxu0 %v12743_v7  ;;  %6448 = vmatprep.subr.bf16.mxu1 %v12746_v42 }
 0x64a   :  { %v14953_v38 = vpop.f32.mrb[121].mxu1  ;;  %v4898_v55 = vpop.f32.mrb[122].mxu0  ;;  %6171 = vmatprep.mubr.bf16.mxu0 %v5278_v25  ;;  %6397 = vmatprep.mubr.bf16.mxu1 %v5278_v25  ;;  %v12755_v25 = vld [vmem:[#allocation20 + $0x384] ss:$16 sps:$4 sm:$0xff]  }
 0x64b   :  { %v5163_v59 = vpack.c.bf16 %v4898_v55, %v4894_v45  ;;  %v14955_v44 = vpop.f32.mrb[122].mxu1  ;;  %v4900_v56 = vpop.f32.mrb[123].mxu0  ;;  %6172 = vmatmul.mubr.bf16.gmra.mrb[148].mxu0 %v5277_v60  ;;  %6398 = vmatmul.mubr.bf16.gmra.mrb[148].mxu1 %v5277_v60  ;;  %v12758_v55 = vld [vmem:[#allocation20 + $0x38c] ss:$16 sps:$4 sm:$0xff]   ;;  %v5219_v60 = vpack.i.b16 %v5196_v10, %v5196_v10  ;;  %v12761_v10 = vld [vmem:[#allocation20 + $0x3a4] ss:$16 sps:$4 sm:$0xff]  }
 0x64c   :  { %v5164_v7 = vpack.c.bf16 %v4900_v56, %v4896_v2  ;;  %v14959_v42 = vpop.f32.mrb[123].mxu1  ;;  %6223 = vmatpush1.bf16.msra.mxu0 %v12741_v49  ;;  %6449 = vmatpush1.bf16.msra.mxu1 %v12744_v32  ;;  %v12753_v49 = vld [vmem:[#allocation20 + $0x380] ss:$16 sps:$4 sm:$0xff]   ;;  %v12756_v32 = vld [vmem:[#allocation20 + $0x388] ss:$16 sps:$4 sm:$0xff]  }
 0x64d   :  { %v5249_v57 = vadd.bf16 %v14850_v52, %v5163_v59  ;;  %6224 = vmatprep.subr.bf16.mxu0 %v12749_v46  ;;  %6450 = vmatprep.subr.bf16.mxu1 %v12752_v51  ;;  %v5195_v59 = vcombine.high %v14838_v18, %v14838_v18  ;;  %v12764_v51 = vld [vmem:[#allocation20 + $0x3ac] ss:$16 sps:$4 sm:$0xff]  }
 0x64e   :  { %v5250_v19 = vadd.bf16 %v14855_v34, %v5164_v7  ;;  %v14972_v7 = vrot.slane %v5219_v60, %v14239_v63  ;;  %v12759_v60 = vld [vmem:[#allocation20 + $0x3a0] ss:$16 sps:$4 sm:$0xff]  }
 0x64f   :  { %v5281_v46 = vmax.bf16 %v15730_v17, %v5249_v57  ;;  %v5212_v30 = vpack.i.b16 %v5195_v59, %v5195_v59  ;;  %v12765_v59 = vld [vmem:[#allocation20 + $0x3c0] ss:$16 sps:$4 sm:$0xff]  }
 0x650   :  { %6225 = vmatpush1.bf16.msra.mxu0 %v12747_v36  ;;  %v4904_v56 = vpop.f32.mrb[124].mxu0  ;;  %6451 = vmatpush1.bf16.msra.mxu1 %v12750_v31  ;;  %v5282_v2 = vmax.bf16 %v15730_v17, %v5250_v19 }
 0x651   :  { %v14968_v0 = vpop.f32.mrb[124].mxu1  ;;  %v4906_v45 = vpop.f32.mrb[125].mxu0  ;;  %6226 = vmatprep.subr.bf16.mxu0 %v12755_v25  ;;  %6452 = vmatprep.subr.bf16.mxu1 %v12758_v55 }
 0x652   :  { %v14974_v31 = vpop.f32.mrb[125].mxu1  ;;  %v4908_v19 = vpop.f32.mrb[126].mxu0  ;;  %6181 = vmatprep.mubr.bf16.mxu0 %v5282_v2  ;;  %6407 = vmatprep.mubr.bf16.mxu1 %v5282_v2  ;;  %v12767_v2 = vld [vmem:[#allocation20 + $0x3c4] ss:$16 sps:$4 sm:$0xff]  }
 0x653   :  { %v5167_v36 = vpack.c.bf16 %v4908_v19, %v4904_v56  ;;  %v14976_v37 = vpop.f32.mrb[126].mxu1  ;;  %v4910_v18 = vpop.f32.mrb[127].mxu0  ;;  %6182 = vmatmul.mubr.bf16.gmra.mrb[152].mxu0 %v5281_v46  ;;  %6408 = vmatmul.mubr.bf16.gmra.mrb[152].mxu1 %v5281_v46  ;;  %v12770_v46 = vld [vmem:[#allocation20 + $0x3cc] ss:$16 sps:$4 sm:$0xff]   ;;  %v15758_v19 = vpack.c.bf16 %v14861_v26, %v14852_v1  ;;  %v12773_v26 = vld [vmem:[#allocation20 + $0x3e4] ss:$16 sps:$4 sm:$0xff]  }
 0x654   :  { %v5169_v57 = vpack.c.bf16 %v14976_v37, %v14968_v0  ;;  %v5168_v25 = vpack.c.bf16 %v4910_v18, %v4906_v45  ;;  %v14980_v55 = vpop.f32.mrb[127].mxu1  ;;  %6227 = vmatpush1.bf16.msra.mxu0 %v12753_v49  ;;  %6453 = vmatpush1.bf16.msra.mxu1 %v12756_v32  ;;  %v12779_v18 = vld [vmem:[#allocation18 + $0x4] ss:$16 sps:$4 sm:$0xff]   ;;  %v12834_v0 = vld [vmem:[#allocation23 + $0x28] ss:$16 sps:$4 sm:$0xff]  }
 0x655   :  { %v5253_v22 = vadd.bf16 %v14850_v52, %v5167_v36  ;;  %v5170_v56 = vpack.c.bf16 %v14980_v55, %v14974_v31  ;;  %6228 = vmatprep.subr.bf16.mxu0 %v12761_v10  ;;  %6454 = vmatprep.subr.bf16.mxu1 %v12764_v51  ;;  %v5228_v45 = vadd.bf16 %v14972_v7, %v15758_v19  ;;  %v12768_v51 = vld [vmem:[#allocation20 + $0x3c8] ss:$16 sps:$4 sm:$0xff]   ;;  %v12776_v36 = vld [vmem:[#allocation20 + $0x3ec] ss:$16 sps:$4 sm:$0xff]   ;;  %v12831_v37 = vld [vmem:[#allocation23 + $0x20] ss:$16 sps:$4 sm:$0xff]  }
 0x656   :  { %v5254_v49 = vadd.bf16 %v14855_v34, %v5168_v25  ;;  %v14992_v52 = vrot.slane %v5212_v30, %v14239_v63  ;;  %v12771_v34 = vld [vmem:[#allocation20 + $0x3e0] ss:$16 sps:$4 sm:$0xff]   ;;  %v15759_v30 = vpack.c.bf16 %v14857_v11, %v14847_v24  ;;  %v12794_v25 = vld [vmem:[#allocation18 + $0xc] ss:$16 sps:$4 sm:$0xff]   ;;  %v12782_v24 = vld [vmem:[#allocation18 + $0x24] ss:$16 sps:$4 sm:$0xff]  }
 0x657   :  { %v5285_v10 = vmax.bf16 %v15730_v17, %v5253_v22  ;;  %v5260_v1 = vmax.bf16 %v15730_v17, %v5228_v45  ;;  %v12774_v22 = vld [vmem:[#allocation20 + $0x3e8] ss:$16 sps:$4 sm:$0xff]   ;;  %v12828_v31 = vld [vmem:[#allocation23 + $0x8] ss:$16 sps:$4 sm:$0xff]  }
 0x658   :  { %6229 = vmatpush1.bf16.msra.mxu0 %v12759_v60  ;;  %6455 = vmatpush1.bf16.msra.mxu1 %v12762_v29  ;;  %v5286_v32 = vmax.bf16 %v15730_v17, %v5254_v49  ;;  %v5227_v29 = vadd.bf16 %v14992_v52, %v15759_v30  ;;  %v15760_v60 = vpack.c.bf16 %v14877_v35, %v14871_v3  ;;  %v12792_v11 = vld [vmem:[#allocation18 + $0x8] ss:$16 sps:$4 sm:$0xff]   ;;  %v12797_v49 = vld [vmem:[#allocation18 + $0x2c] ss:$16 sps:$4 sm:$0xff]  }
 0x659   :  { %6230 = vmatprep.subr.bf16.mxu0 %v12767_v2  ;;  %6456 = vmatprep.subr.bf16.mxu1 %v12770_v46  ;;  %v12777_v46 = vld [vmem:[#allocation18] ss:$16 sps:$4 sm:$0xff]   ;;  %v15761_v3 = vpack.c.bf16 %v14873_v12, %v14869_v43  ;;  %v12788_v12 = vld [vmem:[#allocation18 + $0x64] ss:$16 sps:$4 sm:$0xff]   ;;  %v12801_v30 = vld [vmem:[#allocation18 + $0x48] ss:$16 sps:$4 sm:$0xff]  }
 0x65a   :  { %6191 = vmatprep.mubr.bf16.mxu0 %v5286_v32  ;;  %6417 = vmatprep.mubr.bf16.mxu1 %v5286_v32  ;;  %v5232_v2 = vadd.bf16 %v14972_v7, %v15760_v60  ;;  %v5259_v19 = vmax.bf16 %v15730_v17, %v5227_v29  ;;  %v12780_v32 = vld [vmem:[#allocation18 + $0x20] ss:$16 sps:$4 sm:$0xff]   ;;  %v12791_v60 = vld [vmem:[#allocation18 + $0x84] ss:$16 sps:$4 sm:$0xff]   ;;  %v12833_v55 = vld [vmem:[#allocation23 + $0x24] ss:$16 sps:$4 sm:$0xff]  }
 0x65b   :  { %6192 = vmatmul.mubr.bf16.gmra.mrb[156].mxu0 %v5285_v10  ;;  %6418 = vmatmul.mubr.bf16.gmra.mrb[156].mxu1 %v5285_v10  ;;  %v5231_v35 = vadd.bf16 %v14992_v52, %v15761_v3  ;;  %v15762_v10 = vpack.c.bf16 %v14893_v14, %v14887_v41  ;;  %v12806_v41 = vld [vmem:[#allocation18 + $0x6c] ss:$16 sps:$4 sm:$0xff]   ;;  %v15763_v14 = vpack.c.bf16 %v14889_v53, %v14884_v28  ;;  %v12789_v28 = vld [vmem:[#allocation18 + $0x80] ss:$16 sps:$4 sm:$0xff]  }
 0x65c   :  { %6231 = vmatpush1.bf16.msra.mxu0 %v12765_v59  ;;  %6234 = vmatprep.mubr.bf16.mxu0 %v5260_v1  ;;  %v5264_v45 = vmax.bf16 %v15730_v17, %v5232_v2  ;;  %v12785_v59 = vld [vmem:[#allocation18 + $0x44] ss:$16 sps:$4 sm:$0xff]   ;;  %v12804_v2 = vld [vmem:[#allocation18 + $0x68] ss:$16 sps:$4 sm:$0xff]  }
 0x65d   :  { %6457 = vmatpush1.bf16.msra.mxu1 %v12768_v51  ;;  %6460 = vmatprep.mubr.bf16.mxu1 %v5260_v1  ;;  %v5236_v51 = vadd.bf16 %v14972_v7, %v15762_v10  ;;  %v12795_v1 = vld [vmem:[#allocation18 + $0x28] ss:$16 sps:$4 sm:$0xff]   ;;  %v5235_v29 = vadd.bf16 %v14992_v52, %v15763_v14  ;;  %v12821_v10 = vld [vmem:[#allocation18 + $0xcc] ss:$16 sps:$4 sm:$0xff]   ;;  %v12830_v14 = vld [vmem:[#allocation23 + $0xc] ss:$16 sps:$4 sm:$0xff]  }
 0x65e   :  { %6232 = vmatprep.subr.bf16.mxu0 %v12773_v26  ;;  %6458 = vmatprep.subr.bf16.mxu1 %v12776_v36  ;;  %v12803_v26 = vld [vmem:[#allocation18 + $0x4c] ss:$16 sps:$4 sm:$0xff]   ;;  %v5263_v36 = vmax.bf16 %v15730_v17, %v5231_v35  ;;  %v12809_v35 = vld [vmem:[#allocation18 + $0xc4] ss:$16 sps:$4 sm:$0xff]  }
 0x65f   :  { %v5268_v43 = vmax.bf16 %v15730_v17, %v5236_v51 }
 0x660   :  { %6233 = vmatpush1.bf16.msra.mxu0 %v12771_v34  ;;  %v12783_v34 = vld [vmem:[#allocation18 + $0x40] ss:$16 sps:$4 sm:$0xff]  }
 0x661   :  { %6459 = vmatpush1.bf16.msra.mxu1 %v12774_v22  ;;  %6701 = vmatprep.subr.bf16.mxu0 %v12779_v18  ;;  %v12786_v22 = vld [vmem:[#allocation18 + $0x60] ss:$16 sps:$4 sm:$0xff]   ;;  %v15764_v18 = vpack.c.bf16 %v14909_v50, %v14903_v58  ;;  %v12815_v58 = vld [vmem:[#allocation18 + $0xac] ss:$16 sps:$4 sm:$0xff]   ;;  %v15765_v50 = vpack.c.bf16 %v14905_v47, %v14900_v62 }
 0x662   :  { %6814 = vmatprep.subr.bf16.mxu1 %v12794_v25  ;;  %v12807_v62 = vld [vmem:[#allocation18 + $0xc0] ss:$16 sps:$4 sm:$0xff]  }
 0x663   :  { %6235 = vmatmul.mubr.bf16.vlgmr.msra.gmra.mrb[128].mxu0 %v5259_v19  ;;  %v5240_v25 = vadd.bf16 %v14972_v7, %v15764_v18 }
 0x664   :  { %6461 = vmatmul.mubr.bf16.vlgmr.msra.gmra.mrb[128].mxu1 %v5259_v19  ;;  %6702 = vmatpush1.bf16.msra.mxu0 %v12777_v46  ;;  %v12812_v46 = vld [vmem:[#allocation18 + $0x8c] ss:$16 sps:$4 sm:$0xff]   ;;  %v5267_v19 = vmax.bf16 %v15730_v17, %v5235_v29 }
 0x665   :  { %6244 = vmatprep.mubr.bf16.mxu0 %v5264_v45  ;;  %6470 = vmatprep.mubr.bf16.mxu1 %v5264_v45  ;;  %v5272_v53 = vmax.bf16 %v15730_v17, %v5240_v25  ;;  %v5239_v45 = vadd.bf16 %v14992_v52, %v15765_v50  ;;  %v12852_v50 = vld [vmem:[#allocation23 + $0x88] ss:$16 sps:$4 sm:$0xff]  }
 0x666   :  { %6703 = vmatprep.subr.bf16.mxu0 %v12782_v24  ;;  %6815 = vmatpush1.bf16.msra.mxu1 %v12792_v11  ;;  %v12800_v24 = vld [vmem:[#allocation18 + $0xa4] ss:$16 sps:$4 sm:$0xff]   ;;  %v12810_v11 = vld [vmem:[#allocation18 + $0x88] ss:$16 sps:$4 sm:$0xff]  }
 0x667   :  { %6816 = vmatprep.subr.bf16.mxu1 %v12797_v49  ;;  %v12798_v49 = vld [vmem:[#allocation18 + $0xa0] ss:$16 sps:$4 sm:$0xff]   ;;  %v5271_v51 = vmax.bf16 %v15730_v17, %v5239_v45  ;;  %v12857_v45 = vld [vmem:[#allocation23 + $0xa4] ss:$16 sps:$4 sm:$0xff]  }
 0x668   :  { %6704 = vmatpush1.bf16.msra.mxu0 %v12780_v32  ;;  %v15766_v32 = vpack.c.bf16 %v14925_v20, %v14919_v23  ;;  %v12824_v23 = vld [vmem:[#allocation18 + $0xec] ss:$16 sps:$4 sm:$0xff]   ;;  %v15767_v20 = vpack.c.bf16 %v14921_v27, %v14916_v39  ;;  %v15769_v27 = vpack.c.bf16 %v14937_v5, %v14932_v9  ;;  %v5256_v5 = vadd.bf16 %v14972_v7, %v5170_v56  ;;  %v12836_v56 = vld [vmem:[#allocation23 + $0x2c] ss:$16 sps:$4 sm:$0xff]  }
 0x669   :  { %6705 = vmatprep.subr.bf16.mxu0 %v12785_v59  ;;  %v12813_v59 = vld [vmem:[#allocation18 + $0xa8] ss:$16 sps:$4 sm:$0xff]  }
 0x66a   :  { %6817 = vmatpush1.bf16.msra.mxu1 %v12795_v1  ;;  %v5244_v3 = vadd.bf16 %v14972_v7, %v15766_v32  ;;  %v12818_v1 = vld [vmem:[#allocation18 + $0xe4] ss:$16 sps:$4 sm:$0xff]   ;;  %v12858_v32 = vld [vmem:[#allocation23 + $0xa8] ss:$16 sps:$4 sm:$0xff]  }
 0x66b   :  { %6245 = vmatmul.mubr.bf16.gmra.mrb[132].mxu0 %v5263_v36  ;;  %6818 = vmatprep.subr.bf16.mxu1 %v12803_v26  ;;  %v12819_v26 = vld [vmem:[#allocation18 + $0xc8] ss:$16 sps:$4 sm:$0xff]  }
 0x66c   :  { %6471 = vmatmul.mubr.bf16.gmra.mrb[132].mxu1 %v5263_v36  ;;  %6254 = vmatprep.mubr.bf16.mxu0 %v5268_v43  ;;  %v5276_v47 = vmax.bf16 %v15730_v17, %v5244_v3  ;;  %v5243_v36 = vadd.bf16 %v14992_v52, %v15767_v20  ;;  %v12863_v3 = vld [vmem:[#allocation23 + $0xc4] ss:$16 sps:$4 sm:$0xff]   ;;  %v12876_v20 = vld [vmem:[#allocation23 + $0x108] ss:$16 sps:$4 sm:$0xff]  }
 0x66d   :  { %6480 = vmatprep.mubr.bf16.mxu1 %v5268_v43  ;;  %6706 = vmatpush1.bf16.msra.mxu0 %v12783_v34  ;;  %v12816_v34 = vld [vmem:[#allocation18 + $0xe0] ss:$16 sps:$4 sm:$0xff]   ;;  %v15768_v43 = vpack.c.bf16 %v14941_v16, %v14935_v6  ;;  %v5247_v6 = vadd.bf16 %v14992_v52, %v15769_v27  ;;  %v15770_v16 = vpack.c.bf16 %v14959_v42, %v14953_v38  ;;  %v12894_v27 = vld [vmem:[#allocation23 + $0x168] ss:$16 sps:$4 sm:$0xff]  }
 0x66e   :  { %6707 = vmatprep.subr.bf16.mxu0 %v12788_v12  ;;  %6819 = vmatpush1.bf16.msra.mxu1 %v12801_v30  ;;  %v12822_v30 = vld [vmem:[#allocation18 + $0xe8] ss:$16 sps:$4 sm:$0xff]   ;;  %v5275_v29 = vmax.bf16 %v15730_v17, %v5243_v36  ;;  %v5288_v42 = vmax.bf16 %v15730_v17, %v5256_v5 }
 0x66f   :  { %6820 = vmatprep.subr.bf16.mxu1 %v12806_v41  ;;  %v5248_v12 = vadd.bf16 %v14972_v7, %v15768_v43  ;;  %v12827_v41 = vld [vmem:[#allocation23 + $0x4] ss:$16 sps:$4 sm:$0xff]   ;;  %v5279_v18 = vmax.bf16 %v15730_v17, %v5247_v6  ;;  %v12882_v43 = vld [vmem:[#allocation23 + $0x128] ss:$16 sps:$4 sm:$0xff]  }
 0x670   :  { %v12881_v36 = vld [vmem:[#allocation23 + $0x124] ss:$16 sps:$4 sm:$0xff]  }
 0x671   :  { %6708 = vmatpush1.bf16.msra.mxu0 %v12786_v22  ;;  %v5280_v39 = vmax.bf16 %v15730_v17, %v5248_v12  ;;  %v5252_v22 = vadd.bf16 %v14972_v7, %v15770_v16  ;;  %v12825_v7 = vld [vmem:[#allocation23] ss:$16 sps:$4 sm:$0xff]   ;;  %v12887_v12 = vld [vmem:[#allocation23 + $0x144] ss:$16 sps:$4 sm:$0xff]   ;;  %v12902_v16 = vld [vmem:[#allocation23 + $0x18c] ss:$16 sps:$4 sm:$0xff]  }
 0x672   :  { %6709 = vmatprep.subr.bf16.mxu0 %v12791_v60  ;;  %6821 = vmatpush1.bf16.msra.mxu1 %v12804_v2  ;;  %v15771_v60 = vpack.c.bf16 %v14955_v44, %v14948_v13  ;;  %v5255_v13 = vadd.bf16 %v14992_v52, %v5169_v57  ;;  %v12839_v57 = vld [vmem:[#allocation23 + $0x44] ss:$16 sps:$4 sm:$0xff]   ;;  %v12837_v2 = vld [vmem:[#allocation23 + $0x40] ss:$16 sps:$4 sm:$0xff]  }
 0x673   :  { %6255 = vmatmul.mubr.bf16.gmra.mrb[136].mxu0 %v5267_v19  ;;  %6822 = vmatprep.subr.bf16.mxu1 %v12812_v46  ;;  %v5284_v25 = vmax.bf16 %v15730_v17, %v5252_v22  ;;  %v12840_v46 = vld [vmem:[#allocation23 + $0x48] ss:$16 sps:$4 sm:$0xff]   ;;  %v12899_v6 = vld [vmem:[#allocation23 + $0x184] ss:$16 sps:$4 sm:$0xff]   ;;  %v12897_v22 = vld [vmem:[#allocation23 + $0x180] ss:$16 sps:$4 sm:$0xff]  }
 0x674   :  { %6481 = vmatmul.mubr.bf16.gmra.mrb[136].mxu1 %v5267_v19  ;;  %6264 = vmatprep.mubr.bf16.mxu0 %v5272_v53  ;;  %v5251_v9 = vadd.bf16 %v14992_v52, %v15771_v60  ;;  %v5287_v44 = vmax.bf16 %v15730_v17, %v5255_v13  ;;  %v12842_v52 = vld [vmem:[#allocation23 + $0x4c] ss:$16 sps:$4 sm:$0xff]   ;;  %v12845_v19 = vld [vmem:[#allocation23 + $0x64] ss:$16 sps:$4 sm:$0xff]   ;;  %v12903_v60 = vld [vmem:[#allocation23 + $0x1a0] ss:$16 sps:$4 sm:$0xff]  }
 0x675   :  { %6490 = vmatprep.mubr.bf16.mxu1 %v5272_v53  ;;  %6710 = vmatpush1.bf16.msra.mxu0 %v12789_v28  ;;  %v12843_v28 = vld [vmem:[#allocation23 + $0x60] ss:$16 sps:$4 sm:$0xff]   ;;  %v12846_v53 = vld [vmem:[#allocation23 + $0x68] ss:$16 sps:$4 sm:$0xff]   ;;  %v12911_v5 = vld [vmem:[#allocation23 + $0x1c4] ss:$16 sps:$4 sm:$0xff]  }
 0x676   :  { %6711 = vmatprep.subr.bf16.mxu0 %v12800_v24  ;;  %6823 = vmatpush1.bf16.msra.mxu1 %v12810_v11  ;;  %v5283_v38 = vmax.bf16 %v15730_v17, %v5251_v9  ;;  %v12851_v24 = vld [vmem:[#allocation23 + $0x84] ss:$16 sps:$4 sm:$0xff]   ;;  %v12854_v11 = vld [vmem:[#allocation23 + $0x8c] ss:$16 sps:$4 sm:$0xff]   ;;  %v12906_v9 = vld [vmem:[#allocation23 + $0x1a8] ss:$16 sps:$4 sm:$0xff]  }
 0x677   :  { %6824 = vmatprep.subr.bf16.mxu1 %v12815_v58  ;;  %v12849_v58 = vld [vmem:[#allocation23 + $0x80] ss:$16 sps:$4 sm:$0xff]   ;;  %v12917_v13 = vld [vmem:[#allocation23 + $0x1e4] ss:$16 sps:$4 sm:$0xff]  }
 0x679   :  { %6712 = vmatpush1.bf16.msra.mxu0 %v12798_v49  ;;  %v12855_v49 = vld [vmem:[#allocation23 + $0xa0] ss:$16 sps:$4 sm:$0xff]  }
 0x67a   :  { %6713 = vmatprep.subr.bf16.mxu0 %v12809_v35  ;;  %6825 = vmatpush1.bf16.msra.mxu1 %v12813_v59  ;;  %v12866_v35 = vld [vmem:[#allocation23 + $0xcc] ss:$16 sps:$4 sm:$0xff]   ;;  %v12861_v59 = vld [vmem:[#allocation23 + $0xc0] ss:$16 sps:$4 sm:$0xff]  }
 0x67b   :  { %6265 = vmatmul.mubr.bf16.gmra.mrb[140].mxu0 %v5271_v51  ;;  %6826 = vmatprep.subr.bf16.mxu1 %v12821_v10  ;;  %v12864_v10 = vld [vmem:[#allocation23 + $0xc8] ss:$16 sps:$4 sm:$0xff]  }
 0x67c   :  { %6491 = vmatmul.mubr.bf16.gmra.mrb[140].mxu1 %v5271_v51  ;;  %6274 = vmatprep.mubr.bf16.mxu0 %v5276_v47  ;;  %v12869_v51 = vld [vmem:[#allocation23 + $0xe4] ss:$16 sps:$4 sm:$0xff]  }
 0x67d   :  { %6500 = vmatprep.mubr.bf16.mxu1 %v5276_v47  ;;  %6714 = vmatpush1.bf16.msra.mxu0 %v12807_v62  ;;  %v12867_v62 = vld [vmem:[#allocation23 + $0xe0] ss:$16 sps:$4 sm:$0xff]   ;;  %v12870_v47 = vld [vmem:[#allocation23 + $0xe8] ss:$16 sps:$4 sm:$0xff]  }
 0x67e   :  { %6715 = vmatprep.subr.bf16.mxu0 %v12818_v1  ;;  %6827 = vmatpush1.bf16.msra.mxu1 %v12819_v26  ;;  %v12875_v1 = vld [vmem:[#allocation23 + $0x104] ss:$16 sps:$4 sm:$0xff]   ;;  %v12878_v26 = vld [vmem:[#allocation23 + $0x10c] ss:$16 sps:$4 sm:$0xff]  }
 0x67f   :  { %6828 = vmatprep.subr.bf16.mxu1 %v12824_v23  ;;  %v12873_v23 = vld [vmem:[#allocation23 + $0x100] ss:$16 sps:$4 sm:$0xff]  }
 0x681   :  { %6716 = vmatpush1.bf16.msra.mxu0 %v12816_v34  ;;  %v12879_v34 = vld [vmem:[#allocation23 + $0x120] ss:$16 sps:$4 sm:$0xff]  }
 0x682   :  { %6829 = vmatpush1.bf16.msra.mxu1 %v12822_v30  ;;  %7845 = vmatprep.subr.bf16.mxu0 %v12827_v41  ;;  %v12890_v30 = vld [vmem:[#allocation23 + $0x14c] ss:$16 sps:$4 sm:$0xff]   ;;  %v12885_v41 = vld [vmem:[#allocation23 + $0x140] ss:$16 sps:$4 sm:$0xff]  }
 0x683   :  { %6275 = vmatmul.mubr.bf16.gmra.mrb[144].mxu0 %v5275_v29  ;;  %8071 = vmatprep.subr.bf16.mxu1 %v12830_v14  ;;  %v12888_v14 = vld [vmem:[#allocation23 + $0x148] ss:$16 sps:$4 sm:$0xff]  }
 0x684   :  { %6501 = vmatmul.mubr.bf16.gmra.mrb[144].mxu1 %v5275_v29  ;;  %6284 = vmatprep.mubr.bf16.mxu0 %v5280_v39  ;;  %v12893_v29 = vld [vmem:[#allocation23 + $0x164] ss:$16 sps:$4 sm:$0xff]  }
 0x685   :  { %6510 = vmatprep.mubr.bf16.mxu1 %v5280_v39  ;;  %v12891_v39 = vld [vmem:[#allocation23 + $0x160] ss:$16 sps:$4 sm:$0xff]  }
 0x68b   :  { %6285 = vmatmul.mubr.bf16.gmra.mrb[148].mxu0 %v5279_v18 }
 0x68c   :  { %6511 = vmatmul.mubr.bf16.gmra.mrb[148].mxu1 %v5279_v18  ;;  %6294 = vmatprep.mubr.bf16.mxu0 %v5284_v25  ;;  %v12900_v18 = vld [vmem:[#allocation23 + $0x188] ss:$16 sps:$4 sm:$0xff]  }
 0x68d   :  { %6520 = vmatprep.mubr.bf16.mxu1 %v5284_v25  ;;  %v12905_v25 = vld [vmem:[#allocation23 + $0x1a4] ss:$16 sps:$4 sm:$0xff]  }
 0x693   :  { %6295 = vmatmul.mubr.bf16.gmra.mrb[152].mxu0 %v5283_v38 }
 0x694   :  { %6521 = vmatmul.mubr.bf16.gmra.mrb[152].mxu1 %v5283_v38  ;;  %6304 = vmatprep.mubr.bf16.mxu0 %v5288_v42  ;;  %v12914_v38 = vld [vmem:[#allocation23 + $0x1cc] ss:$16 sps:$4 sm:$0xff]  }
 0x695   :  { %6530 = vmatprep.mubr.bf16.mxu1 %v5288_v42  ;;  %v12909_v42 = vld [vmem:[#allocation23 + $0x1c0] ss:$16 sps:$4 sm:$0xff]  }
 0x69b   :  { %6305 = vmatmul.mubr.bf16.gmra.mrb[156].mxu0 %v5287_v44 }
 0x69c   :  { %6531 = vmatmul.mubr.bf16.gmra.mrb[156].mxu1 %v5287_v44  ;;  %6733 = vmatprep.mubr.bf16.mxu0 %v15730_v17  ;;  %v12920_v44 = vld [vmem:[#allocation23 + $0x1ec] ss:$16 sps:$4 sm:$0xff]  }
 0x69d   :  { %6846 = vmatprep.mubr.bf16.mxu1 %v15730_v17 }
 0x6a3   :  { %6734 = vmatmul.mubr.bf16.vlgmr.msra.gmra.mrb[128].mxu0 %v14102_v8 }
 0x6a4   :  { %6847 = vmatmul.mubr.bf16.vlgmr.msra.gmra.mrb[128].mxu1 %v14102_v8  ;;  %6743 = vmatprep.mubr.bf16.mxu0 %v15730_v17  ;;  %v12848_v8 = vld [vmem:[#allocation23 + $0x6c] ss:$16 sps:$4 sm:$0xff]  }
 0x6a5   :  { %6856 = vmatprep.mubr.bf16.mxu1 %v15730_v17  ;;  %7846 = vmatpush1.bf16.msra.mxu0 %v12825_v7  ;;  %v12915_v7 = vld [vmem:[#allocation23 + $0x1e0] ss:$16 sps:$4 sm:$0xff]  }
 0x6a6   :  { %8072 = vmatpush1.bf16.msra.mxu1 %v12828_v31  ;;  %7847 = vmatprep.subr.bf16.mxu0 %v12833_v55  ;;  %v12918_v31 = vld [vmem:[#allocation23 + $0x1e8] ss:$16 sps:$4 sm:$0xff]   ;;  %v12923_v55 = vld [vmem:[#allocation23 + $0x204] ss:$16 sps:$4 sm:$0xff]  }
 0x6a7   :  { %8073 = vmatprep.subr.bf16.mxu1 %v12836_v56  ;;  %v12926_v56 = vld [vmem:[#allocation23 + $0x20c] ss:$16 sps:$4 sm:$0xff]  }
 0x6a9   :  { %7848 = vmatpush1.bf16.msra.mxu0 %v12831_v37 }
 0x6aa   :  { %8074 = vmatpush1.bf16.msra.mxu1 %v12834_v0  ;;  %7849 = vmatprep.subr.bf16.mxu0 %v12839_v57 }
 0x6ab   :  { %6744 = vmatmul.mubr.bf16.gmra.mrb[132].mxu0 %v14124_v40  ;;  %8075 = vmatprep.subr.bf16.mxu1 %v12842_v52 }
 0x6ac   :  { %6857 = vmatmul.mubr.bf16.gmra.mrb[132].mxu1 %v14124_v40  ;;  %6753 = vmatprep.mubr.bf16.mxu0 %v15730_v17  ;;  %v12860_v40 = vld [vmem:[#allocation23 + $0xac] ss:$16 sps:$4 sm:$0xff]  }
 0x6ad   :  { %6866 = vmatprep.mubr.bf16.mxu1 %v15730_v17  ;;  %7850 = vmatpush1.bf16.msra.mxu0 %v12837_v2 }
 0x6ae   :  { %8076 = vmatpush1.bf16.msra.mxu1 %v12840_v46  ;;  %7851 = vmatprep.subr.bf16.mxu0 %v12845_v19 }
 0x6af   :  { %8077 = vmatprep.subr.bf16.mxu1 %v12848_v8 }
 0x6b1   :  { %7852 = vmatpush1.bf16.msra.mxu0 %v12843_v28 }
 0x6b2   :  { %8078 = vmatpush1.bf16.msra.mxu1 %v12846_v53  ;;  %7853 = vmatprep.subr.bf16.mxu0 %v12851_v24 }
 0x6b3   :  { %6754 = vmatmul.mubr.bf16.gmra.mrb[136].mxu0 %v14143_v61  ;;  %8079 = vmatprep.subr.bf16.mxu1 %v12854_v11 }
 0x6b4   :  { %6867 = vmatmul.mubr.bf16.gmra.mrb[136].mxu1 %v14143_v61  ;;  %6763 = vmatprep.mubr.bf16.mxu0 %v15730_v17  ;;  %v12872_v61 = vld [vmem:[#allocation23 + $0xec] ss:$16 sps:$4 sm:$0xff]  }
 0x6b5   :  { %6876 = vmatprep.mubr.bf16.mxu1 %v15730_v17  ;;  %7854 = vmatpush1.bf16.msra.mxu0 %v12849_v58 }
 0x6b6   :  { %8080 = vmatpush1.bf16.msra.mxu1 %v12852_v50  ;;  %7855 = vmatprep.subr.bf16.mxu0 %v12857_v45 }
 0x6b7   :  { %8081 = vmatprep.subr.bf16.mxu1 %v12860_v40 }
 0x6b9   :  { %7856 = vmatpush1.bf16.msra.mxu0 %v12855_v49 }
 0x6ba   :  { %8082 = vmatpush1.bf16.msra.mxu1 %v12858_v32  ;;  %7857 = vmatprep.subr.bf16.mxu0 %v12863_v3 }
 0x6bb   :  { %6764 = vmatmul.mubr.bf16.gmra.mrb[140].mxu0 %v14162_v21  ;;  %8083 = vmatprep.subr.bf16.mxu1 %v12866_v35 }
 0x6bc   :  { %6877 = vmatmul.mubr.bf16.gmra.mrb[140].mxu1 %v14162_v21  ;;  %6773 = vmatprep.mubr.bf16.mxu0 %v15730_v17  ;;  %v12884_v21 = vld [vmem:[#allocation23 + $0x12c] ss:$16 sps:$4 sm:$0xff]  }
 0x6bd   :  { %6886 = vmatprep.mubr.bf16.mxu1 %v15730_v17  ;;  %7858 = vmatpush1.bf16.msra.mxu0 %v12861_v59 }
 0x6be   :  { %8084 = vmatpush1.bf16.msra.mxu1 %v12864_v10  ;;  %7859 = vmatprep.subr.bf16.mxu0 %v12869_v51 }
 0x6bf   :  { %8085 = vmatprep.subr.bf16.mxu1 %v12872_v61  ;;  %v12921_v61 = vld [vmem:[#allocation23 + $0x200] ss:$16 sps:$4 sm:$0xff]  }
 0x6c1   :  { %7860 = vmatpush1.bf16.msra.mxu0 %v12867_v62  ;;  %v12924_v62 = vld [vmem:[#allocation23 + $0x208] ss:$16 sps:$4 sm:$0xff]  }
 0x6c2   :  { %8086 = vmatpush1.bf16.msra.mxu1 %v12870_v47  ;;  %7861 = vmatprep.subr.bf16.mxu0 %v12875_v1 }
 0x6c3   :  { %6774 = vmatmul.mubr.bf16.gmra.mrb[144].mxu0 %v14180_v54  ;;  %8087 = vmatprep.subr.bf16.mxu1 %v12878_v26 }
 0x6c4   :  { %6887 = vmatmul.mubr.bf16.gmra.mrb[144].mxu1 %v14180_v54  ;;  %6783 = vmatprep.mubr.bf16.mxu0 %v15730_v17  ;;  %v12896_v54 = vld [vmem:[#allocation23 + $0x16c] ss:$16 sps:$4 sm:$0xff]  }
 0x6c5   :  { %6896 = vmatprep.mubr.bf16.mxu1 %v15730_v17  ;;  %7862 = vmatpush1.bf16.msra.mxu0 %v12873_v23  ;;  %v12929_v23 = vld [vmem:[#allocation23 + $0x224] ss:$16 sps:$4 sm:$0xff]  }
 0x6c6   :  { %8088 = vmatpush1.bf16.msra.mxu1 %v12876_v20  ;;  %7863 = vmatprep.subr.bf16.mxu0 %v12881_v36  ;;  %v12932_v20 = vld [vmem:[#allocation23 + $0x22c] ss:$16 sps:$4 sm:$0xff]  }
 0x6c7   :  { %8089 = vmatprep.subr.bf16.mxu1 %v12884_v21 }
 0x6c9   :  { %7864 = vmatpush1.bf16.msra.mxu0 %v12879_v34 }
 0x6ca   :  { %8090 = vmatpush1.bf16.msra.mxu1 %v12882_v43  ;;  %7865 = vmatprep.subr.bf16.mxu0 %v12887_v12 }
 0x6cb   :  { %6784 = vmatmul.mubr.bf16.gmra.mrb[148].mxu0 %v14198_v15  ;;  %8091 = vmatprep.subr.bf16.mxu1 %v12890_v30 }
 0x6cc   :  { %6897 = vmatmul.mubr.bf16.gmra.mrb[148].mxu1 %v14198_v15  ;;  %6793 = vmatprep.mubr.bf16.mxu0 %v15730_v17  ;;  %v12908_v15 = vld [vmem:[#allocation23 + $0x1ac] ss:$16 sps:$4 sm:$0xff]  }
 0x6cd   :  { %6906 = vmatprep.mubr.bf16.mxu1 %v15730_v17  ;;  %7866 = vmatpush1.bf16.msra.mxu0 %v12885_v41 }
 0x6ce   :  { %8092 = vmatpush1.bf16.msra.mxu1 %v12888_v14  ;;  %7867 = vmatprep.subr.bf16.mxu0 %v12893_v29  ;;  %v12927_v29 = vld [vmem:[#allocation23 + $0x220] ss:$16 sps:$4 sm:$0xff]  }
 0x6cf   :  { %8093 = vmatprep.subr.bf16.mxu1 %v12896_v54  ;;  %v12930_v54 = vld [vmem:[#allocation23 + $0x228] ss:$16 sps:$4 sm:$0xff]  }
 0x6d1   :  { %7868 = vmatpush1.bf16.msra.mxu0 %v12891_v39 }
 0x6d2   :  { %8094 = vmatpush1.bf16.msra.mxu1 %v12894_v27  ;;  %7869 = vmatprep.subr.bf16.mxu0 %v12899_v6  ;;  %v12935_v6 = vld [vmem:[#allocation23 + $0x244] ss:$16 sps:$4 sm:$0xff]  }
 0x6d3   :  { %6794 = vmatmul.mubr.bf16.gmra.mrb[152].mxu0 %v14216_v33  ;;  %8095 = vmatprep.subr.bf16.mxu1 %v12902_v16  ;;  %v12938_v16 = vld [vmem:[#allocation23 + $0x24c] ss:$16 sps:$4 sm:$0xff]  }
 0x6d4   :  { %6907 = vmatmul.mubr.bf16.gmra.mrb[152].mxu1 %v14216_v33  ;;  %6803 = vmatprep.mubr.bf16.mxu0 %v15730_v17  ;;  %v12912_v33 = vld [vmem:[#allocation23 + $0x1c8] ss:$16 sps:$4 sm:$0xff]  }
 0x6d5   :  { %6916 = vmatprep.mubr.bf16.mxu1 %v15730_v17  ;;  %7870 = vmatpush1.bf16.msra.mxu0 %v12897_v22 }
 0x6d6   :  { %8096 = vmatpush1.bf16.msra.mxu1 %v12900_v18  ;;  %7871 = vmatprep.subr.bf16.mxu0 %v12905_v25 }
 0x6d7   :  { %8097 = vmatprep.subr.bf16.mxu1 %v12908_v15  ;;  %v12933_v15 = vld [vmem:[#allocation23 + $0x240] ss:$16 sps:$4 sm:$0xff]  }
 0x6d9   :  { %7872 = vmatpush1.bf16.msra.mxu0 %v12903_v60  ;;  %v12936_v60 = vld [vmem:[#allocation23 + $0x248] ss:$16 sps:$4 sm:$0xff]  }
 0x6da   :  { %8098 = vmatpush1.bf16.msra.mxu1 %v12906_v9  ;;  %7873 = vmatprep.subr.bf16.mxu0 %v12911_v5 }
 0x6db   :  { %6804 = vmatmul.mubr.bf16.gmra.mrb[156].mxu0 %v14234_v48  ;;  %8099 = vmatprep.subr.bf16.mxu1 %v12914_v38 }
 0x6dc   :  { %6917 = vmatmul.mubr.bf16.gmra.mrb[156].mxu1 %v14234_v48  ;;  %v10928_v48 = vld.sshfl [vmem:[#allocation21] sm:$0x33 pattern:$0x75316420] }
 0x6dd   :  { %7874 = vmatpush1.bf16.msra.mxu0 %v12909_v42  ;;  %v6968_v37 = vcombine.high %v10928_v48, %v10928_v48  ;;  %v15104_v0 = vrot.slane %v10928_v48, %v14241_v4  ;;  %v12941_v42 = vld [vmem:[#allocation23 + $0x264] ss:$16 sps:$4 sm:$0xff]  }
 0x6de   :  { %8100 = vmatpush1.bf16.msra.mxu1 %v12912_v33  ;;  %7875 = vmatprep.subr.bf16.mxu0 %v12917_v13  ;;  %v12944_v33 = vld [vmem:[#allocation23 + $0x26c] ss:$16 sps:$4 sm:$0xff]  }
 0x6df   :  { %8101 = vmatprep.subr.bf16.mxu1 %v12920_v44  ;;  %v15107_v57 = vrot.slane %v6968_v37, %v14241_v4  ;;  %v6986_v52 = vpack.i.b16 %v15104_v0, %v15104_v0 }
 0x6e1   :  { %7876 = vmatpush1.bf16.msra.mxu0 %v12915_v7  ;;  %v6993_v2 = vpack.i.b16 %v15107_v57, %v15107_v57  ;;  %v15116_v28 = vrot.slane %v6986_v52, %v14239_v63  ;;  %v12939_v52 = vld [vmem:[#allocation23 + $0x260] ss:$16 sps:$4 sm:$0xff]  }
 0x6e2   :  { %8102 = vmatpush1.bf16.msra.mxu1 %v12918_v31  ;;  %7958 = vmatprep.subr.bf16.mxu0 %v12923_v55 }
 0x6e3   :  { %8184 = vmatprep.subr.bf16.mxu1 %v12926_v56  ;;  %v15121_v11 = vrot.slane %v6993_v2, %v14239_v63  ;;  %v12942_v2 = vld [vmem:[#allocation23 + $0x268] ss:$16 sps:$4 sm:$0xff]  }
 0x776   :  { %v6735_v46 = vpop.f32.mrb[128].mxu0 }
 0x777   :  { %v15113_v19 = vpop.f32.mrb[128].mxu1  ;;  %v6737_v8 = vpop.f32.mrb[129].mxu0 }
 0x778   :  { %v15118_v53 = vpop.f32.mrb[129].mxu1  ;;  %v6739_v24 = vpop.f32.mrb[130].mxu0 }
 0x779   :  { %v6927_v58 = vpack.c.bf16 %v6739_v24, %v6735_v46  ;;  %v15123_v50 = vpop.f32.mrb[130].mxu1  ;;  %v6741_v45 = vpop.f32.mrb[131].mxu0  ;;  %v12947_v24 = vld [vmem:[#allocation23 + $0x284] ss:$16 sps:$4 sm:$0xff]  }
 0x77a   :  { %v6929_v40 = vpack.c.bf16 %v15123_v50, %v15113_v19  ;;  %v6928_v49 = vpack.c.bf16 %v6741_v45, %v6737_v8  ;;  %v15127_v32 = vpop.f32.mrb[131].mxu1  ;;  %v13020_v50 = vld [vmem:[#allocation26 + $0x8] ss:$16 sps:$4 sm:$0xff]  }
 0x77b   :  { %v7013_v3 = vadd.bf16 %v15116_v28, %v6927_v58  ;;  %v6930_v35 = vpack.c.bf16 %v15127_v32, %v15118_v53  ;;  %v12950_v58 = vld [vmem:[#allocation23 + $0x28c] ss:$16 sps:$4 sm:$0xff]   ;;  %v13013_v32 = vld [vmem:[#allocation23 + $0x3e4] ss:$16 sps:$4 sm:$0xff]  }
 0x77c   :  { %v7014_v59 = vadd.bf16 %v15121_v11, %v6928_v49 }
 0x77d   :  { %v7045_v47 = vmax.bf16 %v15730_v17, %v7013_v3 }
 0x77e   :  { %v6745_v10 = vpop.f32.mrb[132].mxu0  ;;  %v7046_v51 = vmax.bf16 %v15730_v17, %v7014_v59  ;;  %v12945_v59 = vld [vmem:[#allocation23 + $0x280] ss:$16 sps:$4 sm:$0xff]  }
 0x77f   :  { %v15135_v1 = vpop.f32.mrb[132].mxu1  ;;  %v6747_v26 = vpop.f32.mrb[133].mxu0 }
 0x780   :  { %v15137_v36 = vpop.f32.mrb[133].mxu1  ;;  %v6749_v21 = vpop.f32.mrb[134].mxu0  ;;  %7877 = vmatprep.mubr.bf16.mxu0 %v7046_v51  ;;  %8103 = vmatprep.mubr.bf16.mxu1 %v7046_v51 }
 0x781   :  { %v6931_v34 = vpack.c.bf16 %v6749_v21, %v6745_v10  ;;  %v15139_v43 = vpop.f32.mrb[134].mxu1  ;;  %v6751_v12 = vpop.f32.mrb[135].mxu0  ;;  %7878 = vmatmul.mubr.bf16.vlgmr.msra.gmra.mrb[160].mxu0 %v7045_v47  ;;  %8104 = vmatmul.mubr.bf16.vlgmr.msra.gmra.mrb[160].mxu1 %v7045_v47  ;;  %v12948_v10 = vld [vmem:[#allocation23 + $0x288] ss:$16 sps:$4 sm:$0xff]   ;;  %v12953_v47 = vld [vmem:[#allocation23 + $0x2a4] ss:$16 sps:$4 sm:$0xff]  }
 0x782   :  { %v6933_v30 = vpack.c.bf16 %v15139_v43, %v15135_v1  ;;  %v6932_v41 = vpack.c.bf16 %v6751_v12, %v6747_v26  ;;  %v15143_v14 = vpop.f32.mrb[135].mxu1  ;;  %7959 = vmatpush1.bf16.msra.mxu0 %v12921_v61  ;;  %8185 = vmatpush1.bf16.msra.mxu1 %v12924_v62  ;;  %v12956_v26 = vld [vmem:[#allocation23 + $0x2ac] ss:$16 sps:$4 sm:$0xff]   ;;  %v13029_v1 = vld [vmem:[#allocation26 + $0x40] ss:$16 sps:$4 sm:$0xff]  }
 0x783   :  { %v7017_v39 = vadd.bf16 %v15116_v28, %v6931_v34  ;;  %v6934_v27 = vpack.c.bf16 %v15143_v14, %v15137_v36  ;;  %7960 = vmatprep.subr.bf16.mxu0 %v12929_v23  ;;  %8186 = vmatprep.subr.bf16.mxu1 %v12932_v20  ;;  %v13023_v14 = vld [vmem:[#allocation26 + $0x20] ss:$16 sps:$4 sm:$0xff]  }
 0x784   :  { %v7018_v22 = vadd.bf16 %v15121_v11, %v6932_v41 }
 0x785   :  { %v7049_v38 = vmax.bf16 %v15730_v17, %v7017_v39  ;;  %v12951_v39 = vld [vmem:[#allocation23 + $0x2a0] ss:$16 sps:$4 sm:$0xff]  }
 0x786   :  { %7961 = vmatpush1.bf16.msra.mxu0 %v12927_v29  ;;  %v6755_v18 = vpop.f32.mrb[136].mxu0  ;;  %8187 = vmatpush1.bf16.msra.mxu1 %v12930_v54  ;;  %v7050_v25 = vmax.bf16 %v15730_v17, %v7018_v22 }
 0x787   :  { %v15150_v9 = vpop.f32.mrb[136].mxu1  ;;  %v6757_v5 = vpop.f32.mrb[137].mxu0  ;;  %7962 = vmatprep.subr.bf16.mxu0 %v12935_v6  ;;  %8188 = vmatprep.subr.bf16.mxu1 %v12938_v16  ;;  %v12954_v6 = vld [vmem:[#allocation23 + $0x2a8] ss:$16 sps:$4 sm:$0xff]  }
 0x788   :  { %v15153_v13 = vpop.f32.mrb[137].mxu1  ;;  %v6759_v44 = vpop.f32.mrb[138].mxu0  ;;  %7887 = vmatprep.mubr.bf16.mxu0 %v7050_v25  ;;  %8113 = vmatprep.mubr.bf16.mxu1 %v7050_v25  ;;  %v12962_v25 = vld [vmem:[#allocation23 + $0x2cc] ss:$16 sps:$4 sm:$0xff]  }
 0x789   :  { %v6935_v7 = vpack.c.bf16 %v6759_v44, %v6755_v18  ;;  %v15155_v31 = vpop.f32.mrb[138].mxu1  ;;  %v6761_v55 = vpop.f32.mrb[139].mxu0  ;;  %7888 = vmatmul.mubr.bf16.gmra.mrb[164].mxu0 %v7049_v38  ;;  %8114 = vmatmul.mubr.bf16.gmra.mrb[164].mxu1 %v7049_v38  ;;  %v12959_v18 = vld [vmem:[#allocation23 + $0x2c4] ss:$16 sps:$4 sm:$0xff]   ;;  %v12957_v38 = vld [vmem:[#allocation23 + $0x2c0] ss:$16 sps:$4 sm:$0xff]  }
 0x78a   :  { %v6937_v56 = vpack.c.bf16 %v15155_v31, %v15150_v9  ;;  %v6936_v48 = vpack.c.bf16 %v6761_v55, %v6757_v5  ;;  %v15159_v37 = vpop.f32.mrb[139].mxu1  ;;  %7963 = vmatpush1.bf16.msra.mxu0 %v12933_v15  ;;  %8189 = vmatpush1.bf16.msra.mxu1 %v12936_v60  ;;  %v12965_v55 = vld [vmem:[#allocation23 + $0x2e4] ss:$16 sps:$4 sm:$0xff]  }
 0x78b   :  { %v7021_v46 = vadd.bf16 %v15116_v28, %v6935_v7  ;;  %v6938_v8 = vpack.c.bf16 %v15159_v37, %v15153_v13  ;;  %7964 = vmatprep.subr.bf16.mxu0 %v12941_v42  ;;  %8190 = vmatprep.subr.bf16.mxu1 %v12944_v33  ;;  %v12960_v42 = vld [vmem:[#allocation23 + $0x2c8] ss:$16 sps:$4 sm:$0xff]   ;;  %v13040_v13 = vld [vmem:[#allocation26 + $0x6c] ss:$16 sps:$4 sm:$0xff]   ;;  %v13041_v9 = vld [vmem:[#allocation26 + $0x80] ss:$16 sps:$4 sm:$0xff]  }
 0x78c   :  { %v7022_v45 = vadd.bf16 %v15121_v11, %v6936_v48  ;;  %v12968_v48 = vld [vmem:[#allocation23 + $0x2ec] ss:$16 sps:$4 sm:$0xff]  }
 0x78d   :  { %v7053_v62 = vmax.bf16 %v15730_v17, %v7021_v46 }
 0x78e   :  { %7965 = vmatpush1.bf16.msra.mxu0 %v12939_v52  ;;  %v6765_v49 = vpop.f32.mrb[140].mxu0  ;;  %8191 = vmatpush1.bf16.msra.mxu1 %v12942_v2  ;;  %v7054_v3 = vmax.bf16 %v15730_v17, %v7022_v45 }
 0x78f   :  { %v15166_v51 = vpop.f32.mrb[140].mxu1  ;;  %v6767_v61 = vpop.f32.mrb[141].mxu0  ;;  %7966 = vmatprep.subr.bf16.mxu0 %v12947_v24  ;;  %8192 = vmatprep.subr.bf16.mxu1 %v12950_v58 }
 0x790   :  { %v15169_v23 = vpop.f32.mrb[141].mxu1  ;;  %v6769_v20 = vpop.f32.mrb[142].mxu0  ;;  %7897 = vmatprep.mubr.bf16.mxu0 %v7054_v3  ;;  %8123 = vmatprep.mubr.bf16.mxu1 %v7054_v3 }
 0x791   :  { %v6939_v21 = vpack.c.bf16 %v6769_v20, %v6765_v49  ;;  %v15171_v34 = vpop.f32.mrb[142].mxu1  ;;  %v6771_v12 = vpop.f32.mrb[143].mxu0  ;;  %7898 = vmatmul.mubr.bf16.gmra.mrb[168].mxu0 %v7053_v62  ;;  %8124 = vmatmul.mubr.bf16.gmra.mrb[168].mxu1 %v7053_v62 }
 0x792   :  { %v6941_v41 = vpack.c.bf16 %v15171_v34, %v15166_v51  ;;  %v6940_v29 = vpack.c.bf16 %v6771_v12, %v6767_v61  ;;  %v15175_v54 = vpop.f32.mrb[143].mxu1  ;;  %7967 = vmatpush1.bf16.msra.mxu0 %v12945_v59  ;;  %8193 = vmatpush1.bf16.msra.mxu1 %v12948_v10  ;;  %v12963_v59 = vld [vmem:[#allocation23 + $0x2e0] ss:$16 sps:$4 sm:$0xff]   ;;  %v12966_v10 = vld [vmem:[#allocation23 + $0x2e8] ss:$16 sps:$4 sm:$0xff]  }
 0x793   :  { %v7025_v16 = vadd.bf16 %v15116_v28, %v6939_v21  ;;  %v6942_v22 = vpack.c.bf16 %v15175_v54, %v15169_v23  ;;  %7968 = vmatprep.subr.bf16.mxu0 %v12953_v47  ;;  %8194 = vmatprep.subr.bf16.mxu1 %v12956_v26  ;;  %v12971_v47 = vld [vmem:[#allocation23 + $0x304] ss:$16 sps:$4 sm:$0xff]   ;;  %v12974_v26 = vld [vmem:[#allocation23 + $0x30c] ss:$16 sps:$4 sm:$0xff]   ;;  %v13052_v23 = vld [vmem:[#allocation26 + $0xac] ss:$16 sps:$4 sm:$0xff]  }
 0x794   :  { %v7026_v15 = vadd.bf16 %v15121_v11, %v6940_v29  ;;  %v12969_v29 = vld [vmem:[#allocation23 + $0x300] ss:$16 sps:$4 sm:$0xff]   ;;  %v13053_v51 = vld [vmem:[#allocation26 + $0xc0] ss:$16 sps:$4 sm:$0xff]  }
 0x795   :  { %v7057_v7 = vmax.bf16 %v15730_v17, %v7025_v16 }
 0x796   :  { %7969 = vmatpush1.bf16.msra.mxu0 %v12951_v39  ;;  %v6775_v60 = vpop.f32.mrb[144].mxu0  ;;  %8195 = vmatpush1.bf16.msra.mxu1 %v12954_v6  ;;  %v7058_v5 = vmax.bf16 %v15730_v17, %v7026_v15  ;;  %v12972_v39 = vld [vmem:[#allocation23 + $0x308] ss:$16 sps:$4 sm:$0xff]   ;;  %v12980_v15 = vld [vmem:[#allocation23 + $0x32c] ss:$16 sps:$4 sm:$0xff]  }
 0x797   :  { %v15182_v33 = vpop.f32.mrb[144].mxu1  ;;  %v6777_v44 = vpop.f32.mrb[145].mxu0  ;;  %7970 = vmatprep.subr.bf16.mxu0 %v12959_v18  ;;  %8196 = vmatprep.subr.bf16.mxu1 %v12962_v25  ;;  %v12977_v25 = vld [vmem:[#allocation23 + $0x324] ss:$16 sps:$4 sm:$0xff]  }
 0x798   :  { %v15185_v52 = vpop.f32.mrb[145].mxu1  ;;  %v6779_v2 = vpop.f32.mrb[146].mxu0  ;;  %7907 = vmatprep.mubr.bf16.mxu0 %v7058_v5  ;;  %8133 = vmatprep.mubr.bf16.mxu1 %v7058_v5 }
 0x799   :  { %v6943_v46 = vpack.c.bf16 %v6779_v2, %v6775_v60  ;;  %v15187_v24 = vpop.f32.mrb[146].mxu1  ;;  %v6781_v58 = vpop.f32.mrb[147].mxu0  ;;  %7908 = vmatmul.mubr.bf16.gmra.mrb[172].mxu0 %v7057_v7  ;;  %8134 = vmatmul.mubr.bf16.gmra.mrb[172].mxu1 %v7057_v7  ;;  %v12975_v2 = vld [vmem:[#allocation23 + $0x320] ss:$16 sps:$4 sm:$0xff]  }
 0x79a   :  { %v6944_v49 = vpack.c.bf16 %v6781_v58, %v6777_v44  ;;  %v15191_v3 = vpop.f32.mrb[147].mxu1  ;;  %7971 = vmatpush1.bf16.msra.mxu0 %v12957_v38  ;;  %8197 = vmatpush1.bf16.msra.mxu1 %v12960_v42 }
 0x79b   :  { %v7029_v61 = vadd.bf16 %v15116_v28, %v6943_v46  ;;  %7972 = vmatprep.subr.bf16.mxu0 %v12965_v55  ;;  %8198 = vmatprep.subr.bf16.mxu1 %v12968_v48  ;;  %v12978_v46 = vld [vmem:[#allocation23 + $0x328] ss:$16 sps:$4 sm:$0xff]  }
 0x79c   :  { %v7030_v20 = vadd.bf16 %v15121_v11, %v6944_v49  ;;  %v13002_v49 = vld [vmem:[#allocation23 + $0x3a8] ss:$16 sps:$4 sm:$0xff]  }
 0x79d   :  { %v7061_v18 = vmax.bf16 %v15730_v17, %v7029_v61 }
 0x79e   :  { %7973 = vmatpush1.bf16.msra.mxu0 %v12963_v59  ;;  %v6785_v21 = vpop.f32.mrb[148].mxu0  ;;  %8199 = vmatpush1.bf16.msra.mxu1 %v12966_v10  ;;  %v7062_v12 = vmax.bf16 %v15730_v17, %v7030_v20  ;;  %v12983_v59 = vld [vmem:[#allocation23 + $0x344] ss:$16 sps:$4 sm:$0xff]   ;;  %v12986_v10 = vld [vmem:[#allocation23 + $0x34c] ss:$16 sps:$4 sm:$0xff]  }
 0x79f   :  { %v15198_v6 = vpop.f32.mrb[148].mxu1  ;;  %v6787_v16 = vpop.f32.mrb[149].mxu0  ;;  %7974 = vmatprep.subr.bf16.mxu0 %v12971_v47  ;;  %8200 = vmatprep.subr.bf16.mxu1 %v12974_v26  ;;  %v12981_v20 = vld [vmem:[#allocation23 + $0x340] ss:$16 sps:$4 sm:$0xff]  }
 0x7a0   :  { %v15201_v60 = vpop.f32.mrb[149].mxu1  ;;  %v6789_v5 = vpop.f32.mrb[150].mxu0  ;;  %7917 = vmatprep.mubr.bf16.mxu0 %v7062_v12  ;;  %8143 = vmatprep.mubr.bf16.mxu1 %v7062_v12 }
 0x7a1   :  { %v6947_v38 = vpack.c.bf16 %v6789_v5, %v6785_v21  ;;  %v15203_v42 = vpop.f32.mrb[150].mxu1  ;;  %v6791_v44 = vpop.f32.mrb[151].mxu0  ;;  %7918 = vmatmul.mubr.bf16.gmra.mrb[176].mxu0 %v7061_v18  ;;  %8144 = vmatmul.mubr.bf16.gmra.mrb[176].mxu1 %v7061_v18  ;;  %v12984_v21 = vld [vmem:[#allocation23 + $0x348] ss:$16 sps:$4 sm:$0xff]   ;;  %v12992_v18 = vld [vmem:[#allocation23 + $0x36c] ss:$16 sps:$4 sm:$0xff]  }
 0x7a2   :  { %v6948_v55 = vpack.c.bf16 %v6791_v44, %v6787_v16  ;;  %v15207_v48 = vpop.f32.mrb[151].mxu1  ;;  %7975 = vmatpush1.bf16.msra.mxu0 %v12969_v29  ;;  %8201 = vmatpush1.bf16.msra.mxu1 %v12972_v39  ;;  %v12989_v16 = vld [vmem:[#allocation23 + $0x364] ss:$16 sps:$4 sm:$0xff]  }
 0x7a3   :  { %v7033_v58 = vadd.bf16 %v15116_v28, %v6947_v38  ;;  %7976 = vmatprep.subr.bf16.mxu0 %v12977_v25  ;;  %8202 = vmatprep.subr.bf16.mxu1 %v12980_v15  ;;  %v6984_v25 = vcombine.high %v15107_v57, %v15107_v57  ;;  %v12987_v57 = vld [vmem:[#allocation23 + $0x360] ss:$16 sps:$4 sm:$0xff]  }
 0x7a4   :  { %v7034_v61 = vadd.bf16 %v15121_v11, %v6948_v55 }
 0x7a5   :  { %v7065_v39 = vmax.bf16 %v15730_v17, %v7033_v58 }
 0x7a6   :  { %7977 = vmatpush1.bf16.msra.mxu0 %v12975_v2  ;;  %v6795_v47 = vpop.f32.mrb[152].mxu0  ;;  %8203 = vmatpush1.bf16.msra.mxu1 %v12978_v46  ;;  %v7066_v26 = vmax.bf16 %v15730_v17, %v7034_v61 }
 0x7a7   :  { %v15214_v12 = vpop.f32.mrb[152].mxu1  ;;  %v6797_v29 = vpop.f32.mrb[153].mxu0  ;;  %7978 = vmatprep.subr.bf16.mxu0 %v12983_v59  ;;  %8204 = vmatprep.subr.bf16.mxu1 %v12986_v10  ;;  %v12990_v59 = vld [vmem:[#allocation23 + $0x368] ss:$16 sps:$4 sm:$0xff]  }
 0x7a8   :  { %v15219_v15 = vpop.f32.mrb[153].mxu1  ;;  %v6799_v5 = vpop.f32.mrb[154].mxu0  ;;  %7927 = vmatprep.mubr.bf16.mxu0 %v7066_v26  ;;  %8153 = vmatprep.mubr.bf16.mxu1 %v7066_v26  ;;  %v12998_v26 = vld [vmem:[#allocation23 + $0x38c] ss:$16 sps:$4 sm:$0xff]  }
 0x7a9   :  { %v6951_v38 = vpack.c.bf16 %v6799_v5, %v6795_v47  ;;  %v15221_v44 = vpop.f32.mrb[154].mxu1  ;;  %v6801_v55 = vpop.f32.mrb[155].mxu0  ;;  %7928 = vmatmul.mubr.bf16.gmra.mrb[180].mxu0 %v7065_v39  ;;  %8154 = vmatmul.mubr.bf16.gmra.mrb[180].mxu1 %v7065_v39  ;;  %v12995_v47 = vld [vmem:[#allocation23 + $0x384] ss:$16 sps:$4 sm:$0xff]   ;;  %v7007_v39 = vpack.i.b16 %v6984_v25, %v6984_v25  ;;  %v13004_v25 = vld [vmem:[#allocation23 + $0x3ac] ss:$16 sps:$4 sm:$0xff]  }
 0x7aa   :  { %v6952_v46 = vpack.c.bf16 %v6801_v55, %v6797_v29  ;;  %v15225_v58 = vpop.f32.mrb[155].mxu1  ;;  %7979 = vmatpush1.bf16.msra.mxu0 %v12981_v20  ;;  %8205 = vmatpush1.bf16.msra.mxu1 %v12984_v21  ;;  %v12993_v21 = vld [vmem:[#allocation23 + $0x380] ss:$16 sps:$4 sm:$0xff]   ;;  %v12996_v55 = vld [vmem:[#allocation23 + $0x388] ss:$16 sps:$4 sm:$0xff]  }
 0x7ab   :  { %v7037_v10 = vadd.bf16 %v15116_v28, %v6951_v38  ;;  %7980 = vmatprep.subr.bf16.mxu0 %v12989_v16  ;;  %8206 = vmatprep.subr.bf16.mxu1 %v12992_v18  ;;  %v6983_v38 = vcombine.high %v15104_v0, %v15104_v0  ;;  %v13001_v18 = vld [vmem:[#allocation23 + $0x3a4] ss:$16 sps:$4 sm:$0xff]  }
 0x7ac   :  { %v7038_v5 = vadd.bf16 %v15121_v11, %v6952_v46  ;;  %v15238_v46 = vrot.slane %v7007_v39, %v14239_v63  ;;  %v12999_v39 = vld [vmem:[#allocation23 + $0x3a0] ss:$16 sps:$4 sm:$0xff]  }
 0x7ad   :  { %v7069_v16 = vmax.bf16 %v15730_v17, %v7037_v10  ;;  %v7000_v45 = vpack.i.b16 %v6983_v38, %v6983_v38  ;;  %v13005_v38 = vld [vmem:[#allocation23 + $0x3c0] ss:$16 sps:$4 sm:$0xff]  }
 0x7ae   :  { %7981 = vmatpush1.bf16.msra.mxu0 %v12987_v57  ;;  %v6805_v29 = vpop.f32.mrb[156].mxu0  ;;  %8207 = vmatpush1.bf16.msra.mxu1 %v12990_v59  ;;  %v7070_v20 = vmax.bf16 %v15730_v17, %v7038_v5 }
 0x7af   :  { %v15234_v2 = vpop.f32.mrb[156].mxu1  ;;  %v6807_v61 = vpop.f32.mrb[157].mxu0  ;;  %7982 = vmatprep.subr.bf16.mxu0 %v12995_v47  ;;  %8208 = vmatprep.subr.bf16.mxu1 %v12998_v26 }
 0x7b0   :  { %v15240_v57 = vpop.f32.mrb[157].mxu1  ;;  %v6809_v59 = vpop.f32.mrb[158].mxu0  ;;  %7937 = vmatprep.mubr.bf16.mxu0 %v7070_v20  ;;  %8163 = vmatprep.mubr.bf16.mxu1 %v7070_v20  ;;  %v13007_v20 = vld [vmem:[#allocation23 + $0x3c4] ss:$16 sps:$4 sm:$0xff]  }
 0x7b1   :  { %v6955_v5 = vpack.c.bf16 %v6809_v59, %v6805_v29  ;;  %v15242_v7 = vpop.f32.mrb[158].mxu1  ;;  %v6811_v0 = vpop.f32.mrb[159].mxu0  ;;  %7938 = vmatmul.mubr.bf16.gmra.mrb[184].mxu0 %v7069_v16  ;;  %8164 = vmatmul.mubr.bf16.gmra.mrb[184].mxu1 %v7069_v16  ;;  %v13010_v16 = vld [vmem:[#allocation23 + $0x3cc] ss:$16 sps:$4 sm:$0xff]   ;;  %v7020_v59 = vadd.bf16 %v15238_v46, %v6934_v27  ;;  %v7024_v27 = vadd.bf16 %v15238_v46, %v6938_v8  ;;  %v13035_v8 = vld [vmem:[#allocation26 + $0x60] ss:$16 sps:$4 sm:$0xff]  }
 0x7b2   :  { %v6957_v10 = vpack.c.bf16 %v15242_v7, %v15234_v2  ;;  %v6956_v47 = vpack.c.bf16 %v6811_v0, %v6807_v61  ;;  %v15246_v26 = vpop.f32.mrb[159].mxu1  ;;  %7983 = vmatpush1.bf16.msra.mxu0 %v12993_v21  ;;  %8209 = vmatpush1.bf16.msra.mxu1 %v12996_v55  ;;  %v7016_v61 = vadd.bf16 %v15238_v46, %v6930_v35  ;;  %v13016_v35 = vld [vmem:[#allocation23 + $0x3ec] ss:$16 sps:$4 sm:$0xff]   ;;  %v13109_v7 = vld [vmem:[#allocation26 + $0x1e4] ss:$16 sps:$4 sm:$0xff]  }
 0x7b3   :  { %v7041_v62 = vadd.bf16 %v15116_v28, %v6955_v5  ;;  %v6958_v29 = vpack.c.bf16 %v15246_v26, %v15240_v57  ;;  %7984 = vmatprep.subr.bf16.mxu0 %v13001_v18  ;;  %8210 = vmatprep.subr.bf16.mxu1 %v13004_v25  ;;  %v15258_v28 = vrot.slane %v7000_v45, %v14239_v63  ;;  %v13008_v25 = vld [vmem:[#allocation23 + $0x3c8] ss:$16 sps:$4 sm:$0xff]   ;;  %v13022_v5 = vld [vmem:[#allocation26 + $0xc] ss:$16 sps:$4 sm:$0xff]   ;;  %v13095_v26 = vld [vmem:[#allocation26 + $0x1a0] ss:$16 sps:$4 sm:$0xff]  }
 0x7b4   :  { %v7042_v21 = vadd.bf16 %v15121_v11, %v6956_v47  ;;  %v7048_v53 = vmax.bf16 %v15730_v17, %v7016_v61  ;;  %v13011_v11 = vld [vmem:[#allocation23 + $0x3e0] ss:$16 sps:$4 sm:$0xff]   ;;  %v13017_v47 = vld [vmem:[#allocation26] ss:$16 sps:$4 sm:$0xff]   ;;  %v7052_v19 = vmax.bf16 %v15730_v17, %v7020_v59  ;;  %v7056_v43 = vmax.bf16 %v15730_v17, %v7024_v27 }
 0x7b5   :  { %v7073_v18 = vmax.bf16 %v15730_v17, %v7041_v62  ;;  %v7015_v45 = vadd.bf16 %v15258_v28, %v6929_v40  ;;  %v13014_v62 = vld [vmem:[#allocation23 + $0x3e8] ss:$16 sps:$4 sm:$0xff]   ;;  %v7019_v36 = vadd.bf16 %v15258_v28, %v6933_v30  ;;  %v13034_v61 = vld [vmem:[#allocation26 + $0x4c] ss:$16 sps:$4 sm:$0xff]   ;;  %v13032_v30 = vld [vmem:[#allocation26 + $0x48] ss:$16 sps:$4 sm:$0xff]   ;;  %v7023_v37 = vadd.bf16 %v15258_v28, %v6937_v56 }
 0x7b6   :  { %7985 = vmatpush1.bf16.msra.mxu0 %v12999_v39  ;;  %8211 = vmatpush1.bf16.msra.mxu1 %v13002_v49  ;;  %v7074_v55 = vmax.bf16 %v15730_v17, %v7042_v21  ;;  %v13019_v49 = vld [vmem:[#allocation26 + $0x4] ss:$16 sps:$4 sm:$0xff]   ;;  %v13028_v39 = vld [vmem:[#allocation26 + $0x2c] ss:$16 sps:$4 sm:$0xff]   ;;  %v13044_v56 = vld [vmem:[#allocation26 + $0x88] ss:$16 sps:$4 sm:$0xff]   ;;  %v7027_v54 = vadd.bf16 %v15258_v28, %v6941_v41 }
 0x7b7   :  { %7986 = vmatprep.subr.bf16.mxu0 %v13007_v20  ;;  %8212 = vmatprep.subr.bf16.mxu1 %v13010_v16  ;;  %v7047_v0 = vmax.bf16 %v15730_v17, %v7015_v45  ;;  %v13025_v40 = vld [vmem:[#allocation26 + $0x24] ss:$16 sps:$4 sm:$0xff]   ;;  %v13026_v20 = vld [vmem:[#allocation26 + $0x28] ss:$16 sps:$4 sm:$0xff]   ;;  %v7051_v21 = vmax.bf16 %v15730_v17, %v7019_v36  ;;  %v13058_v59 = vld [vmem:[#allocation26 + $0xcc] ss:$16 sps:$4 sm:$0xff]  }
 0x7b8   :  { %7947 = vmatprep.mubr.bf16.mxu0 %v7074_v55  ;;  %8173 = vmatprep.mubr.bf16.mxu1 %v7074_v55  ;;  %v13031_v16 = vld [vmem:[#allocation26 + $0x44] ss:$16 sps:$4 sm:$0xff]   ;;  %v13056_v41 = vld [vmem:[#allocation26 + $0xc8] ss:$16 sps:$4 sm:$0xff]   ;;  %v13100_v57 = vld [vmem:[#allocation26 + $0x1ac] ss:$16 sps:$4 sm:$0xff]  }
 0x7b9   :  { %7948 = vmatmul.mubr.bf16.gmra.mrb[188].mxu0 %v7073_v18  ;;  %8174 = vmatmul.mubr.bf16.gmra.mrb[188].mxu1 %v7073_v18  ;;  %v13037_v55 = vld [vmem:[#allocation26 + $0x64] ss:$16 sps:$4 sm:$0xff]   ;;  %v13038_v18 = vld [vmem:[#allocation26 + $0x68] ss:$16 sps:$4 sm:$0xff]   ;;  %v13112_v2 = vld [vmem:[#allocation26 + $0x1ec] ss:$16 sps:$4 sm:$0xff]  }
 0x7ba   :  { %7987 = vmatpush1.bf16.msra.mxu0 %v13005_v38  ;;  %7990 = vmatprep.mubr.bf16.mxu0 %v7048_v53  ;;  %v7028_v38 = vadd.bf16 %v15238_v46, %v6942_v22  ;;  %v13047_v22 = vld [vmem:[#allocation26 + $0xa0] ss:$16 sps:$4 sm:$0xff]   ;;  %v13067_v36 = vld [vmem:[#allocation26 + $0x104] ss:$16 sps:$4 sm:$0xff]  }
 0x7bb   :  { %8213 = vmatpush1.bf16.msra.mxu1 %v13008_v25  ;;  %8216 = vmatprep.mubr.bf16.mxu1 %v7048_v53  ;;  %v13043_v25 = vld [vmem:[#allocation26 + $0x84] ss:$16 sps:$4 sm:$0xff]   ;;  %v13046_v53 = vld [vmem:[#allocation26 + $0x8c] ss:$16 sps:$4 sm:$0xff]  }
 0x7bc   :  { %7988 = vmatprep.subr.bf16.mxu0 %v13013_v32  ;;  %8214 = vmatprep.subr.bf16.mxu1 %v13016_v35  ;;  %v7055_v32 = vmax.bf16 %v15730_v17, %v7023_v37  ;;  %v7060_v31 = vmax.bf16 %v15730_v17, %v7028_v38  ;;  %v13049_v35 = vld [vmem:[#allocation26 + $0xa4] ss:$16 sps:$4 sm:$0xff]  }
 0x7bd   :  { %v13085_v38 = vld [vmem:[#allocation26 + $0x164] ss:$16 sps:$4 sm:$0xff]  }
 0x7be   :  { %7989 = vmatpush1.bf16.msra.mxu0 %v13011_v11  ;;  %v15772_v11 = vpack.c.bf16 %v15191_v3, %v15185_v52  ;;  %v13064_v52 = vld [vmem:[#allocation26 + $0xec] ss:$16 sps:$4 sm:$0xff]   ;;  %v15773_v3 = vpack.c.bf16 %v15187_v24, %v15182_v33  ;;  %v13065_v33 = vld [vmem:[#allocation26 + $0x100] ss:$16 sps:$4 sm:$0xff]  }
 0x7bf   :  { %8215 = vmatpush1.bf16.msra.mxu1 %v13014_v62  ;;  %9215 = vmatprep.subr.bf16.mxu0 %v13019_v49  ;;  %v13050_v62 = vld [vmem:[#allocation26 + $0xa8] ss:$16 sps:$4 sm:$0xff]   ;;  %v13055_v49 = vld [vmem:[#allocation26 + $0xc4] ss:$16 sps:$4 sm:$0xff]  }
 0x7c0   :  { %9441 = vmatprep.subr.bf16.mxu1 %v13022_v5  ;;  %v7032_v45 = vadd.bf16 %v15238_v46, %v15772_v11  ;;  %v7059_v5 = vmax.bf16 %v15730_v17, %v7027_v54  ;;  %v13106_v11 = vld [vmem:[#allocation26 + $0x1cc] ss:$16 sps:$4 sm:$0xff]  }
 0x7c1   :  { %7991 = vmatmul.mubr.bf16.vlgmr.msra.gmra.mrb[160].mxu0 %v7047_v0 }
 0x7c2   :  { %8217 = vmatmul.mubr.bf16.vlgmr.msra.gmra.mrb[160].mxu1 %v7047_v0  ;;  %8000 = vmatprep.mubr.bf16.mxu0 %v7052_v19  ;;  %v7064_v34 = vmax.bf16 %v15730_v17, %v7032_v45  ;;  %v13061_v0 = vld [vmem:[#allocation26 + $0xe4] ss:$16 sps:$4 sm:$0xff]   ;;  %v13101_v45 = vld [vmem:[#allocation26 + $0x1c0] ss:$16 sps:$4 sm:$0xff]  }
 0x7c3   :  { %8226 = vmatprep.mubr.bf16.mxu1 %v7052_v19  ;;  %9216 = vmatpush1.bf16.msra.mxu0 %v13017_v47  ;;  %v7031_v47 = vadd.bf16 %v15258_v28, %v15773_v3  ;;  %v13059_v19 = vld [vmem:[#allocation26 + $0xe0] ss:$16 sps:$4 sm:$0xff]  }
 0x7c4   :  { %9442 = vmatpush1.bf16.msra.mxu1 %v13020_v50  ;;  %9217 = vmatprep.subr.bf16.mxu0 %v13025_v40  ;;  %v15774_v50 = vpack.c.bf16 %v15207_v48, %v15201_v60  ;;  %v13076_v60 = vld [vmem:[#allocation26 + $0x12c] ss:$16 sps:$4 sm:$0xff]   ;;  %v15775_v48 = vpack.c.bf16 %v15203_v42, %v15198_v6  ;;  %v13077_v6 = vld [vmem:[#allocation26 + $0x140] ss:$16 sps:$4 sm:$0xff]  }
 0x7c5   :  { %9443 = vmatprep.subr.bf16.mxu1 %v13028_v39  ;;  %v13062_v39 = vld [vmem:[#allocation26 + $0xe8] ss:$16 sps:$4 sm:$0xff]   ;;  %v7063_v27 = vmax.bf16 %v15730_v17, %v7031_v47 }
 0x7c6   :  { %v7036_v40 = vadd.bf16 %v15238_v46, %v15774_v50 }
 0x7c7   :  { %9218 = vmatpush1.bf16.msra.mxu0 %v13023_v14  ;;  %v13070_v14 = vld [vmem:[#allocation26 + $0x10c] ss:$16 sps:$4 sm:$0xff]  }
 0x7c8   :  { %9444 = vmatpush1.bf16.msra.mxu1 %v13026_v20  ;;  %9219 = vmatprep.subr.bf16.mxu0 %v13031_v16  ;;  %v7068_v24 = vmax.bf16 %v15730_v17, %v7036_v40  ;;  %v13068_v20 = vld [vmem:[#allocation26 + $0x108] ss:$16 sps:$4 sm:$0xff]   ;;  %v13073_v16 = vld [vmem:[#allocation26 + $0x124] ss:$16 sps:$4 sm:$0xff]  }
 0x7c9   :  { %8001 = vmatmul.mubr.bf16.gmra.mrb[164].mxu0 %v7051_v21  ;;  %9445 = vmatprep.subr.bf16.mxu1 %v13034_v61  ;;  %v7035_v61 = vadd.bf16 %v15258_v28, %v15775_v48 }
 0x7ca   :  { %8227 = vmatmul.mubr.bf16.gmra.mrb[164].mxu1 %v7051_v21  ;;  %8010 = vmatprep.mubr.bf16.mxu0 %v7056_v43  ;;  %v13071_v21 = vld [vmem:[#allocation26 + $0x120] ss:$16 sps:$4 sm:$0xff]  }
 0x7cb   :  { %8236 = vmatprep.mubr.bf16.mxu1 %v7056_v43  ;;  %9220 = vmatpush1.bf16.msra.mxu0 %v13029_v1  ;;  %v15776_v1 = vpack.c.bf16 %v15225_v58, %v15219_v15  ;;  %v7067_v37 = vmax.bf16 %v15730_v17, %v7035_v61  ;;  %v13088_v15 = vld [vmem:[#allocation26 + $0x16c] ss:$16 sps:$4 sm:$0xff]   ;;  %v15777_v58 = vpack.c.bf16 %v15221_v44, %v15214_v12  ;;  %v13089_v12 = vld [vmem:[#allocation26 + $0x180] ss:$16 sps:$4 sm:$0xff]  }
 0x7cc   :  { %9446 = vmatpush1.bf16.msra.mxu1 %v13032_v30  ;;  %9221 = vmatprep.subr.bf16.mxu0 %v13037_v55  ;;  %v13074_v30 = vld [vmem:[#allocation26 + $0x128] ss:$16 sps:$4 sm:$0xff]   ;;  %v13079_v55 = vld [vmem:[#allocation26 + $0x144] ss:$16 sps:$4 sm:$0xff]  }
 0x7cd   :  { %9447 = vmatprep.subr.bf16.mxu1 %v13040_v13  ;;  %v7040_v43 = vadd.bf16 %v15238_v46, %v15776_v1  ;;  %v13082_v13 = vld [vmem:[#allocation26 + $0x14c] ss:$16 sps:$4 sm:$0xff]  }
 0x7cf   :  { %9222 = vmatpush1.bf16.msra.mxu0 %v13035_v8  ;;  %v7072_v42 = vmax.bf16 %v15730_v17, %v7040_v43  ;;  %v13080_v8 = vld [vmem:[#allocation26 + $0x148] ss:$16 sps:$4 sm:$0xff]   ;;  %v13113_v43 = vld [vmem:[#allocation26 + $0x200] ss:$16 sps:$4 sm:$0xff]  }
 0x7d0   :  { %9448 = vmatpush1.bf16.msra.mxu1 %v13038_v18  ;;  %9223 = vmatprep.subr.bf16.mxu0 %v13043_v25  ;;  %v7039_v18 = vadd.bf16 %v15258_v28, %v15777_v58  ;;  %v13083_v25 = vld [vmem:[#allocation26 + $0x160] ss:$16 sps:$4 sm:$0xff]  }
 0x7d1   :  { %8011 = vmatmul.mubr.bf16.gmra.mrb[168].mxu0 %v7055_v32  ;;  %9449 = vmatprep.subr.bf16.mxu1 %v13046_v53  ;;  %v7044_v53 = vadd.bf16 %v15238_v46, %v6958_v29  ;;  %v7043_v46 = vadd.bf16 %v15258_v28, %v6957_v10  ;;  %v13098_v29 = vld [vmem:[#allocation26 + $0x1a8] ss:$16 sps:$4 sm:$0xff]   ;;  %v13107_v10 = vld [vmem:[#allocation26 + $0x1e0] ss:$16 sps:$4 sm:$0xff]  }
 0x7d2   :  { %8237 = vmatmul.mubr.bf16.gmra.mrb[168].mxu1 %v7055_v32  ;;  %8020 = vmatprep.mubr.bf16.mxu0 %v7060_v31  ;;  %v13086_v32 = vld [vmem:[#allocation26 + $0x168] ss:$16 sps:$4 sm:$0xff]  }
 0x7d3   :  { %8246 = vmatprep.mubr.bf16.mxu1 %v7060_v31  ;;  %9224 = vmatpush1.bf16.msra.mxu0 %v13041_v9  ;;  %v13091_v9 = vld [vmem:[#allocation26 + $0x184] ss:$16 sps:$4 sm:$0xff]   ;;  %v13094_v31 = vld [vmem:[#allocation26 + $0x18c] ss:$16 sps:$4 sm:$0xff]   ;;  %v7076_v44 = vmax.bf16 %v15730_v17, %v7044_v53  ;;  %v7075_v54 = vmax.bf16 %v15730_v17, %v7043_v46  ;;  %v13110_v28 = vld [vmem:[#allocation26 + $0x1e8] ss:$16 sps:$4 sm:$0xff]  }
 0x7d4   :  { %9450 = vmatpush1.bf16.msra.mxu1 %v13044_v56  ;;  %9225 = vmatprep.subr.bf16.mxu0 %v13049_v35  ;;  %v7071_v56 = vmax.bf16 %v15730_v17, %v7039_v18  ;;  %v13092_v35 = vld [vmem:[#allocation26 + $0x188] ss:$16 sps:$4 sm:$0xff]  }
 0x7d5   :  { %9451 = vmatprep.subr.bf16.mxu1 %v13052_v23  ;;  %v13097_v23 = vld [vmem:[#allocation26 + $0x1a4] ss:$16 sps:$4 sm:$0xff]  }
 0x7d7   :  { %9226 = vmatpush1.bf16.msra.mxu0 %v13047_v22  ;;  %v13103_v22 = vld [vmem:[#allocation26 + $0x1c4] ss:$16 sps:$4 sm:$0xff]  }
 0x7d8   :  { %9452 = vmatpush1.bf16.msra.mxu1 %v13050_v62  ;;  %9227 = vmatprep.subr.bf16.mxu0 %v13055_v49  ;;  %v13104_v62 = vld [vmem:[#allocation26 + $0x1c8] ss:$16 sps:$4 sm:$0xff]   ;;  %v13115_v49 = vld [vmem:[#allocation26 + $0x204] ss:$16 sps:$4 sm:$0xff]  }
 0x7d9   :  { %8021 = vmatmul.mubr.bf16.gmra.mrb[172].mxu0 %v7059_v5  ;;  %9453 = vmatprep.subr.bf16.mxu1 %v13058_v59  ;;  %v13118_v59 = vld [vmem:[#allocation26 + $0x20c] ss:$16 sps:$4 sm:$0xff]  }
 0x7da   :  { %8247 = vmatmul.mubr.bf16.gmra.mrb[172].mxu1 %v7059_v5  ;;  %8030 = vmatprep.mubr.bf16.mxu0 %v7064_v34  ;;  %v11057_v5 = vld.sshfl [vmem:[#allocation24] sm:$0x33 pattern:$0x75316420] }
 0x7db   :  { %8256 = vmatprep.mubr.bf16.mxu1 %v7064_v34  ;;  %9228 = vmatpush1.bf16.msra.mxu0 %v13053_v51  ;;  %v8338_v51 = vcombine.high %v11057_v5, %v11057_v5  ;;  %v15338_v34 = vrot.slane %v11057_v5, %v14241_v4 }
 0x7dc   :  { %9454 = vmatpush1.bf16.msra.mxu1 %v13056_v41  ;;  %9229 = vmatprep.subr.bf16.mxu0 %v13061_v0 }
 0x7dd   :  { %9455 = vmatprep.subr.bf16.mxu1 %v13064_v52  ;;  %v15341_v41 = vrot.slane %v8338_v51, %v14241_v4  ;;  %v8356_v0 = vpack.i.b16 %v15338_v34, %v15338_v34 }
 0x7df   :  { %9230 = vmatpush1.bf16.msra.mxu0 %v13059_v19  ;;  %v8363_v52 = vpack.i.b16 %v15341_v41, %v15341_v41  ;;  %v15350_v50 = vrot.slane %v8356_v0, %v14239_v63  ;;  %v13131_v0 = vld [vmem:[#allocation26 + $0x260] ss:$16 sps:$4 sm:$0xff]  }
 0x7e0   :  { %9456 = vmatpush1.bf16.msra.mxu1 %v13062_v39  ;;  %9231 = vmatprep.subr.bf16.mxu0 %v13067_v36 }
 0x7e1   :  { %8031 = vmatmul.mubr.bf16.gmra.mrb[176].mxu0 %v7063_v27  ;;  %9457 = vmatprep.subr.bf16.mxu1 %v13070_v14  ;;  %v15355_v36 = vrot.slane %v8363_v52, %v14239_v63  ;;  %v13134_v52 = vld [vmem:[#allocation26 + $0x268] ss:$16 sps:$4 sm:$0xff]  }
 0x7e2   :  { %8257 = vmatmul.mubr.bf16.gmra.mrb[176].mxu1 %v7063_v27  ;;  %8040 = vmatprep.mubr.bf16.mxu0 %v7068_v24 }
 0x7e3   :  { %8266 = vmatprep.mubr.bf16.mxu1 %v7068_v24  ;;  %9232 = vmatpush1.bf16.msra.mxu0 %v13065_v33 }
 0x7e4   :  { %9458 = vmatpush1.bf16.msra.mxu1 %v13068_v20  ;;  %9233 = vmatprep.subr.bf16.mxu0 %v13073_v16 }
 0x7e5   :  { %9459 = vmatprep.subr.bf16.mxu1 %v13076_v60 }
 0x7e7   :  { %9234 = vmatpush1.bf16.msra.mxu0 %v13071_v21 }
 0x7e8   :  { %9460 = vmatpush1.bf16.msra.mxu1 %v13074_v30  ;;  %9235 = vmatprep.subr.bf16.mxu0 %v13079_v55  ;;  %v13116_v30 = vld [vmem:[#allocation26 + $0x208] ss:$16 sps:$4 sm:$0xff]  }
 0x7e9   :  { %8041 = vmatmul.mubr.bf16.gmra.mrb[180].mxu0 %v7067_v37  ;;  %9461 = vmatprep.subr.bf16.mxu1 %v13082_v13 }
 0x7ea   :  { %8267 = vmatmul.mubr.bf16.gmra.mrb[180].mxu1 %v7067_v37  ;;  %8050 = vmatprep.mubr.bf16.mxu0 %v7072_v42 }
 0x7eb   :  { %8276 = vmatprep.mubr.bf16.mxu1 %v7072_v42  ;;  %9236 = vmatpush1.bf16.msra.mxu0 %v13077_v6  ;;  %v13121_v6 = vld [vmem:[#allocation26 + $0x224] ss:$16 sps:$4 sm:$0xff]   ;;  %v13124_v42 = vld [vmem:[#allocation26 + $0x22c] ss:$16 sps:$4 sm:$0xff]  }
 0x7ec   :  { %9462 = vmatpush1.bf16.msra.mxu1 %v13080_v8  ;;  %9237 = vmatprep.subr.bf16.mxu0 %v13085_v38 }
 0x7ed   :  { %9463 = vmatprep.subr.bf16.mxu1 %v13088_v15 }
 0x7ef   :  { %9238 = vmatpush1.bf16.msra.mxu0 %v13083_v25 }
 0x7f0   :  { %9464 = vmatpush1.bf16.msra.mxu1 %v13086_v32  ;;  %9239 = vmatprep.subr.bf16.mxu0 %v13091_v9  ;;  %v13119_v9 = vld [vmem:[#allocation26 + $0x220] ss:$16 sps:$4 sm:$0xff]  }
 0x7f1   :  { %8051 = vmatmul.mubr.bf16.gmra.mrb[184].mxu0 %v7071_v56  ;;  %9465 = vmatprep.subr.bf16.mxu1 %v13094_v31  ;;  %v13122_v31 = vld [vmem:[#allocation26 + $0x228] ss:$16 sps:$4 sm:$0xff]  }
 0x7f2   :  { %8277 = vmatmul.mubr.bf16.gmra.mrb[184].mxu1 %v7071_v56  ;;  %8060 = vmatprep.mubr.bf16.mxu0 %v7076_v44 }
 0x7f3   :  { %8286 = vmatprep.mubr.bf16.mxu1 %v7076_v44  ;;  %9240 = vmatpush1.bf16.msra.mxu0 %v13089_v12  ;;  %v13127_v44 = vld [vmem:[#allocation26 + $0x244] ss:$16 sps:$4 sm:$0xff]  }
 0x7f4   :  { %9466 = vmatpush1.bf16.msra.mxu1 %v13092_v35  ;;  %9241 = vmatprep.subr.bf16.mxu0 %v13097_v23  ;;  %v13130_v35 = vld [vmem:[#allocation26 + $0x24c] ss:$16 sps:$4 sm:$0xff]  }
 0x7f5   :  { %9467 = vmatprep.subr.bf16.mxu1 %v13100_v57 }
 0x7f7   :  { %9242 = vmatpush1.bf16.msra.mxu0 %v13095_v26  ;;  %v13125_v26 = vld [vmem:[#allocation26 + $0x240] ss:$16 sps:$4 sm:$0xff]  }
 0x7f8   :  { %9468 = vmatpush1.bf16.msra.mxu1 %v13098_v29  ;;  %9243 = vmatprep.subr.bf16.mxu0 %v13103_v22  ;;  %v13128_v29 = vld [vmem:[#allocation26 + $0x248] ss:$16 sps:$4 sm:$0xff]  }
 0x7f9   :  { %8061 = vmatmul.mubr.bf16.gmra.mrb[188].mxu0 %v7075_v54  ;;  %9469 = vmatprep.subr.bf16.mxu1 %v13106_v11 }
 0x7fa   :  { %8287 = vmatmul.mubr.bf16.gmra.mrb[188].mxu1 %v7075_v54 }
 0x7fb   :  { %9244 = vmatpush1.bf16.msra.mxu0 %v13101_v45  ;;  %v13133_v45 = vld [vmem:[#allocation26 + $0x264] ss:$16 sps:$4 sm:$0xff]  }
 0x7fc   :  { %9470 = vmatpush1.bf16.msra.mxu1 %v13104_v62  ;;  %9245 = vmatprep.subr.bf16.mxu0 %v13109_v7  ;;  %v13136_v62 = vld [vmem:[#allocation26 + $0x26c] ss:$16 sps:$4 sm:$0xff]  }
 0x7fd   :  { %9471 = vmatprep.subr.bf16.mxu1 %v13112_v2 }
 0x7ff   :  { %9246 = vmatpush1.bf16.msra.mxu0 %v13107_v10 }
 0x800   :  { %9472 = vmatpush1.bf16.msra.mxu1 %v13110_v28  ;;  %9328 = vmatprep.subr.bf16.mxu0 %v13115_v49 }
 0x801   :  { %9554 = vmatprep.subr.bf16.mxu1 %v13118_v59 }
 0x894   :  { %v7992_v3 = vpop.f32.mrb[160].mxu0 }
 0x895   :  { %v15347_v47 = vpop.f32.mrb[160].mxu1  ;;  %v7994_v19 = vpop.f32.mrb[161].mxu0 }
 0x896   :  { %v15352_v40 = vpop.f32.mrb[161].mxu1  ;;  %v7996_v39 = vpop.f32.mrb[162].mxu0 }
 0x897   :  { %v8297_v14 = vpack.c.bf16 %v7996_v39, %v7992_v3  ;;  %v15357_v27 = vpop.f32.mrb[162].mxu1  ;;  %v7998_v33 = vpop.f32.mrb[163].mxu0  ;;  %v13139_v39 = vld [vmem:[#allocation26 + $0x284] ss:$16 sps:$4 sm:$0xff]  }
 0x898   :  { %v8299_v24 = vpack.c.bf16 %v15357_v27, %v15347_v47  ;;  %v8298_v20 = vpack.c.bf16 %v7998_v33, %v7994_v19  ;;  %v15361_v16 = vpop.f32.mrb[163].mxu1  ;;  %v13210_v47 = vld [vmem:[#allocation29] sm:$0xff]  }
 0x899   :  { %v8383_v60 = vadd.bf16 %v15350_v50, %v8297_v14  ;;  %v8300_v48 = vpack.c.bf16 %v15361_v16, %v15352_v40  ;;  %v13142_v14 = vld [vmem:[#allocation26 + $0x28c] ss:$16 sps:$4 sm:$0xff]   ;;  %v13205_v16 = vld [vmem:[#allocation26 + $0x3e4] ss:$16 sps:$4 sm:$0xff]  }
 0x89a   :  { %v8384_v61 = vadd.bf16 %v15355_v36, %v8298_v20 }
 0x89b   :  { %v8415_v55 = vmax.bf16 %v15730_v17, %v8383_v60 }
 0x89c   :  { %v8002_v21 = vpop.f32.mrb[164].mxu0  ;;  %v8416_v1 = vmax.bf16 %v15730_v17, %v8384_v61  ;;  %v13137_v61 = vld [vmem:[#allocation26 + $0x280] ss:$16 sps:$4 sm:$0xff]  }
 0x89d   :  { %v15369_v13 = vpop.f32.mrb[164].mxu1  ;;  %v8004_v37 = vpop.f32.mrb[165].mxu0 }
 0x89e   :  { %v15371_v8 = vpop.f32.mrb[165].mxu1  ;;  %v8006_v38 = vpop.f32.mrb[166].mxu0  ;;  %9247 = vmatprep.mubr.bf16.mxu0 %v8416_v1  ;;  %9473 = vmatprep.mubr.bf16.mxu1 %v8416_v1 }
 0x89f   :  { %v8301_v15 = vpack.c.bf16 %v8006_v38, %v8002_v21  ;;  %v15373_v58 = vpop.f32.mrb[166].mxu1  ;;  %v8008_v18 = vpop.f32.mrb[167].mxu0  ;;  %9248 = vmatmul.mubr.bf16.vlgmr.msra.gmra.mrb[192].mxu0 %v8415_v55  ;;  %9474 = vmatmul.mubr.bf16.vlgmr.msra.gmra.mrb[192].mxu1 %v8415_v55  ;;  %v13140_v21 = vld [vmem:[#allocation26 + $0x288] ss:$16 sps:$4 sm:$0xff]   ;;  %v13145_v55 = vld [vmem:[#allocation26 + $0x2a4] ss:$16 sps:$4 sm:$0xff]  }
 0x8a0   :  { %v8303_v25 = vpack.c.bf16 %v15373_v58, %v15369_v13  ;;  %v8302_v53 = vpack.c.bf16 %v8008_v18, %v8004_v37  ;;  %v15377_v32 = vpop.f32.mrb[167].mxu1  ;;  %9329 = vmatpush1.bf16.msra.mxu0 %v13113_v43  ;;  %9555 = vmatpush1.bf16.msra.mxu1 %v13116_v30  ;;  %v13148_v37 = vld [vmem:[#allocation26 + $0x2ac] ss:$16 sps:$4 sm:$0xff]   ;;  %v13218_v13 = vld [vmem:[#allocation29 + $0x10] sm:$0xff]  }
 0x8a1   :  { %v8387_v56 = vadd.bf16 %v15350_v50, %v8301_v15  ;;  %v8304_v12 = vpack.c.bf16 %v15377_v32, %v15371_v8  ;;  %9330 = vmatprep.subr.bf16.mxu0 %v13121_v6  ;;  %9556 = vmatprep.subr.bf16.mxu1 %v13124_v42  ;;  %v13214_v32 = vld [vmem:[#allocation29 + $0x8] sm:$0xff]  }
 0x8a2   :  { %v8388_v23 = vadd.bf16 %v15355_v36, %v8302_v53 }
 0x8a3   :  { %v8419_v11 = vmax.bf16 %v15730_v17, %v8387_v56  ;;  %v13143_v56 = vld [vmem:[#allocation26 + $0x2a0] ss:$16 sps:$4 sm:$0xff]  }
 0x8a4   :  { %9331 = vmatpush1.bf16.msra.mxu0 %v13119_v9  ;;  %v8012_v57 = vpop.f32.mrb[168].mxu0  ;;  %9557 = vmatpush1.bf16.msra.mxu1 %v13122_v31  ;;  %v8420_v46 = vmax.bf16 %v15730_v17, %v8388_v23 }
 0x8a5   :  { %v15384_v54 = vpop.f32.mrb[168].mxu1  ;;  %v8014_v22 = vpop.f32.mrb[169].mxu0  ;;  %9332 = vmatprep.subr.bf16.mxu0 %v13127_v44  ;;  %9558 = vmatprep.subr.bf16.mxu1 %v13130_v35  ;;  %v13146_v44 = vld [vmem:[#allocation26 + $0x2a8] ss:$16 sps:$4 sm:$0xff]  }
 0x8a6   :  { %v15387_v7 = vpop.f32.mrb[169].mxu1  ;;  %v8016_v2 = vpop.f32.mrb[170].mxu0  ;;  %9257 = vmatprep.mubr.bf16.mxu0 %v8420_v46  ;;  %9483 = vmatprep.mubr.bf16.mxu1 %v8420_v46  ;;  %v13154_v46 = vld [vmem:[#allocation26 + $0x2cc] ss:$16 sps:$4 sm:$0xff]  }
 0x8a7   :  { %v8305_v10 = vpack.c.bf16 %v8016_v2, %v8012_v57  ;;  %v15389_v28 = vpop.f32.mrb[170].mxu1  ;;  %v8018_v49 = vpop.f32.mrb[171].mxu0  ;;  %9258 = vmatmul.mubr.bf16.gmra.mrb[196].mxu0 %v8419_v11  ;;  %9484 = vmatmul.mubr.bf16.gmra.mrb[196].mxu1 %v8419_v11  ;;  %v13151_v57 = vld [vmem:[#allocation26 + $0x2c4] ss:$16 sps:$4 sm:$0xff]   ;;  %v13149_v11 = vld [vmem:[#allocation26 + $0x2c0] ss:$16 sps:$4 sm:$0xff]  }
 0x8a8   :  { %v8307_v59 = vpack.c.bf16 %v15389_v28, %v15384_v54  ;;  %v8306_v5 = vpack.c.bf16 %v8018_v49, %v8014_v22  ;;  %v15393_v51 = vpop.f32.mrb[171].mxu1  ;;  %9333 = vmatpush1.bf16.msra.mxu0 %v13125_v26  ;;  %9559 = vmatpush1.bf16.msra.mxu1 %v13128_v29  ;;  %v13157_v49 = vld [vmem:[#allocation26 + $0x2e4] ss:$16 sps:$4 sm:$0xff]  }
 0x8a9   :  { %v8391_v3 = vadd.bf16 %v15350_v50, %v8305_v10  ;;  %v8308_v19 = vpack.c.bf16 %v15393_v51, %v15387_v7  ;;  %9334 = vmatprep.subr.bf16.mxu0 %v13133_v45  ;;  %9560 = vmatprep.subr.bf16.mxu1 %v13136_v62  ;;  %v13152_v45 = vld [vmem:[#allocation26 + $0x2c8] ss:$16 sps:$4 sm:$0xff]   ;;  %v13223_v7 = vld [vmem:[#allocation29 + $0xd8] sm:$0xff]  }
 0x8aa   :  { %v8392_v33 = vadd.bf16 %v15355_v36, %v8306_v5  ;;  %v13160_v5 = vld [vmem:[#allocation26 + $0x2ec] ss:$16 sps:$4 sm:$0xff]   ;;  %v13226_v54 = vld [vmem:[#allocation29 + $0x20] sm:$0xff]  }
 0x8ab   :  { %v8423_v30 = vmax.bf16 %v15730_v17, %v8391_v3 }
 0x8ac   :  { %9335 = vmatpush1.bf16.msra.mxu0 %v13131_v0  ;;  %v8022_v20 = vpop.f32.mrb[172].mxu0  ;;  %9561 = vmatpush1.bf16.msra.mxu1 %v13134_v52  ;;  %v8424_v60 = vmax.bf16 %v15730_v17, %v8392_v33 }
 0x8ad   :  { %v15400_v1 = vpop.f32.mrb[172].mxu1  ;;  %v8024_v43 = vpop.f32.mrb[173].mxu0  ;;  %9336 = vmatprep.subr.bf16.mxu0 %v13139_v39  ;;  %9562 = vmatprep.subr.bf16.mxu1 %v13142_v14 }
 0x8ae   :  { %v15403_v6 = vpop.f32.mrb[173].mxu1  ;;  %v8026_v42 = vpop.f32.mrb[174].mxu0  ;;  %9267 = vmatprep.mubr.bf16.mxu0 %v8424_v60  ;;  %9493 = vmatprep.mubr.bf16.mxu1 %v8424_v60 }
 0x8af   :  { %v8309_v38 = vpack.c.bf16 %v8026_v42, %v8022_v20  ;;  %v15405_v15 = vpop.f32.mrb[174].mxu1  ;;  %v8028_v18 = vpop.f32.mrb[175].mxu0  ;;  %9268 = vmatmul.mubr.bf16.gmra.mrb[200].mxu0 %v8423_v30  ;;  %9494 = vmatmul.mubr.bf16.gmra.mrb[200].mxu1 %v8423_v30 }
 0x8b0   :  { %v8311_v53 = vpack.c.bf16 %v15405_v15, %v15400_v1  ;;  %v8310_v9 = vpack.c.bf16 %v8028_v18, %v8024_v43  ;;  %v15409_v31 = vpop.f32.mrb[175].mxu1  ;;  %9337 = vmatpush1.bf16.msra.mxu0 %v13137_v61  ;;  %9563 = vmatpush1.bf16.msra.mxu1 %v13140_v21  ;;  %v13155_v61 = vld [vmem:[#allocation26 + $0x2e0] ss:$16 sps:$4 sm:$0xff]   ;;  %v13158_v21 = vld [vmem:[#allocation26 + $0x2e8] ss:$16 sps:$4 sm:$0xff]  }
 0x8b1   :  { %v8395_v35 = vadd.bf16 %v15350_v50, %v8309_v38  ;;  %v8312_v23 = vpack.c.bf16 %v15409_v31, %v15403_v6  ;;  %9338 = vmatprep.subr.bf16.mxu0 %v13145_v55  ;;  %9564 = vmatprep.subr.bf16.mxu1 %v13148_v37  ;;  %v13163_v55 = vld [vmem:[#allocation26 + $0x304] ss:$16 sps:$4 sm:$0xff]   ;;  %v13166_v37 = vld [vmem:[#allocation26 + $0x30c] ss:$16 sps:$4 sm:$0xff]  }
 0x8b2   :  { %v8396_v26 = vadd.bf16 %v15355_v36, %v8310_v9  ;;  %v13161_v9 = vld [vmem:[#allocation26 + $0x300] ss:$16 sps:$4 sm:$0xff]   ;;  %v13234_v1 = vld [vmem:[#allocation29 + $0x30] sm:$0xff]  }
 0x8b3   :  { %v8427_v10 = vmax.bf16 %v15730_v17, %v8395_v35  ;;  %v13231_v6 = vld [vmem:[#allocation29 + $0xe8] sm:$0xff]  }
 0x8b4   :  { %9339 = vmatpush1.bf16.msra.mxu0 %v13143_v56  ;;  %v8032_v29 = vpop.f32.mrb[176].mxu0  ;;  %9565 = vmatpush1.bf16.msra.mxu1 %v13146_v44  ;;  %v8428_v22 = vmax.bf16 %v15730_v17, %v8396_v26  ;;  %v13164_v56 = vld [vmem:[#allocation26 + $0x308] ss:$16 sps:$4 sm:$0xff]   ;;  %v13172_v26 = vld [vmem:[#allocation26 + $0x32c] ss:$16 sps:$4 sm:$0xff]  }
 0x8b5   :  { %v15416_v62 = vpop.f32.mrb[176].mxu1  ;;  %v8034_v2 = vpop.f32.mrb[177].mxu0  ;;  %9340 = vmatprep.subr.bf16.mxu0 %v13151_v57  ;;  %9566 = vmatprep.subr.bf16.mxu1 %v13154_v46  ;;  %v13169_v46 = vld [vmem:[#allocation26 + $0x324] ss:$16 sps:$4 sm:$0xff]  }
 0x8b6   :  { %v15419_v0 = vpop.f32.mrb[177].mxu1  ;;  %v8036_v52 = vpop.f32.mrb[178].mxu0  ;;  %9277 = vmatprep.mubr.bf16.mxu0 %v8428_v22  ;;  %9503 = vmatprep.mubr.bf16.mxu1 %v8428_v22 }
 0x8b7   :  { %v8313_v3 = vpack.c.bf16 %v8036_v52, %v8032_v29  ;;  %v15421_v39 = vpop.f32.mrb[178].mxu1  ;;  %v8038_v14 = vpop.f32.mrb[179].mxu0  ;;  %9278 = vmatmul.mubr.bf16.gmra.mrb[204].mxu0 %v8427_v10  ;;  %9504 = vmatmul.mubr.bf16.gmra.mrb[204].mxu1 %v8427_v10  ;;  %v13167_v52 = vld [vmem:[#allocation26 + $0x320] ss:$16 sps:$4 sm:$0xff]  }
 0x8b8   :  { %v8314_v20 = vpack.c.bf16 %v8038_v14, %v8034_v2  ;;  %v15425_v60 = vpop.f32.mrb[179].mxu1  ;;  %9341 = vmatpush1.bf16.msra.mxu0 %v13149_v11  ;;  %9567 = vmatpush1.bf16.msra.mxu1 %v13152_v45 }
 0x8b9   :  { %v8399_v43 = vadd.bf16 %v15350_v50, %v8313_v3  ;;  %9342 = vmatprep.subr.bf16.mxu0 %v13157_v49  ;;  %9568 = vmatprep.subr.bf16.mxu1 %v13160_v5  ;;  %v13170_v3 = vld [vmem:[#allocation26 + $0x328] ss:$16 sps:$4 sm:$0xff]  }
 0x8ba   :  { %v8400_v42 = vadd.bf16 %v15355_v36, %v8314_v20  ;;  %v13194_v20 = vld [vmem:[#allocation26 + $0x3a8] ss:$16 sps:$4 sm:$0xff]  }
 0x8bb   :  { %v8431_v57 = vmax.bf16 %v15730_v17, %v8399_v43 }
 0x8bc   :  { %9343 = vmatpush1.bf16.msra.mxu0 %v13155_v61  ;;  %v8042_v38 = vpop.f32.mrb[180].mxu0  ;;  %9569 = vmatpush1.bf16.msra.mxu1 %v13158_v21  ;;  %v8432_v18 = vmax.bf16 %v15730_v17, %v8400_v42  ;;  %v13175_v61 = vld [vmem:[#allocation26 + $0x344] ss:$16 sps:$4 sm:$0xff]   ;;  %v13178_v21 = vld [vmem:[#allocation26 + $0x34c] ss:$16 sps:$4 sm:$0xff]  }
 0x8bd   :  { %v15432_v44 = vpop.f32.mrb[180].mxu1  ;;  %v8044_v35 = vpop.f32.mrb[181].mxu0  ;;  %9344 = vmatprep.subr.bf16.mxu0 %v13163_v55  ;;  %9570 = vmatprep.subr.bf16.mxu1 %v13166_v37  ;;  %v13173_v42 = vld [vmem:[#allocation26 + $0x340] ss:$16 sps:$4 sm:$0xff]  }
 0x8be   :  { %v15435_v29 = vpop.f32.mrb[181].mxu1  ;;  %v8046_v22 = vpop.f32.mrb[182].mxu0  ;;  %9287 = vmatprep.mubr.bf16.mxu0 %v8432_v18  ;;  %9513 = vmatprep.mubr.bf16.mxu1 %v8432_v18 }
 0x8bf   :  { %v8317_v11 = vpack.c.bf16 %v8046_v22, %v8042_v38  ;;  %v15437_v45 = vpop.f32.mrb[182].mxu1  ;;  %v8048_v2 = vpop.f32.mrb[183].mxu0  ;;  %9288 = vmatmul.mubr.bf16.gmra.mrb[208].mxu0 %v8431_v57  ;;  %9514 = vmatmul.mubr.bf16.gmra.mrb[208].mxu1 %v8431_v57  ;;  %v13176_v38 = vld [vmem:[#allocation26 + $0x348] ss:$16 sps:$4 sm:$0xff]   ;;  %v13184_v57 = vld [vmem:[#allocation26 + $0x36c] ss:$16 sps:$4 sm:$0xff]  }
 0x8c0   :  { %v8318_v49 = vpack.c.bf16 %v8048_v2, %v8044_v35  ;;  %v15441_v5 = vpop.f32.mrb[183].mxu1  ;;  %9345 = vmatpush1.bf16.msra.mxu0 %v13161_v9  ;;  %9571 = vmatpush1.bf16.msra.mxu1 %v13164_v56  ;;  %v13181_v35 = vld [vmem:[#allocation26 + $0x364] ss:$16 sps:$4 sm:$0xff]  }
 0x8c1   :  { %v8403_v14 = vadd.bf16 %v15350_v50, %v8317_v11  ;;  %9346 = vmatprep.subr.bf16.mxu0 %v13169_v46  ;;  %9572 = vmatprep.subr.bf16.mxu1 %v13172_v26  ;;  %v8354_v46 = vcombine.high %v15341_v41, %v15341_v41  ;;  %v13179_v41 = vld [vmem:[#allocation26 + $0x360] ss:$16 sps:$4 sm:$0xff]  }
 0x8c2   :  { %v8404_v43 = vadd.bf16 %v15355_v36, %v8318_v49 }
 0x8c3   :  { %v8435_v56 = vmax.bf16 %v15730_v17, %v8403_v14 }
 0x8c4   :  { %9347 = vmatpush1.bf16.msra.mxu0 %v13167_v52  ;;  %v8052_v55 = vpop.f32.mrb[184].mxu0  ;;  %9573 = vmatpush1.bf16.msra.mxu1 %v13170_v3  ;;  %v8436_v37 = vmax.bf16 %v15730_v17, %v8404_v43 }
 0x8c5   :  { %v15448_v18 = vpop.f32.mrb[184].mxu1  ;;  %v8054_v9 = vpop.f32.mrb[185].mxu0  ;;  %9348 = vmatprep.subr.bf16.mxu0 %v13175_v61  ;;  %9574 = vmatprep.subr.bf16.mxu1 %v13178_v21  ;;  %v13182_v61 = vld [vmem:[#allocation26 + $0x368] ss:$16 sps:$4 sm:$0xff]  }
 0x8c6   :  { %v15453_v26 = vpop.f32.mrb[185].mxu1  ;;  %v8056_v22 = vpop.f32.mrb[186].mxu0  ;;  %9297 = vmatprep.mubr.bf16.mxu0 %v8436_v37  ;;  %9523 = vmatprep.mubr.bf16.mxu1 %v8436_v37  ;;  %v13190_v37 = vld [vmem:[#allocation26 + $0x38c] ss:$16 sps:$4 sm:$0xff]  }
 0x8c7   :  { %v8321_v11 = vpack.c.bf16 %v8056_v22, %v8052_v55  ;;  %v15455_v2 = vpop.f32.mrb[186].mxu1  ;;  %v8058_v49 = vpop.f32.mrb[187].mxu0  ;;  %9298 = vmatmul.mubr.bf16.gmra.mrb[212].mxu0 %v8435_v56  ;;  %9524 = vmatmul.mubr.bf16.gmra.mrb[212].mxu1 %v8435_v56  ;;  %v13187_v55 = vld [vmem:[#allocation26 + $0x384] ss:$16 sps:$4 sm:$0xff]   ;;  %v8377_v56 = vpack.i.b16 %v8354_v46, %v8354_v46  ;;  %v13196_v46 = vld [vmem:[#allocation26 + $0x3ac] ss:$16 sps:$4 sm:$0xff]  }
 0x8c8   :  { %v8322_v3 = vpack.c.bf16 %v8058_v49, %v8054_v9  ;;  %v15459_v14 = vpop.f32.mrb[187].mxu1  ;;  %9349 = vmatpush1.bf16.msra.mxu0 %v13173_v42  ;;  %9575 = vmatpush1.bf16.msra.mxu1 %v13176_v38  ;;  %v13185_v38 = vld [vmem:[#allocation26 + $0x380] ss:$16 sps:$4 sm:$0xff]   ;;  %v13188_v49 = vld [vmem:[#allocation26 + $0x388] ss:$16 sps:$4 sm:$0xff]  }
 0x8c9   :  { %v8407_v21 = vadd.bf16 %v15350_v50, %v8321_v11  ;;  %9350 = vmatprep.subr.bf16.mxu0 %v13181_v35  ;;  %9576 = vmatprep.subr.bf16.mxu1 %v13184_v57  ;;  %v8353_v11 = vcombine.high %v15338_v34, %v15338_v34  ;;  %v13193_v57 = vld [vmem:[#allocation26 + $0x3a4] ss:$16 sps:$4 sm:$0xff]  }
 0x8ca   :  { %v8408_v22 = vadd.bf16 %v15355_v36, %v8322_v3  ;;  %v15472_v3 = vrot.slane %v8377_v56, %v14239_v63  ;;  %v13191_v56 = vld [vmem:[#allocation26 + $0x3a0] ss:$16 sps:$4 sm:$0xff]  }
 0x8cb   :  { %v8439_v35 = vmax.bf16 %v15730_v17, %v8407_v21  ;;  %v8370_v33 = vpack.i.b16 %v8353_v11, %v8353_v11  ;;  %v13197_v11 = vld [vmem:[#allocation26 + $0x3c0] ss:$16 sps:$4 sm:$0xff]  }
 0x8cc   :  { %9351 = vmatpush1.bf16.msra.mxu0 %v13179_v41  ;;  %v8062_v9 = vpop.f32.mrb[188].mxu0  ;;  %9577 = vmatpush1.bf16.msra.mxu1 %v13182_v61  ;;  %v8440_v42 = vmax.bf16 %v15730_v17, %v8408_v22 }
 0x8cd   :  { %v15468_v52 = vpop.f32.mrb[188].mxu1  ;;  %v8064_v43 = vpop.f32.mrb[189].mxu0  ;;  %9352 = vmatprep.subr.bf16.mxu0 %v13187_v55  ;;  %9578 = vmatprep.subr.bf16.mxu1 %v13190_v37 }
 0x8ce   :  { %v15474_v41 = vpop.f32.mrb[189].mxu1  ;;  %v8066_v61 = vpop.f32.mrb[190].mxu0  ;;  %9307 = vmatprep.mubr.bf16.mxu0 %v8440_v42  ;;  %9533 = vmatprep.mubr.bf16.mxu1 %v8440_v42  ;;  %v13199_v42 = vld [vmem:[#allocation26 + $0x3c4] ss:$16 sps:$4 sm:$0xff]  }
 0x8cf   :  { %v8325_v22 = vpack.c.bf16 %v8066_v61, %v8062_v9  ;;  %v15476_v10 = vpop.f32.mrb[190].mxu1  ;;  %v8068_v34 = vpop.f32.mrb[191].mxu0  ;;  %9308 = vmatmul.mubr.bf16.gmra.mrb[216].mxu0 %v8439_v35  ;;  %9534 = vmatmul.mubr.bf16.gmra.mrb[216].mxu1 %v8439_v35  ;;  %v13202_v35 = vld [vmem:[#allocation26 + $0x3cc] ss:$16 sps:$4 sm:$0xff]   ;;  %v8390_v61 = vadd.bf16 %v15472_v3, %v8304_v12  ;;  %v8394_v12 = vadd.bf16 %v15472_v3, %v8308_v19 }
 0x8d0   :  { %v8327_v21 = vpack.c.bf16 %v15476_v10, %v15468_v52  ;;  %v8326_v55 = vpack.c.bf16 %v8068_v34, %v8064_v43  ;;  %v15480_v37 = vpop.f32.mrb[191].mxu1  ;;  %9353 = vmatpush1.bf16.msra.mxu0 %v13185_v38  ;;  %9579 = vmatpush1.bf16.msra.mxu1 %v13188_v49  ;;  %v8386_v43 = vadd.bf16 %v15472_v3, %v8300_v48  ;;  %v13208_v48 = vld [vmem:[#allocation26 + $0x3ec] ss:$16 sps:$4 sm:$0xff]  }
 0x8d1   :  { %v8411_v30 = vadd.bf16 %v15350_v50, %v8325_v22  ;;  %v8328_v9 = vpack.c.bf16 %v15480_v37, %v15474_v41  ;;  %9354 = vmatprep.subr.bf16.mxu0 %v13193_v57  ;;  %9580 = vmatprep.subr.bf16.mxu1 %v13196_v46  ;;  %v15492_v50 = vrot.slane %v8370_v33, %v14239_v63  ;;  %v13200_v46 = vld [vmem:[#allocation26 + $0x3c8] ss:$16 sps:$4 sm:$0xff]   ;;  %v13222_v19 = vld [vmem:[#allocation29 + $0x18] sm:$0xff]  }
 0x8d2   :  { %v8412_v38 = vadd.bf16 %v15355_v36, %v8326_v55  ;;  %v8418_v40 = vmax.bf16 %v15730_v17, %v8386_v43  ;;  %v13203_v36 = vld [vmem:[#allocation26 + $0x3e0] ss:$16 sps:$4 sm:$0xff]   ;;  %v13211_v22 = vld [vmem:[#allocation29 + $0xc0] sm:$0xff]   ;;  %v8422_v27 = vmax.bf16 %v15730_v17, %v8390_v61  ;;  %v13219_v43 = vld [vmem:[#allocation29 + $0xd0] sm:$0xff]   ;;  %v8426_v58 = vmax.bf16 %v15730_v17, %v8394_v12 }
 0x8d3   :  { %v8443_v57 = vmax.bf16 %v15730_v17, %v8411_v30  ;;  %v8385_v33 = vadd.bf16 %v15492_v50, %v8299_v24  ;;  %v13206_v30 = vld [vmem:[#allocation26 + $0x3e8] ss:$16 sps:$4 sm:$0xff]   ;;  %v13213_v55 = vld [vmem:[#allocation29 + $0x48] sm:$0xff]   ;;  %v8389_v8 = vadd.bf16 %v15492_v50, %v8303_v25  ;;  %v8393_v51 = vadd.bf16 %v15492_v50, %v8307_v59  ;;  %v13237_v41 = vld [vmem:[#allocation29 + $0x78] sm:$0xff]  }
 0x8d4   :  { %9355 = vmatpush1.bf16.msra.mxu0 %v13191_v56  ;;  %9581 = vmatpush1.bf16.msra.mxu1 %v13194_v20  ;;  %v8444_v49 = vmax.bf16 %v15730_v17, %v8412_v38  ;;  %v13209_v20 = vld [vmem:[#allocation29 + $0x40] sm:$0xff]   ;;  %v13215_v56 = vld [vmem:[#allocation29 + $0xc8] sm:$0xff]   ;;  %v13220_v25 = vld [vmem:[#allocation29 + $0x90] sm:$0xff]   ;;  %v8397_v31 = vadd.bf16 %v15492_v50, %v8311_v53 }
 0x8d5   :  { %9356 = vmatprep.subr.bf16.mxu0 %v13199_v42  ;;  %9582 = vmatprep.subr.bf16.mxu1 %v13202_v35  ;;  %v8417_v34 = vmax.bf16 %v15730_v17, %v8385_v33  ;;  %v13212_v24 = vld [vmem:[#allocation29 + $0x80] sm:$0xff]   ;;  %v13216_v42 = vld [vmem:[#allocation29 + $0x88] sm:$0xff]   ;;  %v13217_v35 = vld [vmem:[#allocation29 + $0x50] sm:$0xff]   ;;  %v8421_v38 = vmax.bf16 %v15730_v17, %v8389_v8  ;;  %v15783_v8 = vpack.c.bf16 %v15455_v2, %v15448_v18 }
 0x8d6   :  { %9317 = vmatprep.mubr.bf16.mxu0 %v8444_v49  ;;  %9543 = vmatprep.mubr.bf16.mxu1 %v8444_v49  ;;  %v13221_v49 = vld [vmem:[#allocation29 + $0x58] sm:$0xff]   ;;  %v13228_v59 = vld [vmem:[#allocation29 + $0xa0] sm:$0xff]   ;;  %v13235_v61 = vld [vmem:[#allocation29 + $0xf0] sm:$0xff]   ;;  %v8413_v18 = vadd.bf16 %v15492_v50, %v8327_v21 }
 0x8d7   :  { %9318 = vmatmul.mubr.bf16.gmra.mrb[220].mxu0 %v8443_v57  ;;  %9544 = vmatmul.mubr.bf16.gmra.mrb[220].mxu1 %v8443_v57  ;;  %v13224_v57 = vld [vmem:[#allocation29 + $0x98] sm:$0xff]   ;;  %v13236_v53 = vld [vmem:[#allocation29 + $0xb0] sm:$0xff]  }
 0x8d8   :  { %9357 = vmatpush1.bf16.msra.mxu0 %v13197_v11  ;;  %9360 = vmatprep.mubr.bf16.mxu0 %v8418_v40  ;;  %v8398_v11 = vadd.bf16 %v15472_v3, %v8312_v23  ;;  %v13230_v23 = vld [vmem:[#allocation29 + $0x28] sm:$0xff]   ;;  %v8445_v2 = vmax.bf16 %v15730_v17, %v8413_v18  ;;  %v13239_v37 = vld [vmem:[#allocation29 + $0xf8] sm:$0xff]  }
 0x8d9   :  { %9583 = vmatpush1.bf16.msra.mxu1 %v13200_v46  ;;  %9586 = vmatprep.mubr.bf16.mxu1 %v8418_v40  ;;  %v13225_v46 = vld [vmem:[#allocation29 + $0x60] sm:$0xff]  }
 0x8da   :  { %9358 = vmatprep.subr.bf16.mxu0 %v13205_v16  ;;  %9584 = vmatprep.subr.bf16.mxu1 %v13208_v48  ;;  %v13227_v40 = vld [vmem:[#allocation29 + $0xe0] sm:$0xff]   ;;  %v8425_v16 = vmax.bf16 %v15730_v17, %v8393_v51  ;;  %v8430_v28 = vmax.bf16 %v15730_v17, %v8398_v11  ;;  %v13229_v48 = vld [vmem:[#allocation29 + $0x68] sm:$0xff]  }
 0x8dc   :  { %9359 = vmatpush1.bf16.msra.mxu0 %v13203_v36  ;;  %v15778_v36 = vpack.c.bf16 %v15425_v60, %v15419_v0  ;;  %v15779_v0 = vpack.c.bf16 %v15421_v39, %v15416_v62  ;;  %v15781_v62 = vpack.c.bf16 %v15437_v45, %v15432_v44  ;;  %v8409_v44 = vadd.bf16 %v15492_v50, %v15783_v8 }
 0x8dd   :  { %9585 = vmatpush1.bf16.msra.mxu1 %v13206_v30  ;;  %11220 = vmatprep.subr.bf16.mxu0 %v13209_v20  ;;  %v13232_v30 = vld [vmem:[#allocation29 + $0xa8] sm:$0xff]   ;;  %v13233_v20 = vld [vmem:[#allocation29 + $0x70] sm:$0xff]   ;;  %v8414_v45 = vadd.bf16 %v15472_v3, %v8328_v9  ;;  %v13240_v9 = vld [vmem:[#allocation29 + $0xb8] sm:$0xff]  }
 0x8de   :  { %11284 = vmatprep.subr.bf16.mxu1 %v13211_v22  ;;  %v8402_v33 = vadd.bf16 %v15472_v3, %v15778_v36  ;;  %v8429_v22 = vmax.bf16 %v15730_v17, %v8397_v31  ;;  %v8401_v60 = vadd.bf16 %v15492_v50, %v15779_v0  ;;  %v8405_v39 = vadd.bf16 %v15492_v50, %v15781_v62 }
 0x8df   :  { %9361 = vmatmul.mubr.bf16.vlgmr.msra.gmra.mrb[192].mxu0 %v8417_v34 }
 0x8e0   :  { %9587 = vmatmul.mubr.bf16.vlgmr.msra.gmra.mrb[192].mxu1 %v8417_v34  ;;  %9370 = vmatprep.mubr.bf16.mxu0 %v8422_v27  ;;  %v8434_v15 = vmax.bf16 %v15730_v17, %v8402_v33  ;;  %v15780_v34 = vpack.c.bf16 %v15441_v5, %v15435_v29  ;;  %v8437_v5 = vmax.bf16 %v15730_v17, %v8405_v39 }
 0x8e1   :  { %9596 = vmatprep.mubr.bf16.mxu1 %v8422_v27  ;;  %11221 = vmatpush3.bf16.msra.mxu0 %v13210_v47  ;;  %v8433_v27 = vmax.bf16 %v15730_v17, %v8401_v60 }
 0x8e2   :  { %11285 = vmatpush3.bf16.msra.mxu1 %v13212_v24  ;;  %11222 = vmatprep.subr.bf16.mxu0 %v13213_v55  ;;  %v8406_v47 = vadd.bf16 %v15472_v3, %v15780_v34  ;;  %v15782_v55 = vpack.c.bf16 %v15459_v14, %v15453_v26  ;;  %v8441_v26 = vmax.bf16 %v15730_v17, %v8409_v44 }
 0x8e3   :  { %11286 = vmatprep.subr.bf16.mxu1 %v13215_v56  ;;  %v8446_v14 = vmax.bf16 %v15730_v17, %v8414_v45 }
 0x8e4   :  { %v8438_v24 = vmax.bf16 %v15730_v17, %v8406_v47  ;;  %v8410_v29 = vadd.bf16 %v15472_v3, %v15782_v55  ;;  %v13238_v3 = vld [vmem:[#allocation29 + $0x38] sm:$0xff]  }
 0x8e5   :  { %11223 = vmatpush3.bf16.msra.mxu0 %v13214_v32  ;;  %v11186_v32 = vld.sshfl [vmem:[#allocation27] sm:$0x33 pattern:$0x75316420] }
 0x8e6   :  { %11287 = vmatpush3.bf16.msra.mxu1 %v13216_v42  ;;  %11224 = vmatprep.subr.bf16.mxu0 %v13217_v35  ;;  %v8442_v56 = vmax.bf16 %v15730_v17, %v8410_v29  ;;  %v9708_v12 = vcombine.high %v11186_v32, %v11186_v32  ;;  %v9715_v42 = vrot.slane %v11186_v32, %v14241_v4 }
 0x8e7   :  { %9371 = vmatmul.mubr.bf16.gmra.mrb[196].mxu0 %v8421_v38  ;;  %11288 = vmatprep.subr.bf16.mxu1 %v13219_v43 }
 0x8e8   :  { %9597 = vmatmul.mubr.bf16.gmra.mrb[196].mxu1 %v8421_v38  ;;  %9380 = vmatprep.mubr.bf16.mxu0 %v8426_v58  ;;  %v9722_v10 = vrot.slane %v9708_v12, %v14241_v4  ;;  %v9723_v52 = vcombine.high %v9715_v42, %v9715_v42  ;;  %v9726_v50 = vpack.i.b16 %v9715_v42, %v9715_v42 }
 0x8e9   :  { %9606 = vmatprep.mubr.bf16.mxu1 %v8426_v58  ;;  %11225 = vmatpush3.bf16.msra.mxu0 %v13218_v13 }
 0x8ea   :  { %11289 = vmatpush3.bf16.msra.mxu1 %v13220_v25  ;;  %11226 = vmatprep.subr.bf16.mxu0 %v13221_v49  ;;  %v9724_v21 = vcombine.high %v9722_v10, %v9722_v10  ;;  %v9740_v35 = vpack.i.b16 %v9723_v52, %v9723_v52  ;;  %v9733_v43 = vpack.i.b16 %v9722_v10, %v9722_v10 }
 0x8eb   :  { %11290 = vmatprep.subr.bf16.mxu1 %v13223_v7  ;;  %v15574_v49 = vrot.slane %v9726_v50, %v14239_v63 }
 0x8ec   :  { %v9747_v38 = vpack.i.b16 %v9724_v21, %v9724_v21  ;;  %v15580_v11 = vrot.slane %v9733_v43, %v14239_v63 }
 0x8ed   :  { %11227 = vmatpush3.bf16.msra.mxu0 %v13222_v19  ;;  %v15577_v19 = vrot.slane %v9740_v35, %v14239_v63 }
 0x8ee   :  { %11291 = vmatpush3.bf16.msra.mxu1 %v13224_v57  ;;  %11228 = vmatprep.subr.bf16.mxu0 %v13225_v46 }
 0x8ef   :  { %9381 = vmatmul.mubr.bf16.gmra.mrb[200].mxu0 %v8425_v16  ;;  %11292 = vmatprep.subr.bf16.mxu1 %v13227_v40  ;;  %v15583_v40 = vrot.slane %v9747_v38, %v14239_v63 }
 0x8f0   :  { %9607 = vmatmul.mubr.bf16.gmra.mrb[200].mxu1 %v8425_v16  ;;  %9390 = vmatprep.mubr.bf16.mxu0 %v8430_v28 }
 0x8f1   :  { %9616 = vmatprep.mubr.bf16.mxu1 %v8430_v28  ;;  %11229 = vmatpush3.bf16.msra.mxu0 %v13226_v54 }
 0x8f2   :  { %11293 = vmatpush3.bf16.msra.mxu1 %v13228_v59  ;;  %11230 = vmatprep.subr.bf16.mxu0 %v13229_v48 }
 0x8f3   :  { %11294 = vmatprep.subr.bf16.mxu1 %v13231_v6 }
 0x8f5   :  { %11231 = vmatpush3.bf16.msra.mxu0 %v13230_v23 }
 0x8f6   :  { %11295 = vmatpush3.bf16.msra.mxu1 %v13232_v30  ;;  %11232 = vmatprep.subr.bf16.mxu0 %v13233_v20 }
 0x8f7   :  { %9391 = vmatmul.mubr.bf16.gmra.mrb[204].mxu0 %v8429_v22  ;;  %11296 = vmatprep.subr.bf16.mxu1 %v13235_v61 }
 0x8f8   :  { %9617 = vmatmul.mubr.bf16.gmra.mrb[204].mxu1 %v8429_v22  ;;  %9400 = vmatprep.mubr.bf16.mxu0 %v8434_v15 }
 0x8f9   :  { %9626 = vmatprep.mubr.bf16.mxu1 %v8434_v15  ;;  %11233 = vmatpush3.bf16.msra.mxu0 %v13234_v1 }
 0x8fa   :  { %11297 = vmatpush3.bf16.msra.mxu1 %v13236_v53  ;;  %11234 = vmatprep.subr.bf16.mxu0 %v13237_v41 }
 0x8fb   :  { %11298 = vmatprep.subr.bf16.mxu1 %v13239_v37 }
 0x8fd   :  { %11235 = vmatpush3.bf16.msra.mxu0 %v13238_v3 }
 0x8fe   :  { %11299 = vmatpush3.bf16.msra.mxu1 %v13240_v9 }
 0x8ff   :  { %9401 = vmatmul.mubr.bf16.gmra.mrb[208].mxu0 %v8433_v27 }
 0x900   :  { %9627 = vmatmul.mubr.bf16.gmra.mrb[208].mxu1 %v8433_v27  ;;  %9410 = vmatprep.mubr.bf16.mxu0 %v8438_v24 }
 0x901   :  { %9636 = vmatprep.mubr.bf16.mxu1 %v8438_v24 }
 0x907   :  { %9411 = vmatmul.mubr.bf16.gmra.mrb[212].mxu0 %v8437_v5 }
 0x908   :  { %9637 = vmatmul.mubr.bf16.gmra.mrb[212].mxu1 %v8437_v5  ;;  %9420 = vmatprep.mubr.bf16.mxu0 %v8442_v56 }
 0x909   :  { %9646 = vmatprep.mubr.bf16.mxu1 %v8442_v56 }
 0x90f   :  { %9421 = vmatmul.mubr.bf16.gmra.mrb[216].mxu0 %v8441_v26 }
 0x910   :  { %9647 = vmatmul.mubr.bf16.gmra.mrb[216].mxu1 %v8441_v26  ;;  %9430 = vmatprep.mubr.bf16.mxu0 %v8446_v14 }
 0x911   :  { %9656 = vmatprep.mubr.bf16.mxu1 %v8446_v14 }
 0x917   :  { %9431 = vmatmul.mubr.bf16.gmra.mrb[220].mxu0 %v8445_v2 }
 0x918   :  { %9657 = vmatmul.mubr.bf16.gmra.mrb[220].mxu1 %v8445_v2 }
 0x9b2   :  { %v9362_v13 = vpop.f32.mrb[192].mxu0 }
 0x9b3   :  { %v9588_v58 = vpop.f32.mrb[192].mxu1  ;;  %v9364_v25 = vpop.f32.mrb[193].mxu0 }
 0x9b4   :  { %v9590_v7 = vpop.f32.mrb[193].mxu1  ;;  %v9366_v51 = vpop.f32.mrb[194].mxu0 }
 0x9b5   :  { %v9667_v4 = vpack.c.bf16 %v9366_v51, %v9362_v13  ;;  %v9592_v57 = vpop.f32.mrb[194].mxu1  ;;  %v9368_v46 = vpop.f32.mrb[195].mxu0 }
 0x9b6   :  { %v9669_v16 = vpack.c.bf16 %v9592_v57, %v9588_v58  ;;  %v9668_v54 = vpack.c.bf16 %v9368_v46, %v9364_v25  ;;  %v9594_v28 = vpop.f32.mrb[195].mxu1 }
 0x9b7   :  { %v9753_v59 = vadd.bf16 %v15574_v49, %v9667_v4  ;;  %v9670_v48 = vpack.c.bf16 %v9594_v28, %v9590_v7 }
 0x9b8   :  { %v9755_v6 = vadd.bf16 %v15577_v19, %v9669_v16  ;;  %v9754_v31 = vadd.bf16 %v15580_v11, %v9668_v54 }
 0x9b9   :  { %v9756_v23 = vadd.bf16 %v15583_v40, %v9670_v48  ;;  %v9785_v30 = vmax.bf16 %v15730_v17, %v9753_v59 }
 0x9ba   :  { %v9372_v36 = vpop.f32.mrb[196].mxu0  ;;  %v9786_v33 = vmax.bf16 %v15730_v17, %v9754_v31  ;;  %v9787_v22 = vmax.bf16 %v15730_v17, %v9755_v6 }
 0x9bb   :  { %v9598_v20 = vpop.f32.mrb[196].mxu1  ;;  %v9374_v63 = vpop.f32.mrb[197].mxu0  ;;  %v9788_v61 = vmax.bf16 %v15730_v17, %v9756_v23 }
 0x9bc   :  { %v9600_v1 = vpop.f32.mrb[197].mxu1  ;;  %v9376_v15 = vpop.f32.mrb[198].mxu0  ;;  %10112 = vmatprep.mubr.bf16.mxu0 %v9786_v33 }
 0x9bd   :  { %v9671_v53 = vpack.c.bf16 %v9376_v15, %v9372_v36  ;;  %v9602_v0 = vpop.f32.mrb[198].mxu1  ;;  %10209 = vmatprep.mubr.bf16.mxu1 %v9788_v61  ;;  %v9378_v60 = vpop.f32.mrb[199].mxu0  ;;  %10113 = vmatmul.mubr.bf16.vlgmr.msra.gmra.mrb[224].mxu0 %v9785_v30 }
 0x9be   :  { %v9673_v34 = vpack.c.bf16 %v9602_v0, %v9598_v20  ;;  %v9672_v47 = vpack.c.bf16 %v9378_v60, %v9374_v63  ;;  %v9604_v27 = vpop.f32.mrb[199].mxu1  ;;  %10210 = vmatmul.mubr.bf16.vlgmr.msra.gmra.mrb[224].mxu1 %v9787_v22 }
 0x9bf   :  { %v9757_v24 = vadd.bf16 %v15574_v49, %v9671_v53  ;;  %v9674_v62 = vpack.c.bf16 %v9604_v27, %v9600_v1 }
 0x9c0   :  { %v9759_v39 = vadd.bf16 %v15577_v19, %v9673_v34  ;;  %v9758_v55 = vadd.bf16 %v15580_v11, %v9672_v47 }
 0x9c1   :  { %v9760_v29 = vadd.bf16 %v15583_v40, %v9674_v62  ;;  %v9789_v26 = vmax.bf16 %v15730_v17, %v9757_v24 }
 0x9c2   :  { %v9382_v5 = vpop.f32.mrb[200].mxu0  ;;  %v9790_v56 = vmax.bf16 %v15730_v17, %v9758_v55  ;;  %v9791_v2 = vmax.bf16 %v15730_v17, %v9759_v39 }
 0x9c3   :  { %v9608_v8 = vpop.f32.mrb[200].mxu1  ;;  %v9384_v44 = vpop.f32.mrb[201].mxu0  ;;  %v9792_v45 = vmax.bf16 %v15730_v17, %v9760_v29 }
 0x9c4   :  { %v9610_v14 = vpop.f32.mrb[201].mxu1  ;;  %v9386_v18 = vpop.f32.mrb[202].mxu0  ;;  %10120 = vmatprep.mubr.bf16.mxu0 %v9790_v56 }
 0x9c5   :  { %v9675_v41 = vpack.c.bf16 %v9386_v18, %v9382_v5  ;;  %v9612_v37 = vpop.f32.mrb[202].mxu1  ;;  %10217 = vmatprep.mubr.bf16.mxu1 %v9792_v45  ;;  %v9388_v3 = vpop.f32.mrb[203].mxu0  ;;  %10121 = vmatmul.mubr.bf16.gmra.mrb[228].mxu0 %v9789_v26 }
 0x9c6   :  { %v9677_v9 = vpack.c.bf16 %v9612_v37, %v9608_v8  ;;  %v9676_v32 = vpack.c.bf16 %v9388_v3, %v9384_v44  ;;  %v9614_v12 = vpop.f32.mrb[203].mxu1  ;;  %10218 = vmatmul.mubr.bf16.gmra.mrb[228].mxu1 %v9791_v2 }
 0x9c7   :  { %v9761_v42 = vadd.bf16 %v15574_v49, %v9675_v41  ;;  %v9678_v10 = vpack.c.bf16 %v9614_v12, %v9610_v14 }
 0x9c8   :  { %v9763_v52 = vadd.bf16 %v15577_v19, %v9677_v9  ;;  %v9762_v21 = vadd.bf16 %v15580_v11, %v9676_v32 }
 0x9c9   :  { %v9764_v50 = vadd.bf16 %v15583_v40, %v9678_v10  ;;  %v9793_v25 = vmax.bf16 %v15730_v17, %v9761_v42 }
 0x9ca   :  { %v9392_v35 = vpop.f32.mrb[204].mxu0  ;;  %v9794_v43 = vmax.bf16 %v15730_v17, %v9762_v21  ;;  %v9795_v4 = vmax.bf16 %v15730_v17, %v9763_v52 }
 0x9cb   :  { %v9618_v38 = vpop.f32.mrb[204].mxu1  ;;  %v9394_v13 = vpop.f32.mrb[205].mxu0  ;;  %v9796_v58 = vmax.bf16 %v15730_v17, %v9764_v50 }
 0x9cc   :  { %v9620_v7 = vpop.f32.mrb[205].mxu1  ;;  %v9396_v51 = vpop.f32.mrb[206].mxu0  ;;  %10128 = vmatprep.mubr.bf16.mxu0 %v9794_v43 }
 0x9cd   :  { %v9679_v57 = vpack.c.bf16 %v9396_v51, %v9392_v35  ;;  %v9622_v46 = vpop.f32.mrb[206].mxu1  ;;  %10225 = vmatprep.mubr.bf16.mxu1 %v9796_v58  ;;  %v9398_v16 = vpop.f32.mrb[207].mxu0  ;;  %10129 = vmatmul.mubr.bf16.gmra.mrb[232].mxu0 %v9793_v25 }
 0x9ce   :  { %v9681_v54 = vpack.c.bf16 %v9622_v46, %v9618_v38  ;;  %v9680_v28 = vpack.c.bf16 %v9398_v16, %v9394_v13  ;;  %v9624_v59 = vpop.f32.mrb[207].mxu1  ;;  %10226 = vmatmul.mubr.bf16.gmra.mrb[232].mxu1 %v9795_v4 }
 0x9cf   :  { %v9765_v48 = vadd.bf16 %v15574_v49, %v9679_v57  ;;  %v9682_v6 = vpack.c.bf16 %v9624_v59, %v9620_v7 }
 0x9d0   :  { %v9767_v31 = vadd.bf16 %v15577_v19, %v9681_v54  ;;  %v9766_v23 = vadd.bf16 %v15580_v11, %v9680_v28 }
 0x9d1   :  { %v9768_v36 = vadd.bf16 %v15583_v40, %v9682_v6  ;;  %v9797_v22 = vmax.bf16 %v15730_v17, %v9765_v48 }
 0x9d2   :  { %v9402_v33 = vpop.f32.mrb[208].mxu0  ;;  %v9798_v30 = vmax.bf16 %v15730_v17, %v9766_v23  ;;  %v9799_v53 = vmax.bf16 %v15730_v17, %v9767_v31 }
 0x9d3   :  { %v9628_v20 = vpop.f32.mrb[208].mxu1  ;;  %v9404_v63 = vpop.f32.mrb[209].mxu0  ;;  %v9800_v61 = vmax.bf16 %v15730_v17, %v9768_v36 }
 0x9d4   :  { %v9630_v1 = vpop.f32.mrb[209].mxu1  ;;  %v9406_v15 = vpop.f32.mrb[210].mxu0  ;;  %10136 = vmatprep.mubr.bf16.mxu0 %v9798_v30 }
 0x9d5   :  { %v9683_v0 = vpack.c.bf16 %v9406_v15, %v9402_v33  ;;  %v9632_v60 = vpop.f32.mrb[210].mxu1  ;;  %10233 = vmatprep.mubr.bf16.mxu1 %v9800_v61  ;;  %v9408_v34 = vpop.f32.mrb[211].mxu0  ;;  %10137 = vmatmul.mubr.bf16.gmra.mrb[236].mxu0 %v9797_v22 }
 0x9d6   :  { %v9685_v47 = vpack.c.bf16 %v9632_v60, %v9628_v20  ;;  %v9684_v27 = vpack.c.bf16 %v9408_v34, %v9404_v63  ;;  %v9634_v24 = vpop.f32.mrb[211].mxu1  ;;  %10234 = vmatmul.mubr.bf16.gmra.mrb[236].mxu1 %v9799_v53 }
 0x9d7   :  { %v9769_v62 = vadd.bf16 %v15574_v49, %v9683_v0  ;;  %v9686_v39 = vpack.c.bf16 %v9634_v24, %v9630_v1 }
 0x9d8   :  { %v9771_v55 = vadd.bf16 %v15577_v19, %v9685_v47  ;;  %v9770_v29 = vadd.bf16 %v15580_v11, %v9684_v27 }
 0x9d9   :  { %v9772_v5 = vadd.bf16 %v15583_v40, %v9686_v39  ;;  %v9801_v14 = vmax.bf16 %v15730_v17, %v9769_v62 }
 0x9da   :  { %v9412_v56 = vpop.f32.mrb[212].mxu0  ;;  %v9802_v8 = vmax.bf16 %v15730_v17, %v9770_v29  ;;  %v9803_v41 = vmax.bf16 %v15730_v17, %v9771_v55 }
 0x9db   :  { %v9638_v44 = vpop.f32.mrb[212].mxu1  ;;  %v9414_v45 = vpop.f32.mrb[213].mxu0  ;;  %v9804_v26 = vmax.bf16 %v15730_v17, %v9772_v5 }
 0x9dc   :  { %v9640_v18 = vpop.f32.mrb[213].mxu1  ;;  %v9416_v2 = vpop.f32.mrb[214].mxu0  ;;  %10144 = vmatprep.mubr.bf16.mxu0 %v9802_v8 }
 0x9dd   :  { %v9687_v37 = vpack.c.bf16 %v9416_v2, %v9412_v56  ;;  %v9642_v3 = vpop.f32.mrb[214].mxu1  ;;  %10241 = vmatprep.mubr.bf16.mxu1 %v9804_v26  ;;  %v9418_v9 = vpop.f32.mrb[215].mxu0  ;;  %10145 = vmatmul.mubr.bf16.gmra.mrb[240].mxu0 %v9801_v14 }
 0x9de   :  { %v9689_v32 = vpack.c.bf16 %v9642_v3, %v9638_v44  ;;  %v9688_v12 = vpack.c.bf16 %v9418_v9, %v9414_v45  ;;  %v9644_v42 = vpop.f32.mrb[215].mxu1  ;;  %10242 = vmatmul.mubr.bf16.gmra.mrb[240].mxu1 %v9803_v41 }
 0x9df   :  { %v9773_v10 = vadd.bf16 %v15574_v49, %v9687_v37  ;;  %v9690_v52 = vpack.c.bf16 %v9644_v42, %v9640_v18  ;;  %v15649_v18 = vld [vmem:[#allocation2] ss:$0 sm:$0xff] }
 0x9e0   :  { %v9775_v21 = vadd.bf16 %v15577_v19, %v9689_v32  ;;  %v9774_v50 = vadd.bf16 %v15580_v11, %v9688_v12 }
 0x9e1   :  { %v9776_v35 = vadd.bf16 %v15583_v40, %v9690_v52  ;;  %v9805_v7 = vmax.bf16 %v15730_v17, %v9773_v10 }
 0x9e2   :  { %v9422_v43 = vpop.f32.mrb[216].mxu0  ;;  %v9806_v38 = vmax.bf16 %v15730_v17, %v9774_v50  ;;  %v9807_v57 = vmax.bf16 %v15730_v17, %v9775_v21 }
 0x9e3   :  { %v9648_v13 = vpop.f32.mrb[216].mxu1  ;;  %v9424_v58 = vpop.f32.mrb[217].mxu0  ;;  %v9808_v25 = vmax.bf16 %v15730_v17, %v9776_v35 }
 0x9e4   :  { %v9650_v51 = vpop.f32.mrb[217].mxu1  ;;  %v9426_v4 = vpop.f32.mrb[218].mxu0  ;;  %10152 = vmatprep.mubr.bf16.mxu0 %v9806_v38 }
 0x9e5   :  { %v9691_v46 = vpack.c.bf16 %v9426_v4, %v9422_v43  ;;  %v9652_v16 = vpop.f32.mrb[218].mxu1  ;;  %10249 = vmatprep.mubr.bf16.mxu1 %v9808_v25  ;;  %v9428_v54 = vpop.f32.mrb[219].mxu0  ;;  %10153 = vmatmul.mubr.bf16.gmra.mrb[244].mxu0 %v9805_v7 }
 0x9e6   :  { %v9693_v28 = vpack.c.bf16 %v9652_v16, %v9648_v13  ;;  %v9692_v59 = vpack.c.bf16 %v9428_v54, %v9424_v58  ;;  %v9654_v48 = vpop.f32.mrb[219].mxu1  ;;  %10250 = vmatmul.mubr.bf16.gmra.mrb[244].mxu1 %v9807_v57 }
 0x9e7   :  { %v9777_v6 = vadd.bf16 %v15574_v49, %v9691_v46  ;;  %v9694_v31 = vpack.c.bf16 %v9654_v48, %v9650_v51 }
 0x9e8   :  { %v9779_v23 = vadd.bf16 %v15577_v19, %v9693_v28  ;;  %v9778_v36 = vadd.bf16 %v15580_v11, %v9692_v59 }
 0x9e9   :  { %v9780_v33 = vadd.bf16 %v15583_v40, %v9694_v31  ;;  %v9809_v1 = vmax.bf16 %v15730_v17, %v9777_v6 }
 0x9ea   :  { %v9432_v30 = vpop.f32.mrb[220].mxu0  ;;  %v9810_v20 = vmax.bf16 %v15730_v17, %v9778_v36  ;;  %v9811_v0 = vmax.bf16 %v15730_v17, %v9779_v23 }
 0x9eb   :  { %v9658_v63 = vpop.f32.mrb[220].mxu1  ;;  %v9434_v61 = vpop.f32.mrb[221].mxu0  ;;  %v9812_v22 = vmax.bf16 %v15730_v17, %v9780_v33 }
 0x9ec   :  { %v9660_v15 = vpop.f32.mrb[221].mxu1  ;;  %v9436_v53 = vpop.f32.mrb[222].mxu0  ;;  %10160 = vmatprep.mubr.bf16.mxu0 %v9810_v20 }
 0x9ed   :  { %v9695_v60 = vpack.c.bf16 %v9436_v53, %v9432_v30  ;;  %v9662_v34 = vpop.f32.mrb[222].mxu1  ;;  %10257 = vmatprep.mubr.bf16.mxu1 %v9812_v22  ;;  %v9438_v47 = vpop.f32.mrb[223].mxu0  ;;  %10161 = vmatmul.mubr.bf16.gmra.mrb[248].mxu0 %v9809_v1 }
 0x9ee   :  { %v9697_v27 = vpack.c.bf16 %v9662_v34, %v9658_v63  ;;  %v9696_v24 = vpack.c.bf16 %v9438_v47, %v9434_v61  ;;  %v9664_v62 = vpop.f32.mrb[223].mxu1  ;;  %10258 = vmatmul.mubr.bf16.gmra.mrb[248].mxu1 %v9811_v0 }
 0x9ef   :  { %v9781_v39 = vadd.bf16 %v15574_v49, %v9695_v60  ;;  %v9698_v55 = vpack.c.bf16 %v9664_v62, %v9660_v15 }
 0x9f0   :  { %v9783_v29 = vadd.bf16 %v15577_v19, %v9697_v27  ;;  %v9782_v5 = vadd.bf16 %v15580_v11, %v9696_v24 }
 0x9f1   :  { %v9784_v56 = vadd.bf16 %v15583_v40, %v9698_v55  ;;  %v9813_v45 = vmax.bf16 %v15730_v17, %v9781_v39 }
 0x9f2   :  { %v9814_v8 = vmax.bf16 %v15730_v17, %v9782_v5  ;;  %v9815_v26 = vmax.bf16 %v15730_v17, %v9783_v29 }
 0x9f3   :  { %v9816_v44 = vmax.bf16 %v15730_v17, %v9784_v56 }
 0x9f4   :  { %10168 = vmatprep.mubr.bf16.mxu0 %v9814_v8 }
 0x9f5   :  { %10265 = vmatprep.mubr.bf16.mxu1 %v9816_v44  ;;  %10169 = vmatmul.mubr.bf16.gmra.mrb[252].mxu0 %v9813_v45 }
 0x9f6   :  { %10266 = vmatmul.mubr.bf16.gmra.mrb[252].mxu1 %v9815_v26 }
 0xa90   :  { %v11236_v49 = vpop.f32.mrb[224].mxu0 }
 0xa91   :  { %v11300_v14 = vpop.f32.mrb[224].mxu1  ;;  %v11237_v19 = vpop.f32.mrb[225].mxu0 }
 0xa92   :  { %v11238_v11 = vadd.f32 %v11237_v19, %v11236_v49  ;;  %v11301_v2 = vpop.f32.mrb[225].mxu1  ;;  %v11239_v40 = vpop.f32.mrb[226].mxu0 }
 0xa93   :  { %v11302_v41 = vadd.f32 %v11301_v2, %v11300_v14  ;;  %v11303_v37 = vpop.f32.mrb[226].mxu1  ;;  %v11240_v3 = vpop.f32.mrb[227].mxu0 }
 0xa94   :  { %v10115_v9 = vadd.f32 %v11238_v11, %v15649_v18  ;;  %v11241_v32 = vadd.f32 %v11240_v3, %v11239_v40  ;;  %v11304_v12 = vpop.f32.mrb[227].mxu1 }
 0xa95   :  { %v11305_v42 = vadd.f32 %v11304_v12, %v11303_v37 }
 0xa96   :  { %v10212_v17 = vadd.f32 %v11302_v41, %v10115_v9  ;;  %v10118_v10 = vadd.f32 %v11241_v32, %v15649_v18 }
 0xa98   :  { %13241 = vtanh.f32 %v10212_v17  ;;  %v10215_v52 = vadd.f32 %v11305_v42, %v10118_v10  ;;  %v11242_v21 = vpop.f32.mrb[228].mxu0 }
 0xa99   :  { %v11306_v50 = vpop.f32.mrb[228].mxu1  ;;  %v11243_v35 = vpop.f32.mrb[229].mxu0 }
 0xa9a   :  { %13243 = vtanh.f32 %v10215_v52  ;;  %v11244_v43 = vadd.f32 %v11243_v35, %v11242_v21  ;;  %v11307_v38 = vpop.f32.mrb[229].mxu1  ;;  %v11245_v13 = vpop.f32.mrb[230].mxu0 }
 0xa9b   :  { %v11308_v58 = vadd.f32 %v11307_v38, %v11306_v50  ;;  %v11309_v25 = vpop.f32.mrb[230].mxu1  ;;  %v11246_v7 = vpop.f32.mrb[231].mxu0 }
 0xa9c   :  { %v10123_v51 = vadd.f32 %v11244_v43, %v15649_v18  ;;  %v11247_v4 = vadd.f32 %v11246_v7, %v11245_v13  ;;  %v11310_v57 = vpop.f32.mrb[231].mxu1 }
 0xa9d   :  { %v11311_v46 = vadd.f32 %v11310_v57, %v11309_v25 }
 0xa9e   :  { %v10220_v16 = vadd.f32 %v11308_v58, %v10123_v51  ;;  %v10126_v54 = vadd.f32 %v11247_v4, %v15649_v18 }
 0xaa0   :  { %13245 = vtanh.f32 %v10220_v16  ;;  %v10223_v28 = vadd.f32 %v11311_v46, %v10126_v54  ;;  %v11248_v59 = vpop.f32.mrb[232].mxu0 }
 0xaa1   :  { %v11312_v48 = vpop.f32.mrb[232].mxu1  ;;  %v11249_v6 = vpop.f32.mrb[233].mxu0 }
 0xaa2   :  { %v13242_v31 = vpop.eup %13241  ;;  %13247 = vtanh.f32 %v10223_v28  ;;  %v11250_v23 = vadd.f32 %v11249_v6, %v11248_v59  ;;  %v11313_v36 = vpop.f32.mrb[233].mxu1 }
 0xaa3   :  { %v11251_v33 = vpop.f32.mrb[234].mxu0  ;;  %10291 = vst.msk [vmem:[#allocation30] sm:$0xff] %vm10290_vm1, %v13242_v31  ;;  %v11314_v30 = vadd.f32 %v11313_v36, %v11312_v48  ;;  %v11315_v20 = vpop.f32.mrb[234].mxu1 }
 0xaa4   :  { %v11252_v63 = vpop.f32.mrb[235].mxu0  ;;  %v13244_v61 = vpop.eup %13243  ;;  %v10131_v22 = vadd.f32 %v11250_v23, %v15649_v18 }
 0xaa5   :  { %v11253_v1 = vadd.f32 %v11252_v63, %v11251_v33  ;;  %v11316_v15 = vpop.f32.mrb[235].mxu1  ;;  %10292 = vst.msk [vmem:[#allocation30 + $0x8] sm:$0xff] %vm10290_vm1, %v13244_v61 }
 0xaa6   :  { %v11317_v53 = vadd.f32 %v11316_v15, %v11315_v20  ;;  %v10228_v0 = vadd.f32 %v11314_v30, %v10131_v22 }
 0xaa7   :  { %v10134_v60 = vadd.f32 %v11253_v1, %v15649_v18 }
 0xaa8   :  { %13249 = vtanh.f32 %v10228_v0  ;;  %v11254_v47 = vpop.f32.mrb[236].mxu0 }
 0xaa9   :  { %v10231_v34 = vadd.f32 %v11317_v53, %v10134_v60  ;;  %v11318_v27 = vpop.f32.mrb[236].mxu1  ;;  %v11255_v24 = vpop.f32.mrb[237].mxu0 }
 0xaaa   :  { %v13246_v62 = vpop.eup %13245  ;;  %v11256_v39 = vadd.f32 %v11255_v24, %v11254_v47  ;;  %v11319_v55 = vpop.f32.mrb[237].mxu1 }
 0xaab   :  { %13251 = vtanh.f32 %v10231_v34  ;;  %v11257_v29 = vpop.f32.mrb[238].mxu0  ;;  %10293 = vst.msk [vmem:[#allocation30 + $0x10] sm:$0xff] %vm10290_vm1, %v13246_v62  ;;  %v11320_v5 = vadd.f32 %v11319_v55, %v11318_v27  ;;  %v11321_v56 = vpop.f32.mrb[238].mxu1 }
 0xaac   :  { %v11258_v8 = vpop.f32.mrb[239].mxu0  ;;  %v13248_v44 = vpop.eup %13247  ;;  %v10139_v45 = vadd.f32 %v11256_v39, %v15649_v18 }
 0xaad   :  { %v11259_v26 = vadd.f32 %v11258_v8, %v11257_v29  ;;  %v11322_v49 = vpop.f32.mrb[239].mxu1  ;;  %10294 = vst.msk [vmem:[#allocation30 + $0x18] sm:$0xff] %vm10290_vm1, %v13248_v44 }
 0xaae   :  { %v11323_v14 = vadd.f32 %v11322_v49, %v11321_v56  ;;  %v10236_v19 = vadd.f32 %v11320_v5, %v10139_v45 }
 0xaaf   :  { %v10142_v11 = vadd.f32 %v11259_v26, %v15649_v18 }
 0xab0   :  { %13253 = vtanh.f32 %v10236_v19  ;;  %v11260_v40 = vpop.f32.mrb[240].mxu0 }
 0xab1   :  { %v10239_v2 = vadd.f32 %v11323_v14, %v10142_v11  ;;  %v11324_v41 = vpop.f32.mrb[240].mxu1  ;;  %v11261_v37 = vpop.f32.mrb[241].mxu0 }
 0xab2   :  { %v13250_v3 = vpop.eup %13249  ;;  %v11262_v9 = vadd.f32 %v11261_v37, %v11260_v40  ;;  %v11325_v32 = vpop.f32.mrb[241].mxu1 }
 0xab3   :  { %13255 = vtanh.f32 %v10239_v2  ;;  %v11263_v12 = vpop.f32.mrb[242].mxu0  ;;  %10295 = vst.msk [vmem:[#allocation30 + $0x20] sm:$0xff] %vm10290_vm1, %v13250_v3  ;;  %v11326_v42 = vadd.f32 %v11325_v32, %v11324_v41  ;;  %v11327_v17 = vpop.f32.mrb[242].mxu1 }
 0xab4   :  { %v11264_v10 = vpop.f32.mrb[243].mxu0  ;;  %v10147_v21 = vadd.f32 %v11262_v9, %v15649_v18  ;;  %v11328_v35 = vpop.f32.mrb[243].mxu1 }
 0xab5   :  { %v13252_v52 = vpop.eup %13251  ;;  %v11265_v50 = vadd.f32 %v11264_v10, %v11263_v12  ;;  %v11329_v43 = vadd.f32 %v11328_v35, %v11327_v17 }
 0xab6   :  { %10296 = vst.msk [vmem:[#allocation30 + $0x28] sm:$0xff] %vm10290_vm1, %v13252_v52  ;;  %v10244_v38 = vadd.f32 %v11326_v42, %v10147_v21 }
 0xab7   :  { %v10150_v13 = vadd.f32 %v11265_v50, %v15649_v18 }
 0xab8   :  { %13257 = vtanh.f32 %v10244_v38  ;;  %v11266_v25 = vpop.f32.mrb[244].mxu0 }
 0xab9   :  { %v10247_v58 = vadd.f32 %v11329_v43, %v10150_v13  ;;  %v11330_v7 = vpop.f32.mrb[244].mxu1  ;;  %v11267_v51 = vpop.f32.mrb[245].mxu0 }
 0xaba   :  { %v13254_v4 = vpop.eup %13253  ;;  %v11268_v57 = vadd.f32 %v11267_v51, %v11266_v25  ;;  %v11331_v46 = vpop.f32.mrb[245].mxu1 }
 0xabb   :  { %13259 = vtanh.f32 %v10247_v58  ;;  %v11269_v16 = vpop.f32.mrb[246].mxu0  ;;  %10297 = vst.msk [vmem:[#allocation30 + $0x30] sm:$0xff] %vm10290_vm1, %v13254_v4  ;;  %v11332_v54 = vadd.f32 %v11331_v46, %v11330_v7  ;;  %v11333_v28 = vpop.f32.mrb[246].mxu1 }
 0xabc   :  { %v11270_v59 = vpop.f32.mrb[247].mxu0  ;;  %v10155_v6 = vadd.f32 %v11268_v57, %v15649_v18  ;;  %v11334_v23 = vpop.f32.mrb[247].mxu1 }
 0xabd   :  { %v13256_v48 = vpop.eup %13255  ;;  %v11271_v31 = vadd.f32 %v11270_v59, %v11269_v16  ;;  %v11335_v36 = vadd.f32 %v11334_v23, %v11333_v28 }
 0xabe   :  { %10298 = vst.msk [vmem:[#allocation30 + $0x38] sm:$0xff] %vm10290_vm1, %v13256_v48  ;;  %v10252_v33 = vadd.f32 %v11332_v54, %v10155_v6 }
 0xabf   :  { %v10158_v30 = vadd.f32 %v11271_v31, %v15649_v18 }
 0xac0   :  { %13261 = vtanh.f32 %v10252_v33  ;;  %v11272_v63 = vpop.f32.mrb[248].mxu0 }
 0xac1   :  { %v10255_v20 = vadd.f32 %v11335_v36, %v10158_v30  ;;  %v11336_v61 = vpop.f32.mrb[248].mxu1  ;;  %v11273_v22 = vpop.f32.mrb[249].mxu0 }
 0xac2   :  { %v13258_v1 = vpop.eup %13257  ;;  %v11274_v15 = vadd.f32 %v11273_v22, %v11272_v63  ;;  %v11337_v53 = vpop.f32.mrb[249].mxu1 }
 0xac3   :  { %13263 = vtanh.f32 %v10255_v20  ;;  %v11275_v0 = vpop.f32.mrb[250].mxu0  ;;  %10299 = vst.msk [vmem:[#allocation30 + $0x40] sm:$0xff] %vm10290_vm1, %v13258_v1  ;;  %v11338_v60 = vadd.f32 %v11337_v53, %v11336_v61  ;;  %v11339_v34 = vpop.f32.mrb[250].mxu1 }
 0xac4   :  { %v11276_v47 = vpop.f32.mrb[251].mxu0  ;;  %v10163_v24 = vadd.f32 %v11274_v15, %v15649_v18  ;;  %v11340_v39 = vpop.f32.mrb[251].mxu1 }
 0xac5   :  { %v13260_v27 = vpop.eup %13259  ;;  %v11277_v62 = vadd.f32 %v11276_v47, %v11275_v0  ;;  %v11341_v55 = vadd.f32 %v11340_v39, %v11339_v34 }
 0xac6   :  { %10300 = vst.msk [vmem:[#allocation30 + $0x48] sm:$0xff] %vm10290_vm1, %v13260_v27  ;;  %v10260_v29 = vadd.f32 %v11338_v60, %v10163_v24 }
 0xac7   :  { %v10166_v5 = vadd.f32 %v11277_v62, %v15649_v18 }
 0xac8   :  { %13265 = vtanh.f32 %v10260_v29  ;;  %v11278_v8 = vpop.f32.mrb[252].mxu0 }
 0xac9   :  { %v10263_v56 = vadd.f32 %v11341_v55, %v10166_v5  ;;  %v11342_v44 = vpop.f32.mrb[252].mxu1  ;;  %v11279_v45 = vpop.f32.mrb[253].mxu0 }
 0xaca   :  { %v13262_v26 = vpop.eup %13261  ;;  %v11280_v49 = vadd.f32 %v11279_v45, %v11278_v8  ;;  %v11343_v14 = vpop.f32.mrb[253].mxu1 }
 0xacb   :  { %13267 = vtanh.f32 %v10263_v56  ;;  %v11281_v19 = vpop.f32.mrb[254].mxu0  ;;  %10301 = vst.msk [vmem:[#allocation30 + $0x50] sm:$0xff] %vm10290_vm1, %v13262_v26  ;;  %v11344_v11 = vadd.f32 %v11343_v14, %v11342_v44  ;;  %v11345_v2 = vpop.f32.mrb[254].mxu1 }
 0xacc   :  { %v11282_v40 = vpop.f32.mrb[255].mxu0  ;;  %v10171_v37 = vadd.f32 %v11280_v49, %v15649_v18  ;;  %v11346_v9 = vpop.f32.mrb[255].mxu1 }
 0xacd   :  { %v13264_v41 = vpop.eup %13263  ;;  %v11283_v3 = vadd.f32 %v11282_v40, %v11281_v19  ;;  %v11347_v32 = vadd.f32 %v11346_v9, %v11345_v2 }
 0xace   :  { %10302 = vst.msk [vmem:[#allocation30 + $0x58] sm:$0xff] %vm10290_vm1, %v13264_v41  ;;  %v10268_v12 = vadd.f32 %v11344_v11, %v10171_v37 }
 0xacf   :  { %v10174_v42 = vadd.f32 %v11283_v3, %v15649_v18 }
 0xad0   :  { %13269 = vtanh.f32 %v10268_v12 }
 0xad1   :  { %v10271_v17 = vadd.f32 %v11347_v32, %v10174_v42 }
 0xad2   :  { %v13266_v10 = vpop.eup %13265 }
 0xad3   :  { %13271 = vtanh.f32 %v10271_v17  ;;  %10303 = vst.msk [vmem:[#allocation30 + $0x60] sm:$0xff] %vm10290_vm1, %v13266_v10 }
 0xad5   :  { %v13268_v52 = vpop.eup %13267 }
 0xad6   :  { %10304 = vst.msk [vmem:[#allocation30 + $0x68] sm:$0xff] %vm10290_vm1, %v13268_v52 }
 0xada   :  { %v13270_v21 = vpop.eup %13269 }
 0xadb   :  { %10305 = vst.msk [vmem:[#allocation30 + $0x70] sm:$0xff] %vm10290_vm1, %v13270_v21 }
 0xadd   :  { %v13272_v50 = vpop.eup %13271 }
 0xade   :  { %10306 = vst.msk [vmem:[#allocation30 + $0x78] sm:$0xff] %vm10290_vm1, %v13272_v50 }
 0xadf   :  { %13658 = shalt.err (!%p13655_p0)
}
 0xae0   :  { %s15784_s5 = sld [smem:[#allocation44_spill]] }
 0xae6   :  { %s13659_s28 = scalar_lea.hbm %s15784_s5, 2048 }
 0xae7   :  { %p13660_p1 = scmp.ne.s32.totalorder %s15784_s5, %s13659_s28  ;;  %p13663_p2 = scmp.lt.u32.totalorder %s13659_s28, %s15784_s5 }
 0xae9   :  { %p13665_p3 = pnand %p13663_p2, %p13660_p1 }
 0xaeb   :  { %13668 = shalt.err (!%p13665_p3)
}
 0xaec   :  { %10318 = dma.vmem_to_hbm [thread:$0]  %s10313_s10, 2048, %s15784_s5, [#allocation5], %s13700_s15, %s13700_s15, %s13701_s17  }
 0xaed   :  { %13687 = dma.done.wait [#allocation5], 2048  }
 0xaee   :  { %13688 = vsyncadd [#allocation5], 4294965248 }
 0xaef   :  { %10322 = vsyncpa [#allocation4], 1 }
 0xaf0   :  { %10323 = vsyncpa [#allocation7], 1 }
 0xaf1   :  { %10324 = vsyncpa [#allocation10], 1 }
 0xaf2   :  { %10325 = vsyncpa [#allocation13], 1 }
 0xaf3   :  { %10326 = vsyncpa [#allocation16], 1 }
 0xaf4   :  { %10327 = vsyncpa [#allocation19], 1 }
 0xaf5   :  { %10328 = vsyncpa [#allocation22], 1 }
 0xaf6   :  { %10329 = vsyncpa [#allocation25], 1 }
 0xaf7   :  { %10330 = vsyncpa [#allocation28], 1 }
 0xaf8   :  { %10331 = vsyncpa [#allocation5], 1 }

</bundles_post_ra>
